<compile_context>
chip_gen: v7x
topology: tpu7x:2x2x1
jax: 0.10.0
libtpu: 0.0.40
codegen_flags: <defaults>
</compile_context>

<pallas_src>
import functools

import jax
import jax.numpy as jnp
from jax import lax
from jax.experimental import pallas as pl
from jax.experimental.pallas import tpu as pltpu

HIDDEN = 120          # LSTM hidden size in the PyTorch module
HIDDEN_PAD = 128      # lane-aligned hidden size used inside the kernel
SEL_T = 35            # hard-coded x[35, :, :] in the PyTorch module
L1_OUT = 10
L1_PAD = 128          # lane-aligned padded l1 output used inside the kernel
L2_OUT = 1
MAX_BATCH_TILE = 8    # one sublane group of rows per grid step


def _lstm_head_kernel(n_steps, hp,
                      x_ref,      # (Bt, n_steps) f32  batch tile of x[:sel_t+1, :, 0].T
                      wih_ref,    # (1, 4*hp)  f32  input weights, order (i,f,o,g), 0-padded
                      whh_ref,    # (hp, 4*hp) mm   recurrent weights (h_in x gate_out), 0-padded
                      b_ref,      # (1, 4*hp)  f32  b_ih + b_hh, 0-padded
                      w1_ref,     # (hp, L1_PAD) mm l1.weight^T, 0-padded
                      b1_ref,     # (1, L1_PAD) f32
                      w2_ref,     # (1, L1_PAD) f32 l2.weight row, 0-padded
                      b2_ref,     # (1, 1)      f32
                      out_ref):   # (Bt, 1)     f32
    B = x_ref.shape[0]
    mm_dtype = whh_ref.dtype          # bf16 (default) or f32

    # Small loop-invariant rows held in registers (8 vregs total).
    wih = wih_ref[...]                # (1, 4*hp)
    bias = b_ref[...]                 # (1, 4*hp)

    h = jnp.zeros((B, hp), jnp.float32)
    c = jnp.zeros((B, hp), jnp.float32)

    # Fully-unrolled serial recurrence (static trip count).  Padded lanes
    # stay exactly 0 throughout: pad gates pre-activate to 0 -> i/f/o = 0.5,
    # g = tanh(0) = 0 -> c_pad = h_pad = 0.
    for t in range(n_steps):
        # Per-step input projection (independent of h -> hidden under the
        # step's MXU/EUP latency).  input_size == 1, so it is one
        # lane-broadcast multiply + add.
        gin_t = x_ref[:, t:t + 1] * wih + bias                 # (B, 4*hp)
        gates = gin_t + jnp.dot(h.astype(mm_dtype), whh_ref[...],
                                preferred_element_type=jnp.float32)
        # sigmoid(x) = 0.5*tanh(0.5*x) + 0.5: single EUP push for i|f|o.
        sig = 0.5 * jnp.tanh(0.5 * gates[:, :3 * hp]) + 0.5
        g_g = jnp.tanh(gates[:, 3 * hp:])
        i_g = sig[:, 0 * hp:1 * hp]
        f_g = sig[:, 1 * hp:2 * hp]
        o_g = sig[:, 2 * hp:3 * hp]
        c = f_g * c + i_g * g_g
        h = o_g * jnp.tanh(c)

    # --- head: Linear(120,10) -> ReLU -> Linear(10,1) on padded lanes ------
    y1 = jnp.dot(h.astype(mm_dtype), w1_ref[...],
                 preferred_element_type=jnp.float32) + b1_ref[...]
    y1 = jnp.maximum(y1, 0.0)
    # Linear(10,1) as VPU multiply + lane reduce (an N=1 MXU matmul would
    # stream a 128x1 RHS through the array for one output lane).
    out_ref[...] = (jnp.sum(y1 * w2_ref[...], axis=-1, keepdims=True)
                    + b2_ref[...])


def _pad_axis(a, new_size, axis):
    pad = [(0, 0)] * a.ndim
    pad[axis] = (0, new_size - a.shape[axis])
    return jnp.pad(a, pad)


def _repack_params(params, matmul_dtype):
    """Repack PyTorch-layout LSTM/Linear params into padded, fused,
    matmul-friendly layouts (plain-JAX glue, outside the kernel).

    PyTorch stacks LSTM gates as (i, f, g, o); reorder to (i, f, o, g) so the
    in-kernel sigmoid slice is one contiguous 3*Hp block.  MXU operands
    (w_hh, w1) are pre-cast to `matmul_dtype` here (no in-kernel convert).
    """
    (w_ih, w_hh, b_ih, b_hh, w1, b1, w2, b2) = params
    assert w_ih.shape == (4 * HIDDEN, 1), "repacking assumes input_size == 1"
    H, Hp = HIDDEN, HIDDEN_PAD
    order = (0, 1, 3, 2)                      # i, f, o, g

    def gate(a, g):                           # gate block g of a (4H, ...) stack
        return a[g * H:(g + 1) * H]

    # Input weights: (4H, 1) -> (1, 4*Hp) row, per-gate zero-padded.
    wih_row = jnp.concatenate(
        [_pad_axis(gate(w_ih, g)[:, 0], Hp, 0) for g in order], axis=0)[None, :]

    # Recurrent weights: (4H, H) -> (Hp, 4*Hp) so gates = h @ W (single dot).
    whh_cat = jnp.concatenate(
        [_pad_axis(_pad_axis(gate(w_hh, g).T, Hp, 0), Hp, 1) for g in order],
        axis=1).astype(matmul_dtype)

    # Combined bias: (1, 4*Hp), zero-padded per gate (keeps padded lanes at 0).
    b_sum = b_ih + b_hh
    b_row = jnp.concatenate(
        [_pad_axis(gate(b_sum, g), Hp, 0) for g in order], axis=0)[None, :]

    # Head weights, zero-padded so all intermediate tiles are lane-dense.
    w1_t = _pad_axis(_pad_axis(w1.T, Hp, 0), L1_PAD, 1).astype(matmul_dtype)
    b1_r = _pad_axis(b1, L1_PAD, 0)[None, :]                  # (1, L1_PAD)
    w2_row = _pad_axis(w2[0], L1_PAD, 0)[None, :]             # (1, L1_PAD)
    b2_r = b2.reshape(1, L2_OUT)                              # (1, 1)
    return wih_row, whh_cat, b_row, w1_t, b1_r, w2_row, b2_r


def single_lstm_quantization_forward(x, params, sel_t=SEL_T,
                                     use_bf16_matmul=True):
    """x: (seq_len, batch, 1) f32, time-major; returns (batch, 1) f32.

    bf16 MXU operands (f32 accumulation, f32 h/c state) are the default on
    every generation -- f32 dots are emulated with multiple bf16 passes
    anyway.  Pass use_bf16_matmul=False for a bit-close f32 path.
    """
    T, B, F = x.shape
    assert F == 1, "module has input_size == 1"
    assert T > sel_t, "sequence must be at least 36 long (module indexes x[35])"
    n_steps = sel_t + 1

    matmul_dtype = jnp.bfloat16 if use_bf16_matmul else jnp.float32
    wih_row, whh_cat, b_row, w1_t, b1_r, w2_row, b2_r = _repack_params(
        params, matmul_dtype)

    # Drop the degenerate feature dim and the timesteps past sel_t, and put
    # batch on sublanes (time on lanes) to match the h/c/gates layout.
    xs = jnp.transpose(x[:n_steps, :, 0])                     # (B, n_steps)

    # Batch-tiled grid: up to 8 rows (one sublane group) per grid step; the
    # axis is "parallel" so v7x shards steps across its two TensorCores.
    b_tile = B if B <= MAX_BATCH_TILE else MAX_BATCH_TILE
    b_pad = pl.cdiv(B, b_tile) * b_tile
    if b_pad != B:
        xs = _pad_axis(xs, b_pad, 0)
    grid = (b_pad // b_tile,)

    full = lambda shape: pl.BlockSpec(shape, lambda i, _s=shape: (0,) * len(_s))
    kernel = functools.partial(_lstm_head_kernel, n_steps, HIDDEN_PAD)

    # Total VMEM footprint (weights + x tile) is well under 1 MiB on every
    # generation (even v7x's 64 MiB is irrelevant); the kernel is purely
    # latency-bound on the 36-step serial recurrence.
    out = pl.pallas_call(
        kernel,
        out_shape=jax.ShapeDtypeStruct((b_pad, L2_OUT), jnp.float32),
        grid=grid,
        in_specs=[
            pl.BlockSpec((b_tile, n_steps), lambda i: (i, 0)),   # xs
            full(wih_row.shape),
            full(whh_cat.shape),
            full(b_row.shape),
            full(w1_t.shape),
            full(b1_r.shape),
            full(w2_row.shape),
            full(b2_r.shape),
        ],
        out_specs=pl.BlockSpec((b_tile, L2_OUT), lambda i: (i, 0)),
        compiler_params=pltpu.CompilerParams(
            dimension_semantics=("parallel",)),
    )(xs, wih_row, whh_cat, b_row, w1_t, b1_r, w2_row, b2_r)
    return out[:B]


def reference_forward(x, params, sel_t=SEL_T):
    """Pure-JAX reference mirroring the PyTorch forward."""
    (w_ih, w_hh, b_ih, b_hh, w1, b1, w2, b2) = params
    H = HIDDEN
    B = x.shape[1]
    x2d = x[..., 0]                                           # (T, B)

    def cell(carry, x_t):
        h, c = carry
        gates = (x_t[:, None] * w_ih[:, 0][None, :]           # (B, 4H)
                 + h @ w_hh.T + b_ih + b_hh)
        i = jax.nn.sigmoid(gates[:, 0:H])
        f = jax.nn.sigmoid(gates[:, H:2 * H])
        g = jnp.tanh(gates[:, 2 * H:3 * H])
        o = jax.nn.sigmoid(gates[:, 3 * H:4 * H])
        c = f * c + i * g
        h = o * jnp.tanh(c)
        return (h, c), h

    init = (jnp.zeros((B, H), jnp.float32), jnp.zeros((B, H), jnp.float32))
    _, hs = lax.scan(cell, init, x2d)
    h_sel = hs[sel_t]
    y = jnp.maximum(h_sel @ w1.T + b1, 0.0)
    y = y @ w2.T + b2
    return y


def make_params(key):
    """Deterministic synthetic parameters with PyTorch-default-like scales."""
    H = HIDDEN
    ks = jax.random.split(key, 8)
    k_lstm = 1.0 / jnp.sqrt(H)
    k_l1 = 1.0 / jnp.sqrt(H)
    k_l2 = 1.0 / jnp.sqrt(L1_OUT)
    u = lambda k, shape, s: jax.random.uniform(k, shape, jnp.float32, -s, s)
    w_ih = u(ks[0], (4 * H, 1), k_lstm)       # weight_ih_l0
    w_hh = u(ks[1], (4 * H, H), k_lstm)       # weight_hh_l0
    b_ih = u(ks[2], (4 * H,), k_lstm)         # bias_ih_l0
    b_hh = u(ks[3], (4 * H,), k_lstm)         # bias_hh_l0
    w1 = u(ks[4], (L1_OUT, H), k_l1)          # l1.weight
    b1 = u(ks[5], (L1_OUT,), k_l1)            # l1.bias
    w2 = u(ks[6], (L2_OUT, L1_OUT), k_l2)     # l2.weight
    b2 = u(ks[7], (L2_OUT,), k_l2)            # l2.bias
    return (w_ih, w_hh, b_ih, b_hh, w1, b1, w2, b2)


if __name__ == "__main__":
    key = jax.random.PRNGKey(0)
    k_x, k_p = jax.random.split(key)

    SEQ_LEN, BATCH = 40, 2                    # seq must be >= 36 (x[35] is used)
    x = jax.random.normal(k_x, (SEQ_LEN, BATCH, 1), dtype=jnp.float32)
    params = make_params(k_p)

    ref = jax.block_until_ready(reference_forward(x, params))

    # f32 MXU-operand path: tight check against the pure-JAX reference.
    out_f32 = jax.block_until_ready(
        single_lstm_quantization_forward(x, params, use_bf16_matmul=False))
    assert out_f32.shape == (BATCH, 1), out_f32.shape
    assert jnp.max(jnp.abs(out_f32 - ref)) < 1e-3, (out_f32, ref)

    # Default path: bf16 MXU operands, f32 accumulation / f32 state.
    out = jax.block_until_ready(single_lstm_quantization_forward(x, params))
    assert out.shape == (BATCH, 1), out.shape
    assert jnp.max(jnp.abs(out - ref)) < 2e-2, (out, ref)

    print("KERNEL_OK")
</pallas_src>

<mosaic_0001>
module attributes {stable_mosaic.version = 11 : i64} {
  func.func @_lstm_head_kernel(%arg0: i32, %arg1: memref<2x36xf32, #tpu.memory_space<vmem>>, %arg2: memref<1x512xf32, #tpu.memory_space<vmem>>, %arg3: memref<128x512xf32, #tpu.memory_space<vmem>>, %arg4: memref<1x512xf32, #tpu.memory_space<vmem>>, %arg5: memref<128x128xf32, #tpu.memory_space<vmem>>, %arg6: memref<1x128xf32, #tpu.memory_space<vmem>>, %arg7: memref<1x128xf32, #tpu.memory_space<vmem>>, %arg8: memref<1x1xf32, #tpu.memory_space<vmem>>, %arg9: memref<2x1xf32, #tpu.memory_space<vmem>>) attributes {dimension_semantics = [#tpu.dimension_semantics<parallel>], iteration_bounds = array<i64: 1>, scalar_prefetch = 0 : i64, scratch_operands = 0 : i64, tpu.core_type = #tpu.core_type<tc>, window_params = [{transform_indices = @transform_0, window_bounds = array<i64: 2, 36>}, {pipeline_mode = #tpu.pipeline_mode<synchronous>, transform_indices = @transform_1, window_bounds = array<i64: 1, 512>}, {pipeline_mode = #tpu.pipeline_mode<synchronous>, transform_indices = @transform_2, window_bounds = array<i64: 128, 512>}, {pipeline_mode = #tpu.pipeline_mode<synchronous>, transform_indices = @transform_3, window_bounds = array<i64: 1, 512>}, {pipeline_mode = #tpu.pipeline_mode<synchronous>, transform_indices = @transform_4, window_bounds = array<i64: 128, 128>}, {pipeline_mode = #tpu.pipeline_mode<synchronous>, transform_indices = @transform_5, window_bounds = array<i64: 1, 128>}, {pipeline_mode = #tpu.pipeline_mode<synchronous>, transform_indices = @transform_6, window_bounds = array<i64: 1, 128>}, {pipeline_mode = #tpu.pipeline_mode<synchronous>, transform_indices = @transform_7, window_bounds = array<i64: 1, 1>}, {transform_indices = @transform_8, window_bounds = array<i64: 2, 1>}]} {
    %c0 = arith.constant 0 : index
    %c0_0 = arith.constant 0 : index
    %0 = vector.load %arg2[%c0, %c0_0] : memref<1x512xf32, #tpu.memory_space<vmem>>, vector<1x512xf32>
    %c0_1 = arith.constant 0 : index
    %c0_2 = arith.constant 0 : index
    %1 = vector.load %arg4[%c0_1, %c0_2] : memref<1x512xf32, #tpu.memory_space<vmem>>, vector<1x512xf32>
    %cst = arith.constant 0.000000e+00 : f32
    %2 = vector.broadcast %cst : f32 to vector<2x128xf32>
    %cst_3 = arith.constant 0.000000e+00 : f32
    %3 = vector.broadcast %cst_3 : f32 to vector<2x128xf32>
    %c0_4 = arith.constant 0 : index
    %c0_5 = arith.constant 0 : index
    %4 = vector.load %arg1[%c0_4, %c0_5] : memref<2x36xf32, #tpu.memory_space<vmem>>, vector<2x1xf32>
    %5 = vector.broadcast %4 : vector<2x1xf32> to vector<2x512xf32>
    %6 = vector.broadcast %0 : vector<1x512xf32> to vector<2x512xf32>
    %7 = arith.mulf %5, %6 : vector<2x512xf32>
    %8 = vector.broadcast %1 : vector<1x512xf32> to vector<2x512xf32>
    %9 = arith.addf %7, %8 : vector<2x512xf32>
    %c0_6 = arith.constant 0 : index
    %c0_7 = arith.constant 0 : index
    %10 = vector.load %arg3[%c0_6, %c0_7] : memref<128x512xf32, #tpu.memory_space<vmem>>, vector<128x512xf32>
    %cst_8 = arith.constant dense<0.000000e+00> : vector<2x512xf32>
    %11 = tpu.matmul %2, %10, %cst_8 {dimension_numbers = #tpu.dot_dimension_numbers<[1], [0], [0], [1], [0, 0, 1, 1], [], []>} : vector<2x128xf32>, vector<128x512xf32>, vector<2x512xf32> -> vector<2x512xf32>
    %12 = arith.addf %9, %11 : vector<2x512xf32>
    %13 = vector.extract_strided_slice %12 {offsets = [0, 0], sizes = [2, 384], strides = [1, 1]} : vector<2x512xf32> to vector<2x384xf32>
    %cst_9 = arith.constant 5.000000e-01 : f32
    %14 = vector.broadcast %cst_9 : f32 to vector<2x384xf32>
    %15 = arith.mulf %14, %13 : vector<2x384xf32>
    %16 = math.tanh %15 : vector<2x384xf32>
    %cst_10 = arith.constant 5.000000e-01 : f32
    %17 = vector.broadcast %cst_10 : f32 to vector<2x384xf32>
    %18 = arith.mulf %17, %16 : vector<2x384xf32>
    %cst_11 = arith.constant 5.000000e-01 : f32
    %19 = vector.broadcast %cst_11 : f32 to vector<2x384xf32>
    %20 = arith.addf %18, %19 : vector<2x384xf32>
    %21 = vector.extract_strided_slice %12 {offsets = [0, 384], sizes = [2, 128], strides = [1, 1]} : vector<2x512xf32> to vector<2x128xf32>
    %22 = math.tanh %21 : vector<2x128xf32>
    %23 = vector.extract_strided_slice %20 {offsets = [0, 0], sizes = [2, 128], strides = [1, 1]} : vector<2x384xf32> to vector<2x128xf32>
    %24 = vector.extract_strided_slice %20 {offsets = [0, 128], sizes = [2, 128], strides = [1, 1]} : vector<2x384xf32> to vector<2x128xf32>
    %25 = vector.extract_strided_slice %20 {offsets = [0, 256], sizes = [2, 128], strides = [1, 1]} : vector<2x384xf32> to vector<2x128xf32>
    %26 = arith.mulf %24, %3 : vector<2x128xf32>
    %27 = arith.mulf %23, %22 : vector<2x128xf32>
    %28 = arith.addf %26, %27 : vector<2x128xf32>
    %29 = math.tanh %28 : vector<2x128xf32>
    %30 = arith.mulf %25, %29 : vector<2x128xf32>
    %c0_12 = arith.constant 0 : index
    %c1 = arith.constant 1 : index
    %31 = vector.load %arg1[%c0_12, %c1] : memref<2x36xf32, #tpu.memory_space<vmem>>, vector<2x1xf32>
    %32 = vector.broadcast %31 : vector<2x1xf32> to vector<2x512xf32>
    %33 = vector.broadcast %0 : vector<1x512xf32> to vector<2x512xf32>
    %34 = arith.mulf %32, %33 : vector<2x512xf32>
    %35 = vector.broadcast %1 : vector<1x512xf32> to vector<2x512xf32>
    %36 = arith.addf %34, %35 : vector<2x512xf32>
    %c0_13 = arith.constant 0 : index
    %c0_14 = arith.constant 0 : index
    %37 = vector.load %arg3[%c0_13, %c0_14] : memref<128x512xf32, #tpu.memory_space<vmem>>, vector<128x512xf32>
    %cst_15 = arith.constant dense<0.000000e+00> : vector<2x512xf32>
    %38 = tpu.matmul %30, %37, %cst_15 {dimension_numbers = #tpu.dot_dimension_numbers<[1], [0], [0], [1], [0, 0, 1, 1], [], []>} : vector<2x128xf32>, vector<128x512xf32>, vector<2x512xf32> -> vector<2x512xf32>
    %39 = arith.addf %36, %38 : vector<2x512xf32>
    %40 = vector.extract_strided_slice %39 {offsets = [0, 0], sizes = [2, 384], strides = [1, 1]} : vector<2x512xf32> to vector<2x384xf32>
    %cst_16 = arith.constant 5.000000e-01 : f32
    %41 = vector.broadcast %cst_16 : f32 to vector<2x384xf32>
    %42 = arith.mulf %41, %40 : vector<2x384xf32>
    %43 = math.tanh %42 : vector<2x384xf32>
    %cst_17 = arith.constant 5.000000e-01 : f32
    %44 = vector.broadcast %cst_17 : f32 to vector<2x384xf32>
    %45 = arith.mulf %44, %43 : vector<2x384xf32>
    %cst_18 = arith.constant 5.000000e-01 : f32
    %46 = vector.broadcast %cst_18 : f32 to vector<2x384xf32>
    %47 = arith.addf %45, %46 : vector<2x384xf32>
    %48 = vector.extract_strided_slice %39 {offsets = [0, 384], sizes = [2, 128], strides = [1, 1]} : vector<2x512xf32> to vector<2x128xf32>
    %49 = math.tanh %48 : vector<2x128xf32>
    %50 = vector.extract_strided_slice %47 {offsets = [0, 0], sizes = [2, 128], strides = [1, 1]} : vector<2x384xf32> to vector<2x128xf32>
    %51 = vector.extract_strided_slice %47 {offsets = [0, 128], sizes = [2, 128], strides = [1, 1]} : vector<2x384xf32> to vector<2x128xf32>
    %52 = vector.extract_strided_slice %47 {offsets = [0, 256], sizes = [2, 128], strides = [1, 1]} : vector<2x384xf32> to vector<2x128xf32>
    %53 = arith.mulf %51, %28 : vector<2x128xf32>
    %54 = arith.mulf %50, %49 : vector<2x128xf32>
    %55 = arith.addf %53, %54 : vector<2x128xf32>
    %56 = math.tanh %55 : vector<2x128xf32>
    %57 = arith.mulf %52, %56 : vector<2x128xf32>
    %c0_19 = arith.constant 0 : index
    %c2 = arith.constant 2 : index
    %58 = vector.load %arg1[%c0_19, %c2] : memref<2x36xf32, #tpu.memory_space<vmem>>, vector<2x1xf32>
    %59 = vector.broadcast %58 : vector<2x1xf32> to vector<2x512xf32>
    %60 = vector.broadcast %0 : vector<1x512xf32> to vector<2x512xf32>
    %61 = arith.mulf %59, %60 : vector<2x512xf32>
    %62 = vector.broadcast %1 : vector<1x512xf32> to vector<2x512xf32>
    %63 = arith.addf %61, %62 : vector<2x512xf32>
    %c0_20 = arith.constant 0 : index
    %c0_21 = arith.constant 0 : index
    %64 = vector.load %arg3[%c0_20, %c0_21] : memref<128x512xf32, #tpu.memory_space<vmem>>, vector<128x512xf32>
    %cst_22 = arith.constant dense<0.000000e+00> : vector<2x512xf32>
    %65 = tpu.matmul %57, %64, %cst_22 {dimension_numbers = #tpu.dot_dimension_numbers<[1], [0], [0], [1], [0, 0, 1, 1], [], []>} : vector<2x128xf32>, vector<128x512xf32>, vector<2x512xf32> -> vector<2x512xf32>
    %66 = arith.addf %63, %65 : vector<2x512xf32>
    %67 = vector.extract_strided_slice %66 {offsets = [0, 0], sizes = [2, 384], strides = [1, 1]} : vector<2x512xf32> to vector<2x384xf32>
    %cst_23 = arith.constant 5.000000e-01 : f32
    %68 = vector.broadcast %cst_23 : f32 to vector<2x384xf32>
    %69 = arith.mulf %68, %67 : vector<2x384xf32>
    %70 = math.tanh %69 : vector<2x384xf32>
    %cst_24 = arith.constant 5.000000e-01 : f32
    %71 = vector.broadcast %cst_24 : f32 to vector<2x384xf32>
    %72 = arith.mulf %71, %70 : vector<2x384xf32>
    %cst_25 = arith.constant 5.000000e-01 : f32
    %73 = vector.broadcast %cst_25 : f32 to vector<2x384xf32>
    %74 = arith.addf %72, %73 : vector<2x384xf32>
    %75 = vector.extract_strided_slice %66 {offsets = [0, 384], sizes = [2, 128], strides = [1, 1]} : vector<2x512xf32> to vector<2x128xf32>
    %76 = math.tanh %75 : vector<2x128xf32>
    %77 = vector.extract_strided_slice %74 {offsets = [0, 0], sizes = [2, 128], strides = [1, 1]} : vector<2x384xf32> to vector<2x128xf32>
    %78 = vector.extract_strided_slice %74 {offsets = [0, 128], sizes = [2, 128], strides = [1, 1]} : vector<2x384xf32> to vector<2x128xf32>
    %79 = vector.extract_strided_slice %74 {offsets = [0, 256], sizes = [2, 128], strides = [1, 1]} : vector<2x384xf32> to vector<2x128xf32>
    %80 = arith.mulf %78, %55 : vector<2x128xf32>
    %81 = arith.mulf %77, %76 : vector<2x128xf32>
    %82 = arith.addf %80, %81 : vector<2x128xf32>
    %83 = math.tanh %82 : vector<2x128xf32>
    %84 = arith.mulf %79, %83 : vector<2x128xf32>
    %c0_26 = arith.constant 0 : index
    %c3 = arith.constant 3 : index
    %85 = vector.load %arg1[%c0_26, %c3] : memref<2x36xf32, #tpu.memory_space<vmem>>, vector<2x1xf32>
    %86 = vector.broadcast %85 : vector<2x1xf32> to vector<2x512xf32>
    %87 = vector.broadcast %0 : vector<1x512xf32> to vector<2x512xf32>
    %88 = arith.mulf %86, %87 : vector<2x512xf32>
    %89 = vector.broadcast %1 : vector<1x512xf32> to vector<2x512xf32>
    %90 = arith.addf %88, %89 : vector<2x512xf32>
    %c0_27 = arith.constant 0 : index
    %c0_28 = arith.constant 0 : index
    %91 = vector.load %arg3[%c0_27, %c0_28] : memref<128x512xf32, #tpu.memory_space<vmem>>, vector<128x512xf32>
    %cst_29 = arith.constant dense<0.000000e+00> : vector<2x512xf32>
    %92 = tpu.matmul %84, %91, %cst_29 {dimension_numbers = #tpu.dot_dimension_numbers<[1], [0], [0], [1], [0, 0, 1, 1], [], []>} : vector<2x128xf32>, vector<128x512xf32>, vector<2x512xf32> -> vector<2x512xf32>
    %93 = arith.addf %90, %92 : vector<2x512xf32>
    %94 = vector.extract_strided_slice %93 {offsets = [0, 0], sizes = [2, 384], strides = [1, 1]} : vector<2x512xf32> to vector<2x384xf32>
    %cst_30 = arith.constant 5.000000e-01 : f32
    %95 = vector.broadcast %cst_30 : f32 to vector<2x384xf32>
    %96 = arith.mulf %95, %94 : vector<2x384xf32>
    %97 = math.tanh %96 : vector<2x384xf32>
    %cst_31 = arith.constant 5.000000e-01 : f32
    %98 = vector.broadcast %cst_31 : f32 to vector<2x384xf32>
    %99 = arith.mulf %98, %97 : vector<2x384xf32>
    %cst_32 = arith.constant 5.000000e-01 : f32
    %100 = vector.broadcast %cst_32 : f32 to vector<2x384xf32>
    %101 = arith.addf %99, %100 : vector<2x384xf32>
    %102 = vector.extract_strided_slice %93 {offsets = [0, 384], sizes = [2, 128], strides = [1, 1]} : vector<2x512xf32> to vector<2x128xf32>
    %103 = math.tanh %102 : vector<2x128xf32>
    %104 = vector.extract_strided_slice %101 {offsets = [0, 0], sizes = [2, 128], strides = [1, 1]} : vector<2x384xf32> to vector<2x128xf32>
    %105 = vector.extract_strided_slice %101 {offsets = [0, 128], sizes = [2, 128], strides = [1, 1]} : vector<2x384xf32> to vector<2x128xf32>
    %106 = vector.extract_strided_slice %101 {offsets = [0, 256], sizes = [2, 128], strides = [1, 1]} : vector<2x384xf32> to vector<2x128xf32>
    %107 = arith.mulf %105, %82 : vector<2x128xf32>
    %108 = arith.mulf %104, %103 : vector<2x128xf32>
    %109 = arith.addf %107, %108 : vector<2x128xf32>
    %110 = math.tanh %109 : vector<2x128xf32>
    %111 = arith.mulf %106, %110 : vector<2x128xf32>
    %c0_33 = arith.constant 0 : index
    %c4 = arith.constant 4 : index
    %112 = vector.load %arg1[%c0_33, %c4] : memref<2x36xf32, #tpu.memory_space<vmem>>, vector<2x1xf32>
    %113 = vector.broadcast %112 : vector<2x1xf32> to vector<2x512xf32>
    %114 = vector.broadcast %0 : vector<1x512xf32> to vector<2x512xf32>
    %115 = arith.mulf %113, %114 : vector<2x512xf32>
    %116 = vector.broadcast %1 : vector<1x512xf32> to vector<2x512xf32>
    %117 = arith.addf %115, %116 : vector<2x512xf32>
    %c0_34 = arith.constant 0 : index
    %c0_35 = arith.constant 0 : index
    %118 = vector.load %arg3[%c0_34, %c0_35] : memref<128x512xf32, #tpu.memory_space<vmem>>, vector<128x512xf32>
    %cst_36 = arith.constant dense<0.000000e+00> : vector<2x512xf32>
    %119 = tpu.matmul %111, %118, %cst_36 {dimension_numbers = #tpu.dot_dimension_numbers<[1], [0], [0], [1], [0, 0, 1, 1], [], []>} : vector<2x128xf32>, vector<128x512xf32>, vector<2x512xf32> -> vector<2x512xf32>
    %120 = arith.addf %117, %119 : vector<2x512xf32>
    %121 = vector.extract_strided_slice %120 {offsets = [0, 0], sizes = [2, 384], strides = [1, 1]} : vector<2x512xf32> to vector<2x384xf32>
    %cst_37 = arith.constant 5.000000e-01 : f32
    %122 = vector.broadcast %cst_37 : f32 to vector<2x384xf32>
    %123 = arith.mulf %122, %121 : vector<2x384xf32>
    %124 = math.tanh %123 : vector<2x384xf32>
    %cst_38 = arith.constant 5.000000e-01 : f32
    %125 = vector.broadcast %cst_38 : f32 to vector<2x384xf32>
    %126 = arith.mulf %125, %124 : vector<2x384xf32>
    %cst_39 = arith.constant 5.000000e-01 : f32
    %127 = vector.broadcast %cst_39 : f32 to vector<2x384xf32>
    %128 = arith.addf %126, %127 : vector<2x384xf32>
    %129 = vector.extract_strided_slice %120 {offsets = [0, 384], sizes = [2, 128], strides = [1, 1]} : vector<2x512xf32> to vector<2x128xf32>
    %130 = math.tanh %129 : vector<2x128xf32>
    %131 = vector.extract_strided_slice %128 {offsets = [0, 0], sizes = [2, 128], strides = [1, 1]} : vector<2x384xf32> to vector<2x128xf32>
    %132 = vector.extract_strided_slice %128 {offsets = [0, 128], sizes = [2, 128], strides = [1, 1]} : vector<2x384xf32> to vector<2x128xf32>
    %133 = vector.extract_strided_slice %128 {offsets = [0, 256], sizes = [2, 128], strides = [1, 1]} : vector<2x384xf32> to vector<2x128xf32>
    %134 = arith.mulf %132, %109 : vector<2x128xf32>
    %135 = arith.mulf %131, %130 : vector<2x128xf32>
    %136 = arith.addf %134, %135 : vector<2x128xf32>
    %137 = math.tanh %136 : vector<2x128xf32>
    %138 = arith.mulf %133, %137 : vector<2x128xf32>
    %c0_40 = arith.constant 0 : index
    %c5 = arith.constant 5 : index
    %139 = vector.load %arg1[%c0_40, %c5] : memref<2x36xf32, #tpu.memory_space<vmem>>, vector<2x1xf32>
    %140 = vector.broadcast %139 : vector<2x1xf32> to vector<2x512xf32>
    %141 = vector.broadcast %0 : vector<1x512xf32> to vector<2x512xf32>
    %142 = arith.mulf %140, %141 : vector<2x512xf32>
    %143 = vector.broadcast %1 : vector<1x512xf32> to vector<2x512xf32>
    %144 = arith.addf %142, %143 : vector<2x512xf32>
    %c0_41 = arith.constant 0 : index
    %c0_42 = arith.constant 0 : index
    %145 = vector.load %arg3[%c0_41, %c0_42] : memref<128x512xf32, #tpu.memory_space<vmem>>, vector<128x512xf32>
    %cst_43 = arith.constant dense<0.000000e+00> : vector<2x512xf32>
    %146 = tpu.matmul %138, %145, %cst_43 {dimension_numbers = #tpu.dot_dimension_numbers<[1], [0], [0], [1], [0, 0, 1, 1], [], []>} : vector<2x128xf32>, vector<128x512xf32>, vector<2x512xf32> -> vector<2x512xf32>
    %147 = arith.addf %144, %146 : vector<2x512xf32>
    %148 = vector.extract_strided_slice %147 {offsets = [0, 0], sizes = [2, 384], strides = [1, 1]} : vector<2x512xf32> to vector<2x384xf32>
    %cst_44 = arith.constant 5.000000e-01 : f32
    %149 = vector.broadcast %cst_44 : f32 to vector<2x384xf32>
    %150 = arith.mulf %149, %148 : vector<2x384xf32>
    %151 = math.tanh %150 : vector<2x384xf32>
    %cst_45 = arith.constant 5.000000e-01 : f32
    %152 = vector.broadcast %cst_45 : f32 to vector<2x384xf32>
    %153 = arith.mulf %152, %151 : vector<2x384xf32>
    %cst_46 = arith.constant 5.000000e-01 : f32
    %154 = vector.broadcast %cst_46 : f32 to vector<2x384xf32>
    %155 = arith.addf %153, %154 : vector<2x384xf32>
    %156 = vector.extract_strided_slice %147 {offsets = [0, 384], sizes = [2, 128], strides = [1, 1]} : vector<2x512xf32> to vector<2x128xf32>
    %157 = math.tanh %156 : vector<2x128xf32>
    %158 = vector.extract_strided_slice %155 {offsets = [0, 0], sizes = [2, 128], strides = [1, 1]} : vector<2x384xf32> to vector<2x128xf32>
    %159 = vector.extract_strided_slice %155 {offsets = [0, 128], sizes = [2, 128], strides = [1, 1]} : vector<2x384xf32> to vector<2x128xf32>
    %160 = vector.extract_strided_slice %155 {offsets = [0, 256], sizes = [2, 128], strides = [1, 1]} : vector<2x384xf32> to vector<2x128xf32>
    %161 = arith.mulf %159, %136 : vector<2x128xf32>
    %162 = arith.mulf %158, %157 : vector<2x128xf32>
    %163 = arith.addf %161, %162 : vector<2x128xf32>
    %164 = math.tanh %163 : vector<2x128xf32>
    %165 = arith.mulf %160, %164 : vector<2x128xf32>
    %c0_47 = arith.constant 0 : index
    %c6 = arith.constant 6 : index
    %166 = vector.load %arg1[%c0_47, %c6] : memref<2x36xf32, #tpu.memory_space<vmem>>, vector<2x1xf32>
    %167 = vector.broadcast %166 : vector<2x1xf32> to vector<2x512xf32>
    %168 = vector.broadcast %0 : vector<1x512xf32> to vector<2x512xf32>
    %169 = arith.mulf %167, %168 : vector<2x512xf32>
    %170 = vector.broadcast %1 : vector<1x512xf32> to vector<2x512xf32>
    %171 = arith.addf %169, %170 : vector<2x512xf32>
    %c0_48 = arith.constant 0 : index
    %c0_49 = arith.constant 0 : index
    %172 = vector.load %arg3[%c0_48, %c0_49] : memref<128x512xf32, #tpu.memory_space<vmem>>, vector<128x512xf32>
    %cst_50 = arith.constant dense<0.000000e+00> : vector<2x512xf32>
    %173 = tpu.matmul %165, %172, %cst_50 {dimension_numbers = #tpu.dot_dimension_numbers<[1], [0], [0], [1], [0, 0, 1, 1], [], []>} : vector<2x128xf32>, vector<128x512xf32>, vector<2x512xf32> -> vector<2x512xf32>
    %174 = arith.addf %171, %173 : vector<2x512xf32>
    %175 = vector.extract_strided_slice %174 {offsets = [0, 0], sizes = [2, 384], strides = [1, 1]} : vector<2x512xf32> to vector<2x384xf32>
    %cst_51 = arith.constant 5.000000e-01 : f32
    %176 = vector.broadcast %cst_51 : f32 to vector<2x384xf32>
    %177 = arith.mulf %176, %175 : vector<2x384xf32>
    %178 = math.tanh %177 : vector<2x384xf32>
    %cst_52 = arith.constant 5.000000e-01 : f32
    %179 = vector.broadcast %cst_52 : f32 to vector<2x384xf32>
    %180 = arith.mulf %179, %178 : vector<2x384xf32>
    %cst_53 = arith.constant 5.000000e-01 : f32
    %181 = vector.broadcast %cst_53 : f32 to vector<2x384xf32>
    %182 = arith.addf %180, %181 : vector<2x384xf32>
    %183 = vector.extract_strided_slice %174 {offsets = [0, 384], sizes = [2, 128], strides = [1, 1]} : vector<2x512xf32> to vector<2x128xf32>
    %184 = math.tanh %183 : vector<2x128xf32>
    %185 = vector.extract_strided_slice %182 {offsets = [0, 0], sizes = [2, 128], strides = [1, 1]} : vector<2x384xf32> to vector<2x128xf32>
    %186 = vector.extract_strided_slice %182 {offsets = [0, 128], sizes = [2, 128], strides = [1, 1]} : vector<2x384xf32> to vector<2x128xf32>
    %187 = vector.extract_strided_slice %182 {offsets = [0, 256], sizes = [2, 128], strides = [1, 1]} : vector<2x384xf32> to vector<2x128xf32>
    %188 = arith.mulf %186, %163 : vector<2x128xf32>
    %189 = arith.mulf %185, %184 : vector<2x128xf32>
    %190 = arith.addf %188, %189 : vector<2x128xf32>
    %191 = math.tanh %190 : vector<2x128xf32>
    %192 = arith.mulf %187, %191 : vector<2x128xf32>
    %c0_54 = arith.constant 0 : index
    %c7 = arith.constant 7 : index
    %193 = vector.load %arg1[%c0_54, %c7] : memref<2x36xf32, #tpu.memory_space<vmem>>, vector<2x1xf32>
    %194 = vector.broadcast %193 : vector<2x1xf32> to vector<2x512xf32>
    %195 = vector.broadcast %0 : vector<1x512xf32> to vector<2x512xf32>
    %196 = arith.mulf %194, %195 : vector<2x512xf32>
    %197 = vector.broadcast %1 : vector<1x512xf32> to vector<2x512xf32>
    %198 = arith.addf %196, %197 : vector<2x512xf32>
    %c0_55 = arith.constant 0 : index
    %c0_56 = arith.constant 0 : index
    %199 = vector.load %arg3[%c0_55, %c0_56] : memref<128x512xf32, #tpu.memory_space<vmem>>, vector<128x512xf32>
    %cst_57 = arith.constant dense<0.000000e+00> : vector<2x512xf32>
    %200 = tpu.matmul %192, %199, %cst_57 {dimension_numbers = #tpu.dot_dimension_numbers<[1], [0], [0], [1], [0, 0, 1, 1], [], []>} : vector<2x128xf32>, vector<128x512xf32>, vector<2x512xf32> -> vector<2x512xf32>
    %201 = arith.addf %198, %200 : vector<2x512xf32>
    %202 = vector.extract_strided_slice %201 {offsets = [0, 0], sizes = [2, 384], strides = [1, 1]} : vector<2x512xf32> to vector<2x384xf32>
    %cst_58 = arith.constant 5.000000e-01 : f32
    %203 = vector.broadcast %cst_58 : f32 to vector<2x384xf32>
    %204 = arith.mulf %203, %202 : vector<2x384xf32>
    %205 = math.tanh %204 : vector<2x384xf32>
    %cst_59 = arith.constant 5.000000e-01 : f32
    %206 = vector.broadcast %cst_59 : f32 to vector<2x384xf32>
    %207 = arith.mulf %206, %205 : vector<2x384xf32>
    %cst_60 = arith.constant 5.000000e-01 : f32
    %208 = vector.broadcast %cst_60 : f32 to vector<2x384xf32>
    %209 = arith.addf %207, %208 : vector<2x384xf32>
    %210 = vector.extract_strided_slice %201 {offsets = [0, 384], sizes = [2, 128], strides = [1, 1]} : vector<2x512xf32> to vector<2x128xf32>
    %211 = math.tanh %210 : vector<2x128xf32>
    %212 = vector.extract_strided_slice %209 {offsets = [0, 0], sizes = [2, 128], strides = [1, 1]} : vector<2x384xf32> to vector<2x128xf32>
    %213 = vector.extract_strided_slice %209 {offsets = [0, 128], sizes = [2, 128], strides = [1, 1]} : vector<2x384xf32> to vector<2x128xf32>
    %214 = vector.extract_strided_slice %209 {offsets = [0, 256], sizes = [2, 128], strides = [1, 1]} : vector<2x384xf32> to vector<2x128xf32>
    %215 = arith.mulf %213, %190 : vector<2x128xf32>
    %216 = arith.mulf %212, %211 : vector<2x128xf32>
    %217 = arith.addf %215, %216 : vector<2x128xf32>
    %218 = math.tanh %217 : vector<2x128xf32>
    %219 = arith.mulf %214, %218 : vector<2x128xf32>
    %c0_61 = arith.constant 0 : index
    %c8 = arith.constant 8 : index
    %220 = vector.load %arg1[%c0_61, %c8] : memref<2x36xf32, #tpu.memory_space<vmem>>, vector<2x1xf32>
    %221 = vector.broadcast %220 : vector<2x1xf32> to vector<2x512xf32>
    %222 = vector.broadcast %0 : vector<1x512xf32> to vector<2x512xf32>
    %223 = arith.mulf %221, %222 : vector<2x512xf32>
    %224 = vector.broadcast %1 : vector<1x512xf32> to vector<2x512xf32>
    %225 = arith.addf %223, %224 : vector<2x512xf32>
    %c0_62 = arith.constant 0 : index
    %c0_63 = arith.constant 0 : index
    %226 = vector.load %arg3[%c0_62, %c0_63] : memref<128x512xf32, #tpu.memory_space<vmem>>, vector<128x512xf32>
    %cst_64 = arith.constant dense<0.000000e+00> : vector<2x512xf32>
    %227 = tpu.matmul %219, %226, %cst_64 {dimension_numbers = #tpu.dot_dimension_numbers<[1], [0], [0], [1], [0, 0, 1, 1], [], []>} : vector<2x128xf32>, vector<128x512xf32>, vector<2x512xf32> -> vector<2x512xf32>
    %228 = arith.addf %225, %227 : vector<2x512xf32>
    %229 = vector.extract_strided_slice %228 {offsets = [0, 0], sizes = [2, 384], strides = [1, 1]} : vector<2x512xf32> to vector<2x384xf32>
    %cst_65 = arith.constant 5.000000e-01 : f32
    %230 = vector.broadcast %cst_65 : f32 to vector<2x384xf32>
    %231 = arith.mulf %230, %229 : vector<2x384xf32>
    %232 = math.tanh %231 : vector<2x384xf32>
    %cst_66 = arith.constant 5.000000e-01 : f32
    %233 = vector.broadcast %cst_66 : f32 to vector<2x384xf32>
    %234 = arith.mulf %233, %232 : vector<2x384xf32>
    %cst_67 = arith.constant 5.000000e-01 : f32
    %235 = vector.broadcast %cst_67 : f32 to vector<2x384xf32>
    %236 = arith.addf %234, %235 : vector<2x384xf32>
    %237 = vector.extract_strided_slice %228 {offsets = [0, 384], sizes = [2, 128], strides = [1, 1]} : vector<2x512xf32> to vector<2x128xf32>
    %238 = math.tanh %237 : vector<2x128xf32>
    %239 = vector.extract_strided_slice %236 {offsets = [0, 0], sizes = [2, 128], strides = [1, 1]} : vector<2x384xf32> to vector<2x128xf32>
    %240 = vector.extract_strided_slice %236 {offsets = [0, 128], sizes = [2, 128], strides = [1, 1]} : vector<2x384xf32> to vector<2x128xf32>
    %241 = vector.extract_strided_slice %236 {offsets = [0, 256], sizes = [2, 128], strides = [1, 1]} : vector<2x384xf32> to vector<2x128xf32>
    %242 = arith.mulf %240, %217 : vector<2x128xf32>
    %243 = arith.mulf %239, %238 : vector<2x128xf32>
    %244 = arith.addf %242, %243 : vector<2x128xf32>
    %245 = math.tanh %244 : vector<2x128xf32>
    %246 = arith.mulf %241, %245 : vector<2x128xf32>
    %c0_68 = arith.constant 0 : index
    %c9 = arith.constant 9 : index
    %247 = vector.load %arg1[%c0_68, %c9] : memref<2x36xf32, #tpu.memory_space<vmem>>, vector<2x1xf32>
    %248 = vector.broadcast %247 : vector<2x1xf32> to vector<2x512xf32>
    %249 = vector.broadcast %0 : vector<1x512xf32> to vector<2x512xf32>
    %250 = arith.mulf %248, %249 : vector<2x512xf32>
    %251 = vector.broadcast %1 : vector<1x512xf32> to vector<2x512xf32>
    %252 = arith.addf %250, %251 : vector<2x512xf32>
    %c0_69 = arith.constant 0 : index
    %c0_70 = arith.constant 0 : index
    %253 = vector.load %arg3[%c0_69, %c0_70] : memref<128x512xf32, #tpu.memory_space<vmem>>, vector<128x512xf32>
    %cst_71 = arith.constant dense<0.000000e+00> : vector<2x512xf32>
    %254 = tpu.matmul %246, %253, %cst_71 {dimension_numbers = #tpu.dot_dimension_numbers<[1], [0], [0], [1], [0, 0, 1, 1], [], []>} : vector<2x128xf32>, vector<128x512xf32>, vector<2x512xf32> -> vector<2x512xf32>
    %255 = arith.addf %252, %254 : vector<2x512xf32>
    %256 = vector.extract_strided_slice %255 {offsets = [0, 0], sizes = [2, 384], strides = [1, 1]} : vector<2x512xf32> to vector<2x384xf32>
    %cst_72 = arith.constant 5.000000e-01 : f32
    %257 = vector.broadcast %cst_72 : f32 to vector<2x384xf32>
    %258 = arith.mulf %257, %256 : vector<2x384xf32>
    %259 = math.tanh %258 : vector<2x384xf32>
    %cst_73 = arith.constant 5.000000e-01 : f32
    %260 = vector.broadcast %cst_73 : f32 to vector<2x384xf32>
    %261 = arith.mulf %260, %259 : vector<2x384xf32>
    %cst_74 = arith.constant 5.000000e-01 : f32
    %262 = vector.broadcast %cst_74 : f32 to vector<2x384xf32>
    %263 = arith.addf %261, %262 : vector<2x384xf32>
    %264 = vector.extract_strided_slice %255 {offsets = [0, 384], sizes = [2, 128], strides = [1, 1]} : vector<2x512xf32> to vector<2x128xf32>
    %265 = math.tanh %264 : vector<2x128xf32>
    %266 = vector.extract_strided_slice %263 {offsets = [0, 0], sizes = [2, 128], strides = [1, 1]} : vector<2x384xf32> to vector<2x128xf32>
    %267 = vector.extract_strided_slice %263 {offsets = [0, 128], sizes = [2, 128], strides = [1, 1]} : vector<2x384xf32> to vector<2x128xf32>
    %268 = vector.extract_strided_slice %263 {offsets = [0, 256], sizes = [2, 128], strides = [1, 1]} : vector<2x384xf32> to vector<2x128xf32>
    %269 = arith.mulf %267, %244 : vector<2x128xf32>
    %270 = arith.mulf %266, %265 : vector<2x128xf32>
    %271 = arith.addf %269, %270 : vector<2x128xf32>
    %272 = math.tanh %271 : vector<2x128xf32>
    %273 = arith.mulf %268, %272 : vector<2x128xf32>
    %c0_75 = arith.constant 0 : index
    %c10 = arith.constant 10 : index
    %274 = vector.load %arg1[%c0_75, %c10] : memref<2x36xf32, #tpu.memory_space<vmem>>, vector<2x1xf32>
    %275 = vector.broadcast %274 : vector<2x1xf32> to vector<2x512xf32>
    %276 = vector.broadcast %0 : vector<1x512xf32> to vector<2x512xf32>
    %277 = arith.mulf %275, %276 : vector<2x512xf32>
    %278 = vector.broadcast %1 : vector<1x512xf32> to vector<2x512xf32>
    %279 = arith.addf %277, %278 : vector<2x512xf32>
    %c0_76 = arith.constant 0 : index
    %c0_77 = arith.constant 0 : index
    %280 = vector.load %arg3[%c0_76, %c0_77] : memref<128x512xf32, #tpu.memory_space<vmem>>, vector<128x512xf32>
    %cst_78 = arith.constant dense<0.000000e+00> : vector<2x512xf32>
    %281 = tpu.matmul %273, %280, %cst_78 {dimension_numbers = #tpu.dot_dimension_numbers<[1], [0], [0], [1], [0, 0, 1, 1], [], []>} : vector<2x128xf32>, vector<128x512xf32>, vector<2x512xf32> -> vector<2x512xf32>
    %282 = arith.addf %279, %281 : vector<2x512xf32>
    %283 = vector.extract_strided_slice %282 {offsets = [0, 0], sizes = [2, 384], strides = [1, 1]} : vector<2x512xf32> to vector<2x384xf32>
    %cst_79 = arith.constant 5.000000e-01 : f32
    %284 = vector.broadcast %cst_79 : f32 to vector<2x384xf32>
    %285 = arith.mulf %284, %283 : vector<2x384xf32>
    %286 = math.tanh %285 : vector<2x384xf32>
    %cst_80 = arith.constant 5.000000e-01 : f32
    %287 = vector.broadcast %cst_80 : f32 to vector<2x384xf32>
    %288 = arith.mulf %287, %286 : vector<2x384xf32>
    %cst_81 = arith.constant 5.000000e-01 : f32
    %289 = vector.broadcast %cst_81 : f32 to vector<2x384xf32>
    %290 = arith.addf %288, %289 : vector<2x384xf32>
    %291 = vector.extract_strided_slice %282 {offsets = [0, 384], sizes = [2, 128], strides = [1, 1]} : vector<2x512xf32> to vector<2x128xf32>
    %292 = math.tanh %291 : vector<2x128xf32>
    %293 = vector.extract_strided_slice %290 {offsets = [0, 0], sizes = [2, 128], strides = [1, 1]} : vector<2x384xf32> to vector<2x128xf32>
    %294 = vector.extract_strided_slice %290 {offsets = [0, 128], sizes = [2, 128], strides = [1, 1]} : vector<2x384xf32> to vector<2x128xf32>
    %295 = vector.extract_strided_slice %290 {offsets = [0, 256], sizes = [2, 128], strides = [1, 1]} : vector<2x384xf32> to vector<2x128xf32>
    %296 = arith.mulf %294, %271 : vector<2x128xf32>
    %297 = arith.mulf %293, %292 : vector<2x128xf32>
    %298 = arith.addf %296, %297 : vector<2x128xf32>
    %299 = math.tanh %298 : vector<2x128xf32>
    %300 = arith.mulf %295, %299 : vector<2x128xf32>
    %c0_82 = arith.constant 0 : index
    %c11 = arith.constant 11 : index
    %301 = vector.load %arg1[%c0_82, %c11] : memref<2x36xf32, #tpu.memory_space<vmem>>, vector<2x1xf32>
    %302 = vector.broadcast %301 : vector<2x1xf32> to vector<2x512xf32>
    %303 = vector.broadcast %0 : vector<1x512xf32> to vector<2x512xf32>
    %304 = arith.mulf %302, %303 : vector<2x512xf32>
    %305 = vector.broadcast %1 : vector<1x512xf32> to vector<2x512xf32>
    %306 = arith.addf %304, %305 : vector<2x512xf32>
    %c0_83 = arith.constant 0 : index
    %c0_84 = arith.constant 0 : index
    %307 = vector.load %arg3[%c0_83, %c0_84] : memref<128x512xf32, #tpu.memory_space<vmem>>, vector<128x512xf32>
    %cst_85 = arith.constant dense<0.000000e+00> : vector<2x512xf32>
    %308 = tpu.matmul %300, %307, %cst_85 {dimension_numbers = #tpu.dot_dimension_numbers<[1], [0], [0], [1], [0, 0, 1, 1], [], []>} : vector<2x128xf32>, vector<128x512xf32>, vector<2x512xf32> -> vector<2x512xf32>
    %309 = arith.addf %306, %308 : vector<2x512xf32>
    %310 = vector.extract_strided_slice %309 {offsets = [0, 0], sizes = [2, 384], strides = [1, 1]} : vector<2x512xf32> to vector<2x384xf32>
    %cst_86 = arith.constant 5.000000e-01 : f32
    %311 = vector.broadcast %cst_86 : f32 to vector<2x384xf32>
    %312 = arith.mulf %311, %310 : vector<2x384xf32>
    %313 = math.tanh %312 : vector<2x384xf32>
    %cst_87 = arith.constant 5.000000e-01 : f32
    %314 = vector.broadcast %cst_87 : f32 to vector<2x384xf32>
    %315 = arith.mulf %314, %313 : vector<2x384xf32>
    %cst_88 = arith.constant 5.000000e-01 : f32
    %316 = vector.broadcast %cst_88 : f32 to vector<2x384xf32>
    %317 = arith.addf %315, %316 : vector<2x384xf32>
    %318 = vector.extract_strided_slice %309 {offsets = [0, 384], sizes = [2, 128], strides = [1, 1]} : vector<2x512xf32> to vector<2x128xf32>
    %319 = math.tanh %318 : vector<2x128xf32>
    %320 = vector.extract_strided_slice %317 {offsets = [0, 0], sizes = [2, 128], strides = [1, 1]} : vector<2x384xf32> to vector<2x128xf32>
    %321 = vector.extract_strided_slice %317 {offsets = [0, 128], sizes = [2, 128], strides = [1, 1]} : vector<2x384xf32> to vector<2x128xf32>
    %322 = vector.extract_strided_slice %317 {offsets = [0, 256], sizes = [2, 128], strides = [1, 1]} : vector<2x384xf32> to vector<2x128xf32>
    %323 = arith.mulf %321, %298 : vector<2x128xf32>
    %324 = arith.mulf %320, %319 : vector<2x128xf32>
    %325 = arith.addf %323, %324 : vector<2x128xf32>
    %326 = math.tanh %325 : vector<2x128xf32>
    %327 = arith.mulf %322, %326 : vector<2x128xf32>
    %c0_89 = arith.constant 0 : index
    %c12 = arith.constant 12 : index
    %328 = vector.load %arg1[%c0_89, %c12] : memref<2x36xf32, #tpu.memory_space<vmem>>, vector<2x1xf32>
    %329 = vector.broadcast %328 : vector<2x1xf32> to vector<2x512xf32>
    %330 = vector.broadcast %0 : vector<1x512xf32> to vector<2x512xf32>
    %331 = arith.mulf %329, %330 : vector<2x512xf32>
    %332 = vector.broadcast %1 : vector<1x512xf32> to vector<2x512xf32>
    %333 = arith.addf %331, %332 : vector<2x512xf32>
    %c0_90 = arith.constant 0 : index
    %c0_91 = arith.constant 0 : index
    %334 = vector.load %arg3[%c0_90, %c0_91] : memref<128x512xf32, #tpu.memory_space<vmem>>, vector<128x512xf32>
    %cst_92 = arith.constant dense<0.000000e+00> : vector<2x512xf32>
    %335 = tpu.matmul %327, %334, %cst_92 {dimension_numbers = #tpu.dot_dimension_numbers<[1], [0], [0], [1], [0, 0, 1, 1], [], []>} : vector<2x128xf32>, vector<128x512xf32>, vector<2x512xf32> -> vector<2x512xf32>
    %336 = arith.addf %333, %335 : vector<2x512xf32>
    %337 = vector.extract_strided_slice %336 {offsets = [0, 0], sizes = [2, 384], strides = [1, 1]} : vector<2x512xf32> to vector<2x384xf32>
    %cst_93 = arith.constant 5.000000e-01 : f32
    %338 = vector.broadcast %cst_93 : f32 to vector<2x384xf32>
    %339 = arith.mulf %338, %337 : vector<2x384xf32>
    %340 = math.tanh %339 : vector<2x384xf32>
    %cst_94 = arith.constant 5.000000e-01 : f32
    %341 = vector.broadcast %cst_94 : f32 to vector<2x384xf32>
    %342 = arith.mulf %341, %340 : vector<2x384xf32>
    %cst_95 = arith.constant 5.000000e-01 : f32
    %343 = vector.broadcast %cst_95 : f32 to vector<2x384xf32>
    %344 = arith.addf %342, %343 : vector<2x384xf32>
    %345 = vector.extract_strided_slice %336 {offsets = [0, 384], sizes = [2, 128], strides = [1, 1]} : vector<2x512xf32> to vector<2x128xf32>
    %346 = math.tanh %345 : vector<2x128xf32>
    %347 = vector.extract_strided_slice %344 {offsets = [0, 0], sizes = [2, 128], strides = [1, 1]} : vector<2x384xf32> to vector<2x128xf32>
    %348 = vector.extract_strided_slice %344 {offsets = [0, 128], sizes = [2, 128], strides = [1, 1]} : vector<2x384xf32> to vector<2x128xf32>
    %349 = vector.extract_strided_slice %344 {offsets = [0, 256], sizes = [2, 128], strides = [1, 1]} : vector<2x384xf32> to vector<2x128xf32>
    %350 = arith.mulf %348, %325 : vector<2x128xf32>
    %351 = arith.mulf %347, %346 : vector<2x128xf32>
    %352 = arith.addf %350, %351 : vector<2x128xf32>
    %353 = math.tanh %352 : vector<2x128xf32>
    %354 = arith.mulf %349, %353 : vector<2x128xf32>
    %c0_96 = arith.constant 0 : index
    %c13 = arith.constant 13 : index
    %355 = vector.load %arg1[%c0_96, %c13] : memref<2x36xf32, #tpu.memory_space<vmem>>, vector<2x1xf32>
    %356 = vector.broadcast %355 : vector<2x1xf32> to vector<2x512xf32>
    %357 = vector.broadcast %0 : vector<1x512xf32> to vector<2x512xf32>
    %358 = arith.mulf %356, %357 : vector<2x512xf32>
    %359 = vector.broadcast %1 : vector<1x512xf32> to vector<2x512xf32>
    %360 = arith.addf %358, %359 : vector<2x512xf32>
    %c0_97 = arith.constant 0 : index
    %c0_98 = arith.constant 0 : index
    %361 = vector.load %arg3[%c0_97, %c0_98] : memref<128x512xf32, #tpu.memory_space<vmem>>, vector<128x512xf32>
    %cst_99 = arith.constant dense<0.000000e+00> : vector<2x512xf32>
    %362 = tpu.matmul %354, %361, %cst_99 {dimension_numbers = #tpu.dot_dimension_numbers<[1], [0], [0], [1], [0, 0, 1, 1], [], []>} : vector<2x128xf32>, vector<128x512xf32>, vector<2x512xf32> -> vector<2x512xf32>
    %363 = arith.addf %360, %362 : vector<2x512xf32>
    %364 = vector.extract_strided_slice %363 {offsets = [0, 0], sizes = [2, 384], strides = [1, 1]} : vector<2x512xf32> to vector<2x384xf32>
    %cst_100 = arith.constant 5.000000e-01 : f32
    %365 = vector.broadcast %cst_100 : f32 to vector<2x384xf32>
    %366 = arith.mulf %365, %364 : vector<2x384xf32>
    %367 = math.tanh %366 : vector<2x384xf32>
    %cst_101 = arith.constant 5.000000e-01 : f32
    %368 = vector.broadcast %cst_101 : f32 to vector<2x384xf32>
    %369 = arith.mulf %368, %367 : vector<2x384xf32>
    %cst_102 = arith.constant 5.000000e-01 : f32
    %370 = vector.broadcast %cst_102 : f32 to vector<2x384xf32>
    %371 = arith.addf %369, %370 : vector<2x384xf32>
    %372 = vector.extract_strided_slice %363 {offsets = [0, 384], sizes = [2, 128], strides = [1, 1]} : vector<2x512xf32> to vector<2x128xf32>
    %373 = math.tanh %372 : vector<2x128xf32>
    %374 = vector.extract_strided_slice %371 {offsets = [0, 0], sizes = [2, 128], strides = [1, 1]} : vector<2x384xf32> to vector<2x128xf32>
    %375 = vector.extract_strided_slice %371 {offsets = [0, 128], sizes = [2, 128], strides = [1, 1]} : vector<2x384xf32> to vector<2x128xf32>
    %376 = vector.extract_strided_slice %371 {offsets = [0, 256], sizes = [2, 128], strides = [1, 1]} : vector<2x384xf32> to vector<2x128xf32>
    %377 = arith.mulf %375, %352 : vector<2x128xf32>
    %378 = arith.mulf %374, %373 : vector<2x128xf32>
    %379 = arith.addf %377, %378 : vector<2x128xf32>
    %380 = math.tanh %379 : vector<2x128xf32>
    %381 = arith.mulf %376, %380 : vector<2x128xf32>
    %c0_103 = arith.constant 0 : index
    %c14 = arith.constant 14 : index
    %382 = vector.load %arg1[%c0_103, %c14] : memref<2x36xf32, #tpu.memory_space<vmem>>, vector<2x1xf32>
    %383 = vector.broadcast %382 : vector<2x1xf32> to vector<2x512xf32>
    %384 = vector.broadcast %0 : vector<1x512xf32> to vector<2x512xf32>
    %385 = arith.mulf %383, %384 : vector<2x512xf32>
    %386 = vector.broadcast %1 : vector<1x512xf32> to vector<2x512xf32>
    %387 = arith.addf %385, %386 : vector<2x512xf32>
    %c0_104 = arith.constant 0 : index
    %c0_105 = arith.constant 0 : index
    %388 = vector.load %arg3[%c0_104, %c0_105] : memref<128x512xf32, #tpu.memory_space<vmem>>, vector<128x512xf32>
    %cst_106 = arith.constant dense<0.000000e+00> : vector<2x512xf32>
    %389 = tpu.matmul %381, %388, %cst_106 {dimension_numbers = #tpu.dot_dimension_numbers<[1], [0], [0], [1], [0, 0, 1, 1], [], []>} : vector<2x128xf32>, vector<128x512xf32>, vector<2x512xf32> -> vector<2x512xf32>
    %390 = arith.addf %387, %389 : vector<2x512xf32>
    %391 = vector.extract_strided_slice %390 {offsets = [0, 0], sizes = [2, 384], strides = [1, 1]} : vector<2x512xf32> to vector<2x384xf32>
    %cst_107 = arith.constant 5.000000e-01 : f32
    %392 = vector.broadcast %cst_107 : f32 to vector<2x384xf32>
    %393 = arith.mulf %392, %391 : vector<2x384xf32>
    %394 = math.tanh %393 : vector<2x384xf32>
    %cst_108 = arith.constant 5.000000e-01 : f32
    %395 = vector.broadcast %cst_108 : f32 to vector<2x384xf32>
    %396 = arith.mulf %395, %394 : vector<2x384xf32>
    %cst_109 = arith.constant 5.000000e-01 : f32
    %397 = vector.broadcast %cst_109 : f32 to vector<2x384xf32>
    %398 = arith.addf %396, %397 : vector<2x384xf32>
    %399 = vector.extract_strided_slice %390 {offsets = [0, 384], sizes = [2, 128], strides = [1, 1]} : vector<2x512xf32> to vector<2x128xf32>
    %400 = math.tanh %399 : vector<2x128xf32>
    %401 = vector.extract_strided_slice %398 {offsets = [0, 0], sizes = [2, 128], strides = [1, 1]} : vector<2x384xf32> to vector<2x128xf32>
    %402 = vector.extract_strided_slice %398 {offsets = [0, 128], sizes = [2, 128], strides = [1, 1]} : vector<2x384xf32> to vector<2x128xf32>
    %403 = vector.extract_strided_slice %398 {offsets = [0, 256], sizes = [2, 128], strides = [1, 1]} : vector<2x384xf32> to vector<2x128xf32>
    %404 = arith.mulf %402, %379 : vector<2x128xf32>
    %405 = arith.mulf %401, %400 : vector<2x128xf32>
    %406 = arith.addf %404, %405 : vector<2x128xf32>
    %407 = math.tanh %406 : vector<2x128xf32>
    %408 = arith.mulf %403, %407 : vector<2x128xf32>
    %c0_110 = arith.constant 0 : index
    %c15 = arith.constant 15 : index
    %409 = vector.load %arg1[%c0_110, %c15] : memref<2x36xf32, #tpu.memory_space<vmem>>, vector<2x1xf32>
    %410 = vector.broadcast %409 : vector<2x1xf32> to vector<2x512xf32>
    %411 = vector.broadcast %0 : vector<1x512xf32> to vector<2x512xf32>
    %412 = arith.mulf %410, %411 : vector<2x512xf32>
    %413 = vector.broadcast %1 : vector<1x512xf32> to vector<2x512xf32>
    %414 = arith.addf %412, %413 : vector<2x512xf32>
    %c0_111 = arith.constant 0 : index
    %c0_112 = arith.constant 0 : index
    %415 = vector.load %arg3[%c0_111, %c0_112] : memref<128x512xf32, #tpu.memory_space<vmem>>, vector<128x512xf32>
    %cst_113 = arith.constant dense<0.000000e+00> : vector<2x512xf32>
    %416 = tpu.matmul %408, %415, %cst_113 {dimension_numbers = #tpu.dot_dimension_numbers<[1], [0], [0], [1], [0, 0, 1, 1], [], []>} : vector<2x128xf32>, vector<128x512xf32>, vector<2x512xf32> -> vector<2x512xf32>
    %417 = arith.addf %414, %416 : vector<2x512xf32>
    %418 = vector.extract_strided_slice %417 {offsets = [0, 0], sizes = [2, 384], strides = [1, 1]} : vector<2x512xf32> to vector<2x384xf32>
    %cst_114 = arith.constant 5.000000e-01 : f32
    %419 = vector.broadcast %cst_114 : f32 to vector<2x384xf32>
    %420 = arith.mulf %419, %418 : vector<2x384xf32>
    %421 = math.tanh %420 : vector<2x384xf32>
    %cst_115 = arith.constant 5.000000e-01 : f32
    %422 = vector.broadcast %cst_115 : f32 to vector<2x384xf32>
    %423 = arith.mulf %422, %421 : vector<2x384xf32>
    %cst_116 = arith.constant 5.000000e-01 : f32
    %424 = vector.broadcast %cst_116 : f32 to vector<2x384xf32>
    %425 = arith.addf %423, %424 : vector<2x384xf32>
    %426 = vector.extract_strided_slice %417 {offsets = [0, 384], sizes = [2, 128], strides = [1, 1]} : vector<2x512xf32> to vector<2x128xf32>
    %427 = math.tanh %426 : vector<2x128xf32>
    %428 = vector.extract_strided_slice %425 {offsets = [0, 0], sizes = [2, 128], strides = [1, 1]} : vector<2x384xf32> to vector<2x128xf32>
    %429 = vector.extract_strided_slice %425 {offsets = [0, 128], sizes = [2, 128], strides = [1, 1]} : vector<2x384xf32> to vector<2x128xf32>
    %430 = vector.extract_strided_slice %425 {offsets = [0, 256], sizes = [2, 128], strides = [1, 1]} : vector<2x384xf32> to vector<2x128xf32>
    %431 = arith.mulf %429, %406 : vector<2x128xf32>
    %432 = arith.mulf %428, %427 : vector<2x128xf32>
    %433 = arith.addf %431, %432 : vector<2x128xf32>
    %434 = math.tanh %433 : vector<2x128xf32>
    %435 = arith.mulf %430, %434 : vector<2x128xf32>
    %c0_117 = arith.constant 0 : index
    %c16 = arith.constant 16 : index
    %436 = vector.load %arg1[%c0_117, %c16] : memref<2x36xf32, #tpu.memory_space<vmem>>, vector<2x1xf32>
    %437 = vector.broadcast %436 : vector<2x1xf32> to vector<2x512xf32>
    %438 = vector.broadcast %0 : vector<1x512xf32> to vector<2x512xf32>
    %439 = arith.mulf %437, %438 : vector<2x512xf32>
    %440 = vector.broadcast %1 : vector<1x512xf32> to vector<2x512xf32>
    %441 = arith.addf %439, %440 : vector<2x512xf32>
    %c0_118 = arith.constant 0 : index
    %c0_119 = arith.constant 0 : index
    %442 = vector.load %arg3[%c0_118, %c0_119] : memref<128x512xf32, #tpu.memory_space<vmem>>, vector<128x512xf32>
    %cst_120 = arith.constant dense<0.000000e+00> : vector<2x512xf32>
    %443 = tpu.matmul %435, %442, %cst_120 {dimension_numbers = #tpu.dot_dimension_numbers<[1], [0], [0], [1], [0, 0, 1, 1], [], []>} : vector<2x128xf32>, vector<128x512xf32>, vector<2x512xf32> -> vector<2x512xf32>
    %444 = arith.addf %441, %443 : vector<2x512xf32>
    %445 = vector.extract_strided_slice %444 {offsets = [0, 0], sizes = [2, 384], strides = [1, 1]} : vector<2x512xf32> to vector<2x384xf32>
    %cst_121 = arith.constant 5.000000e-01 : f32
    %446 = vector.broadcast %cst_121 : f32 to vector<2x384xf32>
    %447 = arith.mulf %446, %445 : vector<2x384xf32>
    %448 = math.tanh %447 : vector<2x384xf32>
    %cst_122 = arith.constant 5.000000e-01 : f32
    %449 = vector.broadcast %cst_122 : f32 to vector<2x384xf32>
    %450 = arith.mulf %449, %448 : vector<2x384xf32>
    %cst_123 = arith.constant 5.000000e-01 : f32
    %451 = vector.broadcast %cst_123 : f32 to vector<2x384xf32>
    %452 = arith.addf %450, %451 : vector<2x384xf32>
    %453 = vector.extract_strided_slice %444 {offsets = [0, 384], sizes = [2, 128], strides = [1, 1]} : vector<2x512xf32> to vector<2x128xf32>
    %454 = math.tanh %453 : vector<2x128xf32>
    %455 = vector.extract_strided_slice %452 {offsets = [0, 0], sizes = [2, 128], strides = [1, 1]} : vector<2x384xf32> to vector<2x128xf32>
    %456 = vector.extract_strided_slice %452 {offsets = [0, 128], sizes = [2, 128], strides = [1, 1]} : vector<2x384xf32> to vector<2x128xf32>
    %457 = vector.extract_strided_slice %452 {offsets = [0, 256], sizes = [2, 128], strides = [1, 1]} : vector<2x384xf32> to vector<2x128xf32>
    %458 = arith.mulf %456, %433 : vector<2x128xf32>
    %459 = arith.mulf %455, %454 : vector<2x128xf32>
    %460 = arith.addf %458, %459 : vector<2x128xf32>
    %461 = math.tanh %460 : vector<2x128xf32>
    %462 = arith.mulf %457, %461 : vector<2x128xf32>
    %c0_124 = arith.constant 0 : index
    %c17 = arith.constant 17 : index
    %463 = vector.load %arg1[%c0_124, %c17] : memref<2x36xf32, #tpu.memory_space<vmem>>, vector<2x1xf32>
    %464 = vector.broadcast %463 : vector<2x1xf32> to vector<2x512xf32>
    %465 = vector.broadcast %0 : vector<1x512xf32> to vector<2x512xf32>
    %466 = arith.mulf %464, %465 : vector<2x512xf32>
    %467 = vector.broadcast %1 : vector<1x512xf32> to vector<2x512xf32>
    %468 = arith.addf %466, %467 : vector<2x512xf32>
    %c0_125 = arith.constant 0 : index
    %c0_126 = arith.constant 0 : index
    %469 = vector.load %arg3[%c0_125, %c0_126] : memref<128x512xf32, #tpu.memory_space<vmem>>, vector<128x512xf32>
    %cst_127 = arith.constant dense<0.000000e+00> : vector<2x512xf32>
    %470 = tpu.matmul %462, %469, %cst_127 {dimension_numbers = #tpu.dot_dimension_numbers<[1], [0], [0], [1], [0, 0, 1, 1], [], []>} : vector<2x128xf32>, vector<128x512xf32>, vector<2x512xf32> -> vector<2x512xf32>
    %471 = arith.addf %468, %470 : vector<2x512xf32>
    %472 = vector.extract_strided_slice %471 {offsets = [0, 0], sizes = [2, 384], strides = [1, 1]} : vector<2x512xf32> to vector<2x384xf32>
    %cst_128 = arith.constant 5.000000e-01 : f32
    %473 = vector.broadcast %cst_128 : f32 to vector<2x384xf32>
    %474 = arith.mulf %473, %472 : vector<2x384xf32>
    %475 = math.tanh %474 : vector<2x384xf32>
    %cst_129 = arith.constant 5.000000e-01 : f32
    %476 = vector.broadcast %cst_129 : f32 to vector<2x384xf32>
    %477 = arith.mulf %476, %475 : vector<2x384xf32>
    %cst_130 = arith.constant 5.000000e-01 : f32
    %478 = vector.broadcast %cst_130 : f32 to vector<2x384xf32>
    %479 = arith.addf %477, %478 : vector<2x384xf32>
    %480 = vector.extract_strided_slice %471 {offsets = [0, 384], sizes = [2, 128], strides = [1, 1]} : vector<2x512xf32> to vector<2x128xf32>
    %481 = math.tanh %480 : vector<2x128xf32>
    %482 = vector.extract_strided_slice %479 {offsets = [0, 0], sizes = [2, 128], strides = [1, 1]} : vector<2x384xf32> to vector<2x128xf32>
    %483 = vector.extract_strided_slice %479 {offsets = [0, 128], sizes = [2, 128], strides = [1, 1]} : vector<2x384xf32> to vector<2x128xf32>
    %484 = vector.extract_strided_slice %479 {offsets = [0, 256], sizes = [2, 128], strides = [1, 1]} : vector<2x384xf32> to vector<2x128xf32>
    %485 = arith.mulf %483, %460 : vector<2x128xf32>
    %486 = arith.mulf %482, %481 : vector<2x128xf32>
    %487 = arith.addf %485, %486 : vector<2x128xf32>
    %488 = math.tanh %487 : vector<2x128xf32>
    %489 = arith.mulf %484, %488 : vector<2x128xf32>
    %c0_131 = arith.constant 0 : index
    %c18 = arith.constant 18 : index
    %490 = vector.load %arg1[%c0_131, %c18] : memref<2x36xf32, #tpu.memory_space<vmem>>, vector<2x1xf32>
    %491 = vector.broadcast %490 : vector<2x1xf32> to vector<2x512xf32>
    %492 = vector.broadcast %0 : vector<1x512xf32> to vector<2x512xf32>
    %493 = arith.mulf %491, %492 : vector<2x512xf32>
    %494 = vector.broadcast %1 : vector<1x512xf32> to vector<2x512xf32>
    %495 = arith.addf %493, %494 : vector<2x512xf32>
    %c0_132 = arith.constant 0 : index
    %c0_133 = arith.constant 0 : index
    %496 = vector.load %arg3[%c0_132, %c0_133] : memref<128x512xf32, #tpu.memory_space<vmem>>, vector<128x512xf32>
    %cst_134 = arith.constant dense<0.000000e+00> : vector<2x512xf32>
    %497 = tpu.matmul %489, %496, %cst_134 {dimension_numbers = #tpu.dot_dimension_numbers<[1], [0], [0], [1], [0, 0, 1, 1], [], []>} : vector<2x128xf32>, vector<128x512xf32>, vector<2x512xf32> -> vector<2x512xf32>
    %498 = arith.addf %495, %497 : vector<2x512xf32>
    %499 = vector.extract_strided_slice %498 {offsets = [0, 0], sizes = [2, 384], strides = [1, 1]} : vector<2x512xf32> to vector<2x384xf32>
    %cst_135 = arith.constant 5.000000e-01 : f32
    %500 = vector.broadcast %cst_135 : f32 to vector<2x384xf32>
    %501 = arith.mulf %500, %499 : vector<2x384xf32>
    %502 = math.tanh %501 : vector<2x384xf32>
    %cst_136 = arith.constant 5.000000e-01 : f32
    %503 = vector.broadcast %cst_136 : f32 to vector<2x384xf32>
    %504 = arith.mulf %503, %502 : vector<2x384xf32>
    %cst_137 = arith.constant 5.000000e-01 : f32
    %505 = vector.broadcast %cst_137 : f32 to vector<2x384xf32>
    %506 = arith.addf %504, %505 : vector<2x384xf32>
    %507 = vector.extract_strided_slice %498 {offsets = [0, 384], sizes = [2, 128], strides = [1, 1]} : vector<2x512xf32> to vector<2x128xf32>
    %508 = math.tanh %507 : vector<2x128xf32>
    %509 = vector.extract_strided_slice %506 {offsets = [0, 0], sizes = [2, 128], strides = [1, 1]} : vector<2x384xf32> to vector<2x128xf32>
    %510 = vector.extract_strided_slice %506 {offsets = [0, 128], sizes = [2, 128], strides = [1, 1]} : vector<2x384xf32> to vector<2x128xf32>
    %511 = vector.extract_strided_slice %506 {offsets = [0, 256], sizes = [2, 128], strides = [1, 1]} : vector<2x384xf32> to vector<2x128xf32>
    %512 = arith.mulf %510, %487 : vector<2x128xf32>
    %513 = arith.mulf %509, %508 : vector<2x128xf32>
    %514 = arith.addf %512, %513 : vector<2x128xf32>
    %515 = math.tanh %514 : vector<2x128xf32>
    %516 = arith.mulf %511, %515 : vector<2x128xf32>
    %c0_138 = arith.constant 0 : index
    %c19 = arith.constant 19 : index
    %517 = vector.load %arg1[%c0_138, %c19] : memref<2x36xf32, #tpu.memory_space<vmem>>, vector<2x1xf32>
    %518 = vector.broadcast %517 : vector<2x1xf32> to vector<2x512xf32>
    %519 = vector.broadcast %0 : vector<1x512xf32> to vector<2x512xf32>
    %520 = arith.mulf %518, %519 : vector<2x512xf32>
    %521 = vector.broadcast %1 : vector<1x512xf32> to vector<2x512xf32>
    %522 = arith.addf %520, %521 : vector<2x512xf32>
    %c0_139 = arith.constant 0 : index
    %c0_140 = arith.constant 0 : index
    %523 = vector.load %arg3[%c0_139, %c0_140] : memref<128x512xf32, #tpu.memory_space<vmem>>, vector<128x512xf32>
    %cst_141 = arith.constant dense<0.000000e+00> : vector<2x512xf32>
    %524 = tpu.matmul %516, %523, %cst_141 {dimension_numbers = #tpu.dot_dimension_numbers<[1], [0], [0], [1], [0, 0, 1, 1], [], []>} : vector<2x128xf32>, vector<128x512xf32>, vector<2x512xf32> -> vector<2x512xf32>
    %525 = arith.addf %522, %524 : vector<2x512xf32>
    %526 = vector.extract_strided_slice %525 {offsets = [0, 0], sizes = [2, 384], strides = [1, 1]} : vector<2x512xf32> to vector<2x384xf32>
    %cst_142 = arith.constant 5.000000e-01 : f32
    %527 = vector.broadcast %cst_142 : f32 to vector<2x384xf32>
    %528 = arith.mulf %527, %526 : vector<2x384xf32>
    %529 = math.tanh %528 : vector<2x384xf32>
    %cst_143 = arith.constant 5.000000e-01 : f32
    %530 = vector.broadcast %cst_143 : f32 to vector<2x384xf32>
    %531 = arith.mulf %530, %529 : vector<2x384xf32>
    %cst_144 = arith.constant 5.000000e-01 : f32
    %532 = vector.broadcast %cst_144 : f32 to vector<2x384xf32>
    %533 = arith.addf %531, %532 : vector<2x384xf32>
    %534 = vector.extract_strided_slice %525 {offsets = [0, 384], sizes = [2, 128], strides = [1, 1]} : vector<2x512xf32> to vector<2x128xf32>
    %535 = math.tanh %534 : vector<2x128xf32>
    %536 = vector.extract_strided_slice %533 {offsets = [0, 0], sizes = [2, 128], strides = [1, 1]} : vector<2x384xf32> to vector<2x128xf32>
    %537 = vector.extract_strided_slice %533 {offsets = [0, 128], sizes = [2, 128], strides = [1, 1]} : vector<2x384xf32> to vector<2x128xf32>
    %538 = vector.extract_strided_slice %533 {offsets = [0, 256], sizes = [2, 128], strides = [1, 1]} : vector<2x384xf32> to vector<2x128xf32>
    %539 = arith.mulf %537, %514 : vector<2x128xf32>
    %540 = arith.mulf %536, %535 : vector<2x128xf32>
    %541 = arith.addf %539, %540 : vector<2x128xf32>
    %542 = math.tanh %541 : vector<2x128xf32>
    %543 = arith.mulf %538, %542 : vector<2x128xf32>
    %c0_145 = arith.constant 0 : index
    %c20 = arith.constant 20 : index
    %544 = vector.load %arg1[%c0_145, %c20] : memref<2x36xf32, #tpu.memory_space<vmem>>, vector<2x1xf32>
    %545 = vector.broadcast %544 : vector<2x1xf32> to vector<2x512xf32>
    %546 = vector.broadcast %0 : vector<1x512xf32> to vector<2x512xf32>
    %547 = arith.mulf %545, %546 : vector<2x512xf32>
    %548 = vector.broadcast %1 : vector<1x512xf32> to vector<2x512xf32>
    %549 = arith.addf %547, %548 : vector<2x512xf32>
    %c0_146 = arith.constant 0 : index
    %c0_147 = arith.constant 0 : index
    %550 = vector.load %arg3[%c0_146, %c0_147] : memref<128x512xf32, #tpu.memory_space<vmem>>, vector<128x512xf32>
    %cst_148 = arith.constant dense<0.000000e+00> : vector<2x512xf32>
    %551 = tpu.matmul %543, %550, %cst_148 {dimension_numbers = #tpu.dot_dimension_numbers<[1], [0], [0], [1], [0, 0, 1, 1], [], []>} : vector<2x128xf32>, vector<128x512xf32>, vector<2x512xf32> -> vector<2x512xf32>
    %552 = arith.addf %549, %551 : vector<2x512xf32>
    %553 = vector.extract_strided_slice %552 {offsets = [0, 0], sizes = [2, 384], strides = [1, 1]} : vector<2x512xf32> to vector<2x384xf32>
    %cst_149 = arith.constant 5.000000e-01 : f32
    %554 = vector.broadcast %cst_149 : f32 to vector<2x384xf32>
    %555 = arith.mulf %554, %553 : vector<2x384xf32>
    %556 = math.tanh %555 : vector<2x384xf32>
    %cst_150 = arith.constant 5.000000e-01 : f32
    %557 = vector.broadcast %cst_150 : f32 to vector<2x384xf32>
    %558 = arith.mulf %557, %556 : vector<2x384xf32>
    %cst_151 = arith.constant 5.000000e-01 : f32
    %559 = vector.broadcast %cst_151 : f32 to vector<2x384xf32>
    %560 = arith.addf %558, %559 : vector<2x384xf32>
    %561 = vector.extract_strided_slice %552 {offsets = [0, 384], sizes = [2, 128], strides = [1, 1]} : vector<2x512xf32> to vector<2x128xf32>
    %562 = math.tanh %561 : vector<2x128xf32>
    %563 = vector.extract_strided_slice %560 {offsets = [0, 0], sizes = [2, 128], strides = [1, 1]} : vector<2x384xf32> to vector<2x128xf32>
    %564 = vector.extract_strided_slice %560 {offsets = [0, 128], sizes = [2, 128], strides = [1, 1]} : vector<2x384xf32> to vector<2x128xf32>
    %565 = vector.extract_strided_slice %560 {offsets = [0, 256], sizes = [2, 128], strides = [1, 1]} : vector<2x384xf32> to vector<2x128xf32>
    %566 = arith.mulf %564, %541 : vector<2x128xf32>
    %567 = arith.mulf %563, %562 : vector<2x128xf32>
    %568 = arith.addf %566, %567 : vector<2x128xf32>
    %569 = math.tanh %568 : vector<2x128xf32>
    %570 = arith.mulf %565, %569 : vector<2x128xf32>
    %c0_152 = arith.constant 0 : index
    %c21 = arith.constant 21 : index
    %571 = vector.load %arg1[%c0_152, %c21] : memref<2x36xf32, #tpu.memory_space<vmem>>, vector<2x1xf32>
    %572 = vector.broadcast %571 : vector<2x1xf32> to vector<2x512xf32>
    %573 = vector.broadcast %0 : vector<1x512xf32> to vector<2x512xf32>
    %574 = arith.mulf %572, %573 : vector<2x512xf32>
    %575 = vector.broadcast %1 : vector<1x512xf32> to vector<2x512xf32>
    %576 = arith.addf %574, %575 : vector<2x512xf32>
    %c0_153 = arith.constant 0 : index
    %c0_154 = arith.constant 0 : index
    %577 = vector.load %arg3[%c0_153, %c0_154] : memref<128x512xf32, #tpu.memory_space<vmem>>, vector<128x512xf32>
    %cst_155 = arith.constant dense<0.000000e+00> : vector<2x512xf32>
    %578 = tpu.matmul %570, %577, %cst_155 {dimension_numbers = #tpu.dot_dimension_numbers<[1], [0], [0], [1], [0, 0, 1, 1], [], []>} : vector<2x128xf32>, vector<128x512xf32>, vector<2x512xf32> -> vector<2x512xf32>
    %579 = arith.addf %576, %578 : vector<2x512xf32>
    %580 = vector.extract_strided_slice %579 {offsets = [0, 0], sizes = [2, 384], strides = [1, 1]} : vector<2x512xf32> to vector<2x384xf32>
    %cst_156 = arith.constant 5.000000e-01 : f32
    %581 = vector.broadcast %cst_156 : f32 to vector<2x384xf32>
    %582 = arith.mulf %581, %580 : vector<2x384xf32>
    %583 = math.tanh %582 : vector<2x384xf32>
    %cst_157 = arith.constant 5.000000e-01 : f32
    %584 = vector.broadcast %cst_157 : f32 to vector<2x384xf32>
    %585 = arith.mulf %584, %583 : vector<2x384xf32>
    %cst_158 = arith.constant 5.000000e-01 : f32
    %586 = vector.broadcast %cst_158 : f32 to vector<2x384xf32>
    %587 = arith.addf %585, %586 : vector<2x384xf32>
    %588 = vector.extract_strided_slice %579 {offsets = [0, 384], sizes = [2, 128], strides = [1, 1]} : vector<2x512xf32> to vector<2x128xf32>
    %589 = math.tanh %588 : vector<2x128xf32>
    %590 = vector.extract_strided_slice %587 {offsets = [0, 0], sizes = [2, 128], strides = [1, 1]} : vector<2x384xf32> to vector<2x128xf32>
    %591 = vector.extract_strided_slice %587 {offsets = [0, 128], sizes = [2, 128], strides = [1, 1]} : vector<2x384xf32> to vector<2x128xf32>
    %592 = vector.extract_strided_slice %587 {offsets = [0, 256], sizes = [2, 128], strides = [1, 1]} : vector<2x384xf32> to vector<2x128xf32>
    %593 = arith.mulf %591, %568 : vector<2x128xf32>
    %594 = arith.mulf %590, %589 : vector<2x128xf32>
    %595 = arith.addf %593, %594 : vector<2x128xf32>
    %596 = math.tanh %595 : vector<2x128xf32>
    %597 = arith.mulf %592, %596 : vector<2x128xf32>
    %c0_159 = arith.constant 0 : index
    %c22 = arith.constant 22 : index
    %598 = vector.load %arg1[%c0_159, %c22] : memref<2x36xf32, #tpu.memory_space<vmem>>, vector<2x1xf32>
    %599 = vector.broadcast %598 : vector<2x1xf32> to vector<2x512xf32>
    %600 = vector.broadcast %0 : vector<1x512xf32> to vector<2x512xf32>
    %601 = arith.mulf %599, %600 : vector<2x512xf32>
    %602 = vector.broadcast %1 : vector<1x512xf32> to vector<2x512xf32>
    %603 = arith.addf %601, %602 : vector<2x512xf32>
    %c0_160 = arith.constant 0 : index
    %c0_161 = arith.constant 0 : index
    %604 = vector.load %arg3[%c0_160, %c0_161] : memref<128x512xf32, #tpu.memory_space<vmem>>, vector<128x512xf32>
    %cst_162 = arith.constant dense<0.000000e+00> : vector<2x512xf32>
    %605 = tpu.matmul %597, %604, %cst_162 {dimension_numbers = #tpu.dot_dimension_numbers<[1], [0], [0], [1], [0, 0, 1, 1], [], []>} : vector<2x128xf32>, vector<128x512xf32>, vector<2x512xf32> -> vector<2x512xf32>
    %606 = arith.addf %603, %605 : vector<2x512xf32>
    %607 = vector.extract_strided_slice %606 {offsets = [0, 0], sizes = [2, 384], strides = [1, 1]} : vector<2x512xf32> to vector<2x384xf32>
    %cst_163 = arith.constant 5.000000e-01 : f32
    %608 = vector.broadcast %cst_163 : f32 to vector<2x384xf32>
    %609 = arith.mulf %608, %607 : vector<2x384xf32>
    %610 = math.tanh %609 : vector<2x384xf32>
    %cst_164 = arith.constant 5.000000e-01 : f32
    %611 = vector.broadcast %cst_164 : f32 to vector<2x384xf32>
    %612 = arith.mulf %611, %610 : vector<2x384xf32>
    %cst_165 = arith.constant 5.000000e-01 : f32
    %613 = vector.broadcast %cst_165 : f32 to vector<2x384xf32>
    %614 = arith.addf %612, %613 : vector<2x384xf32>
    %615 = vector.extract_strided_slice %606 {offsets = [0, 384], sizes = [2, 128], strides = [1, 1]} : vector<2x512xf32> to vector<2x128xf32>
    %616 = math.tanh %615 : vector<2x128xf32>
    %617 = vector.extract_strided_slice %614 {offsets = [0, 0], sizes = [2, 128], strides = [1, 1]} : vector<2x384xf32> to vector<2x128xf32>
    %618 = vector.extract_strided_slice %614 {offsets = [0, 128], sizes = [2, 128], strides = [1, 1]} : vector<2x384xf32> to vector<2x128xf32>
    %619 = vector.extract_strided_slice %614 {offsets = [0, 256], sizes = [2, 128], strides = [1, 1]} : vector<2x384xf32> to vector<2x128xf32>
    %620 = arith.mulf %618, %595 : vector<2x128xf32>
    %621 = arith.mulf %617, %616 : vector<2x128xf32>
    %622 = arith.addf %620, %621 : vector<2x128xf32>
    %623 = math.tanh %622 : vector<2x128xf32>
    %624 = arith.mulf %619, %623 : vector<2x128xf32>
    %c0_166 = arith.constant 0 : index
    %c23 = arith.constant 23 : index
    %625 = vector.load %arg1[%c0_166, %c23] : memref<2x36xf32, #tpu.memory_space<vmem>>, vector<2x1xf32>
    %626 = vector.broadcast %625 : vector<2x1xf32> to vector<2x512xf32>
    %627 = vector.broadcast %0 : vector<1x512xf32> to vector<2x512xf32>
    %628 = arith.mulf %626, %627 : vector<2x512xf32>
    %629 = vector.broadcast %1 : vector<1x512xf32> to vector<2x512xf32>
    %630 = arith.addf %628, %629 : vector<2x512xf32>
    %c0_167 = arith.constant 0 : index
    %c0_168 = arith.constant 0 : index
    %631 = vector.load %arg3[%c0_167, %c0_168] : memref<128x512xf32, #tpu.memory_space<vmem>>, vector<128x512xf32>
    %cst_169 = arith.constant dense<0.000000e+00> : vector<2x512xf32>
    %632 = tpu.matmul %624, %631, %cst_169 {dimension_numbers = #tpu.dot_dimension_numbers<[1], [0], [0], [1], [0, 0, 1, 1], [], []>} : vector<2x128xf32>, vector<128x512xf32>, vector<2x512xf32> -> vector<2x512xf32>
    %633 = arith.addf %630, %632 : vector<2x512xf32>
    %634 = vector.extract_strided_slice %633 {offsets = [0, 0], sizes = [2, 384], strides = [1, 1]} : vector<2x512xf32> to vector<2x384xf32>
    %cst_170 = arith.constant 5.000000e-01 : f32
    %635 = vector.broadcast %cst_170 : f32 to vector<2x384xf32>
    %636 = arith.mulf %635, %634 : vector<2x384xf32>
    %637 = math.tanh %636 : vector<2x384xf32>
    %cst_171 = arith.constant 5.000000e-01 : f32
    %638 = vector.broadcast %cst_171 : f32 to vector<2x384xf32>
    %639 = arith.mulf %638, %637 : vector<2x384xf32>
    %cst_172 = arith.constant 5.000000e-01 : f32
    %640 = vector.broadcast %cst_172 : f32 to vector<2x384xf32>
    %641 = arith.addf %639, %640 : vector<2x384xf32>
    %642 = vector.extract_strided_slice %633 {offsets = [0, 384], sizes = [2, 128], strides = [1, 1]} : vector<2x512xf32> to vector<2x128xf32>
    %643 = math.tanh %642 : vector<2x128xf32>
    %644 = vector.extract_strided_slice %641 {offsets = [0, 0], sizes = [2, 128], strides = [1, 1]} : vector<2x384xf32> to vector<2x128xf32>
    %645 = vector.extract_strided_slice %641 {offsets = [0, 128], sizes = [2, 128], strides = [1, 1]} : vector<2x384xf32> to vector<2x128xf32>
    %646 = vector.extract_strided_slice %641 {offsets = [0, 256], sizes = [2, 128], strides = [1, 1]} : vector<2x384xf32> to vector<2x128xf32>
    %647 = arith.mulf %645, %622 : vector<2x128xf32>
    %648 = arith.mulf %644, %643 : vector<2x128xf32>
    %649 = arith.addf %647, %648 : vector<2x128xf32>
    %650 = math.tanh %649 : vector<2x128xf32>
    %651 = arith.mulf %646, %650 : vector<2x128xf32>
    %c0_173 = arith.constant 0 : index
    %c24 = arith.constant 24 : index
    %652 = vector.load %arg1[%c0_173, %c24] : memref<2x36xf32, #tpu.memory_space<vmem>>, vector<2x1xf32>
    %653 = vector.broadcast %652 : vector<2x1xf32> to vector<2x512xf32>
    %654 = vector.broadcast %0 : vector<1x512xf32> to vector<2x512xf32>
    %655 = arith.mulf %653, %654 : vector<2x512xf32>
    %656 = vector.broadcast %1 : vector<1x512xf32> to vector<2x512xf32>
    %657 = arith.addf %655, %656 : vector<2x512xf32>
    %c0_174 = arith.constant 0 : index
    %c0_175 = arith.constant 0 : index
    %658 = vector.load %arg3[%c0_174, %c0_175] : memref<128x512xf32, #tpu.memory_space<vmem>>, vector<128x512xf32>
    %cst_176 = arith.constant dense<0.000000e+00> : vector<2x512xf32>
    %659 = tpu.matmul %651, %658, %cst_176 {dimension_numbers = #tpu.dot_dimension_numbers<[1], [0], [0], [1], [0, 0, 1, 1], [], []>} : vector<2x128xf32>, vector<128x512xf32>, vector<2x512xf32> -> vector<2x512xf32>
    %660 = arith.addf %657, %659 : vector<2x512xf32>
    %661 = vector.extract_strided_slice %660 {offsets = [0, 0], sizes = [2, 384], strides = [1, 1]} : vector<2x512xf32> to vector<2x384xf32>
    %cst_177 = arith.constant 5.000000e-01 : f32
    %662 = vector.broadcast %cst_177 : f32 to vector<2x384xf32>
    %663 = arith.mulf %662, %661 : vector<2x384xf32>
    %664 = math.tanh %663 : vector<2x384xf32>
    %cst_178 = arith.constant 5.000000e-01 : f32
    %665 = vector.broadcast %cst_178 : f32 to vector<2x384xf32>
    %666 = arith.mulf %665, %664 : vector<2x384xf32>
    %cst_179 = arith.constant 5.000000e-01 : f32
    %667 = vector.broadcast %cst_179 : f32 to vector<2x384xf32>
    %668 = arith.addf %666, %667 : vector<2x384xf32>
    %669 = vector.extract_strided_slice %660 {offsets = [0, 384], sizes = [2, 128], strides = [1, 1]} : vector<2x512xf32> to vector<2x128xf32>
    %670 = math.tanh %669 : vector<2x128xf32>
    %671 = vector.extract_strided_slice %668 {offsets = [0, 0], sizes = [2, 128], strides = [1, 1]} : vector<2x384xf32> to vector<2x128xf32>
    %672 = vector.extract_strided_slice %668 {offsets = [0, 128], sizes = [2, 128], strides = [1, 1]} : vector<2x384xf32> to vector<2x128xf32>
    %673 = vector.extract_strided_slice %668 {offsets = [0, 256], sizes = [2, 128], strides = [1, 1]} : vector<2x384xf32> to vector<2x128xf32>
    %674 = arith.mulf %672, %649 : vector<2x128xf32>
    %675 = arith.mulf %671, %670 : vector<2x128xf32>
    %676 = arith.addf %674, %675 : vector<2x128xf32>
    %677 = math.tanh %676 : vector<2x128xf32>
    %678 = arith.mulf %673, %677 : vector<2x128xf32>
    %c0_180 = arith.constant 0 : index
    %c25 = arith.constant 25 : index
    %679 = vector.load %arg1[%c0_180, %c25] : memref<2x36xf32, #tpu.memory_space<vmem>>, vector<2x1xf32>
    %680 = vector.broadcast %679 : vector<2x1xf32> to vector<2x512xf32>
    %681 = vector.broadcast %0 : vector<1x512xf32> to vector<2x512xf32>
    %682 = arith.mulf %680, %681 : vector<2x512xf32>
    %683 = vector.broadcast %1 : vector<1x512xf32> to vector<2x512xf32>
    %684 = arith.addf %682, %683 : vector<2x512xf32>
    %c0_181 = arith.constant 0 : index
    %c0_182 = arith.constant 0 : index
    %685 = vector.load %arg3[%c0_181, %c0_182] : memref<128x512xf32, #tpu.memory_space<vmem>>, vector<128x512xf32>
    %cst_183 = arith.constant dense<0.000000e+00> : vector<2x512xf32>
    %686 = tpu.matmul %678, %685, %cst_183 {dimension_numbers = #tpu.dot_dimension_numbers<[1], [0], [0], [1], [0, 0, 1, 1], [], []>} : vector<2x128xf32>, vector<128x512xf32>, vector<2x512xf32> -> vector<2x512xf32>
    %687 = arith.addf %684, %686 : vector<2x512xf32>
    %688 = vector.extract_strided_slice %687 {offsets = [0, 0], sizes = [2, 384], strides = [1, 1]} : vector<2x512xf32> to vector<2x384xf32>
    %cst_184 = arith.constant 5.000000e-01 : f32
    %689 = vector.broadcast %cst_184 : f32 to vector<2x384xf32>
    %690 = arith.mulf %689, %688 : vector<2x384xf32>
    %691 = math.tanh %690 : vector<2x384xf32>
    %cst_185 = arith.constant 5.000000e-01 : f32
    %692 = vector.broadcast %cst_185 : f32 to vector<2x384xf32>
    %693 = arith.mulf %692, %691 : vector<2x384xf32>
    %cst_186 = arith.constant 5.000000e-01 : f32
    %694 = vector.broadcast %cst_186 : f32 to vector<2x384xf32>
    %695 = arith.addf %693, %694 : vector<2x384xf32>
    %696 = vector.extract_strided_slice %687 {offsets = [0, 384], sizes = [2, 128], strides = [1, 1]} : vector<2x512xf32> to vector<2x128xf32>
    %697 = math.tanh %696 : vector<2x128xf32>
    %698 = vector.extract_strided_slice %695 {offsets = [0, 0], sizes = [2, 128], strides = [1, 1]} : vector<2x384xf32> to vector<2x128xf32>
    %699 = vector.extract_strided_slice %695 {offsets = [0, 128], sizes = [2, 128], strides = [1, 1]} : vector<2x384xf32> to vector<2x128xf32>
    %700 = vector.extract_strided_slice %695 {offsets = [0, 256], sizes = [2, 128], strides = [1, 1]} : vector<2x384xf32> to vector<2x128xf32>
    %701 = arith.mulf %699, %676 : vector<2x128xf32>
    %702 = arith.mulf %698, %697 : vector<2x128xf32>
    %703 = arith.addf %701, %702 : vector<2x128xf32>
    %704 = math.tanh %703 : vector<2x128xf32>
    %705 = arith.mulf %700, %704 : vector<2x128xf32>
    %c0_187 = arith.constant 0 : index
    %c26 = arith.constant 26 : index
    %706 = vector.load %arg1[%c0_187, %c26] : memref<2x36xf32, #tpu.memory_space<vmem>>, vector<2x1xf32>
    %707 = vector.broadcast %706 : vector<2x1xf32> to vector<2x512xf32>
    %708 = vector.broadcast %0 : vector<1x512xf32> to vector<2x512xf32>
    %709 = arith.mulf %707, %708 : vector<2x512xf32>
    %710 = vector.broadcast %1 : vector<1x512xf32> to vector<2x512xf32>
    %711 = arith.addf %709, %710 : vector<2x512xf32>
    %c0_188 = arith.constant 0 : index
    %c0_189 = arith.constant 0 : index
    %712 = vector.load %arg3[%c0_188, %c0_189] : memref<128x512xf32, #tpu.memory_space<vmem>>, vector<128x512xf32>
    %cst_190 = arith.constant dense<0.000000e+00> : vector<2x512xf32>
    %713 = tpu.matmul %705, %712, %cst_190 {dimension_numbers = #tpu.dot_dimension_numbers<[1], [0], [0], [1], [0, 0, 1, 1], [], []>} : vector<2x128xf32>, vector<128x512xf32>, vector<2x512xf32> -> vector<2x512xf32>
    %714 = arith.addf %711, %713 : vector<2x512xf32>
    %715 = vector.extract_strided_slice %714 {offsets = [0, 0], sizes = [2, 384], strides = [1, 1]} : vector<2x512xf32> to vector<2x384xf32>
    %cst_191 = arith.constant 5.000000e-01 : f32
    %716 = vector.broadcast %cst_191 : f32 to vector<2x384xf32>
    %717 = arith.mulf %716, %715 : vector<2x384xf32>
    %718 = math.tanh %717 : vector<2x384xf32>
    %cst_192 = arith.constant 5.000000e-01 : f32
    %719 = vector.broadcast %cst_192 : f32 to vector<2x384xf32>
    %720 = arith.mulf %719, %718 : vector<2x384xf32>
    %cst_193 = arith.constant 5.000000e-01 : f32
    %721 = vector.broadcast %cst_193 : f32 to vector<2x384xf32>
    %722 = arith.addf %720, %721 : vector<2x384xf32>
    %723 = vector.extract_strided_slice %714 {offsets = [0, 384], sizes = [2, 128], strides = [1, 1]} : vector<2x512xf32> to vector<2x128xf32>
    %724 = math.tanh %723 : vector<2x128xf32>
    %725 = vector.extract_strided_slice %722 {offsets = [0, 0], sizes = [2, 128], strides = [1, 1]} : vector<2x384xf32> to vector<2x128xf32>
    %726 = vector.extract_strided_slice %722 {offsets = [0, 128], sizes = [2, 128], strides = [1, 1]} : vector<2x384xf32> to vector<2x128xf32>
    %727 = vector.extract_strided_slice %722 {offsets = [0, 256], sizes = [2, 128], strides = [1, 1]} : vector<2x384xf32> to vector<2x128xf32>
    %728 = arith.mulf %726, %703 : vector<2x128xf32>
    %729 = arith.mulf %725, %724 : vector<2x128xf32>
    %730 = arith.addf %728, %729 : vector<2x128xf32>
    %731 = math.tanh %730 : vector<2x128xf32>
    %732 = arith.mulf %727, %731 : vector<2x128xf32>
    %c0_194 = arith.constant 0 : index
    %c27 = arith.constant 27 : index
    %733 = vector.load %arg1[%c0_194, %c27] : memref<2x36xf32, #tpu.memory_space<vmem>>, vector<2x1xf32>
    %734 = vector.broadcast %733 : vector<2x1xf32> to vector<2x512xf32>
    %735 = vector.broadcast %0 : vector<1x512xf32> to vector<2x512xf32>
    %736 = arith.mulf %734, %735 : vector<2x512xf32>
    %737 = vector.broadcast %1 : vector<1x512xf32> to vector<2x512xf32>
    %738 = arith.addf %736, %737 : vector<2x512xf32>
    %c0_195 = arith.constant 0 : index
    %c0_196 = arith.constant 0 : index
    %739 = vector.load %arg3[%c0_195, %c0_196] : memref<128x512xf32, #tpu.memory_space<vmem>>, vector<128x512xf32>
    %cst_197 = arith.constant dense<0.000000e+00> : vector<2x512xf32>
    %740 = tpu.matmul %732, %739, %cst_197 {dimension_numbers = #tpu.dot_dimension_numbers<[1], [0], [0], [1], [0, 0, 1, 1], [], []>} : vector<2x128xf32>, vector<128x512xf32>, vector<2x512xf32> -> vector<2x512xf32>
    %741 = arith.addf %738, %740 : vector<2x512xf32>
    %742 = vector.extract_strided_slice %741 {offsets = [0, 0], sizes = [2, 384], strides = [1, 1]} : vector<2x512xf32> to vector<2x384xf32>
    %cst_198 = arith.constant 5.000000e-01 : f32
    %743 = vector.broadcast %cst_198 : f32 to vector<2x384xf32>
    %744 = arith.mulf %743, %742 : vector<2x384xf32>
    %745 = math.tanh %744 : vector<2x384xf32>
    %cst_199 = arith.constant 5.000000e-01 : f32
    %746 = vector.broadcast %cst_199 : f32 to vector<2x384xf32>
    %747 = arith.mulf %746, %745 : vector<2x384xf32>
    %cst_200 = arith.constant 5.000000e-01 : f32
    %748 = vector.broadcast %cst_200 : f32 to vector<2x384xf32>
    %749 = arith.addf %747, %748 : vector<2x384xf32>
    %750 = vector.extract_strided_slice %741 {offsets = [0, 384], sizes = [2, 128], strides = [1, 1]} : vector<2x512xf32> to vector<2x128xf32>
    %751 = math.tanh %750 : vector<2x128xf32>
    %752 = vector.extract_strided_slice %749 {offsets = [0, 0], sizes = [2, 128], strides = [1, 1]} : vector<2x384xf32> to vector<2x128xf32>
    %753 = vector.extract_strided_slice %749 {offsets = [0, 128], sizes = [2, 128], strides = [1, 1]} : vector<2x384xf32> to vector<2x128xf32>
    %754 = vector.extract_strided_slice %749 {offsets = [0, 256], sizes = [2, 128], strides = [1, 1]} : vector<2x384xf32> to vector<2x128xf32>
    %755 = arith.mulf %753, %730 : vector<2x128xf32>
    %756 = arith.mulf %752, %751 : vector<2x128xf32>
    %757 = arith.addf %755, %756 : vector<2x128xf32>
    %758 = math.tanh %757 : vector<2x128xf32>
    %759 = arith.mulf %754, %758 : vector<2x128xf32>
    %c0_201 = arith.constant 0 : index
    %c28 = arith.constant 28 : index
    %760 = vector.load %arg1[%c0_201, %c28] : memref<2x36xf32, #tpu.memory_space<vmem>>, vector<2x1xf32>
    %761 = vector.broadcast %760 : vector<2x1xf32> to vector<2x512xf32>
    %762 = vector.broadcast %0 : vector<1x512xf32> to vector<2x512xf32>
    %763 = arith.mulf %761, %762 : vector<2x512xf32>
    %764 = vector.broadcast %1 : vector<1x512xf32> to vector<2x512xf32>
    %765 = arith.addf %763, %764 : vector<2x512xf32>
    %c0_202 = arith.constant 0 : index
    %c0_203 = arith.constant 0 : index
    %766 = vector.load %arg3[%c0_202, %c0_203] : memref<128x512xf32, #tpu.memory_space<vmem>>, vector<128x512xf32>
    %cst_204 = arith.constant dense<0.000000e+00> : vector<2x512xf32>
    %767 = tpu.matmul %759, %766, %cst_204 {dimension_numbers = #tpu.dot_dimension_numbers<[1], [0], [0], [1], [0, 0, 1, 1], [], []>} : vector<2x128xf32>, vector<128x512xf32>, vector<2x512xf32> -> vector<2x512xf32>
    %768 = arith.addf %765, %767 : vector<2x512xf32>
    %769 = vector.extract_strided_slice %768 {offsets = [0, 0], sizes = [2, 384], strides = [1, 1]} : vector<2x512xf32> to vector<2x384xf32>
    %cst_205 = arith.constant 5.000000e-01 : f32
    %770 = vector.broadcast %cst_205 : f32 to vector<2x384xf32>
    %771 = arith.mulf %770, %769 : vector<2x384xf32>
    %772 = math.tanh %771 : vector<2x384xf32>
    %cst_206 = arith.constant 5.000000e-01 : f32
    %773 = vector.broadcast %cst_206 : f32 to vector<2x384xf32>
    %774 = arith.mulf %773, %772 : vector<2x384xf32>
    %cst_207 = arith.constant 5.000000e-01 : f32
    %775 = vector.broadcast %cst_207 : f32 to vector<2x384xf32>
    %776 = arith.addf %774, %775 : vector<2x384xf32>
    %777 = vector.extract_strided_slice %768 {offsets = [0, 384], sizes = [2, 128], strides = [1, 1]} : vector<2x512xf32> to vector<2x128xf32>
    %778 = math.tanh %777 : vector<2x128xf32>
    %779 = vector.extract_strided_slice %776 {offsets = [0, 0], sizes = [2, 128], strides = [1, 1]} : vector<2x384xf32> to vector<2x128xf32>
    %780 = vector.extract_strided_slice %776 {offsets = [0, 128], sizes = [2, 128], strides = [1, 1]} : vector<2x384xf32> to vector<2x128xf32>
    %781 = vector.extract_strided_slice %776 {offsets = [0, 256], sizes = [2, 128], strides = [1, 1]} : vector<2x384xf32> to vector<2x128xf32>
    %782 = arith.mulf %780, %757 : vector<2x128xf32>
    %783 = arith.mulf %779, %778 : vector<2x128xf32>
    %784 = arith.addf %782, %783 : vector<2x128xf32>
    %785 = math.tanh %784 : vector<2x128xf32>
    %786 = arith.mulf %781, %785 : vector<2x128xf32>
    %c0_208 = arith.constant 0 : index
    %c29 = arith.constant 29 : index
    %787 = vector.load %arg1[%c0_208, %c29] : memref<2x36xf32, #tpu.memory_space<vmem>>, vector<2x1xf32>
    %788 = vector.broadcast %787 : vector<2x1xf32> to vector<2x512xf32>
    %789 = vector.broadcast %0 : vector<1x512xf32> to vector<2x512xf32>
    %790 = arith.mulf %788, %789 : vector<2x512xf32>
    %791 = vector.broadcast %1 : vector<1x512xf32> to vector<2x512xf32>
    %792 = arith.addf %790, %791 : vector<2x512xf32>
    %c0_209 = arith.constant 0 : index
    %c0_210 = arith.constant 0 : index
    %793 = vector.load %arg3[%c0_209, %c0_210] : memref<128x512xf32, #tpu.memory_space<vmem>>, vector<128x512xf32>
    %cst_211 = arith.constant dense<0.000000e+00> : vector<2x512xf32>
    %794 = tpu.matmul %786, %793, %cst_211 {dimension_numbers = #tpu.dot_dimension_numbers<[1], [0], [0], [1], [0, 0, 1, 1], [], []>} : vector<2x128xf32>, vector<128x512xf32>, vector<2x512xf32> -> vector<2x512xf32>
    %795 = arith.addf %792, %794 : vector<2x512xf32>
    %796 = vector.extract_strided_slice %795 {offsets = [0, 0], sizes = [2, 384], strides = [1, 1]} : vector<2x512xf32> to vector<2x384xf32>
    %cst_212 = arith.constant 5.000000e-01 : f32
    %797 = vector.broadcast %cst_212 : f32 to vector<2x384xf32>
    %798 = arith.mulf %797, %796 : vector<2x384xf32>
    %799 = math.tanh %798 : vector<2x384xf32>
    %cst_213 = arith.constant 5.000000e-01 : f32
    %800 = vector.broadcast %cst_213 : f32 to vector<2x384xf32>
    %801 = arith.mulf %800, %799 : vector<2x384xf32>
    %cst_214 = arith.constant 5.000000e-01 : f32
    %802 = vector.broadcast %cst_214 : f32 to vector<2x384xf32>
    %803 = arith.addf %801, %802 : vector<2x384xf32>
    %804 = vector.extract_strided_slice %795 {offsets = [0, 384], sizes = [2, 128], strides = [1, 1]} : vector<2x512xf32> to vector<2x128xf32>
    %805 = math.tanh %804 : vector<2x128xf32>
    %806 = vector.extract_strided_slice %803 {offsets = [0, 0], sizes = [2, 128], strides = [1, 1]} : vector<2x384xf32> to vector<2x128xf32>
    %807 = vector.extract_strided_slice %803 {offsets = [0, 128], sizes = [2, 128], strides = [1, 1]} : vector<2x384xf32> to vector<2x128xf32>
    %808 = vector.extract_strided_slice %803 {offsets = [0, 256], sizes = [2, 128], strides = [1, 1]} : vector<2x384xf32> to vector<2x128xf32>
    %809 = arith.mulf %807, %784 : vector<2x128xf32>
    %810 = arith.mulf %806, %805 : vector<2x128xf32>
    %811 = arith.addf %809, %810 : vector<2x128xf32>
    %812 = math.tanh %811 : vector<2x128xf32>
    %813 = arith.mulf %808, %812 : vector<2x128xf32>
    %c0_215 = arith.constant 0 : index
    %c30 = arith.constant 30 : index
    %814 = vector.load %arg1[%c0_215, %c30] : memref<2x36xf32, #tpu.memory_space<vmem>>, vector<2x1xf32>
    %815 = vector.broadcast %814 : vector<2x1xf32> to vector<2x512xf32>
    %816 = vector.broadcast %0 : vector<1x512xf32> to vector<2x512xf32>
    %817 = arith.mulf %815, %816 : vector<2x512xf32>
    %818 = vector.broadcast %1 : vector<1x512xf32> to vector<2x512xf32>
    %819 = arith.addf %817, %818 : vector<2x512xf32>
    %c0_216 = arith.constant 0 : index
    %c0_217 = arith.constant 0 : index
    %820 = vector.load %arg3[%c0_216, %c0_217] : memref<128x512xf32, #tpu.memory_space<vmem>>, vector<128x512xf32>
    %cst_218 = arith.constant dense<0.000000e+00> : vector<2x512xf32>
    %821 = tpu.matmul %813, %820, %cst_218 {dimension_numbers = #tpu.dot_dimension_numbers<[1], [0], [0], [1], [0, 0, 1, 1], [], []>} : vector<2x128xf32>, vector<128x512xf32>, vector<2x512xf32> -> vector<2x512xf32>
    %822 = arith.addf %819, %821 : vector<2x512xf32>
    %823 = vector.extract_strided_slice %822 {offsets = [0, 0], sizes = [2, 384], strides = [1, 1]} : vector<2x512xf32> to vector<2x384xf32>
    %cst_219 = arith.constant 5.000000e-01 : f32
    %824 = vector.broadcast %cst_219 : f32 to vector<2x384xf32>
    %825 = arith.mulf %824, %823 : vector<2x384xf32>
    %826 = math.tanh %825 : vector<2x384xf32>
    %cst_220 = arith.constant 5.000000e-01 : f32
    %827 = vector.broadcast %cst_220 : f32 to vector<2x384xf32>
    %828 = arith.mulf %827, %826 : vector<2x384xf32>
    %cst_221 = arith.constant 5.000000e-01 : f32
    %829 = vector.broadcast %cst_221 : f32 to vector<2x384xf32>
    %830 = arith.addf %828, %829 : vector<2x384xf32>
    %831 = vector.extract_strided_slice %822 {offsets = [0, 384], sizes = [2, 128], strides = [1, 1]} : vector<2x512xf32> to vector<2x128xf32>
    %832 = math.tanh %831 : vector<2x128xf32>
    %833 = vector.extract_strided_slice %830 {offsets = [0, 0], sizes = [2, 128], strides = [1, 1]} : vector<2x384xf32> to vector<2x128xf32>
    %834 = vector.extract_strided_slice %830 {offsets = [0, 128], sizes = [2, 128], strides = [1, 1]} : vector<2x384xf32> to vector<2x128xf32>
    %835 = vector.extract_strided_slice %830 {offsets = [0, 256], sizes = [2, 128], strides = [1, 1]} : vector<2x384xf32> to vector<2x128xf32>
    %836 = arith.mulf %834, %811 : vector<2x128xf32>
    %837 = arith.mulf %833, %832 : vector<2x128xf32>
    %838 = arith.addf %836, %837 : vector<2x128xf32>
    %839 = math.tanh %838 : vector<2x128xf32>
    %840 = arith.mulf %835, %839 : vector<2x128xf32>
    %c0_222 = arith.constant 0 : index
    %c31 = arith.constant 31 : index
    %841 = vector.load %arg1[%c0_222, %c31] : memref<2x36xf32, #tpu.memory_space<vmem>>, vector<2x1xf32>
    %842 = vector.broadcast %841 : vector<2x1xf32> to vector<2x512xf32>
    %843 = vector.broadcast %0 : vector<1x512xf32> to vector<2x512xf32>
    %844 = arith.mulf %842, %843 : vector<2x512xf32>
    %845 = vector.broadcast %1 : vector<1x512xf32> to vector<2x512xf32>
    %846 = arith.addf %844, %845 : vector<2x512xf32>
    %c0_223 = arith.constant 0 : index
    %c0_224 = arith.constant 0 : index
    %847 = vector.load %arg3[%c0_223, %c0_224] : memref<128x512xf32, #tpu.memory_space<vmem>>, vector<128x512xf32>
    %cst_225 = arith.constant dense<0.000000e+00> : vector<2x512xf32>
    %848 = tpu.matmul %840, %847, %cst_225 {dimension_numbers = #tpu.dot_dimension_numbers<[1], [0], [0], [1], [0, 0, 1, 1], [], []>} : vector<2x128xf32>, vector<128x512xf32>, vector<2x512xf32> -> vector<2x512xf32>
    %849 = arith.addf %846, %848 : vector<2x512xf32>
    %850 = vector.extract_strided_slice %849 {offsets = [0, 0], sizes = [2, 384], strides = [1, 1]} : vector<2x512xf32> to vector<2x384xf32>
    %cst_226 = arith.constant 5.000000e-01 : f32
    %851 = vector.broadcast %cst_226 : f32 to vector<2x384xf32>
    %852 = arith.mulf %851, %850 : vector<2x384xf32>
    %853 = math.tanh %852 : vector<2x384xf32>
    %cst_227 = arith.constant 5.000000e-01 : f32
    %854 = vector.broadcast %cst_227 : f32 to vector<2x384xf32>
    %855 = arith.mulf %854, %853 : vector<2x384xf32>
    %cst_228 = arith.constant 5.000000e-01 : f32
    %856 = vector.broadcast %cst_228 : f32 to vector<2x384xf32>
    %857 = arith.addf %855, %856 : vector<2x384xf32>
    %858 = vector.extract_strided_slice %849 {offsets = [0, 384], sizes = [2, 128], strides = [1, 1]} : vector<2x512xf32> to vector<2x128xf32>
    %859 = math.tanh %858 : vector<2x128xf32>
    %860 = vector.extract_strided_slice %857 {offsets = [0, 0], sizes = [2, 128], strides = [1, 1]} : vector<2x384xf32> to vector<2x128xf32>
    %861 = vector.extract_strided_slice %857 {offsets = [0, 128], sizes = [2, 128], strides = [1, 1]} : vector<2x384xf32> to vector<2x128xf32>
    %862 = vector.extract_strided_slice %857 {offsets = [0, 256], sizes = [2, 128], strides = [1, 1]} : vector<2x384xf32> to vector<2x128xf32>
    %863 = arith.mulf %861, %838 : vector<2x128xf32>
    %864 = arith.mulf %860, %859 : vector<2x128xf32>
    %865 = arith.addf %863, %864 : vector<2x128xf32>
    %866 = math.tanh %865 : vector<2x128xf32>
    %867 = arith.mulf %862, %866 : vector<2x128xf32>
    %c0_229 = arith.constant 0 : index
    %c32 = arith.constant 32 : index
    %868 = vector.load %arg1[%c0_229, %c32] : memref<2x36xf32, #tpu.memory_space<vmem>>, vector<2x1xf32>
    %869 = vector.broadcast %868 : vector<2x1xf32> to vector<2x512xf32>
    %870 = vector.broadcast %0 : vector<1x512xf32> to vector<2x512xf32>
    %871 = arith.mulf %869, %870 : vector<2x512xf32>
    %872 = vector.broadcast %1 : vector<1x512xf32> to vector<2x512xf32>
    %873 = arith.addf %871, %872 : vector<2x512xf32>
    %c0_230 = arith.constant 0 : index
    %c0_231 = arith.constant 0 : index
    %874 = vector.load %arg3[%c0_230, %c0_231] : memref<128x512xf32, #tpu.memory_space<vmem>>, vector<128x512xf32>
    %cst_232 = arith.constant dense<0.000000e+00> : vector<2x512xf32>
    %875 = tpu.matmul %867, %874, %cst_232 {dimension_numbers = #tpu.dot_dimension_numbers<[1], [0], [0], [1], [0, 0, 1, 1], [], []>} : vector<2x128xf32>, vector<128x512xf32>, vector<2x512xf32> -> vector<2x512xf32>
    %876 = arith.addf %873, %875 : vector<2x512xf32>
    %877 = vector.extract_strided_slice %876 {offsets = [0, 0], sizes = [2, 384], strides = [1, 1]} : vector<2x512xf32> to vector<2x384xf32>
    %cst_233 = arith.constant 5.000000e-01 : f32
    %878 = vector.broadcast %cst_233 : f32 to vector<2x384xf32>
    %879 = arith.mulf %878, %877 : vector<2x384xf32>
    %880 = math.tanh %879 : vector<2x384xf32>
    %cst_234 = arith.constant 5.000000e-01 : f32
    %881 = vector.broadcast %cst_234 : f32 to vector<2x384xf32>
    %882 = arith.mulf %881, %880 : vector<2x384xf32>
    %cst_235 = arith.constant 5.000000e-01 : f32
    %883 = vector.broadcast %cst_235 : f32 to vector<2x384xf32>
    %884 = arith.addf %882, %883 : vector<2x384xf32>
    %885 = vector.extract_strided_slice %876 {offsets = [0, 384], sizes = [2, 128], strides = [1, 1]} : vector<2x512xf32> to vector<2x128xf32>
    %886 = math.tanh %885 : vector<2x128xf32>
    %887 = vector.extract_strided_slice %884 {offsets = [0, 0], sizes = [2, 128], strides = [1, 1]} : vector<2x384xf32> to vector<2x128xf32>
    %888 = vector.extract_strided_slice %884 {offsets = [0, 128], sizes = [2, 128], strides = [1, 1]} : vector<2x384xf32> to vector<2x128xf32>
    %889 = vector.extract_strided_slice %884 {offsets = [0, 256], sizes = [2, 128], strides = [1, 1]} : vector<2x384xf32> to vector<2x128xf32>
    %890 = arith.mulf %888, %865 : vector<2x128xf32>
    %891 = arith.mulf %887, %886 : vector<2x128xf32>
    %892 = arith.addf %890, %891 : vector<2x128xf32>
    %893 = math.tanh %892 : vector<2x128xf32>
    %894 = arith.mulf %889, %893 : vector<2x128xf32>
    %c0_236 = arith.constant 0 : index
    %c33 = arith.constant 33 : index
    %895 = vector.load %arg1[%c0_236, %c33] : memref<2x36xf32, #tpu.memory_space<vmem>>, vector<2x1xf32>
    %896 = vector.broadcast %895 : vector<2x1xf32> to vector<2x512xf32>
    %897 = vector.broadcast %0 : vector<1x512xf32> to vector<2x512xf32>
    %898 = arith.mulf %896, %897 : vector<2x512xf32>
    %899 = vector.broadcast %1 : vector<1x512xf32> to vector<2x512xf32>
    %900 = arith.addf %898, %899 : vector<2x512xf32>
    %c0_237 = arith.constant 0 : index
    %c0_238 = arith.constant 0 : index
    %901 = vector.load %arg3[%c0_237, %c0_238] : memref<128x512xf32, #tpu.memory_space<vmem>>, vector<128x512xf32>
    %cst_239 = arith.constant dense<0.000000e+00> : vector<2x512xf32>
    %902 = tpu.matmul %894, %901, %cst_239 {dimension_numbers = #tpu.dot_dimension_numbers<[1], [0], [0], [1], [0, 0, 1, 1], [], []>} : vector<2x128xf32>, vector<128x512xf32>, vector<2x512xf32> -> vector<2x512xf32>
    %903 = arith.addf %900, %902 : vector<2x512xf32>
    %904 = vector.extract_strided_slice %903 {offsets = [0, 0], sizes = [2, 384], strides = [1, 1]} : vector<2x512xf32> to vector<2x384xf32>
    %cst_240 = arith.constant 5.000000e-01 : f32
    %905 = vector.broadcast %cst_240 : f32 to vector<2x384xf32>
    %906 = arith.mulf %905, %904 : vector<2x384xf32>
    %907 = math.tanh %906 : vector<2x384xf32>
    %cst_241 = arith.constant 5.000000e-01 : f32
    %908 = vector.broadcast %cst_241 : f32 to vector<2x384xf32>
    %909 = arith.mulf %908, %907 : vector<2x384xf32>
    %cst_242 = arith.constant 5.000000e-01 : f32
    %910 = vector.broadcast %cst_242 : f32 to vector<2x384xf32>
    %911 = arith.addf %909, %910 : vector<2x384xf32>
    %912 = vector.extract_strided_slice %903 {offsets = [0, 384], sizes = [2, 128], strides = [1, 1]} : vector<2x512xf32> to vector<2x128xf32>
    %913 = math.tanh %912 : vector<2x128xf32>
    %914 = vector.extract_strided_slice %911 {offsets = [0, 0], sizes = [2, 128], strides = [1, 1]} : vector<2x384xf32> to vector<2x128xf32>
    %915 = vector.extract_strided_slice %911 {offsets = [0, 128], sizes = [2, 128], strides = [1, 1]} : vector<2x384xf32> to vector<2x128xf32>
    %916 = vector.extract_strided_slice %911 {offsets = [0, 256], sizes = [2, 128], strides = [1, 1]} : vector<2x384xf32> to vector<2x128xf32>
    %917 = arith.mulf %915, %892 : vector<2x128xf32>
    %918 = arith.mulf %914, %913 : vector<2x128xf32>
    %919 = arith.addf %917, %918 : vector<2x128xf32>
    %920 = math.tanh %919 : vector<2x128xf32>
    %921 = arith.mulf %916, %920 : vector<2x128xf32>
    %c0_243 = arith.constant 0 : index
    %c34 = arith.constant 34 : index
    %922 = vector.load %arg1[%c0_243, %c34] : memref<2x36xf32, #tpu.memory_space<vmem>>, vector<2x1xf32>
    %923 = vector.broadcast %922 : vector<2x1xf32> to vector<2x512xf32>
    %924 = vector.broadcast %0 : vector<1x512xf32> to vector<2x512xf32>
    %925 = arith.mulf %923, %924 : vector<2x512xf32>
    %926 = vector.broadcast %1 : vector<1x512xf32> to vector<2x512xf32>
    %927 = arith.addf %925, %926 : vector<2x512xf32>
    %c0_244 = arith.constant 0 : index
    %c0_245 = arith.constant 0 : index
    %928 = vector.load %arg3[%c0_244, %c0_245] : memref<128x512xf32, #tpu.memory_space<vmem>>, vector<128x512xf32>
    %cst_246 = arith.constant dense<0.000000e+00> : vector<2x512xf32>
    %929 = tpu.matmul %921, %928, %cst_246 {dimension_numbers = #tpu.dot_dimension_numbers<[1], [0], [0], [1], [0, 0, 1, 1], [], []>} : vector<2x128xf32>, vector<128x512xf32>, vector<2x512xf32> -> vector<2x512xf32>
    %930 = arith.addf %927, %929 : vector<2x512xf32>
    %931 = vector.extract_strided_slice %930 {offsets = [0, 0], sizes = [2, 384], strides = [1, 1]} : vector<2x512xf32> to vector<2x384xf32>
    %cst_247 = arith.constant 5.000000e-01 : f32
    %932 = vector.broadcast %cst_247 : f32 to vector<2x384xf32>
    %933 = arith.mulf %932, %931 : vector<2x384xf32>
    %934 = math.tanh %933 : vector<2x384xf32>
    %cst_248 = arith.constant 5.000000e-01 : f32
    %935 = vector.broadcast %cst_248 : f32 to vector<2x384xf32>
    %936 = arith.mulf %935, %934 : vector<2x384xf32>
    %cst_249 = arith.constant 5.000000e-01 : f32
    %937 = vector.broadcast %cst_249 : f32 to vector<2x384xf32>
    %938 = arith.addf %936, %937 : vector<2x384xf32>
    %939 = vector.extract_strided_slice %930 {offsets = [0, 384], sizes = [2, 128], strides = [1, 1]} : vector<2x512xf32> to vector<2x128xf32>
    %940 = math.tanh %939 : vector<2x128xf32>
    %941 = vector.extract_strided_slice %938 {offsets = [0, 0], sizes = [2, 128], strides = [1, 1]} : vector<2x384xf32> to vector<2x128xf32>
    %942 = vector.extract_strided_slice %938 {offsets = [0, 128], sizes = [2, 128], strides = [1, 1]} : vector<2x384xf32> to vector<2x128xf32>
    %943 = vector.extract_strided_slice %938 {offsets = [0, 256], sizes = [2, 128], strides = [1, 1]} : vector<2x384xf32> to vector<2x128xf32>
    %944 = arith.mulf %942, %919 : vector<2x128xf32>
    %945 = arith.mulf %941, %940 : vector<2x128xf32>
    %946 = arith.addf %944, %945 : vector<2x128xf32>
    %947 = math.tanh %946 : vector<2x128xf32>
    %948 = arith.mulf %943, %947 : vector<2x128xf32>
    %c0_250 = arith.constant 0 : index
    %c35 = arith.constant 35 : index
    %949 = vector.load %arg1[%c0_250, %c35] : memref<2x36xf32, #tpu.memory_space<vmem>>, vector<2x1xf32>
    %950 = vector.broadcast %949 : vector<2x1xf32> to vector<2x512xf32>
    %951 = vector.broadcast %0 : vector<1x512xf32> to vector<2x512xf32>
    %952 = arith.mulf %950, %951 : vector<2x512xf32>
    %953 = vector.broadcast %1 : vector<1x512xf32> to vector<2x512xf32>
    %954 = arith.addf %952, %953 : vector<2x512xf32>
    %c0_251 = arith.constant 0 : index
    %c0_252 = arith.constant 0 : index
    %955 = vector.load %arg3[%c0_251, %c0_252] : memref<128x512xf32, #tpu.memory_space<vmem>>, vector<128x512xf32>
    %cst_253 = arith.constant dense<0.000000e+00> : vector<2x512xf32>
    %956 = tpu.matmul %948, %955, %cst_253 {dimension_numbers = #tpu.dot_dimension_numbers<[1], [0], [0], [1], [0, 0, 1, 1], [], []>} : vector<2x128xf32>, vector<128x512xf32>, vector<2x512xf32> -> vector<2x512xf32>
    %957 = arith.addf %954, %956 : vector<2x512xf32>
    %958 = vector.extract_strided_slice %957 {offsets = [0, 0], sizes = [2, 384], strides = [1, 1]} : vector<2x512xf32> to vector<2x384xf32>
    %cst_254 = arith.constant 5.000000e-01 : f32
    %959 = vector.broadcast %cst_254 : f32 to vector<2x384xf32>
    %960 = arith.mulf %959, %958 : vector<2x384xf32>
    %961 = math.tanh %960 : vector<2x384xf32>
    %cst_255 = arith.constant 5.000000e-01 : f32
    %962 = vector.broadcast %cst_255 : f32 to vector<2x384xf32>
    %963 = arith.mulf %962, %961 : vector<2x384xf32>
    %cst_256 = arith.constant 5.000000e-01 : f32
    %964 = vector.broadcast %cst_256 : f32 to vector<2x384xf32>
    %965 = arith.addf %963, %964 : vector<2x384xf32>
    %966 = vector.extract_strided_slice %957 {offsets = [0, 384], sizes = [2, 128], strides = [1, 1]} : vector<2x512xf32> to vector<2x128xf32>
    %967 = math.tanh %966 : vector<2x128xf32>
    %968 = vector.extract_strided_slice %965 {offsets = [0, 0], sizes = [2, 128], strides = [1, 1]} : vector<2x384xf32> to vector<2x128xf32>
    %969 = vector.extract_strided_slice %965 {offsets = [0, 128], sizes = [2, 128], strides = [1, 1]} : vector<2x384xf32> to vector<2x128xf32>
    %970 = vector.extract_strided_slice %965 {offsets = [0, 256], sizes = [2, 128], strides = [1, 1]} : vector<2x384xf32> to vector<2x128xf32>
    %971 = arith.mulf %969, %946 : vector<2x128xf32>
    %972 = arith.mulf %968, %967 : vector<2x128xf32>
    %973 = arith.addf %971, %972 : vector<2x128xf32>
    %974 = math.tanh %973 : vector<2x128xf32>
    %975 = arith.mulf %970, %974 : vector<2x128xf32>
    %c0_257 = arith.constant 0 : index
    %c0_258 = arith.constant 0 : index
    %976 = vector.load %arg5[%c0_257, %c0_258] : memref<128x128xf32, #tpu.memory_space<vmem>>, vector<128x128xf32>
    %cst_259 = arith.constant dense<0.000000e+00> : vector<2x128xf32>
    %977 = tpu.matmul %975, %976, %cst_259 {dimension_numbers = #tpu.dot_dimension_numbers<[1], [0], [0], [1], [0, 0, 1, 1], [], []>} : vector<2x128xf32>, vector<128x128xf32>, vector<2x128xf32> -> vector<2x128xf32>
    %c0_260 = arith.constant 0 : index
    %c0_261 = arith.constant 0 : index
    %978 = vector.load %arg6[%c0_260, %c0_261] : memref<1x128xf32, #tpu.memory_space<vmem>>, vector<1x128xf32>
    %979 = vector.broadcast %978 : vector<1x128xf32> to vector<2x128xf32>
    %980 = arith.addf %977, %979 : vector<2x128xf32>
    %cst_262 = arith.constant 0.000000e+00 : f32
    %981 = vector.broadcast %cst_262 : f32 to vector<2x128xf32>
    %982 = arith.maximumf %980, %981 : vector<2x128xf32>
    %c0_263 = arith.constant 0 : index
    %c0_264 = arith.constant 0 : index
    %983 = vector.load %arg7[%c0_263, %c0_264] : memref<1x128xf32, #tpu.memory_space<vmem>>, vector<1x128xf32>
    %984 = vector.broadcast %983 : vector<1x128xf32> to vector<2x128xf32>
    %985 = arith.mulf %982, %984 : vector<2x128xf32>
    %cst_265 = arith.constant dense<0.000000e+00> : vector<2xf32>
    %986 = vector.multi_reduction <add>, %985, %cst_265 [1] : vector<2x128xf32> to vector<2xf32>
    %987 = vector.shape_cast %986 : vector<2xf32> to vector<2x1xf32>
    %c0_266 = arith.constant 0 : index
    %c0_267 = arith.constant 0 : index
    %988 = vector.load %arg8[%c0_266, %c0_267] : memref<1x1xf32, #tpu.memory_space<vmem>>, vector<1x1xf32>
    %989 = vector.broadcast %988 : vector<1x1xf32> to vector<2x1xf32>
    %990 = arith.addf %987, %989 : vector<2x1xf32>
    %c0_268 = arith.constant 0 : index
    %c0_269 = arith.constant 0 : index
    %991 = vector.load %arg9[%c0_268, %c0_269] : memref<2x1xf32, #tpu.memory_space<vmem>>, vector<2x1xf32>
    tpu.vector_store %arg9[%c0_268, %c0_269], %990 {strides = array<i32>} : memref<2x1xf32, #tpu.memory_space<vmem>>, vector<2x1xf32>,
    return
  }
  func.func @transform_0(%arg0: i32) -> (i32, i32) {
    %c0_i32 = arith.constant 0 : i32
    %c0_i32_0 = arith.constant 0 : i32
    return %arg0, %c0_i32 : i32, i32
  }
  func.func @transform_1(%arg0: i32) -> (i32, i32) {
    %c0_i32 = arith.constant 0 : i32
    %c0_i32_0 = arith.constant 0 : i32
    %c0_i32_1 = arith.constant 0 : i32
    return %c0_i32, %c0_i32_0 : i32, i32
  }
  func.func @transform_2(%arg0: i32) -> (i32, i32) {
    %c0_i32 = arith.constant 0 : i32
    %c0_i32_0 = arith.constant 0 : i32
    %c0_i32_1 = arith.constant 0 : i32
    return %c0_i32, %c0_i32_0 : i32, i32
  }
  func.func @transform_3(%arg0: i32) -> (i32, i32) {
    %c0_i32 = arith.constant 0 : i32
    %c0_i32_0 = arith.constant 0 : i32
    %c0_i32_1 = arith.constant 0 : i32
    return %c0_i32, %c0_i32_0 : i32, i32
  }
  func.func @transform_4(%arg0: i32) -> (i32, i32) {
    %c0_i32 = arith.constant 0 : i32
    %c0_i32_0 = arith.constant 0 : i32
    %c0_i32_1 = arith.constant 0 : i32
    return %c0_i32, %c0_i32_0 : i32, i32
  }
  func.func @transform_5(%arg0: i32) -> (i32, i32) {
    %c0_i32 = arith.constant 0 : i32
    %c0_i32_0 = arith.constant 0 : i32
    %c0_i32_1 = arith.constant 0 : i32
    return %c0_i32, %c0_i32_0 : i32, i32
  }
  func.func @transform_6(%arg0: i32) -> (i32, i32) {
    %c0_i32 = arith.constant 0 : i32
    %c0_i32_0 = arith.constant 0 : i32
    %c0_i32_1 = arith.constant 0 : i32
    return %c0_i32, %c0_i32_0 : i32, i32
  }
  func.func @transform_7(%arg0: i32) -> (i32, i32) {
    %c0_i32 = arith.constant 0 : i32
    %c0_i32_0 = arith.constant 0 : i32
    %c0_i32_1 = arith.constant 0 : i32
    return %c0_i32, %c0_i32_0 : i32, i32
  }
  func.func @transform_8(%arg0: i32) -> (i32, i32) {
    %c0_i32 = arith.constant 0 : i32
    %c0_i32_0 = arith.constant 0 : i32
    return %arg0, %c0_i32 : i32, i32
  }
}

</mosaic_0001>

<bundles_post_ra>
// kernel: tpu_custom_call.1
= control target key start
LH: loop header
LB: loop body
LE: loop exit
PB: predicated region body
PF: predicated region fallthrough
CT: control target
= control target key end

     0   :  { %s11434_s0 = inlined_call_operand.vmem [shape: f32[2,36], index: 0, kind: input, shape index: {}]   ;;  %s11435_s1 = inlined_call_operand.vmem [shape: f32[1,512], index: 1, kind: input, shape index: {}]   ;;  %s11436_s2 = inlined_call_operand.hbm [shape: f32[128,512], index: 2, kind: input, shape index: {}]   ;;  %s11437_s3 = inlined_call_operand.vmem [shape: f32[1,512], index: 3, kind: input, shape index: {}]   ;;  %s11438_s4 = inlined_call_operand.hbm [shape: f32[128,128], index: 4, kind: input, shape index: {}]   ;;  %s11439_s5 = inlined_call_operand.vmem [shape: f32[1,128], index: 5, kind: input, shape index: {}]   ;;  %s11440_s6 = inlined_call_operand.vmem [shape: f32[1,128], index: 6, kind: input, shape index: {}]   ;;  %s11441_s7 = inlined_call_operand.<no memory space> [shape: f32[1,1], index: 7, kind: input, shape index: {}]   ;;  %s11442_s8 = inlined_call_operand.vmem [shape: f32[2,1], index: 8, kind: output, shape index: {}]  }
   0x1   :  { %v13_v0 = vstv %s11441_s7 }
   0x2   :  { %14 = vst [vmem:[#allocation2] sm:$0x1] %v13_v0 }
   0x3   :  { %15 = vsyncpa [#allocation4], 0 }
   0x4   :  { %16 = vsyncpa [#allocation6], 0  ;;  %s9504_s29 = smov [#allocation3]   ;;  %s9456_s11 = scalar_lea.hbm %s11436_s2, 8192 }
   0x5   :  { %s26_s30 = sshll.u32 %s9504_s29, 4  ;;  %p9457_p0 = scmp.ne.s32.totalorder %s11436_s2, %s9456_s11  ;;  %s27_s30 = int_to_ptr.vmem [resolvable:$true] %s26_s30 }
   0x6   :  { %p9460_p1 = scmp.lt.u32.totalorder %s9456_s11, %s11436_s2 }
   0x8   :  { %p9462_p2 = pnand %p9460_p1, %p9457_p0 }
   0xa   :  { %9465 = shalt.err (!%p9462_p2)
}
   0xb   :  { %s9466_s7 = scalar_lea.vmem %s27_s30, 8192  ;;  %p9471_p4 = scmp.lt.s32.totalorder %s27_s30, %s27_s30 }
   0xc   :  { %p9467_p3 = scmp.ne.s32.totalorder %s27_s30, %s9466_s7  ;;  %p9472_p5 = scmp.lt.s32.totalorder %s9466_s7, %s9466_s7 }
   0xe   :  { %p9473_p6 = por %p9472_p5, %p9471_p4 }
  0x10   :  { %p9474_p7 = pnand %p9473_p6, %p9467_p3 }
  0x12   :  { %9477 = shalt.err (!%p9474_p7)
}
  0x13   :  { %s9505_s16 = smov 512   ;;  %s9506_s17 = smov 32  }
  0x14   :  { %32 = dma.hbm_to_vmem [thread:$0]  %s11436_s2, 8192, %s27_s30, [#allocation4], %s9505_s16, %s9505_s16, %s9506_s17  }
  0x15   :  { %s9507_s20 = smov [#allocation5]   ;;  %s9478_s24 = scalar_lea.hbm %s11438_s4, 2048 }
  0x16   :  { %s40_s21 = sshll.u32 %s9507_s20, 4  ;;  %p9479_p8 = scmp.ne.s32.totalorder %s11438_s4, %s9478_s24  ;;  %s41_s21 = int_to_ptr.vmem [resolvable:$true] %s40_s21 }
  0x17   :  { %p9482_p9 = scmp.lt.u32.totalorder %s9478_s24, %s11438_s4 }
  0x19   :  { %p9484_p10 = pnand %p9482_p9, %p9479_p8 }
  0x1b   :  { %9487 = shalt.err (!%p9484_p10)
}
  0x1c   :  { %s9488_s29 = scalar_lea.vmem %s41_s21, 2048  ;;  %p9493_p12 = scmp.lt.s32.totalorder %s41_s21, %s41_s21 }
  0x1d   :  { %p9489_p11 = scmp.ne.s32.totalorder %s41_s21, %s9488_s29  ;;  %p9494_p13 = scmp.lt.s32.totalorder %s9488_s29, %s9488_s29 }
  0x1f   :  { %p9495_p0 = por %p9494_p13, %p9493_p12 }
  0x21   :  { %p9496_p1 = pnand %p9495_p0, %p9489_p11 }
  0x23   :  { %9499 = shalt.err (!%p9496_p1)
}
  0x24   :  { %s9508_s2 = smov 128   ;;  %s9509_s30 = smov 8  }
  0x25   :  { %46 = dma.hbm_to_vmem [thread:$0]  %s11438_s4, 2048, %s41_s21, [#allocation6], %s9508_s2, %s9508_s2, %s9509_s30  }
  0x26   :  { %9500 = dma.done.wait [#allocation4], 8192  }
  0x27   :  { %9501 = vsyncadd [#allocation4], 4294959104 }
  0x28   :  { %9502 = dma.done.wait [#allocation6], 2048  }
  0x29   :  { %9503 = vsyncadd [#allocation6], 4294965248  ;;  %v11443_v1 = vmov 0.0   ;;  %v9511_v2 = vmov 0   ;;  %v118_v3 = vld [vmem:[#allocation3 + $0x8] sm:$0xff]  ;;  %v120_v5 = vld [vmem:[#allocation3 + $0x18] sm:$0xff] }
  0x2a   :  { %245 = vmatprep.mubr.f32.mxu0 %v11443_v1  ;;  %316 = vmatprep.mubr.f32.mxu1 %v11443_v1  ;;  %v122_v4 = vld [vmem:[#allocation3 + $0x28] sm:$0xff]  ;;  %v124_v7 = vld [vmem:[#allocation3 + $0x38] sm:$0xff]  ;;  %v117_v8 = vld [vmem:[#allocation3] sm:$0xff]  ;;  %vm9548_vm0 = vmmov 0   ;;  %vm6607_vm1 = vcmask 1041408   ;;  %vm6619_vm2 = vcmask 1024  }
  0x2b   :  { %9055 = vset.pattern.permute.xlu0 %v9511_v2  ;;  %v9623_v6 = vpack.c.bf16 %v122_v4, %v118_v3  ;;  %v121_v9 = vld [vmem:[#allocation3 + $0x20] sm:$0xff]  ;;  %v9625_v10 = vpack.c.bf16 %v124_v7, %v120_v5  ;;  %v119_v12 = vld [vmem:[#allocation3 + $0x10] sm:$0xff]  ;;  %v126_v14 = vld [vmem:[#allocation3 + $0x48] sm:$0xff] }
  0x2c   :  { %v9627_v11 = vpack.c.bf16 %v121_v9, %v117_v8  ;;  %v123_v13 = vld [vmem:[#allocation3 + $0x30] sm:$0xff]  ;;  %v130_v16 = vld [vmem:[#allocation3 + $0x68] sm:$0xff]  ;;  %v128_v17 = vld [vmem:[#allocation3 + $0x58] sm:$0xff] }
  0x2d   :  { %6683 = vmatprep.subr.bf16.mxu0 %v9623_v6  ;;  %v9630_v15 = vpack.c.bf16 %v123_v13, %v119_v12  ;;  %v132_v18 = vld [vmem:[#allocation3 + $0x78] sm:$0xff]  ;;  %6715 = vmatprep.subr.bf16.mxu1 %v9625_v10  ;;  %v9634_v19 = vpack.c.bf16 %v130_v16, %v126_v14  ;;  %v125_v21 = vld [vmem:[#allocation3 + $0x40] sm:$0xff]  ;;  %v127_v23 = vld [vmem:[#allocation3 + $0x50] sm:$0xff] }
  0x2e   :  { %6685 = vmatpush1.bf16.msra.mxu0 %v9627_v11  ;;  %v9636_v20 = vpack.c.bf16 %v132_v18, %v128_v17  ;;  %v129_v22 = vld [vmem:[#allocation3 + $0x60] sm:$0xff]  ;;  %v131_v25 = vld [vmem:[#allocation3 + $0x70] sm:$0xff]  ;;  %v134_v26 = vld [vmem:[#allocation3 + $0x88] sm:$0xff] }
  0x2f   :  { %6717 = vmatpush1.bf16.msra.mxu1 %v9630_v15  ;;  %v9639_v24 = vpack.c.bf16 %v129_v22, %v125_v21  ;;  %v138_v27 = vld [vmem:[#allocation3 + $0xa8] sm:$0xff]  ;;  %6687 = vmatprep.subr.bf16.mxu0 %v9634_v19  ;;  %v9643_v28 = vpack.c.bf16 %v131_v25, %v127_v23  ;;  %v136_v30 = vld [vmem:[#allocation3 + $0x98] sm:$0xff]  ;;  %v133_v32 = vld [vmem:[#allocation3 + $0x80] sm:$0xff] }
  0x30   :  { %6719 = vmatprep.subr.bf16.mxu1 %v9636_v20  ;;  %v9645_v29 = vpack.c.bf16 %v138_v27, %v134_v26  ;;  %v140_v31 = vld [vmem:[#allocation3 + $0xb8] sm:$0xff]  ;;  %v137_v34 = vld [vmem:[#allocation3 + $0xa0] sm:$0xff]  ;;  %v135_v35 = vld [vmem:[#allocation3 + $0x90] sm:$0xff] }
  0x31   :  { %v9647_v33 = vpack.c.bf16 %v140_v31, %v136_v30  ;;  %v139_v36 = vld [vmem:[#allocation3 + $0xb0] sm:$0xff]  ;;  %v9650_v37 = vpack.c.bf16 %v137_v34, %v133_v32  ;;  %v142_v38 = vld [vmem:[#allocation3 + $0xc8] sm:$0xff]  ;;  %v144_v40 = vld [vmem:[#allocation3 + $0xd8] sm:$0xff] }
  0x32   :  { %6689 = vmatpush1.bf16.msra.mxu0 %v9639_v24  ;;  %v146_v39 = vld [vmem:[#allocation3 + $0xe8] sm:$0xff]  ;;  %v9654_v41 = vpack.c.bf16 %v139_v36, %v135_v35  ;;  %v148_v43 = vld [vmem:[#allocation3 + $0xf8] sm:$0xff]  ;;  %v141_v44 = vld [vmem:[#allocation3 + $0xc0] sm:$0xff] }
  0x33   :  { %6721 = vmatpush1.bf16.msra.mxu1 %v9643_v28  ;;  %6691 = vmatprep.subr.bf16.mxu0 %v9645_v29  ;;  %v9656_v42 = vpack.c.bf16 %v146_v39, %v142_v38  ;;  %v145_v45 = vld [vmem:[#allocation3 + $0xe0] sm:$0xff]  ;;  %v9659_v46 = vpack.c.bf16 %v148_v43, %v144_v40  ;;  %v143_v47 = vld [vmem:[#allocation3 + $0xd0] sm:$0xff]  ;;  %v150_v49 = vld [vmem:[#allocation3 + $0x108] sm:$0xff] }
  0x34   :  { %6723 = vmatprep.subr.bf16.mxu1 %v9647_v33  ;;  %v147_v48 = vld [vmem:[#allocation3 + $0xf0] sm:$0xff]  ;;  %v154_v50 = vld [vmem:[#allocation3 + $0x128] sm:$0xff]  ;;  %v152_v51 = vld [vmem:[#allocation3 + $0x118] sm:$0xff]  ;;  %v9662_v53 = vpack.c.bf16 %v145_v45, %v141_v44 }
  0x35   :  { %v156_v52 = vld [vmem:[#allocation3 + $0x138] sm:$0xff]  ;;  %v9666_v54 = vpack.c.bf16 %v147_v48, %v143_v47  ;;  %v9668_v55 = vpack.c.bf16 %v154_v50, %v150_v49  ;;  %v149_v56 = vld [vmem:[#allocation3 + $0x100] sm:$0xff]  ;;  %v151_v58 = vld [vmem:[#allocation3 + $0x110] sm:$0xff] }
  0x36   :  { %6693 = vmatpush1.bf16.msra.mxu0 %v9650_v37  ;;  %v153_v57 = vld [vmem:[#allocation3 + $0x120] sm:$0xff]  ;;  %v9671_v59 = vpack.c.bf16 %v156_v52, %v152_v51  ;;  %v155_v60 = vld [vmem:[#allocation3 + $0x130] sm:$0xff]  ;;  %v158_v61 = vld [vmem:[#allocation3 + $0x148] sm:$0xff]  ;;  %v9512_v51 = vmov 1   ;;  %v68_v52 = vlaneseq }
  0x37   :  { %6725 = vmatpush1.bf16.msra.mxu1 %v9654_v41  ;;  %6695 = vmatprep.subr.bf16.mxu0 %v9656_v42  ;;  %v162_v62 = vld [vmem:[#allocation3 + $0x168] sm:$0xff]  ;;  %v160_v63 = vld [vmem:[#allocation3 + $0x158] sm:$0xff]  ;;  %v9674_v2 = vpack.c.bf16 %v153_v57, %v149_v56  ;;  %v9678_v3 = vpack.c.bf16 %v155_v60, %v151_v58  ;;  %v157_v5 = vld [vmem:[#allocation3 + $0x140] sm:$0xff] }
  0x38   :  { %6727 = vmatprep.subr.bf16.mxu1 %v9659_v46  ;;  %v164_v0 = vld [vmem:[#allocation3 + $0x178] sm:$0xff]  ;;  %v9680_v4 = vpack.c.bf16 %v162_v62, %v158_v61  ;;  %v161_v7 = vld [vmem:[#allocation3 + $0x160] sm:$0xff]  ;;  %v159_v8 = vld [vmem:[#allocation3 + $0x150] sm:$0xff]  ;;  %v69_v56 = vshrl.u32 %v68_v52, 7 }
  0x39   :  { %v9683_v9 = vpack.c.bf16 %v164_v0, %v160_v63  ;;  %v163_v12 = vld [vmem:[#allocation3 + $0x170] sm:$0xff]  ;;  %v166_v13 = vld [vmem:[#allocation3 + $0x188] sm:$0xff]  ;;  %v168_v16 = vld [vmem:[#allocation3 + $0x198] sm:$0xff]  ;;  %v9686_v18 = vpack.c.bf16 %v161_v7, %v157_v5 }
  0x3a   :  { %6697 = vmatpush1.bf16.msra.mxu0 %v9662_v53  ;;  %v170_v14 = vld [vmem:[#allocation3 + $0x1a8] sm:$0xff]  ;;  %v172_v17 = vld [vmem:[#allocation3 + $0x1b8] sm:$0xff]  ;;  %v165_v21 = vld [vmem:[#allocation3 + $0x180] sm:$0xff]  ;;  %v9690_v22 = vpack.c.bf16 %v163_v12, %v159_v8  ;;  %v70_v57 = vsub.s32 0, %v69_v56  ;;  %v74_v60 = vsub.s32 1, %v69_v56  ;;  %v82_v62 = vsub.s32 3, %v69_v56 }
  0x3b   :  { %6729 = vmatpush1.bf16.msra.mxu1 %v9666_v54  ;;  %6699 = vmatprep.subr.bf16.mxu0 %v9668_v55  ;;  %v9692_v23 = vpack.c.bf16 %v170_v14, %v166_v13  ;;  %v169_v25 = vld [vmem:[#allocation3 + $0x1a0] sm:$0xff]  ;;  %v167_v26 = vld [vmem:[#allocation3 + $0x190] sm:$0xff]  ;;  %v9700_v30 = vpack.c.bf16 %v172_v17, %v168_v16  ;;  %v174_v32 = vld [vmem:[#allocation3 + $0x1c8] sm:$0xff]  ;;  %v78_v13 = vsub.s32 2, %v69_v56 }
  0x3c   :  { %6731 = vmatprep.subr.bf16.mxu1 %v9671_v59  ;;  %v9697_v27 = vld [vmem:[%s11434_s0] sm:$0x3]  ;;  %v171_v31 = vld [vmem:[#allocation3 + $0x1b0] sm:$0xff]  ;;  %v178_v34 = vld [vmem:[#allocation3 + $0x1e8] sm:$0xff]  ;;  %v9704_v38 = vpack.c.bf16 %v169_v25, %v165_v21 }
  0x3d   :  { %64 = vperm.xlu0 %9055, %v9697_v27   ;;  %v176_v35 = vld [vmem:[#allocation3 + $0x1d8] sm:$0xff]  ;;  %v9708_v39 = vpack.c.bf16 %v171_v31, %v167_v26  ;;  %v9710_v40 = vpack.c.bf16 %v178_v34, %v174_v32  ;;  %v173_v43 = vld [vmem:[#allocation3 + $0x1c0] sm:$0xff]  ;;  %v175_v47 = vld [vmem:[#allocation3 + $0x1d0] sm:$0xff] }
  0x3e   :  { %6701 = vmatpush1.bf16.msra.mxu0 %v9674_v2  ;;  %v180_v36 = vld [vmem:[#allocation3 + $0x1f8] sm:$0xff]  ;;  %v177_v44 = vld [vmem:[#allocation3 + $0x1e0] sm:$0xff]  ;;  %v179_v48 = vld [vmem:[#allocation3 + $0x1f0] sm:$0xff] }
  0x3f   :  { %6733 = vmatpush1.bf16.msra.mxu1 %v9678_v3  ;;  %6703 = vmatprep.subr.bf16.mxu0 %v9680_v4  ;;  %v9713_v45 = vpack.c.bf16 %v180_v36, %v176_v35  ;;  %v9716_v49 = vpack.c.bf16 %v177_v44, %v173_v43  ;;  %v9720_v50 = vpack.c.bf16 %v179_v48, %v175_v47  ;;  %v59_v58 = vld [vmem:[%s11435_s1] sm:$0xf] }
  0x40   :  { %6735 = vmatprep.subr.bf16.mxu1 %v9683_v9  ;;  %v9767_v61 = vrot.slane %v59_v58, %v70_v57  ;;  %v60_v0 = vld [vmem:[%s11437_s3] sm:$0xf]  ;;  %v9772_v5 = vrot.slane %v59_v58, %v74_v60  ;;  %v9777_v12 = vrot.slane %v59_v58, %v82_v62  ;;  %v9786_v26 = vrot.slane %v59_v58, %v78_v13 }
  0x41   :  { %9056 = vset.pattern.permute.xlu0 %v9512_v51  ;;  %v9775_v8 = vrot.slane %v60_v0, %v70_v57  ;;  %v9780_v16 = vrot.slane %v60_v0, %v74_v60  ;;  %v9784_v25 = vrot.slane %v60_v0, %v82_v62  ;;  %v9791_v47 = vrot.slane %v60_v0, %v78_v13 }
  0x42   :  { %6705 = vmatpush1.bf16.msra.mxu0 %v9686_v18  ;;  %346 = vperm.xlu0 %9056, %v9697_v27  }
  0x43   :  { %6737 = vmatpush1.bf16.msra.mxu1 %v9690_v22  ;;  %6707 = vmatprep.subr.bf16.mxu0 %v9692_v23  ;;  %11451 = vst [vmem:[#allocation9_spill] sm:$0xff] %v9784_v25 }
  0x44   :  { %6739 = vmatprep.subr.bf16.mxu1 %v9700_v30 }
  0x46   :  { %6709 = vmatpush1.bf16.msra.mxu0 %v9704_v38 }
  0x47   :  { %6741 = vmatpush1.bf16.msra.mxu1 %v9708_v39  ;;  %6711 = vmatprep.subr.bf16.mxu0 %v9710_v40 }
  0x48   :  { %6743 = vmatprep.subr.bf16.mxu1 %v9713_v45 }
  0x4a   :  { %6713 = vmatpush1.bf16.msra.mxu0 %v9716_v49 }
  0x4b   :  { %6745 = vmatpush1.bf16.msra.mxu1 %v9720_v50  ;;  %6747 = vmatprep.subr.bf16.mxu0 %v9623_v6 }
  0x4c   :  { %6779 = vmatprep.subr.bf16.mxu1 %v9625_v10 }
  0x4d   :  { %246 = vmatmul.mubr.f32.vlgmr.msra.gmra.mrb[0].mxu0 %v11443_v1 }
  0x4e   :  { %317 = vmatmul.mubr.f32.vlgmr.msra.gmra.mrb[0].mxu1 %v11443_v1  ;;  %6749 = vmatpush1.bf16.msra.mxu0 %v9627_v11 }
  0x4f   :  { %6781 = vmatpush1.bf16.msra.mxu1 %v9630_v15  ;;  %6751 = vmatprep.subr.bf16.mxu0 %v9634_v19 }
  0x50   :  { %6783 = vmatprep.subr.bf16.mxu1 %v9636_v20  ;;  %421 = vmatprep.mubr.f32.mxu0 %v11443_v1 }
  0x51   :  { %492 = vmatprep.mubr.f32.mxu1 %v11443_v1 }
  0x52   :  { %6753 = vmatpush1.bf16.msra.mxu0 %v9639_v24 }
  0x53   :  { %6785 = vmatpush1.bf16.msra.mxu1 %v9643_v28  ;;  %6755 = vmatprep.subr.bf16.mxu0 %v9645_v29 }
  0x54   :  { %6787 = vmatprep.subr.bf16.mxu1 %v9647_v33 }
  0x56   :  { %6757 = vmatpush1.bf16.msra.mxu0 %v9650_v37 }
  0x57   :  { %6789 = vmatpush1.bf16.msra.mxu1 %v9654_v41  ;;  %6759 = vmatprep.subr.bf16.mxu0 %v9656_v42 }
  0x58   :  { %6791 = vmatprep.subr.bf16.mxu1 %v9659_v46 }
  0x5a   :  { %6761 = vmatpush1.bf16.msra.mxu0 %v9662_v53 }
  0x5b   :  { %6793 = vmatpush1.bf16.msra.mxu1 %v9666_v54  ;;  %6763 = vmatprep.subr.bf16.mxu0 %v9668_v55 }
  0x5c   :  { %6795 = vmatprep.subr.bf16.mxu1 %v9671_v59 }
  0x5e   :  { %6765 = vmatpush1.bf16.msra.mxu0 %v9674_v2 }
  0x5f   :  { %6797 = vmatpush1.bf16.msra.mxu1 %v9678_v3  ;;  %6767 = vmatprep.subr.bf16.mxu0 %v9680_v4 }
  0x60   :  { %6799 = vmatprep.subr.bf16.mxu1 %v9683_v9 }
  0x62   :  { %6769 = vmatpush1.bf16.msra.mxu0 %v9686_v18 }
  0x63   :  { %6801 = vmatpush1.bf16.msra.mxu1 %v9690_v22  ;;  %6771 = vmatprep.subr.bf16.mxu0 %v9692_v23 }
  0x64   :  { %6803 = vmatprep.subr.bf16.mxu1 %v9700_v30 }
  0x66   :  { %6773 = vmatpush1.bf16.msra.mxu0 %v9704_v38 }
  0x67   :  { %6805 = vmatpush1.bf16.msra.mxu1 %v9708_v39  ;;  %6775 = vmatprep.subr.bf16.mxu0 %v9710_v40 }
  0x68   :  { %6807 = vmatprep.subr.bf16.mxu1 %v9713_v45 }
  0x6a   :  { %6777 = vmatpush1.bf16.msra.mxu0 %v9716_v49 }
  0x6b   :  { %6809 = vmatpush1.bf16.msra.mxu1 %v9720_v50  ;;  %6811 = vmatprep.subr.bf16.mxu0 %v9623_v6 }
  0x6c   :  { %6843 = vmatprep.subr.bf16.mxu1 %v9625_v10 }
  0xbc   :  { %v65_v63 = vpop.permute.xlu0 %64 }
  0xbd   :  { %v88_v7 = vmul.f32 %v9767_v61, %v65_v63  ;;  %v89_v14 = vmul.f32 %v9772_v5, %v65_v63  ;;  %v91_v21 = vmul.f32 %v9777_v12, %v65_v63  ;;  %v90_v44 = vmul.f32 %v9786_v26, %v65_v63 }
  0xbf   :  { %v113_v17 = vadd.f32 %v9775_v8, %v88_v7  ;;  %v114_v31 = vadd.f32 %v9780_v16, %v89_v14  ;;  %v116_v43 = vadd.f32 %v9784_v25, %v91_v21  ;;  %v115_v58 = vadd.f32 %v9791_v47, %v90_v44 }
 0x120   :  { %v247_v32 = vpop.f32.mrb[0].mxu0 }
 0x121   :  { %v323_v34 = vadd.f32 %v247_v32, %v113_v17  ;;  %v318_v35 = vpop.f32.mrb[0].mxu1  ;;  %v249_v36 = vpop.f32.mrb[1].mxu0 }
 0x122   :  { %v324_v48 = vadd.f32 %v249_v36, %v114_v31  ;;  %v320_v51 = vpop.f32.mrb[1].mxu1  ;;  %v325_v60 = vadd.f32 %v318_v35, %v115_v58 }
 0x123   :  { %v327_v52 = vmul.f32 0.5, %v323_v34  ;;  %v326_v57 = vadd.f32 %v320_v51, %v116_v43  ;;  %v9513_v51 = vmov 2  }
 0x124   :  { %v328_v56 = vmul.f32 0.5, %v324_v48  ;;  %v329_v62 = vmul.f32 0.5, %v325_v60  ;;  %9057 = vset.pattern.permute.xlu1 %v9513_v51 }
 0x125   :  { %9091 = vtanh.f32 %v327_v52  ;;  %522 = vperm.xlu1 %9057, %v9697_v27   ;;  %v347_v52 = vpop.permute.xlu0 %346 }
 0x126   :  { %9093 = vtanh.f32 %v328_v56  ;;  %v349_v56 = vmul.f32 %v347_v52, %v9767_v61  ;;  %v352_v60 = vmul.f32 %v347_v52, %v9777_v12 }
 0x127   :  { %9095 = vtanh.f32 %v326_v57  ;;  %v350_v57 = vmul.f32 %v347_v52, %v9772_v5 }
 0x128   :  { %9097 = vtanh.f32 %v329_v62  ;;  %v353_v58 = vadd.f32 %v349_v56, %v9775_v8 }
 0x129   :  { %v354_v62 = vadd.f32 %v350_v57, %v9780_v16 }
 0x12f   :  { %v9092_v7 = vpop.eup %9091 }
 0x130   :  { %v333_v14 = vmul.f32 0.5, %v9092_v7  ;;  %v9094_v17 = vpop.eup %9093 }
 0x131   :  { %v334_v63 = vmul.f32 0.5, %v9094_v17  ;;  %v9096_v0 = vpop.eup %9095 }
 0x132   :  { %v336_v21 = vadd.f32 0.5, %v333_v14  ;;  %v9098_v36 = vpop.eup %9097 }
 0x133   :  { %v337_v13 = vadd.f32 0.5, %v334_v63  ;;  %v335_v43 = vmul.f32 0.5, %v9098_v36  ;;  %v356_v63 = vadd.f32 %v352_v60, %v9784_v25 }
 0x134   :  { %v341_v31 = vmul.f32 %v9096_v0, %v336_v21 }
 0x135   :  { %v340_v32 = vmul.f32 0.0, %v337_v13  ;;  %v338_v44 = vadd.f32 0.5, %v335_v43  ;;  %v351_v13 = vmul.f32 %v347_v52, %v9786_v26 }
 0x137   :  { %v9794_v34 = vadd.f32 %v341_v31, %v340_v32 }
 0x139   :  { %9099 = vtanh.f32 %v9794_v34 }
 0x143   :  { %v9100_v48 = vpop.eup %9099 }
 0x144   :  { %v344_v35 = vmul.f32 %v9100_v48, %v338_v44  ;;  %v355_v44 = vadd.f32 %v351_v13, %v9791_v47 }
 0x146   :  { %422 = vmatmul.mubr.f32.vlgmr.msra.gmra.mrb[2].mxu0 %v344_v35  ;;  %493 = vmatmul.mubr.f32.vlgmr.msra.gmra.mrb[2].mxu1 %v344_v35 }
 0x147   :  { %6813 = vmatpush1.bf16.msra.mxu0 %v9627_v11  ;;  %6845 = vmatpush1.bf16.msra.mxu1 %v9630_v15 }
 0x148   :  { %6815 = vmatprep.subr.bf16.mxu0 %v9634_v19  ;;  %6847 = vmatprep.subr.bf16.mxu1 %v9636_v20 }
 0x149   :  { %597 = vmatprep.mubr.f32.mxu0 %v11443_v1  ;;  %668 = vmatprep.mubr.f32.mxu1 %v11443_v1 }
 0x14b   :  { %6817 = vmatpush1.bf16.msra.mxu0 %v9639_v24  ;;  %6849 = vmatpush1.bf16.msra.mxu1 %v9643_v28 }
 0x14c   :  { %6819 = vmatprep.subr.bf16.mxu0 %v9645_v29  ;;  %6851 = vmatprep.subr.bf16.mxu1 %v9647_v33 }
 0x14f   :  { %6821 = vmatpush1.bf16.msra.mxu0 %v9650_v37  ;;  %6853 = vmatpush1.bf16.msra.mxu1 %v9654_v41 }
 0x150   :  { %6823 = vmatprep.subr.bf16.mxu0 %v9656_v42  ;;  %6855 = vmatprep.subr.bf16.mxu1 %v9659_v46 }
 0x153   :  { %6825 = vmatpush1.bf16.msra.mxu0 %v9662_v53  ;;  %6857 = vmatpush1.bf16.msra.mxu1 %v9666_v54 }
 0x154   :  { %6827 = vmatprep.subr.bf16.mxu0 %v9668_v55  ;;  %6859 = vmatprep.subr.bf16.mxu1 %v9671_v59 }
 0x157   :  { %6829 = vmatpush1.bf16.msra.mxu0 %v9674_v2  ;;  %6861 = vmatpush1.bf16.msra.mxu1 %v9678_v3 }
 0x158   :  { %6831 = vmatprep.subr.bf16.mxu0 %v9680_v4  ;;  %6863 = vmatprep.subr.bf16.mxu1 %v9683_v9 }
 0x15b   :  { %6833 = vmatpush1.bf16.msra.mxu0 %v9686_v18  ;;  %6865 = vmatpush1.bf16.msra.mxu1 %v9690_v22 }
 0x15c   :  { %6835 = vmatprep.subr.bf16.mxu0 %v9692_v23  ;;  %6867 = vmatprep.subr.bf16.mxu1 %v9700_v30 }
 0x15f   :  { %6837 = vmatpush1.bf16.msra.mxu0 %v9704_v38  ;;  %6869 = vmatpush1.bf16.msra.mxu1 %v9708_v39 }
 0x160   :  { %6839 = vmatprep.subr.bf16.mxu0 %v9710_v40  ;;  %6871 = vmatprep.subr.bf16.mxu1 %v9713_v45 }
 0x163   :  { %6841 = vmatpush1.bf16.msra.mxu0 %v9716_v49  ;;  %6873 = vmatpush1.bf16.msra.mxu1 %v9720_v50 }
 0x164   :  { %6875 = vmatprep.subr.bf16.mxu0 %v9623_v6  ;;  %6907 = vmatprep.subr.bf16.mxu1 %v9625_v10 }
 0x219   :  { %v423_v7 = vpop.f32.mrb[2].mxu0  ;;  %v494_v14 = vpop.f32.mrb[2].mxu1 }
 0x21a   :  { %v499_v17 = vadd.f32 %v423_v7, %v353_v58  ;;  %v425_v21 = vpop.f32.mrb[3].mxu0  ;;  %v496_v0 = vpop.f32.mrb[3].mxu1  ;;  %v501_v48 = vadd.f32 %v494_v14, %v355_v44 }
 0x21b   :  { %v500_v31 = vadd.f32 %v425_v21, %v354_v62  ;;  %v502_v43 = vadd.f32 %v496_v0, %v356_v63 }
 0x21c   :  { %v503_v32 = vmul.f32 0.5, %v499_v17  ;;  %v505_v35 = vmul.f32 0.5, %v501_v48 }
 0x21d   :  { %v504_v36 = vmul.f32 0.5, %v500_v31  ;;  %v523_v31 = vpop.permute.xlu1 %522 }
 0x21e   :  { %9101 = vtanh.f32 %v503_v32  ;;  %v525_v32 = vmul.f32 %v523_v31, %v9767_v61  ;;  %v528_v44 = vmul.f32 %v523_v31, %v9777_v12 }
 0x21f   :  { %9103 = vtanh.f32 %v504_v36  ;;  %v526_v36 = vmul.f32 %v523_v31, %v9772_v5 }
 0x220   :  { %9105 = vtanh.f32 %v502_v43  ;;  %v529_v43 = vadd.f32 %v525_v32, %v9775_v8 }
 0x221   :  { %9107 = vtanh.f32 %v505_v35  ;;  %v530_v48 = vadd.f32 %v526_v36, %v9780_v16 }
 0x228   :  { %v9102_v51 = vpop.eup %9101 }
 0x229   :  { %v509_v56 = vmul.f32 0.5, %v9102_v51  ;;  %v9104_v57 = vpop.eup %9103 }
 0x22a   :  { %v510_v60 = vmul.f32 0.5, %v9104_v57  ;;  %v9106_v7 = vpop.eup %9105 }
 0x22b   :  { %v512_v58 = vadd.f32 0.5, %v509_v56  ;;  %v9108_v21 = vpop.eup %9107 }
 0x22c   :  { %v513_v1 = vadd.f32 0.5, %v510_v60  ;;  %v511_v63 = vmul.f32 0.5, %v9108_v21 }
 0x22d   :  { %v517_v52 = vmul.f32 %v9106_v7, %v512_v58  ;;  %v532_v58 = vadd.f32 %v528_v44, %v9784_v25  ;;  %v527_v7 = vmul.f32 %v523_v31, %v9786_v26 }
 0x22e   :  { %v516_v62 = vmul.f32 %v513_v1, %v9794_v34  ;;  %v514_v0 = vadd.f32 0.5, %v511_v63  ;;  %v11452_v1 = vmov 0.0   ;;  %v9514_v34 = vmov 3  }
 0x22f   :  { %9058 = vset.pattern.permute.xlu1 %v9514_v34 }
 0x230   :  { %v9841_v17 = vadd.f32 %v517_v52, %v516_v62  ;;  %698 = vperm.xlu1 %9058, %v9697_v27  }
 0x232   :  { %9109 = vtanh.f32 %v9841_v17 }
 0x23c   :  { %v9110_v14 = vpop.eup %9109 }
 0x23d   :  { %v520_v13 = vmul.f32 %v9110_v14, %v514_v0  ;;  %v531_v0 = vadd.f32 %v527_v7, %v9791_v47 }
 0x23f   :  { %598 = vmatmul.mubr.f32.vlgmr.msra.gmra.mrb[4].mxu0 %v520_v13  ;;  %669 = vmatmul.mubr.f32.vlgmr.msra.gmra.mrb[4].mxu1 %v520_v13 }
 0x240   :  { %6877 = vmatpush1.bf16.msra.mxu0 %v9627_v11  ;;  %6909 = vmatpush1.bf16.msra.mxu1 %v9630_v15 }
 0x241   :  { %6879 = vmatprep.subr.bf16.mxu0 %v9634_v19  ;;  %6911 = vmatprep.subr.bf16.mxu1 %v9636_v20 }
 0x242   :  { %773 = vmatprep.mubr.f32.mxu0 %v11452_v1  ;;  %844 = vmatprep.mubr.f32.mxu1 %v11452_v1 }
 0x244   :  { %6881 = vmatpush1.bf16.msra.mxu0 %v9639_v24  ;;  %6913 = vmatpush1.bf16.msra.mxu1 %v9643_v28 }
 0x245   :  { %6883 = vmatprep.subr.bf16.mxu0 %v9645_v29  ;;  %6915 = vmatprep.subr.bf16.mxu1 %v9647_v33 }
 0x248   :  { %6885 = vmatpush1.bf16.msra.mxu0 %v9650_v37  ;;  %6917 = vmatpush1.bf16.msra.mxu1 %v9654_v41 }
 0x249   :  { %6887 = vmatprep.subr.bf16.mxu0 %v9656_v42  ;;  %6919 = vmatprep.subr.bf16.mxu1 %v9659_v46 }
 0x24c   :  { %6889 = vmatpush1.bf16.msra.mxu0 %v9662_v53  ;;  %6921 = vmatpush1.bf16.msra.mxu1 %v9666_v54 }
 0x24d   :  { %6891 = vmatprep.subr.bf16.mxu0 %v9668_v55  ;;  %6923 = vmatprep.subr.bf16.mxu1 %v9671_v59 }
 0x250   :  { %6893 = vmatpush1.bf16.msra.mxu0 %v9674_v2  ;;  %6925 = vmatpush1.bf16.msra.mxu1 %v9678_v3 }
 0x251   :  { %6895 = vmatprep.subr.bf16.mxu0 %v9680_v4  ;;  %6927 = vmatprep.subr.bf16.mxu1 %v9683_v9 }
 0x254   :  { %6897 = vmatpush1.bf16.msra.mxu0 %v9686_v18  ;;  %6929 = vmatpush1.bf16.msra.mxu1 %v9690_v22 }
 0x255   :  { %6899 = vmatprep.subr.bf16.mxu0 %v9692_v23  ;;  %6931 = vmatprep.subr.bf16.mxu1 %v9700_v30 }
 0x258   :  { %6901 = vmatpush1.bf16.msra.mxu0 %v9704_v38  ;;  %6933 = vmatpush1.bf16.msra.mxu1 %v9708_v39 }
 0x259   :  { %6903 = vmatprep.subr.bf16.mxu0 %v9710_v40  ;;  %6935 = vmatprep.subr.bf16.mxu1 %v9713_v45 }
 0x25c   :  { %6905 = vmatpush1.bf16.msra.mxu0 %v9716_v49  ;;  %6937 = vmatpush1.bf16.msra.mxu1 %v9720_v50 }
 0x25d   :  { %6939 = vmatprep.subr.bf16.mxu0 %v9623_v6  ;;  %6971 = vmatprep.subr.bf16.mxu1 %v9625_v10 }
 0x312   :  { %v599_v35 = vpop.f32.mrb[4].mxu0  ;;  %v670_v51 = vpop.f32.mrb[4].mxu1 }
 0x313   :  { %v675_v56 = vadd.f32 %v599_v35, %v529_v43  ;;  %v601_v57 = vpop.f32.mrb[5].mxu0  ;;  %v672_v60 = vpop.f32.mrb[5].mxu1  ;;  %v677_v14 = vadd.f32 %v670_v51, %v531_v0 }
 0x314   :  { %v676_v52 = vadd.f32 %v601_v57, %v530_v48  ;;  %v678_v63 = vadd.f32 %v672_v60, %v532_v58 }
 0x315   :  { %v679_v62 = vmul.f32 0.5, %v675_v56  ;;  %v681_v13 = vmul.f32 0.5, %v677_v14 }
 0x316   :  { %v680_v21 = vmul.f32 0.5, %v676_v52 }
 0x317   :  { %9111 = vtanh.f32 %v679_v62 }
 0x318   :  { %9113 = vtanh.f32 %v680_v21 }
 0x319   :  { %9115 = vtanh.f32 %v678_v63 }
 0x31a   :  { %9117 = vtanh.f32 %v681_v13 }
 0x321   :  { %v9112_v34 = vpop.eup %9111 }
 0x322   :  { %v685_v32 = vmul.f32 0.5, %v9112_v34  ;;  %v9114_v36 = vpop.eup %9113 }
 0x323   :  { %v686_v44 = vmul.f32 0.5, %v9114_v36  ;;  %v9116_v35 = vpop.eup %9115  ;;  %v11453_v36 = vld [vmem:[#allocation9_spill] sm:$0xff] }
 0x324   :  { %v688_v43 = vadd.f32 0.5, %v685_v32  ;;  %v9118_v57 = vpop.eup %9117 }
 0x325   :  { %v689_v25 = vadd.f32 0.5, %v686_v44  ;;  %v687_v58 = vmul.f32 0.5, %v9118_v57 }
 0x326   :  { %v693_v31 = vmul.f32 %v9116_v35, %v688_v43 }
 0x327   :  { %v692_v48 = vmul.f32 %v689_v25, %v9841_v17  ;;  %v690_v60 = vadd.f32 0.5, %v687_v58  ;;  %v9515_v25 = vmov 4   ;;  %v699_v17 = vpop.permute.xlu1 %698 }
 0x328   :  { %9059 = vset.pattern.permute.xlu1 %v9515_v25  ;;  %v701_v52 = vmul.f32 %v699_v17, %v9767_v61  ;;  %v702_v62 = vmul.f32 %v699_v17, %v9772_v5  ;;  %v704_v63 = vmul.f32 %v699_v17, %v9777_v12  ;;  %v703_v35 = vmul.f32 %v699_v17, %v9786_v26 }
 0x329   :  { %v9888_v56 = vadd.f32 %v693_v31, %v692_v48  ;;  %874 = vperm.xlu1 %9059, %v9697_v27  }
 0x32a   :  { %v705_v21 = vadd.f32 %v701_v52, %v9775_v8  ;;  %v706_v0 = vadd.f32 %v702_v62, %v9780_v16  ;;  %v708_v43 = vadd.f32 %v704_v63, %v11453_v36 }
 0x32b   :  { %9119 = vtanh.f32 %v9888_v56 }
 0x335   :  { %v9120_v51 = vpop.eup %9119 }
 0x336   :  { %v696_v7 = vmul.f32 %v9120_v51, %v690_v60  ;;  %v707_v60 = vadd.f32 %v703_v35, %v9791_v47 }
 0x338   :  { %774 = vmatmul.mubr.f32.vlgmr.msra.gmra.mrb[6].mxu0 %v696_v7  ;;  %845 = vmatmul.mubr.f32.vlgmr.msra.gmra.mrb[6].mxu1 %v696_v7 }
 0x339   :  { %6941 = vmatpush1.bf16.msra.mxu0 %v9627_v11  ;;  %6973 = vmatpush1.bf16.msra.mxu1 %v9630_v15 }
 0x33a   :  { %6943 = vmatprep.subr.bf16.mxu0 %v9634_v19  ;;  %6975 = vmatprep.subr.bf16.mxu1 %v9636_v20 }
 0x33b   :  { %949 = vmatprep.mubr.f32.mxu0 %v11452_v1  ;;  %1020 = vmatprep.mubr.f32.mxu1 %v11452_v1 }
 0x33d   :  { %6945 = vmatpush1.bf16.msra.mxu0 %v9639_v24  ;;  %6977 = vmatpush1.bf16.msra.mxu1 %v9643_v28 }
 0x33e   :  { %6947 = vmatprep.subr.bf16.mxu0 %v9645_v29  ;;  %6979 = vmatprep.subr.bf16.mxu1 %v9647_v33 }
 0x341   :  { %6949 = vmatpush1.bf16.msra.mxu0 %v9650_v37  ;;  %6981 = vmatpush1.bf16.msra.mxu1 %v9654_v41 }
 0x342   :  { %6951 = vmatprep.subr.bf16.mxu0 %v9656_v42  ;;  %6983 = vmatprep.subr.bf16.mxu1 %v9659_v46 }
 0x345   :  { %6953 = vmatpush1.bf16.msra.mxu0 %v9662_v53  ;;  %6985 = vmatpush1.bf16.msra.mxu1 %v9666_v54 }
 0x346   :  { %6955 = vmatprep.subr.bf16.mxu0 %v9668_v55  ;;  %6987 = vmatprep.subr.bf16.mxu1 %v9671_v59 }
 0x349   :  { %6957 = vmatpush1.bf16.msra.mxu0 %v9674_v2  ;;  %6989 = vmatpush1.bf16.msra.mxu1 %v9678_v3 }
 0x34a   :  { %6959 = vmatprep.subr.bf16.mxu0 %v9680_v4  ;;  %6991 = vmatprep.subr.bf16.mxu1 %v9683_v9 }
 0x34d   :  { %6961 = vmatpush1.bf16.msra.mxu0 %v9686_v18  ;;  %6993 = vmatpush1.bf16.msra.mxu1 %v9690_v22 }
 0x34e   :  { %6963 = vmatprep.subr.bf16.mxu0 %v9692_v23  ;;  %6995 = vmatprep.subr.bf16.mxu1 %v9700_v30 }
 0x351   :  { %6965 = vmatpush1.bf16.msra.mxu0 %v9704_v38  ;;  %6997 = vmatpush1.bf16.msra.mxu1 %v9708_v39 }
 0x352   :  { %6967 = vmatprep.subr.bf16.mxu0 %v9710_v40  ;;  %6999 = vmatprep.subr.bf16.mxu1 %v9713_v45 }
 0x355   :  { %6969 = vmatpush1.bf16.msra.mxu0 %v9716_v49  ;;  %7001 = vmatpush1.bf16.msra.mxu1 %v9720_v50 }
 0x356   :  { %7003 = vmatprep.subr.bf16.mxu0 %v9623_v6  ;;  %7035 = vmatprep.subr.bf16.mxu1 %v9625_v10 }
 0x40b   :  { %v775_v14 = vpop.f32.mrb[6].mxu0  ;;  %v846_v13 = vpop.f32.mrb[6].mxu1 }
 0x40c   :  { %v851_v34 = vadd.f32 %v775_v14, %v705_v21  ;;  %v777_v32 = vpop.f32.mrb[7].mxu0  ;;  %v848_v44 = vpop.f32.mrb[7].mxu1  ;;  %v853_v51 = vadd.f32 %v846_v13, %v707_v60 }
 0x40d   :  { %v852_v31 = vadd.f32 %v777_v32, %v706_v0  ;;  %v854_v58 = vadd.f32 %v848_v44, %v708_v43 }
 0x40e   :  { %v855_v48 = vmul.f32 0.5, %v851_v34  ;;  %v857_v7 = vmul.f32 0.5, %v853_v51 }
 0x40f   :  { %v856_v57 = vmul.f32 0.5, %v852_v31 }
 0x410   :  { %9121 = vtanh.f32 %v855_v48 }
 0x411   :  { %9123 = vtanh.f32 %v856_v57 }
 0x412   :  { %9125 = vtanh.f32 %v854_v58 }
 0x413   :  { %9127 = vtanh.f32 %v857_v7 }
 0x41a   :  { %v9122_v25 = vpop.eup %9121 }
 0x41b   :  { %v861_v52 = vmul.f32 0.5, %v9122_v25  ;;  %v9124_v62 = vpop.eup %9123 }
 0x41c   :  { %v862_v63 = vmul.f32 0.5, %v9124_v62  ;;  %v9126_v14 = vpop.eup %9125  ;;  %v11454_v62 = vld [vmem:[#allocation9_spill] sm:$0xff] }
 0x41d   :  { %v864_v21 = vadd.f32 0.5, %v861_v52  ;;  %v9128_v32 = vpop.eup %9127 }
 0x41e   :  { %v865_v36 = vadd.f32 0.5, %v862_v63  ;;  %v863_v43 = vmul.f32 0.5, %v9128_v32 }
 0x41f   :  { %v869_v17 = vmul.f32 %v9126_v14, %v864_v21 }
 0x420   :  { %v868_v0 = vmul.f32 %v865_v36, %v9888_v56  ;;  %v866_v44 = vadd.f32 0.5, %v863_v43  ;;  %v9516_v56 = vmov 5   ;;  %v875_v36 = vpop.permute.xlu1 %874 }
 0x421   :  { %9060 = vset.pattern.permute.xlu0 %v9516_v56  ;;  %v877_v31 = vmul.f32 %v875_v36, %v9767_v61  ;;  %v878_v48 = vmul.f32 %v875_v36, %v9772_v5  ;;  %v880_v58 = vmul.f32 %v875_v36, %v9777_v12  ;;  %v879_v14 = vmul.f32 %v875_v36, %v9786_v26 }
 0x422   :  { %v9935_v34 = vadd.f32 %v869_v17, %v868_v0  ;;  %1050 = vperm.xlu0 %9060, %v9697_v27  }
 0x423   :  { %v881_v57 = vadd.f32 %v877_v31, %v9775_v8  ;;  %v882_v60 = vadd.f32 %v878_v48, %v9780_v16  ;;  %v884_v21 = vadd.f32 %v880_v58, %v11454_v62 }
 0x424   :  { %9129 = vtanh.f32 %v9935_v34 }
 0x42e   :  { %v9130_v13 = vpop.eup %9129 }
 0x42f   :  { %v872_v35 = vmul.f32 %v9130_v13, %v866_v44  ;;  %v883_v44 = vadd.f32 %v879_v14, %v9791_v47 }
 0x431   :  { %950 = vmatmul.mubr.f32.vlgmr.msra.gmra.mrb[8].mxu0 %v872_v35  ;;  %1021 = vmatmul.mubr.f32.vlgmr.msra.gmra.mrb[8].mxu1 %v872_v35 }
 0x432   :  { %7005 = vmatpush1.bf16.msra.mxu0 %v9627_v11  ;;  %7037 = vmatpush1.bf16.msra.mxu1 %v9630_v15 }
 0x433   :  { %7007 = vmatprep.subr.bf16.mxu0 %v9634_v19  ;;  %7039 = vmatprep.subr.bf16.mxu1 %v9636_v20 }
 0x434   :  { %1125 = vmatprep.mubr.f32.mxu0 %v11452_v1  ;;  %1196 = vmatprep.mubr.f32.mxu1 %v11452_v1 }
 0x436   :  { %7009 = vmatpush1.bf16.msra.mxu0 %v9639_v24  ;;  %7041 = vmatpush1.bf16.msra.mxu1 %v9643_v28 }
 0x437   :  { %7011 = vmatprep.subr.bf16.mxu0 %v9645_v29  ;;  %7043 = vmatprep.subr.bf16.mxu1 %v9647_v33 }
 0x43a   :  { %7013 = vmatpush1.bf16.msra.mxu0 %v9650_v37  ;;  %7045 = vmatpush1.bf16.msra.mxu1 %v9654_v41 }
 0x43b   :  { %7015 = vmatprep.subr.bf16.mxu0 %v9656_v42  ;;  %7047 = vmatprep.subr.bf16.mxu1 %v9659_v46 }
 0x43e   :  { %7017 = vmatpush1.bf16.msra.mxu0 %v9662_v53  ;;  %7049 = vmatpush1.bf16.msra.mxu1 %v9666_v54 }
 0x43f   :  { %7019 = vmatprep.subr.bf16.mxu0 %v9668_v55  ;;  %7051 = vmatprep.subr.bf16.mxu1 %v9671_v59 }
 0x442   :  { %7021 = vmatpush1.bf16.msra.mxu0 %v9674_v2  ;;  %7053 = vmatpush1.bf16.msra.mxu1 %v9678_v3 }
 0x443   :  { %7023 = vmatprep.subr.bf16.mxu0 %v9680_v4  ;;  %7055 = vmatprep.subr.bf16.mxu1 %v9683_v9 }
 0x446   :  { %7025 = vmatpush1.bf16.msra.mxu0 %v9686_v18  ;;  %7057 = vmatpush1.bf16.msra.mxu1 %v9690_v22 }
 0x447   :  { %7027 = vmatprep.subr.bf16.mxu0 %v9692_v23  ;;  %7059 = vmatprep.subr.bf16.mxu1 %v9700_v30 }
 0x44a   :  { %7029 = vmatpush1.bf16.msra.mxu0 %v9704_v38  ;;  %7061 = vmatpush1.bf16.msra.mxu1 %v9708_v39 }
 0x44b   :  { %7031 = vmatprep.subr.bf16.mxu0 %v9710_v40  ;;  %7063 = vmatprep.subr.bf16.mxu1 %v9713_v45 }
 0x44e   :  { %7033 = vmatpush1.bf16.msra.mxu0 %v9716_v49  ;;  %7065 = vmatpush1.bf16.msra.mxu1 %v9720_v50 }
 0x44f   :  { %7067 = vmatprep.subr.bf16.mxu0 %v9623_v6  ;;  %7099 = vmatprep.subr.bf16.mxu1 %v9625_v10 }
 0x504   :  { %v951_v51 = vpop.f32.mrb[8].mxu0  ;;  %v1022_v7 = vpop.f32.mrb[8].mxu1 }
 0x505   :  { %v1027_v25 = vadd.f32 %v951_v51, %v881_v57  ;;  %v953_v52 = vpop.f32.mrb[9].mxu0  ;;  %v1024_v63 = vpop.f32.mrb[9].mxu1  ;;  %v1029_v13 = vadd.f32 %v1022_v7, %v883_v44 }
 0x506   :  { %v1028_v17 = vadd.f32 %v953_v52, %v882_v60  ;;  %v1030_v43 = vadd.f32 %v1024_v63, %v884_v21 }
 0x507   :  { %v1031_v0 = vmul.f32 0.5, %v1027_v25  ;;  %v1033_v35 = vmul.f32 0.5, %v1029_v13 }
 0x508   :  { %v1032_v32 = vmul.f32 0.5, %v1028_v17 }
 0x509   :  { %9131 = vtanh.f32 %v1031_v0 }
 0x50a   :  { %9133 = vtanh.f32 %v1032_v32 }
 0x50b   :  { %9135 = vtanh.f32 %v1030_v43 }
 0x50c   :  { %9137 = vtanh.f32 %v1033_v35 }
 0x513   :  { %v9132_v56 = vpop.eup %9131 }
 0x514   :  { %v1037_v31 = vmul.f32 0.5, %v9132_v56  ;;  %v9134_v48 = vpop.eup %9133 }
 0x515   :  { %v1038_v58 = vmul.f32 0.5, %v9134_v48  ;;  %v9136_v51 = vpop.eup %9135  ;;  %v11455_v48 = vld [vmem:[#allocation9_spill] sm:$0xff] }
 0x516   :  { %v1040_v57 = vadd.f32 0.5, %v1037_v31  ;;  %v9138_v52 = vpop.eup %9137 }
 0x517   :  { %v1041_v62 = vadd.f32 0.5, %v1038_v58  ;;  %v1039_v21 = vmul.f32 0.5, %v9138_v52 }
 0x518   :  { %v1045_v36 = vmul.f32 %v9136_v51, %v1040_v57 }
 0x519   :  { %v1044_v60 = vmul.f32 %v1041_v62, %v9935_v34  ;;  %v1042_v63 = vadd.f32 0.5, %v1039_v21  ;;  %v9517_v34 = vmov 6   ;;  %v1051_v62 = vpop.permute.xlu0 %1050 }
 0x51a   :  { %9061 = vset.pattern.permute.xlu1 %v9517_v34  ;;  %v1053_v17 = vmul.f32 %v1051_v62, %v9767_v61  ;;  %v1054_v0 = vmul.f32 %v1051_v62, %v9772_v5  ;;  %v1056_v43 = vmul.f32 %v1051_v62, %v9777_v12 }
 0x51b   :  { %v9982_v25 = vadd.f32 %v1045_v36, %v1044_v60  ;;  %1226 = vperm.xlu1 %9061, %v9697_v27   ;;  %v1055_v27 = vmul.f32 %v1051_v62, %v9786_v26 }
 0x51c   :  { %v1057_v32 = vadd.f32 %v1053_v17, %v9775_v8  ;;  %v1058_v44 = vadd.f32 %v1054_v0, %v9780_v16  ;;  %v1060_v57 = vadd.f32 %v1056_v43, %v11455_v48 }
 0x51d   :  { %9139 = vtanh.f32 %v9982_v25  ;;  %v1059_v21 = vadd.f32 %v1055_v27, %v9791_v47 }
 0x527   :  { %v9140_v7 = vpop.eup %9139 }
 0x528   :  { %v1048_v14 = vmul.f32 %v9140_v7, %v1042_v63 }
 0x52a   :  { %1126 = vmatmul.mubr.f32.vlgmr.msra.gmra.mrb[10].mxu0 %v1048_v14  ;;  %1197 = vmatmul.mubr.f32.vlgmr.msra.gmra.mrb[10].mxu1 %v1048_v14 }
 0x52b   :  { %7069 = vmatpush1.bf16.msra.mxu0 %v9627_v11  ;;  %7101 = vmatpush1.bf16.msra.mxu1 %v9630_v15 }
 0x52c   :  { %7071 = vmatprep.subr.bf16.mxu0 %v9634_v19  ;;  %7103 = vmatprep.subr.bf16.mxu1 %v9636_v20 }
 0x52d   :  { %1301 = vmatprep.mubr.f32.mxu0 %v11452_v1  ;;  %1372 = vmatprep.mubr.f32.mxu1 %v11452_v1 }
 0x52f   :  { %7073 = vmatpush1.bf16.msra.mxu0 %v9639_v24  ;;  %7105 = vmatpush1.bf16.msra.mxu1 %v9643_v28 }
 0x530   :  { %7075 = vmatprep.subr.bf16.mxu0 %v9645_v29  ;;  %7107 = vmatprep.subr.bf16.mxu1 %v9647_v33 }
 0x533   :  { %7077 = vmatpush1.bf16.msra.mxu0 %v9650_v37  ;;  %7109 = vmatpush1.bf16.msra.mxu1 %v9654_v41 }
 0x534   :  { %7079 = vmatprep.subr.bf16.mxu0 %v9656_v42  ;;  %7111 = vmatprep.subr.bf16.mxu1 %v9659_v46 }
 0x537   :  { %7081 = vmatpush1.bf16.msra.mxu0 %v9662_v53  ;;  %7113 = vmatpush1.bf16.msra.mxu1 %v9666_v54 }
 0x538   :  { %7083 = vmatprep.subr.bf16.mxu0 %v9668_v55  ;;  %7115 = vmatprep.subr.bf16.mxu1 %v9671_v59 }
 0x53b   :  { %7085 = vmatpush1.bf16.msra.mxu0 %v9674_v2  ;;  %7117 = vmatpush1.bf16.msra.mxu1 %v9678_v3 }
 0x53c   :  { %7087 = vmatprep.subr.bf16.mxu0 %v9680_v4  ;;  %7119 = vmatprep.subr.bf16.mxu1 %v9683_v9 }
 0x53f   :  { %7089 = vmatpush1.bf16.msra.mxu0 %v9686_v18  ;;  %7121 = vmatpush1.bf16.msra.mxu1 %v9690_v22 }
 0x540   :  { %7091 = vmatprep.subr.bf16.mxu0 %v9692_v23  ;;  %7123 = vmatprep.subr.bf16.mxu1 %v9700_v30 }
 0x543   :  { %7093 = vmatpush1.bf16.msra.mxu0 %v9704_v38  ;;  %7125 = vmatpush1.bf16.msra.mxu1 %v9708_v39 }
 0x544   :  { %7095 = vmatprep.subr.bf16.mxu0 %v9710_v40  ;;  %7127 = vmatprep.subr.bf16.mxu1 %v9713_v45 }
 0x547   :  { %7097 = vmatpush1.bf16.msra.mxu0 %v9716_v49  ;;  %7129 = vmatpush1.bf16.msra.mxu1 %v9720_v50 }
 0x548   :  { %7131 = vmatprep.subr.bf16.mxu0 %v9623_v6  ;;  %7163 = vmatprep.subr.bf16.mxu1 %v9625_v10 }
 0x5fd   :  { %v1127_v13 = vpop.f32.mrb[10].mxu0  ;;  %v1198_v35 = vpop.f32.mrb[10].mxu1 }
 0x5fe   :  { %v1203_v56 = vadd.f32 %v1127_v13, %v1057_v32  ;;  %v1129_v31 = vpop.f32.mrb[11].mxu0  ;;  %v1200_v58 = vpop.f32.mrb[11].mxu1  ;;  %v1205_v63 = vadd.f32 %v1198_v35, %v1059_v21 }
 0x5ff   :  { %v1204_v51 = vadd.f32 %v1129_v31, %v1058_v44  ;;  %v1206_v52 = vadd.f32 %v1200_v58, %v1060_v57 }
 0x600   :  { %v1207_v36 = vmul.f32 0.5, %v1203_v56  ;;  %v1209_v7 = vmul.f32 0.5, %v1205_v63 }
 0x601   :  { %v1208_v60 = vmul.f32 0.5, %v1204_v51  ;;  %v10069_v51 = vld [vmem:[%s11434_s0] sm:$0x3] }
 0x602   :  { %9141 = vtanh.f32 %v1207_v36  ;;  %v1227_v36 = vpop.permute.xlu1 %1226 }
 0x603   :  { %9143 = vtanh.f32 %v1208_v60  ;;  %v1229_v60 = vmul.f32 %v1227_v36, %v9767_v61  ;;  %v1232_v63 = vmul.f32 %v1227_v36, %v9777_v12 }
 0x604   :  { %9145 = vtanh.f32 %v1206_v52  ;;  %v1230_v52 = vmul.f32 %v1227_v36, %v9772_v5 }
 0x605   :  { %9147 = vtanh.f32 %v1209_v7  ;;  %v1233_v21 = vadd.f32 %v1229_v60, %v9775_v8 }
 0x606   :  { %v1234_v7 = vadd.f32 %v1230_v52, %v9780_v16 }
 0x60c   :  { %v9142_v14 = vpop.eup %9141 }
 0x60d   :  { %v1213_v34 = vmul.f32 0.5, %v9142_v14  ;;  %v9144_v17 = vpop.eup %9143 }
 0x60e   :  { %v1214_v32 = vmul.f32 0.5, %v9144_v17  ;;  %v9146_v43 = vpop.eup %9145 }
 0x60f   :  { %v1216_v0 = vadd.f32 0.5, %v1213_v34  ;;  %v9148_v31 = vpop.eup %9147 }
 0x610   :  { %v1217_v13 = vadd.f32 0.5, %v1214_v32  ;;  %v1215_v57 = vmul.f32 0.5, %v9148_v31  ;;  %v1236_v32 = vadd.f32 %v1232_v63, %v11455_v48 }
 0x611   :  { %v1221_v62 = vmul.f32 %v9146_v43, %v1216_v0 }
 0x612   :  { %v1220_v44 = vmul.f32 %v1217_v13, %v9982_v25  ;;  %v1218_v58 = vadd.f32 0.5, %v1215_v57  ;;  %v9518_v25 = vmov 7   ;;  %v1231_v13 = vmul.f32 %v1227_v36, %v9786_v26 }
 0x613   :  { %9062 = vset.pattern.permute.xlu1 %v9518_v25 }
 0x614   :  { %v10029_v56 = vadd.f32 %v1221_v62, %v1220_v44  ;;  %1402 = vperm.xlu1 %9062, %v10069_v51  }
 0x616   :  { %9149 = vtanh.f32 %v10029_v56 }
 0x620   :  { %v9150_v35 = vpop.eup %9149 }
 0x621   :  { %v1224_v27 = vmul.f32 %v9150_v35, %v1218_v58  ;;  %v1235_v58 = vadd.f32 %v1231_v13, %v9791_v47 }
 0x623   :  { %1302 = vmatmul.mubr.f32.vlgmr.msra.gmra.mrb[12].mxu0 %v1224_v27  ;;  %1373 = vmatmul.mubr.f32.vlgmr.msra.gmra.mrb[12].mxu1 %v1224_v27 }
 0x624   :  { %7133 = vmatpush1.bf16.msra.mxu0 %v9627_v11  ;;  %7165 = vmatpush1.bf16.msra.mxu1 %v9630_v15 }
 0x625   :  { %7135 = vmatprep.subr.bf16.mxu0 %v9634_v19  ;;  %7167 = vmatprep.subr.bf16.mxu1 %v9636_v20 }
 0x626   :  { %1477 = vmatprep.mubr.f32.mxu0 %v11452_v1  ;;  %1548 = vmatprep.mubr.f32.mxu1 %v11452_v1 }
 0x628   :  { %7137 = vmatpush1.bf16.msra.mxu0 %v9639_v24  ;;  %7169 = vmatpush1.bf16.msra.mxu1 %v9643_v28 }
 0x629   :  { %7139 = vmatprep.subr.bf16.mxu0 %v9645_v29  ;;  %7171 = vmatprep.subr.bf16.mxu1 %v9647_v33 }
 0x62c   :  { %7141 = vmatpush1.bf16.msra.mxu0 %v9650_v37  ;;  %7173 = vmatpush1.bf16.msra.mxu1 %v9654_v41 }
 0x62d   :  { %7143 = vmatprep.subr.bf16.mxu0 %v9656_v42  ;;  %7175 = vmatprep.subr.bf16.mxu1 %v9659_v46 }
 0x630   :  { %7145 = vmatpush1.bf16.msra.mxu0 %v9662_v53  ;;  %7177 = vmatpush1.bf16.msra.mxu1 %v9666_v54 }
 0x631   :  { %7147 = vmatprep.subr.bf16.mxu0 %v9668_v55  ;;  %7179 = vmatprep.subr.bf16.mxu1 %v9671_v59 }
 0x634   :  { %7149 = vmatpush1.bf16.msra.mxu0 %v9674_v2  ;;  %7181 = vmatpush1.bf16.msra.mxu1 %v9678_v3 }
 0x635   :  { %7151 = vmatprep.subr.bf16.mxu0 %v9680_v4  ;;  %7183 = vmatprep.subr.bf16.mxu1 %v9683_v9 }
 0x638   :  { %7153 = vmatpush1.bf16.msra.mxu0 %v9686_v18  ;;  %7185 = vmatpush1.bf16.msra.mxu1 %v9690_v22 }
 0x639   :  { %7155 = vmatprep.subr.bf16.mxu0 %v9692_v23  ;;  %7187 = vmatprep.subr.bf16.mxu1 %v9700_v30 }
 0x63c   :  { %7157 = vmatpush1.bf16.msra.mxu0 %v9704_v38  ;;  %7189 = vmatpush1.bf16.msra.mxu1 %v9708_v39 }
 0x63d   :  { %7159 = vmatprep.subr.bf16.mxu0 %v9710_v40  ;;  %7191 = vmatprep.subr.bf16.mxu1 %v9713_v45 }
 0x640   :  { %7161 = vmatpush1.bf16.msra.mxu0 %v9716_v49  ;;  %7193 = vmatpush1.bf16.msra.mxu1 %v9720_v50 }
 0x641   :  { %7195 = vmatprep.subr.bf16.mxu0 %v9623_v6  ;;  %7227 = vmatprep.subr.bf16.mxu1 %v9625_v10 }
 0x6f6   :  { %v1303_v14 = vpop.f32.mrb[12].mxu0  ;;  %v1374_v34 = vpop.f32.mrb[12].mxu1 }
 0x6f7   :  { %v1379_v17 = vadd.f32 %v1303_v14, %v1233_v21  ;;  %v1305_v0 = vpop.f32.mrb[13].mxu0  ;;  %v1376_v43 = vpop.f32.mrb[13].mxu1  ;;  %v1381_v35 = vadd.f32 %v1374_v34, %v1235_v58 }
 0x6f8   :  { %v1380_v62 = vadd.f32 %v1305_v0, %v1234_v7  ;;  %v1382_v57 = vadd.f32 %v1376_v43, %v1236_v32 }
 0x6f9   :  { %v1383_v44 = vmul.f32 0.5, %v1379_v17  ;;  %v1385_v27 = vmul.f32 0.5, %v1381_v35 }
 0x6fa   :  { %v1384_v31 = vmul.f32 0.5, %v1380_v62 }
 0x6fb   :  { %9151 = vtanh.f32 %v1383_v44 }
 0x6fc   :  { %9153 = vtanh.f32 %v1384_v31 }
 0x6fd   :  { %9155 = vtanh.f32 %v1382_v57 }
 0x6fe   :  { %9157 = vtanh.f32 %v1385_v27 }
 0x705   :  { %v9152_v25 = vpop.eup %9151 }
 0x706   :  { %v1389_v60 = vmul.f32 0.5, %v9152_v25  ;;  %v9154_v52 = vpop.eup %9153 }
 0x707   :  { %v1390_v63 = vmul.f32 0.5, %v9154_v52  ;;  %v9156_v14 = vpop.eup %9155  ;;  %v11456_v52 = vld [vmem:[#allocation9_spill] sm:$0xff] }
 0x708   :  { %v1392_v21 = vadd.f32 0.5, %v1389_v60  ;;  %v9158_v0 = vpop.eup %9157 }
 0x709   :  { %v1393_v48 = vadd.f32 0.5, %v1390_v63  ;;  %v1391_v32 = vmul.f32 0.5, %v9158_v0 }
 0x70a   :  { %v1397_v36 = vmul.f32 %v9156_v14, %v1392_v21 }
 0x70b   :  { %v1396_v7 = vmul.f32 %v1393_v48, %v10029_v56  ;;  %v1394_v43 = vadd.f32 0.5, %v1391_v32  ;;  %v9519_v48 = vmov 8   ;;  %v1403_v56 = vpop.permute.xlu1 %1402 }
 0x70c   :  { %9063 = vset.pattern.permute.xlu0 %v9519_v48  ;;  %v1405_v62 = vmul.f32 %v1403_v56, %v9767_v61  ;;  %v1406_v44 = vmul.f32 %v1403_v56, %v9772_v5  ;;  %v1408_v57 = vmul.f32 %v1403_v56, %v9777_v12  ;;  %v1407_v14 = vmul.f32 %v1403_v56, %v9786_v26 }
 0x70d   :  { %v10081_v17 = vadd.f32 %v1397_v36, %v1396_v7  ;;  %1578 = vperm.xlu0 %9063, %v10069_v51  }
 0x70e   :  { %v1409_v31 = vadd.f32 %v1405_v62, %v9775_v8  ;;  %v1410_v58 = vadd.f32 %v1406_v44, %v9780_v16  ;;  %v1412_v21 = vadd.f32 %v1408_v57, %v11456_v52 }
 0x70f   :  { %9159 = vtanh.f32 %v10081_v17 }
 0x719   :  { %v9160_v34 = vpop.eup %9159 }
 0x71a   :  { %v1400_v13 = vmul.f32 %v9160_v34, %v1394_v43  ;;  %v1411_v43 = vadd.f32 %v1407_v14, %v9791_v47 }
 0x71c   :  { %1478 = vmatmul.mubr.f32.vlgmr.msra.gmra.mrb[14].mxu0 %v1400_v13  ;;  %1549 = vmatmul.mubr.f32.vlgmr.msra.gmra.mrb[14].mxu1 %v1400_v13 }
 0x71d   :  { %7197 = vmatpush1.bf16.msra.mxu0 %v9627_v11  ;;  %7229 = vmatpush1.bf16.msra.mxu1 %v9630_v15 }
 0x71e   :  { %7199 = vmatprep.subr.bf16.mxu0 %v9634_v19  ;;  %7231 = vmatprep.subr.bf16.mxu1 %v9636_v20 }
 0x71f   :  { %1653 = vmatprep.mubr.f32.mxu0 %v11452_v1  ;;  %1724 = vmatprep.mubr.f32.mxu1 %v11452_v1 }
 0x721   :  { %7201 = vmatpush1.bf16.msra.mxu0 %v9639_v24  ;;  %7233 = vmatpush1.bf16.msra.mxu1 %v9643_v28 }
 0x722   :  { %7203 = vmatprep.subr.bf16.mxu0 %v9645_v29  ;;  %7235 = vmatprep.subr.bf16.mxu1 %v9647_v33 }
 0x725   :  { %7205 = vmatpush1.bf16.msra.mxu0 %v9650_v37  ;;  %7237 = vmatpush1.bf16.msra.mxu1 %v9654_v41 }
 0x726   :  { %7207 = vmatprep.subr.bf16.mxu0 %v9656_v42  ;;  %7239 = vmatprep.subr.bf16.mxu1 %v9659_v46 }
 0x729   :  { %7209 = vmatpush1.bf16.msra.mxu0 %v9662_v53  ;;  %7241 = vmatpush1.bf16.msra.mxu1 %v9666_v54 }
 0x72a   :  { %7211 = vmatprep.subr.bf16.mxu0 %v9668_v55  ;;  %7243 = vmatprep.subr.bf16.mxu1 %v9671_v59 }
 0x72d   :  { %7213 = vmatpush1.bf16.msra.mxu0 %v9674_v2  ;;  %7245 = vmatpush1.bf16.msra.mxu1 %v9678_v3 }
 0x72e   :  { %7215 = vmatprep.subr.bf16.mxu0 %v9680_v4  ;;  %7247 = vmatprep.subr.bf16.mxu1 %v9683_v9 }
 0x731   :  { %7217 = vmatpush1.bf16.msra.mxu0 %v9686_v18  ;;  %7249 = vmatpush1.bf16.msra.mxu1 %v9690_v22 }
 0x732   :  { %7219 = vmatprep.subr.bf16.mxu0 %v9692_v23  ;;  %7251 = vmatprep.subr.bf16.mxu1 %v9700_v30 }
 0x735   :  { %7221 = vmatpush1.bf16.msra.mxu0 %v9704_v38  ;;  %7253 = vmatpush1.bf16.msra.mxu1 %v9708_v39 }
 0x736   :  { %7223 = vmatprep.subr.bf16.mxu0 %v9710_v40  ;;  %7255 = vmatprep.subr.bf16.mxu1 %v9713_v45 }
 0x739   :  { %7225 = vmatpush1.bf16.msra.mxu0 %v9716_v49  ;;  %7257 = vmatpush1.bf16.msra.mxu1 %v9720_v50 }
 0x73a   :  { %7259 = vmatprep.subr.bf16.mxu0 %v9623_v6  ;;  %7291 = vmatprep.subr.bf16.mxu1 %v9625_v10 }
 0x7ef   :  { %v1479_v35 = vpop.f32.mrb[14].mxu0  ;;  %v1550_v27 = vpop.f32.mrb[14].mxu1 }
 0x7f0   :  { %v1555_v25 = vadd.f32 %v1479_v35, %v1409_v31  ;;  %v1481_v60 = vpop.f32.mrb[15].mxu0  ;;  %v1552_v63 = vpop.f32.mrb[15].mxu1  ;;  %v1557_v34 = vadd.f32 %v1550_v27, %v1411_v43 }
 0x7f1   :  { %v1556_v36 = vadd.f32 %v1481_v60, %v1410_v58  ;;  %v1558_v32 = vadd.f32 %v1552_v63, %v1412_v21 }
 0x7f2   :  { %v1559_v7 = vmul.f32 0.5, %v1555_v25  ;;  %v1561_v13 = vmul.f32 0.5, %v1557_v34 }
 0x7f3   :  { %v1560_v0 = vmul.f32 0.5, %v1556_v36 }
 0x7f4   :  { %9161 = vtanh.f32 %v1559_v7 }
 0x7f5   :  { %9163 = vtanh.f32 %v1560_v0 }
 0x7f6   :  { %9165 = vtanh.f32 %v1558_v32 }
 0x7f7   :  { %9167 = vtanh.f32 %v1561_v13 }
 0x7fe   :  { %v9162_v48 = vpop.eup %9161 }
 0x7ff   :  { %v1565_v62 = vmul.f32 0.5, %v9162_v48  ;;  %v9164_v44 = vpop.eup %9163 }
 0x800   :  { %v1566_v57 = vmul.f32 0.5, %v9164_v44  ;;  %v9166_v35 = vpop.eup %9165  ;;  %v11457_v44 = vld [vmem:[#allocation9_spill] sm:$0xff] }
 0x801   :  { %v1568_v31 = vadd.f32 0.5, %v1565_v62  ;;  %v9168_v60 = vpop.eup %9167 }
 0x802   :  { %v1569_v52 = vadd.f32 0.5, %v1566_v57  ;;  %v1567_v21 = vmul.f32 0.5, %v9168_v60 }
 0x803   :  { %v1573_v56 = vmul.f32 %v9166_v35, %v1568_v31 }
 0x804   :  { %v1572_v58 = vmul.f32 %v1569_v52, %v10081_v17  ;;  %v1570_v63 = vadd.f32 0.5, %v1567_v21  ;;  %v9520_v17 = vmov 9   ;;  %v1579_v52 = vpop.permute.xlu0 %1578 }
 0x805   :  { %9064 = vset.pattern.permute.xlu1 %v9520_v17  ;;  %v1581_v36 = vmul.f32 %v1579_v52, %v9767_v61  ;;  %v1582_v7 = vmul.f32 %v1579_v52, %v9772_v5  ;;  %v1584_v32 = vmul.f32 %v1579_v52, %v9777_v12  ;;  %v1583_v35 = vmul.f32 %v1579_v52, %v9786_v26 }
 0x806   :  { %v10128_v25 = vadd.f32 %v1573_v56, %v1572_v58  ;;  %1754 = vperm.xlu1 %9064, %v10069_v51  }
 0x807   :  { %v1585_v0 = vadd.f32 %v1581_v36, %v9775_v8  ;;  %v1586_v43 = vadd.f32 %v1582_v7, %v9780_v16  ;;  %v1588_v31 = vadd.f32 %v1584_v32, %v11457_v44 }
 0x808   :  { %9169 = vtanh.f32 %v10128_v25 }
 0x812   :  { %v9170_v27 = vpop.eup %9169 }
 0x813   :  { %v1576_v14 = vmul.f32 %v9170_v27, %v1570_v63  ;;  %v1587_v63 = vadd.f32 %v1583_v35, %v9791_v47 }
 0x815   :  { %1654 = vmatmul.mubr.f32.vlgmr.msra.gmra.mrb[16].mxu0 %v1576_v14  ;;  %1725 = vmatmul.mubr.f32.vlgmr.msra.gmra.mrb[16].mxu1 %v1576_v14 }
 0x816   :  { %7261 = vmatpush1.bf16.msra.mxu0 %v9627_v11  ;;  %7293 = vmatpush1.bf16.msra.mxu1 %v9630_v15 }
 0x817   :  { %7263 = vmatprep.subr.bf16.mxu0 %v9634_v19  ;;  %7295 = vmatprep.subr.bf16.mxu1 %v9636_v20 }
 0x818   :  { %1829 = vmatprep.mubr.f32.mxu0 %v11452_v1  ;;  %1900 = vmatprep.mubr.f32.mxu1 %v11452_v1 }
 0x81a   :  { %7265 = vmatpush1.bf16.msra.mxu0 %v9639_v24  ;;  %7297 = vmatpush1.bf16.msra.mxu1 %v9643_v28 }
 0x81b   :  { %7267 = vmatprep.subr.bf16.mxu0 %v9645_v29  ;;  %7299 = vmatprep.subr.bf16.mxu1 %v9647_v33 }
 0x81e   :  { %7269 = vmatpush1.bf16.msra.mxu0 %v9650_v37  ;;  %7301 = vmatpush1.bf16.msra.mxu1 %v9654_v41 }
 0x81f   :  { %7271 = vmatprep.subr.bf16.mxu0 %v9656_v42  ;;  %7303 = vmatprep.subr.bf16.mxu1 %v9659_v46 }
 0x822   :  { %7273 = vmatpush1.bf16.msra.mxu0 %v9662_v53  ;;  %7305 = vmatpush1.bf16.msra.mxu1 %v9666_v54 }
 0x823   :  { %7275 = vmatprep.subr.bf16.mxu0 %v9668_v55  ;;  %7307 = vmatprep.subr.bf16.mxu1 %v9671_v59 }
 0x826   :  { %7277 = vmatpush1.bf16.msra.mxu0 %v9674_v2  ;;  %7309 = vmatpush1.bf16.msra.mxu1 %v9678_v3 }
 0x827   :  { %7279 = vmatprep.subr.bf16.mxu0 %v9680_v4  ;;  %7311 = vmatprep.subr.bf16.mxu1 %v9683_v9 }
 0x82a   :  { %7281 = vmatpush1.bf16.msra.mxu0 %v9686_v18  ;;  %7313 = vmatpush1.bf16.msra.mxu1 %v9690_v22 }
 0x82b   :  { %7283 = vmatprep.subr.bf16.mxu0 %v9692_v23  ;;  %7315 = vmatprep.subr.bf16.mxu1 %v9700_v30 }
 0x82e   :  { %7285 = vmatpush1.bf16.msra.mxu0 %v9704_v38  ;;  %7317 = vmatpush1.bf16.msra.mxu1 %v9708_v39 }
 0x82f   :  { %7287 = vmatprep.subr.bf16.mxu0 %v9710_v40  ;;  %7319 = vmatprep.subr.bf16.mxu1 %v9713_v45 }
 0x832   :  { %7289 = vmatpush1.bf16.msra.mxu0 %v9716_v49  ;;  %7321 = vmatpush1.bf16.msra.mxu1 %v9720_v50 }
 0x833   :  { %7323 = vmatprep.subr.bf16.mxu0 %v9623_v6  ;;  %7355 = vmatprep.subr.bf16.mxu1 %v9625_v10 }
 0x8e8   :  { %v1655_v34 = vpop.f32.mrb[16].mxu0  ;;  %v1726_v13 = vpop.f32.mrb[16].mxu1 }
 0x8e9   :  { %v1731_v48 = vadd.f32 %v1655_v34, %v1585_v0  ;;  %v1657_v62 = vpop.f32.mrb[17].mxu0  ;;  %v1728_v57 = vpop.f32.mrb[17].mxu1  ;;  %v1733_v27 = vadd.f32 %v1726_v13, %v1587_v63 }
 0x8ea   :  { %v1732_v56 = vadd.f32 %v1657_v62, %v1586_v43  ;;  %v1734_v21 = vadd.f32 %v1728_v57, %v1588_v31 }
 0x8eb   :  { %v1735_v58 = vmul.f32 0.5, %v1731_v48  ;;  %v1737_v14 = vmul.f32 0.5, %v1733_v27 }
 0x8ec   :  { %v1736_v60 = vmul.f32 0.5, %v1732_v56 }
 0x8ed   :  { %9171 = vtanh.f32 %v1735_v58 }
 0x8ee   :  { %9173 = vtanh.f32 %v1736_v60 }
 0x8ef   :  { %9175 = vtanh.f32 %v1734_v21 }
 0x8f0   :  { %9177 = vtanh.f32 %v1737_v14 }
 0x8f7   :  { %v9172_v17 = vpop.eup %9171 }
 0x8f8   :  { %v1741_v36 = vmul.f32 0.5, %v9172_v17  ;;  %v9174_v7 = vpop.eup %9173 }
 0x8f9   :  { %v1742_v32 = vmul.f32 0.5, %v9174_v7  ;;  %v9176_v34 = vpop.eup %9175  ;;  %v11458_v7 = vld [vmem:[#allocation9_spill] sm:$0xff] }
 0x8fa   :  { %v1744_v0 = vadd.f32 0.5, %v1741_v36  ;;  %v9178_v62 = vpop.eup %9177 }
 0x8fb   :  { %v1745_v44 = vadd.f32 0.5, %v1742_v32  ;;  %v1743_v31 = vmul.f32 0.5, %v9178_v62 }
 0x8fc   :  { %v1749_v52 = vmul.f32 %v9176_v34, %v1744_v0 }
 0x8fd   :  { %v1748_v43 = vmul.f32 %v1745_v44, %v10128_v25  ;;  %v1746_v57 = vadd.f32 0.5, %v1743_v31  ;;  %v9521_v25 = vmov 10   ;;  %v1755_v44 = vpop.permute.xlu1 %1754 }
 0x8fe   :  { %9065 = vset.pattern.permute.xlu1 %v9521_v25  ;;  %v1757_v56 = vmul.f32 %v1755_v44, %v9767_v61  ;;  %v1758_v58 = vmul.f32 %v1755_v44, %v9772_v5  ;;  %v1760_v21 = vmul.f32 %v1755_v44, %v9777_v12  ;;  %v1759_v34 = vmul.f32 %v1755_v44, %v9786_v26 }
 0x8ff   :  { %v10175_v48 = vadd.f32 %v1749_v52, %v1748_v43  ;;  %1930 = vperm.xlu1 %9065, %v10069_v51  }
 0x900   :  { %v1761_v60 = vadd.f32 %v1757_v56, %v9775_v8  ;;  %v1762_v63 = vadd.f32 %v1758_v58, %v9780_v16  ;;  %v1764_v0 = vadd.f32 %v1760_v21, %v11458_v7 }
 0x901   :  { %9179 = vtanh.f32 %v10175_v48 }
 0x90b   :  { %v9180_v13 = vpop.eup %9179 }
 0x90c   :  { %v1752_v35 = vmul.f32 %v9180_v13, %v1746_v57  ;;  %v1763_v57 = vadd.f32 %v1759_v34, %v9791_v47 }
 0x90e   :  { %1830 = vmatmul.mubr.f32.vlgmr.msra.gmra.mrb[18].mxu0 %v1752_v35  ;;  %1901 = vmatmul.mubr.f32.vlgmr.msra.gmra.mrb[18].mxu1 %v1752_v35 }
 0x90f   :  { %7325 = vmatpush1.bf16.msra.mxu0 %v9627_v11  ;;  %7357 = vmatpush1.bf16.msra.mxu1 %v9630_v15 }
 0x910   :  { %7327 = vmatprep.subr.bf16.mxu0 %v9634_v19  ;;  %7359 = vmatprep.subr.bf16.mxu1 %v9636_v20 }
 0x911   :  { %2005 = vmatprep.mubr.f32.mxu0 %v11452_v1  ;;  %2076 = vmatprep.mubr.f32.mxu1 %v11452_v1 }
 0x913   :  { %7329 = vmatpush1.bf16.msra.mxu0 %v9639_v24  ;;  %7361 = vmatpush1.bf16.msra.mxu1 %v9643_v28 }
 0x914   :  { %7331 = vmatprep.subr.bf16.mxu0 %v9645_v29  ;;  %7363 = vmatprep.subr.bf16.mxu1 %v9647_v33 }
 0x917   :  { %7333 = vmatpush1.bf16.msra.mxu0 %v9650_v37  ;;  %7365 = vmatpush1.bf16.msra.mxu1 %v9654_v41 }
 0x918   :  { %7335 = vmatprep.subr.bf16.mxu0 %v9656_v42  ;;  %7367 = vmatprep.subr.bf16.mxu1 %v9659_v46 }
 0x91b   :  { %7337 = vmatpush1.bf16.msra.mxu0 %v9662_v53  ;;  %7369 = vmatpush1.bf16.msra.mxu1 %v9666_v54 }
 0x91c   :  { %7339 = vmatprep.subr.bf16.mxu0 %v9668_v55  ;;  %7371 = vmatprep.subr.bf16.mxu1 %v9671_v59 }
 0x91f   :  { %7341 = vmatpush1.bf16.msra.mxu0 %v9674_v2  ;;  %7373 = vmatpush1.bf16.msra.mxu1 %v9678_v3 }
 0x920   :  { %7343 = vmatprep.subr.bf16.mxu0 %v9680_v4  ;;  %7375 = vmatprep.subr.bf16.mxu1 %v9683_v9 }
 0x923   :  { %7345 = vmatpush1.bf16.msra.mxu0 %v9686_v18  ;;  %7377 = vmatpush1.bf16.msra.mxu1 %v9690_v22 }
 0x924   :  { %7347 = vmatprep.subr.bf16.mxu0 %v9692_v23  ;;  %7379 = vmatprep.subr.bf16.mxu1 %v9700_v30 }
 0x927   :  { %7349 = vmatpush1.bf16.msra.mxu0 %v9704_v38  ;;  %7381 = vmatpush1.bf16.msra.mxu1 %v9708_v39 }
 0x928   :  { %7351 = vmatprep.subr.bf16.mxu0 %v9710_v40  ;;  %7383 = vmatprep.subr.bf16.mxu1 %v9713_v45 }
 0x92b   :  { %7353 = vmatpush1.bf16.msra.mxu0 %v9716_v49  ;;  %7385 = vmatpush1.bf16.msra.mxu1 %v9720_v50 }
 0x92c   :  { %7387 = vmatprep.subr.bf16.mxu0 %v9623_v6  ;;  %7419 = vmatprep.subr.bf16.mxu1 %v9625_v10 }
 0x9e1   :  { %v1831_v27 = vpop.f32.mrb[18].mxu0  ;;  %v1902_v14 = vpop.f32.mrb[18].mxu1 }
 0x9e2   :  { %v1907_v17 = vadd.f32 %v1831_v27, %v1761_v60  ;;  %v1833_v36 = vpop.f32.mrb[19].mxu0  ;;  %v1904_v32 = vpop.f32.mrb[19].mxu1  ;;  %v1909_v13 = vadd.f32 %v1902_v14, %v1763_v57 }
 0x9e3   :  { %v1908_v52 = vadd.f32 %v1833_v36, %v1762_v63  ;;  %v1910_v31 = vadd.f32 %v1904_v32, %v1764_v0 }
 0x9e4   :  { %v1911_v43 = vmul.f32 0.5, %v1907_v17  ;;  %v1913_v35 = vmul.f32 0.5, %v1909_v13 }
 0x9e5   :  { %v1912_v62 = vmul.f32 0.5, %v1908_v52 }
 0x9e6   :  { %9181 = vtanh.f32 %v1911_v43 }
 0x9e7   :  { %9183 = vtanh.f32 %v1912_v62 }
 0x9e8   :  { %9185 = vtanh.f32 %v1910_v31 }
 0x9e9   :  { %9187 = vtanh.f32 %v1913_v35 }
 0x9f0   :  { %v9182_v25 = vpop.eup %9181 }
 0x9f1   :  { %v1917_v56 = vmul.f32 0.5, %v9182_v25  ;;  %v9184_v58 = vpop.eup %9183 }
 0x9f2   :  { %v1918_v21 = vmul.f32 0.5, %v9184_v58  ;;  %v9186_v27 = vpop.eup %9185  ;;  %v11459_v58 = vld [vmem:[#allocation9_spill] sm:$0xff] }
 0x9f3   :  { %v1920_v60 = vadd.f32 0.5, %v1917_v56  ;;  %v9188_v36 = vpop.eup %9187 }
 0x9f4   :  { %v1921_v7 = vadd.f32 0.5, %v1918_v21  ;;  %v1919_v0 = vmul.f32 0.5, %v9188_v36 }
 0x9f5   :  { %v1925_v44 = vmul.f32 %v9186_v27, %v1920_v60 }
 0x9f6   :  { %v1924_v63 = vmul.f32 %v1921_v7, %v10175_v48  ;;  %v1922_v32 = vadd.f32 0.5, %v1919_v0  ;;  %v9522_v48 = vmov 11   ;;  %v1931_v7 = vpop.permute.xlu1 %1930 }
 0x9f7   :  { %9066 = vset.pattern.permute.xlu0 %v9522_v48  ;;  %v1933_v52 = vmul.f32 %v1931_v7, %v9767_v61  ;;  %v1934_v43 = vmul.f32 %v1931_v7, %v9772_v5  ;;  %v1936_v31 = vmul.f32 %v1931_v7, %v9777_v12  ;;  %v1935_v27 = vmul.f32 %v1931_v7, %v9786_v26 }
 0x9f8   :  { %v10222_v17 = vadd.f32 %v1925_v44, %v1924_v63  ;;  %2106 = vperm.xlu0 %9066, %v10069_v51  }
 0x9f9   :  { %v1937_v62 = vadd.f32 %v1933_v52, %v9775_v8  ;;  %v1938_v57 = vadd.f32 %v1934_v43, %v9780_v16  ;;  %v1940_v60 = vadd.f32 %v1936_v31, %v11459_v58 }
 0x9fa   :  { %9189 = vtanh.f32 %v10222_v17 }
 0xa04   :  { %v9190_v14 = vpop.eup %9189 }
 0xa05   :  { %v1928_v34 = vmul.f32 %v9190_v14, %v1922_v32  ;;  %v1939_v32 = vadd.f32 %v1935_v27, %v9791_v47 }
 0xa07   :  { %2006 = vmatmul.mubr.f32.vlgmr.msra.gmra.mrb[20].mxu0 %v1928_v34  ;;  %2077 = vmatmul.mubr.f32.vlgmr.msra.gmra.mrb[20].mxu1 %v1928_v34 }
 0xa08   :  { %7389 = vmatpush1.bf16.msra.mxu0 %v9627_v11  ;;  %7421 = vmatpush1.bf16.msra.mxu1 %v9630_v15 }
 0xa09   :  { %7391 = vmatprep.subr.bf16.mxu0 %v9634_v19  ;;  %7423 = vmatprep.subr.bf16.mxu1 %v9636_v20 }
 0xa0a   :  { %2181 = vmatprep.mubr.f32.mxu0 %v11452_v1  ;;  %2252 = vmatprep.mubr.f32.mxu1 %v11452_v1 }
 0xa0c   :  { %7393 = vmatpush1.bf16.msra.mxu0 %v9639_v24  ;;  %7425 = vmatpush1.bf16.msra.mxu1 %v9643_v28 }
 0xa0d   :  { %7395 = vmatprep.subr.bf16.mxu0 %v9645_v29  ;;  %7427 = vmatprep.subr.bf16.mxu1 %v9647_v33 }
 0xa10   :  { %7397 = vmatpush1.bf16.msra.mxu0 %v9650_v37  ;;  %7429 = vmatpush1.bf16.msra.mxu1 %v9654_v41 }
 0xa11   :  { %7399 = vmatprep.subr.bf16.mxu0 %v9656_v42  ;;  %7431 = vmatprep.subr.bf16.mxu1 %v9659_v46 }
 0xa14   :  { %7401 = vmatpush1.bf16.msra.mxu0 %v9662_v53  ;;  %7433 = vmatpush1.bf16.msra.mxu1 %v9666_v54 }
 0xa15   :  { %7403 = vmatprep.subr.bf16.mxu0 %v9668_v55  ;;  %7435 = vmatprep.subr.bf16.mxu1 %v9671_v59 }
 0xa18   :  { %7405 = vmatpush1.bf16.msra.mxu0 %v9674_v2  ;;  %7437 = vmatpush1.bf16.msra.mxu1 %v9678_v3 }
 0xa19   :  { %7407 = vmatprep.subr.bf16.mxu0 %v9680_v4  ;;  %7439 = vmatprep.subr.bf16.mxu1 %v9683_v9 }
 0xa1c   :  { %7409 = vmatpush1.bf16.msra.mxu0 %v9686_v18  ;;  %7441 = vmatpush1.bf16.msra.mxu1 %v9690_v22 }
 0xa1d   :  { %7411 = vmatprep.subr.bf16.mxu0 %v9692_v23  ;;  %7443 = vmatprep.subr.bf16.mxu1 %v9700_v30 }
 0xa20   :  { %7413 = vmatpush1.bf16.msra.mxu0 %v9704_v38  ;;  %7445 = vmatpush1.bf16.msra.mxu1 %v9708_v39 }
 0xa21   :  { %7415 = vmatprep.subr.bf16.mxu0 %v9710_v40  ;;  %7447 = vmatprep.subr.bf16.mxu1 %v9713_v45 }
 0xa24   :  { %7417 = vmatpush1.bf16.msra.mxu0 %v9716_v49  ;;  %7449 = vmatpush1.bf16.msra.mxu1 %v9720_v50 }
 0xa25   :  { %7451 = vmatprep.subr.bf16.mxu0 %v9623_v6  ;;  %7483 = vmatprep.subr.bf16.mxu1 %v9625_v10 }
 0xada   :  { %v2007_v13 = vpop.f32.mrb[20].mxu0  ;;  %v2078_v35 = vpop.f32.mrb[20].mxu1 }
 0xadb   :  { %v2083_v25 = vadd.f32 %v2007_v13, %v1937_v62  ;;  %v2009_v56 = vpop.f32.mrb[21].mxu0  ;;  %v2080_v21 = vpop.f32.mrb[21].mxu1  ;;  %v2085_v14 = vadd.f32 %v2078_v35, %v1939_v32 }
 0xadc   :  { %v2084_v44 = vadd.f32 %v2009_v56, %v1938_v57  ;;  %v2086_v0 = vadd.f32 %v2080_v21, %v1940_v60 }
 0xadd   :  { %v2087_v63 = vmul.f32 0.5, %v2083_v25  ;;  %v2089_v34 = vmul.f32 0.5, %v2085_v14 }
 0xade   :  { %v2088_v36 = vmul.f32 0.5, %v2084_v44 }
 0xadf   :  { %9191 = vtanh.f32 %v2087_v63 }
 0xae0   :  { %9193 = vtanh.f32 %v2088_v36 }
 0xae1   :  { %9195 = vtanh.f32 %v2086_v0 }
 0xae2   :  { %9197 = vtanh.f32 %v2089_v34 }
 0xae9   :  { %v9192_v48 = vpop.eup %9191 }
 0xaea   :  { %v2093_v52 = vmul.f32 0.5, %v9192_v48  ;;  %v9194_v43 = vpop.eup %9193 }
 0xaeb   :  { %v2094_v31 = vmul.f32 0.5, %v9194_v43  ;;  %v9196_v13 = vpop.eup %9195  ;;  %v11460_v43 = vld [vmem:[#allocation9_spill] sm:$0xff] }
 0xaec   :  { %v2096_v62 = vadd.f32 0.5, %v2093_v52  ;;  %v9198_v56 = vpop.eup %9197 }
 0xaed   :  { %v2097_v58 = vadd.f32 0.5, %v2094_v31  ;;  %v2095_v60 = vmul.f32 0.5, %v9198_v56 }
 0xaee   :  { %v2101_v7 = vmul.f32 %v9196_v13, %v2096_v62 }
 0xaef   :  { %v2100_v57 = vmul.f32 %v2097_v58, %v10222_v17  ;;  %v2098_v21 = vadd.f32 0.5, %v2095_v60  ;;  %v9523_v17 = vmov 12   ;;  %v2107_v58 = vpop.permute.xlu0 %2106 }
 0xaf0   :  { %9067 = vset.pattern.permute.xlu1 %v9523_v17  ;;  %v2109_v44 = vmul.f32 %v2107_v58, %v9767_v61  ;;  %v2110_v63 = vmul.f32 %v2107_v58, %v9772_v5  ;;  %v2112_v0 = vmul.f32 %v2107_v58, %v9777_v12  ;;  %v2111_v13 = vmul.f32 %v2107_v58, %v9786_v26 }
 0xaf1   :  { %v10269_v25 = vadd.f32 %v2101_v7, %v2100_v57  ;;  %2282 = vperm.xlu1 %9067, %v10069_v51  }
 0xaf2   :  { %v2113_v36 = vadd.f32 %v2109_v44, %v9775_v8  ;;  %v2114_v32 = vadd.f32 %v2110_v63, %v9780_v16  ;;  %v2116_v62 = vadd.f32 %v2112_v0, %v11460_v43 }
 0xaf3   :  { %9199 = vtanh.f32 %v10269_v25 }
 0xafd   :  { %v9200_v35 = vpop.eup %9199 }
 0xafe   :  { %v2104_v27 = vmul.f32 %v9200_v35, %v2098_v21  ;;  %v2115_v21 = vadd.f32 %v2111_v13, %v9791_v47 }
 0xb00   :  { %2182 = vmatmul.mubr.f32.vlgmr.msra.gmra.mrb[22].mxu0 %v2104_v27  ;;  %2253 = vmatmul.mubr.f32.vlgmr.msra.gmra.mrb[22].mxu1 %v2104_v27 }
 0xb01   :  { %7453 = vmatpush1.bf16.msra.mxu0 %v9627_v11  ;;  %7485 = vmatpush1.bf16.msra.mxu1 %v9630_v15 }
 0xb02   :  { %7455 = vmatprep.subr.bf16.mxu0 %v9634_v19  ;;  %7487 = vmatprep.subr.bf16.mxu1 %v9636_v20 }
 0xb03   :  { %2357 = vmatprep.mubr.f32.mxu0 %v11452_v1  ;;  %2428 = vmatprep.mubr.f32.mxu1 %v11452_v1 }
 0xb05   :  { %7457 = vmatpush1.bf16.msra.mxu0 %v9639_v24  ;;  %7489 = vmatpush1.bf16.msra.mxu1 %v9643_v28 }
 0xb06   :  { %7459 = vmatprep.subr.bf16.mxu0 %v9645_v29  ;;  %7491 = vmatprep.subr.bf16.mxu1 %v9647_v33 }
 0xb09   :  { %7461 = vmatpush1.bf16.msra.mxu0 %v9650_v37  ;;  %7493 = vmatpush1.bf16.msra.mxu1 %v9654_v41 }
 0xb0a   :  { %7463 = vmatprep.subr.bf16.mxu0 %v9656_v42  ;;  %7495 = vmatprep.subr.bf16.mxu1 %v9659_v46 }
 0xb0d   :  { %7465 = vmatpush1.bf16.msra.mxu0 %v9662_v53  ;;  %7497 = vmatpush1.bf16.msra.mxu1 %v9666_v54 }
 0xb0e   :  { %7467 = vmatprep.subr.bf16.mxu0 %v9668_v55  ;;  %7499 = vmatprep.subr.bf16.mxu1 %v9671_v59 }
 0xb11   :  { %7469 = vmatpush1.bf16.msra.mxu0 %v9674_v2  ;;  %7501 = vmatpush1.bf16.msra.mxu1 %v9678_v3 }
 0xb12   :  { %7471 = vmatprep.subr.bf16.mxu0 %v9680_v4  ;;  %7503 = vmatprep.subr.bf16.mxu1 %v9683_v9 }
 0xb15   :  { %7473 = vmatpush1.bf16.msra.mxu0 %v9686_v18  ;;  %7505 = vmatpush1.bf16.msra.mxu1 %v9690_v22 }
 0xb16   :  { %7475 = vmatprep.subr.bf16.mxu0 %v9692_v23  ;;  %7507 = vmatprep.subr.bf16.mxu1 %v9700_v30 }
 0xb19   :  { %7477 = vmatpush1.bf16.msra.mxu0 %v9704_v38  ;;  %7509 = vmatpush1.bf16.msra.mxu1 %v9708_v39 }
 0xb1a   :  { %7479 = vmatprep.subr.bf16.mxu0 %v9710_v40  ;;  %7511 = vmatprep.subr.bf16.mxu1 %v9713_v45 }
 0xb1d   :  { %7481 = vmatpush1.bf16.msra.mxu0 %v9716_v49  ;;  %7513 = vmatpush1.bf16.msra.mxu1 %v9720_v50 }
 0xb1e   :  { %7515 = vmatprep.subr.bf16.mxu0 %v9623_v6  ;;  %7547 = vmatprep.subr.bf16.mxu1 %v9625_v10 }
 0xbd3   :  { %v2183_v14 = vpop.f32.mrb[22].mxu0  ;;  %v2254_v34 = vpop.f32.mrb[22].mxu1 }
 0xbd4   :  { %v2259_v48 = vadd.f32 %v2183_v14, %v2113_v36  ;;  %v2185_v52 = vpop.f32.mrb[23].mxu0  ;;  %v2256_v31 = vpop.f32.mrb[23].mxu1  ;;  %v2261_v35 = vadd.f32 %v2254_v34, %v2115_v21 }
 0xbd5   :  { %v2260_v7 = vadd.f32 %v2185_v52, %v2114_v32  ;;  %v2262_v60 = vadd.f32 %v2256_v31, %v2116_v62 }
 0xbd6   :  { %v2263_v57 = vmul.f32 0.5, %v2259_v48  ;;  %v2265_v27 = vmul.f32 0.5, %v2261_v35 }
 0xbd7   :  { %v2264_v56 = vmul.f32 0.5, %v2260_v7 }
 0xbd8   :  { %9201 = vtanh.f32 %v2263_v57 }
 0xbd9   :  { %9203 = vtanh.f32 %v2264_v56 }
 0xbda   :  { %9205 = vtanh.f32 %v2262_v60 }
 0xbdb   :  { %9207 = vtanh.f32 %v2265_v27 }
 0xbe2   :  { %v9202_v17 = vpop.eup %9201 }
 0xbe3   :  { %v2269_v44 = vmul.f32 0.5, %v9202_v17  ;;  %v9204_v63 = vpop.eup %9203 }
 0xbe4   :  { %v2270_v0 = vmul.f32 0.5, %v9204_v63  ;;  %v9206_v14 = vpop.eup %9205  ;;  %v11461_v63 = vld [vmem:[#allocation9_spill] sm:$0xff] }
 0xbe5   :  { %v2272_v36 = vadd.f32 0.5, %v2269_v44  ;;  %v9208_v52 = vpop.eup %9207 }
 0xbe6   :  { %v2273_v43 = vadd.f32 0.5, %v2270_v0  ;;  %v2271_v62 = vmul.f32 0.5, %v9208_v52 }
 0xbe7   :  { %v2277_v58 = vmul.f32 %v9206_v14, %v2272_v36 }
 0xbe8   :  { %v2276_v32 = vmul.f32 %v2273_v43, %v10269_v25  ;;  %v2274_v31 = vadd.f32 0.5, %v2271_v62  ;;  %v9524_v25 = vmov 13   ;;  %v2283_v43 = vpop.permute.xlu1 %2282 }
 0xbe9   :  { %9068 = vset.pattern.permute.xlu1 %v9524_v25  ;;  %v2285_v7 = vmul.f32 %v2283_v43, %v9767_v61  ;;  %v2286_v57 = vmul.f32 %v2283_v43, %v9772_v5  ;;  %v2288_v60 = vmul.f32 %v2283_v43, %v9777_v12 }
 0xbea   :  { %v10316_v48 = vadd.f32 %v2277_v58, %v2276_v32  ;;  %2458 = vperm.xlu1 %9068, %v10069_v51   ;;  %v2287_v51 = vmul.f32 %v2283_v43, %v9786_v26 }
 0xbeb   :  { %v2289_v56 = vadd.f32 %v2285_v7, %v9775_v8  ;;  %v2290_v21 = vadd.f32 %v2286_v57, %v9780_v16  ;;  %v2292_v36 = vadd.f32 %v2288_v60, %v11461_v63 }
 0xbec   :  { %9209 = vtanh.f32 %v10316_v48  ;;  %v2291_v62 = vadd.f32 %v2287_v51, %v9791_v47 }
 0xbf6   :  { %v9210_v34 = vpop.eup %9209 }
 0xbf7   :  { %v2280_v13 = vmul.f32 %v9210_v34, %v2274_v31 }
 0xbf9   :  { %2358 = vmatmul.mubr.f32.vlgmr.msra.gmra.mrb[24].mxu0 %v2280_v13  ;;  %2429 = vmatmul.mubr.f32.vlgmr.msra.gmra.mrb[24].mxu1 %v2280_v13 }
 0xbfa   :  { %7517 = vmatpush1.bf16.msra.mxu0 %v9627_v11  ;;  %7549 = vmatpush1.bf16.msra.mxu1 %v9630_v15 }
 0xbfb   :  { %7519 = vmatprep.subr.bf16.mxu0 %v9634_v19  ;;  %7551 = vmatprep.subr.bf16.mxu1 %v9636_v20 }
 0xbfc   :  { %2533 = vmatprep.mubr.f32.mxu0 %v11452_v1  ;;  %2604 = vmatprep.mubr.f32.mxu1 %v11452_v1 }
 0xbfe   :  { %7521 = vmatpush1.bf16.msra.mxu0 %v9639_v24  ;;  %7553 = vmatpush1.bf16.msra.mxu1 %v9643_v28 }
 0xbff   :  { %7523 = vmatprep.subr.bf16.mxu0 %v9645_v29  ;;  %7555 = vmatprep.subr.bf16.mxu1 %v9647_v33 }
 0xc02   :  { %7525 = vmatpush1.bf16.msra.mxu0 %v9650_v37  ;;  %7557 = vmatpush1.bf16.msra.mxu1 %v9654_v41 }
 0xc03   :  { %7527 = vmatprep.subr.bf16.mxu0 %v9656_v42  ;;  %7559 = vmatprep.subr.bf16.mxu1 %v9659_v46 }
 0xc06   :  { %7529 = vmatpush1.bf16.msra.mxu0 %v9662_v53  ;;  %7561 = vmatpush1.bf16.msra.mxu1 %v9666_v54 }
 0xc07   :  { %7531 = vmatprep.subr.bf16.mxu0 %v9668_v55  ;;  %7563 = vmatprep.subr.bf16.mxu1 %v9671_v59 }
 0xc0a   :  { %7533 = vmatpush1.bf16.msra.mxu0 %v9674_v2  ;;  %7565 = vmatpush1.bf16.msra.mxu1 %v9678_v3 }
 0xc0b   :  { %7535 = vmatprep.subr.bf16.mxu0 %v9680_v4  ;;  %7567 = vmatprep.subr.bf16.mxu1 %v9683_v9 }
 0xc0e   :  { %7537 = vmatpush1.bf16.msra.mxu0 %v9686_v18  ;;  %7569 = vmatpush1.bf16.msra.mxu1 %v9690_v22 }
 0xc0f   :  { %7539 = vmatprep.subr.bf16.mxu0 %v9692_v23  ;;  %7571 = vmatprep.subr.bf16.mxu1 %v9700_v30 }
 0xc12   :  { %7541 = vmatpush1.bf16.msra.mxu0 %v9704_v38  ;;  %7573 = vmatpush1.bf16.msra.mxu1 %v9708_v39 }
 0xc13   :  { %7543 = vmatprep.subr.bf16.mxu0 %v9710_v40  ;;  %7575 = vmatprep.subr.bf16.mxu1 %v9713_v45 }
 0xc16   :  { %7545 = vmatpush1.bf16.msra.mxu0 %v9716_v49  ;;  %7577 = vmatpush1.bf16.msra.mxu1 %v9720_v50 }
 0xc17   :  { %7579 = vmatprep.subr.bf16.mxu0 %v9623_v6  ;;  %7611 = vmatprep.subr.bf16.mxu1 %v9625_v10 }
 0xccc   :  { %v2359_v35 = vpop.f32.mrb[24].mxu0  ;;  %v2430_v27 = vpop.f32.mrb[24].mxu1 }
 0xccd   :  { %v2435_v17 = vadd.f32 %v2359_v35, %v2289_v56  ;;  %v2361_v44 = vpop.f32.mrb[25].mxu0  ;;  %v2432_v0 = vpop.f32.mrb[25].mxu1  ;;  %v2437_v31 = vadd.f32 %v2430_v27, %v2291_v62 }
 0xcce   :  { %v2436_v14 = vadd.f32 %v2361_v44, %v2290_v21  ;;  %v2438_v52 = vadd.f32 %v2432_v0, %v2292_v36 }
 0xccf   :  { %v2439_v58 = vmul.f32 0.5, %v2435_v17  ;;  %v2441_v34 = vmul.f32 0.5, %v2437_v31 }
 0xcd0   :  { %v2440_v32 = vmul.f32 0.5, %v2436_v14  ;;  %v10403_v14 = vld [vmem:[%s11434_s0] sm:$0x3] }
 0xcd1   :  { %9211 = vtanh.f32 %v2439_v58  ;;  %v2459_v58 = vpop.permute.xlu1 %2458 }
 0xcd2   :  { %9213 = vtanh.f32 %v2440_v32  ;;  %v2461_v32 = vmul.f32 %v2459_v58, %v9767_v61  ;;  %v2464_v31 = vmul.f32 %v2459_v58, %v9777_v12 }
 0xcd3   :  { %9215 = vtanh.f32 %v2438_v52  ;;  %v2462_v52 = vmul.f32 %v2459_v58, %v9772_v5 }
 0xcd4   :  { %9217 = vtanh.f32 %v2441_v34  ;;  %v2465_v62 = vadd.f32 %v2461_v32, %v9775_v8 }
 0xcd5   :  { %v2466_v34 = vadd.f32 %v2462_v52, %v9780_v16 }
 0xcdb   :  { %v9212_v13 = vpop.eup %9211 }
 0xcdc   :  { %v2445_v25 = vmul.f32 0.5, %v9212_v13  ;;  %v9214_v7 = vpop.eup %9213 }
 0xcdd   :  { %v2446_v56 = vmul.f32 0.5, %v9214_v7  ;;  %v9216_v60 = vpop.eup %9215 }
 0xcde   :  { %v2448_v57 = vadd.f32 0.5, %v2445_v25  ;;  %v9218_v44 = vpop.eup %9217 }
 0xcdf   :  { %v2449_v35 = vadd.f32 0.5, %v2446_v56  ;;  %v2447_v36 = vmul.f32 0.5, %v9218_v44  ;;  %v2468_v56 = vadd.f32 %v2464_v31, %v11461_v63 }
 0xce0   :  { %v2453_v43 = vmul.f32 %v9216_v60, %v2448_v57 }
 0xce1   :  { %v2452_v21 = vmul.f32 %v2449_v35, %v10316_v48  ;;  %v2450_v0 = vadd.f32 0.5, %v2447_v36  ;;  %v9525_v48 = vmov 14   ;;  %v2463_v35 = vmul.f32 %v2459_v58, %v9786_v26 }
 0xce2   :  { %9069 = vset.pattern.permute.xlu0 %v9525_v48 }
 0xce3   :  { %v10363_v17 = vadd.f32 %v2453_v43, %v2452_v21  ;;  %2634 = vperm.xlu0 %9069, %v10403_v14  }
 0xce5   :  { %9219 = vtanh.f32 %v10363_v17 }
 0xcef   :  { %v9220_v27 = vpop.eup %9219 }
 0xcf0   :  { %v2456_v51 = vmul.f32 %v9220_v27, %v2450_v0  ;;  %v2467_v0 = vadd.f32 %v2463_v35, %v9791_v47 }
 0xcf2   :  { %2534 = vmatmul.mubr.f32.vlgmr.msra.gmra.mrb[26].mxu0 %v2456_v51  ;;  %2605 = vmatmul.mubr.f32.vlgmr.msra.gmra.mrb[26].mxu1 %v2456_v51 }
 0xcf3   :  { %7581 = vmatpush1.bf16.msra.mxu0 %v9627_v11  ;;  %7613 = vmatpush1.bf16.msra.mxu1 %v9630_v15 }
 0xcf4   :  { %7583 = vmatprep.subr.bf16.mxu0 %v9634_v19  ;;  %7615 = vmatprep.subr.bf16.mxu1 %v9636_v20 }
 0xcf5   :  { %2709 = vmatprep.mubr.f32.mxu0 %v11452_v1  ;;  %2780 = vmatprep.mubr.f32.mxu1 %v11452_v1 }
 0xcf7   :  { %7585 = vmatpush1.bf16.msra.mxu0 %v9639_v24  ;;  %7617 = vmatpush1.bf16.msra.mxu1 %v9643_v28 }
 0xcf8   :  { %7587 = vmatprep.subr.bf16.mxu0 %v9645_v29  ;;  %7619 = vmatprep.subr.bf16.mxu1 %v9647_v33 }
 0xcfb   :  { %7589 = vmatpush1.bf16.msra.mxu0 %v9650_v37  ;;  %7621 = vmatpush1.bf16.msra.mxu1 %v9654_v41 }
 0xcfc   :  { %7591 = vmatprep.subr.bf16.mxu0 %v9656_v42  ;;  %7623 = vmatprep.subr.bf16.mxu1 %v9659_v46 }
 0xcff   :  { %7593 = vmatpush1.bf16.msra.mxu0 %v9662_v53  ;;  %7625 = vmatpush1.bf16.msra.mxu1 %v9666_v54 }
 0xd00   :  { %7595 = vmatprep.subr.bf16.mxu0 %v9668_v55  ;;  %7627 = vmatprep.subr.bf16.mxu1 %v9671_v59 }
 0xd03   :  { %7597 = vmatpush1.bf16.msra.mxu0 %v9674_v2  ;;  %7629 = vmatpush1.bf16.msra.mxu1 %v9678_v3 }
 0xd04   :  { %7599 = vmatprep.subr.bf16.mxu0 %v9680_v4  ;;  %7631 = vmatprep.subr.bf16.mxu1 %v9683_v9 }
 0xd07   :  { %7601 = vmatpush1.bf16.msra.mxu0 %v9686_v18  ;;  %7633 = vmatpush1.bf16.msra.mxu1 %v9690_v22 }
 0xd08   :  { %7603 = vmatprep.subr.bf16.mxu0 %v9692_v23  ;;  %7635 = vmatprep.subr.bf16.mxu1 %v9700_v30 }
 0xd0b   :  { %7605 = vmatpush1.bf16.msra.mxu0 %v9704_v38  ;;  %7637 = vmatpush1.bf16.msra.mxu1 %v9708_v39 }
 0xd0c   :  { %7607 = vmatprep.subr.bf16.mxu0 %v9710_v40  ;;  %7639 = vmatprep.subr.bf16.mxu1 %v9713_v45 }
 0xd0f   :  { %7609 = vmatpush1.bf16.msra.mxu0 %v9716_v49  ;;  %7641 = vmatpush1.bf16.msra.mxu1 %v9720_v50 }
 0xd10   :  { %7643 = vmatprep.subr.bf16.mxu0 %v9623_v6  ;;  %7675 = vmatprep.subr.bf16.mxu1 %v9625_v10 }
 0xdc5   :  { %v2535_v13 = vpop.f32.mrb[26].mxu0  ;;  %v2606_v25 = vpop.f32.mrb[26].mxu1 }
 0xdc6   :  { %v2611_v7 = vadd.f32 %v2535_v13, %v2465_v62  ;;  %v2537_v57 = vpop.f32.mrb[27].mxu0  ;;  %v2608_v60 = vpop.f32.mrb[27].mxu1  ;;  %v2613_v27 = vadd.f32 %v2606_v25, %v2467_v0 }
 0xdc7   :  { %v2612_v43 = vadd.f32 %v2537_v57, %v2466_v34  ;;  %v2614_v36 = vadd.f32 %v2608_v60, %v2468_v56 }
 0xdc8   :  { %v2615_v21 = vmul.f32 0.5, %v2611_v7  ;;  %v2617_v51 = vmul.f32 0.5, %v2613_v27 }
 0xdc9   :  { %v2616_v44 = vmul.f32 0.5, %v2612_v43 }
 0xdca   :  { %9221 = vtanh.f32 %v2615_v21 }
 0xdcb   :  { %9223 = vtanh.f32 %v2616_v44 }
 0xdcc   :  { %9225 = vtanh.f32 %v2614_v36 }
 0xdcd   :  { %9227 = vtanh.f32 %v2617_v51 }
 0xdd4   :  { %v9222_v48 = vpop.eup %9221 }
 0xdd5   :  { %v2621_v32 = vmul.f32 0.5, %v9222_v48  ;;  %v9224_v52 = vpop.eup %9223 }
 0xdd6   :  { %v2622_v31 = vmul.f32 0.5, %v9224_v52  ;;  %v9226_v13 = vpop.eup %9225  ;;  %v11462_v52 = vld [vmem:[#allocation9_spill] sm:$0xff] }
 0xdd7   :  { %v2624_v62 = vadd.f32 0.5, %v2621_v32  ;;  %v9228_v57 = vpop.eup %9227 }
 0xdd8   :  { %v2625_v63 = vadd.f32 0.5, %v2622_v31  ;;  %v2623_v56 = vmul.f32 0.5, %v9228_v57 }
 0xdd9   :  { %v2629_v58 = vmul.f32 %v9226_v13, %v2624_v62 }
 0xdda   :  { %v2628_v34 = vmul.f32 %v2625_v63, %v10363_v17  ;;  %v2626_v60 = vadd.f32 0.5, %v2623_v56  ;;  %v9526_v63 = vmov 15   ;;  %v2635_v17 = vpop.permute.xlu0 %2634 }
 0xddb   :  { %9070 = vset.pattern.permute.xlu1 %v9526_v63  ;;  %v2637_v43 = vmul.f32 %v2635_v17, %v9767_v61  ;;  %v2638_v21 = vmul.f32 %v2635_v17, %v9772_v5  ;;  %v2640_v36 = vmul.f32 %v2635_v17, %v9777_v12  ;;  %v2639_v13 = vmul.f32 %v2635_v17, %v9786_v26 }
 0xddc   :  { %v10415_v7 = vadd.f32 %v2629_v58, %v2628_v34  ;;  %2810 = vperm.xlu1 %9070, %v10403_v14  }
 0xddd   :  { %v2641_v44 = vadd.f32 %v2637_v43, %v9775_v8  ;;  %v2642_v0 = vadd.f32 %v2638_v21, %v9780_v16  ;;  %v2644_v62 = vadd.f32 %v2640_v36, %v11462_v52 }
 0xdde   :  { %9229 = vtanh.f32 %v10415_v7 }
 0xde8   :  { %v9230_v25 = vpop.eup %9229 }
 0xde9   :  { %v2632_v35 = vmul.f32 %v9230_v25, %v2626_v60  ;;  %v2643_v60 = vadd.f32 %v2639_v13, %v9791_v47 }
 0xdeb   :  { %2710 = vmatmul.mubr.f32.vlgmr.msra.gmra.mrb[28].mxu0 %v2632_v35  ;;  %2781 = vmatmul.mubr.f32.vlgmr.msra.gmra.mrb[28].mxu1 %v2632_v35 }
 0xdec   :  { %7645 = vmatpush1.bf16.msra.mxu0 %v9627_v11  ;;  %7677 = vmatpush1.bf16.msra.mxu1 %v9630_v15 }
 0xded   :  { %7647 = vmatprep.subr.bf16.mxu0 %v9634_v19  ;;  %7679 = vmatprep.subr.bf16.mxu1 %v9636_v20 }
 0xdee   :  { %2885 = vmatprep.mubr.f32.mxu0 %v11452_v1  ;;  %2956 = vmatprep.mubr.f32.mxu1 %v11452_v1 }
 0xdf0   :  { %7649 = vmatpush1.bf16.msra.mxu0 %v9639_v24  ;;  %7681 = vmatpush1.bf16.msra.mxu1 %v9643_v28 }
 0xdf1   :  { %7651 = vmatprep.subr.bf16.mxu0 %v9645_v29  ;;  %7683 = vmatprep.subr.bf16.mxu1 %v9647_v33 }
 0xdf4   :  { %7653 = vmatpush1.bf16.msra.mxu0 %v9650_v37  ;;  %7685 = vmatpush1.bf16.msra.mxu1 %v9654_v41 }
 0xdf5   :  { %7655 = vmatprep.subr.bf16.mxu0 %v9656_v42  ;;  %7687 = vmatprep.subr.bf16.mxu1 %v9659_v46 }
 0xdf8   :  { %7657 = vmatpush1.bf16.msra.mxu0 %v9662_v53  ;;  %7689 = vmatpush1.bf16.msra.mxu1 %v9666_v54 }
 0xdf9   :  { %7659 = vmatprep.subr.bf16.mxu0 %v9668_v55  ;;  %7691 = vmatprep.subr.bf16.mxu1 %v9671_v59 }
 0xdfc   :  { %7661 = vmatpush1.bf16.msra.mxu0 %v9674_v2  ;;  %7693 = vmatpush1.bf16.msra.mxu1 %v9678_v3 }
 0xdfd   :  { %7663 = vmatprep.subr.bf16.mxu0 %v9680_v4  ;;  %7695 = vmatprep.subr.bf16.mxu1 %v9683_v9 }
 0xe00   :  { %7665 = vmatpush1.bf16.msra.mxu0 %v9686_v18  ;;  %7697 = vmatpush1.bf16.msra.mxu1 %v9690_v22 }
 0xe01   :  { %7667 = vmatprep.subr.bf16.mxu0 %v9692_v23  ;;  %7699 = vmatprep.subr.bf16.mxu1 %v9700_v30 }
 0xe04   :  { %7669 = vmatpush1.bf16.msra.mxu0 %v9704_v38  ;;  %7701 = vmatpush1.bf16.msra.mxu1 %v9708_v39 }
 0xe05   :  { %7671 = vmatprep.subr.bf16.mxu0 %v9710_v40  ;;  %7703 = vmatprep.subr.bf16.mxu1 %v9713_v45 }
 0xe08   :  { %7673 = vmatpush1.bf16.msra.mxu0 %v9716_v49  ;;  %7705 = vmatpush1.bf16.msra.mxu1 %v9720_v50 }
 0xe09   :  { %7707 = vmatprep.subr.bf16.mxu0 %v9623_v6  ;;  %7739 = vmatprep.subr.bf16.mxu1 %v9625_v10 }
 0xebe   :  { %v2711_v27 = vpop.f32.mrb[28].mxu0  ;;  %v2782_v51 = vpop.f32.mrb[28].mxu1 }
 0xebf   :  { %v2787_v48 = vadd.f32 %v2711_v27, %v2641_v44  ;;  %v2713_v32 = vpop.f32.mrb[29].mxu0  ;;  %v2784_v31 = vpop.f32.mrb[29].mxu1  ;;  %v2789_v25 = vadd.f32 %v2782_v51, %v2643_v60 }
 0xec0   :  { %v2788_v58 = vadd.f32 %v2713_v32, %v2642_v0  ;;  %v2790_v56 = vadd.f32 %v2784_v31, %v2644_v62 }
 0xec1   :  { %v2791_v34 = vmul.f32 0.5, %v2787_v48  ;;  %v2793_v35 = vmul.f32 0.5, %v2789_v25 }
 0xec2   :  { %v2792_v57 = vmul.f32 0.5, %v2788_v58 }
 0xec3   :  { %9231 = vtanh.f32 %v2791_v34 }
 0xec4   :  { %9233 = vtanh.f32 %v2792_v57 }
 0xec5   :  { %9235 = vtanh.f32 %v2790_v56 }
 0xec6   :  { %9237 = vtanh.f32 %v2793_v35 }
 0xecd   :  { %v9232_v63 = vpop.eup %9231 }
 0xece   :  { %v2797_v43 = vmul.f32 0.5, %v9232_v63  ;;  %v9234_v21 = vpop.eup %9233 }
 0xecf   :  { %v2798_v36 = vmul.f32 0.5, %v9234_v21  ;;  %v9236_v27 = vpop.eup %9235  ;;  %v11463_v21 = vld [vmem:[#allocation9_spill] sm:$0xff] }
 0xed0   :  { %v2800_v44 = vadd.f32 0.5, %v2797_v43  ;;  %v9238_v32 = vpop.eup %9237 }
 0xed1   :  { %v2801_v52 = vadd.f32 0.5, %v2798_v36  ;;  %v2799_v62 = vmul.f32 0.5, %v9238_v32 }
 0xed2   :  { %v2805_v17 = vmul.f32 %v9236_v27, %v2800_v44 }
 0xed3   :  { %v2804_v0 = vmul.f32 %v2801_v52, %v10415_v7  ;;  %v2802_v31 = vadd.f32 0.5, %v2799_v62  ;;  %v9527_v7 = vmov 16   ;;  %v2811_v52 = vpop.permute.xlu1 %2810 }
 0xed4   :  { %9071 = vset.pattern.permute.xlu1 %v9527_v7  ;;  %v2813_v58 = vmul.f32 %v2811_v52, %v9767_v61  ;;  %v2814_v34 = vmul.f32 %v2811_v52, %v9772_v5  ;;  %v2816_v56 = vmul.f32 %v2811_v52, %v9777_v12  ;;  %v2815_v27 = vmul.f32 %v2811_v52, %v9786_v26 }
 0xed5   :  { %v10462_v48 = vadd.f32 %v2805_v17, %v2804_v0  ;;  %2986 = vperm.xlu1 %9071, %v10403_v14  }
 0xed6   :  { %v2817_v57 = vadd.f32 %v2813_v58, %v9775_v8  ;;  %v2818_v60 = vadd.f32 %v2814_v34, %v9780_v16  ;;  %v2820_v44 = vadd.f32 %v2816_v56, %v11463_v21 }
 0xed7   :  { %9239 = vtanh.f32 %v10462_v48 }
 0xee1   :  { %v9240_v51 = vpop.eup %9239 }
 0xee2   :  { %v2808_v13 = vmul.f32 %v9240_v51, %v2802_v31  ;;  %v2819_v31 = vadd.f32 %v2815_v27, %v9791_v47 }
 0xee4   :  { %2886 = vmatmul.mubr.f32.vlgmr.msra.gmra.mrb[30].mxu0 %v2808_v13  ;;  %2957 = vmatmul.mubr.f32.vlgmr.msra.gmra.mrb[30].mxu1 %v2808_v13 }
 0xee5   :  { %7709 = vmatpush1.bf16.msra.mxu0 %v9627_v11  ;;  %7741 = vmatpush1.bf16.msra.mxu1 %v9630_v15 }
 0xee6   :  { %7711 = vmatprep.subr.bf16.mxu0 %v9634_v19  ;;  %7743 = vmatprep.subr.bf16.mxu1 %v9636_v20 }
 0xee7   :  { %3061 = vmatprep.mubr.f32.mxu0 %v11452_v1  ;;  %3132 = vmatprep.mubr.f32.mxu1 %v11452_v1 }
 0xee9   :  { %7713 = vmatpush1.bf16.msra.mxu0 %v9639_v24  ;;  %7745 = vmatpush1.bf16.msra.mxu1 %v9643_v28 }
 0xeea   :  { %7715 = vmatprep.subr.bf16.mxu0 %v9645_v29  ;;  %7747 = vmatprep.subr.bf16.mxu1 %v9647_v33 }
 0xeed   :  { %7717 = vmatpush1.bf16.msra.mxu0 %v9650_v37  ;;  %7749 = vmatpush1.bf16.msra.mxu1 %v9654_v41 }
 0xeee   :  { %7719 = vmatprep.subr.bf16.mxu0 %v9656_v42  ;;  %7751 = vmatprep.subr.bf16.mxu1 %v9659_v46 }
 0xef1   :  { %7721 = vmatpush1.bf16.msra.mxu0 %v9662_v53  ;;  %7753 = vmatpush1.bf16.msra.mxu1 %v9666_v54 }
 0xef2   :  { %7723 = vmatprep.subr.bf16.mxu0 %v9668_v55  ;;  %7755 = vmatprep.subr.bf16.mxu1 %v9671_v59 }
 0xef5   :  { %7725 = vmatpush1.bf16.msra.mxu0 %v9674_v2  ;;  %7757 = vmatpush1.bf16.msra.mxu1 %v9678_v3 }
 0xef6   :  { %7727 = vmatprep.subr.bf16.mxu0 %v9680_v4  ;;  %7759 = vmatprep.subr.bf16.mxu1 %v9683_v9 }
 0xef9   :  { %7729 = vmatpush1.bf16.msra.mxu0 %v9686_v18  ;;  %7761 = vmatpush1.bf16.msra.mxu1 %v9690_v22 }
 0xefa   :  { %7731 = vmatprep.subr.bf16.mxu0 %v9692_v23  ;;  %7763 = vmatprep.subr.bf16.mxu1 %v9700_v30 }
 0xefd   :  { %7733 = vmatpush1.bf16.msra.mxu0 %v9704_v38  ;;  %7765 = vmatpush1.bf16.msra.mxu1 %v9708_v39 }
 0xefe   :  { %7735 = vmatprep.subr.bf16.mxu0 %v9710_v40  ;;  %7767 = vmatprep.subr.bf16.mxu1 %v9713_v45 }
 0xf01   :  { %7737 = vmatpush1.bf16.msra.mxu0 %v9716_v49  ;;  %7769 = vmatpush1.bf16.msra.mxu1 %v9720_v50 }
 0xf02   :  { %7771 = vmatprep.subr.bf16.mxu0 %v9623_v6  ;;  %7803 = vmatprep.subr.bf16.mxu1 %v9625_v10 }
 0xfb7   :  { %v2887_v25 = vpop.f32.mrb[30].mxu0  ;;  %v2958_v35 = vpop.f32.mrb[30].mxu1 }
 0xfb8   :  { %v2963_v63 = vadd.f32 %v2887_v25, %v2817_v57  ;;  %v2889_v43 = vpop.f32.mrb[31].mxu0  ;;  %v2960_v36 = vpop.f32.mrb[31].mxu1  ;;  %v2965_v51 = vadd.f32 %v2958_v35, %v2819_v31 }
 0xfb9   :  { %v2964_v17 = vadd.f32 %v2889_v43, %v2818_v60  ;;  %v2966_v62 = vadd.f32 %v2960_v36, %v2820_v44 }
 0xfba   :  { %v2967_v0 = vmul.f32 0.5, %v2963_v63  ;;  %v2969_v13 = vmul.f32 0.5, %v2965_v51 }
 0xfbb   :  { %v2968_v32 = vmul.f32 0.5, %v2964_v17 }
 0xfbc   :  { %9241 = vtanh.f32 %v2967_v0 }
 0xfbd   :  { %9243 = vtanh.f32 %v2968_v32 }
 0xfbe   :  { %9245 = vtanh.f32 %v2966_v62 }
 0xfbf   :  { %9247 = vtanh.f32 %v2969_v13 }
 0xfc6   :  { %v9242_v7 = vpop.eup %9241 }
 0xfc7   :  { %v2973_v58 = vmul.f32 0.5, %v9242_v7  ;;  %v9244_v34 = vpop.eup %9243 }
 0xfc8   :  { %v2974_v56 = vmul.f32 0.5, %v9244_v34  ;;  %v9246_v25 = vpop.eup %9245  ;;  %v11464_v34 = vld [vmem:[#allocation9_spill] sm:$0xff] }
 0xfc9   :  { %v2976_v57 = vadd.f32 0.5, %v2973_v58  ;;  %v9248_v43 = vpop.eup %9247 }
 0xfca   :  { %v2977_v21 = vadd.f32 0.5, %v2974_v56  ;;  %v2975_v44 = vmul.f32 0.5, %v9248_v43 }
 0xfcb   :  { %v2981_v52 = vmul.f32 %v9246_v25, %v2976_v57 }
 0xfcc   :  { %v2980_v60 = vmul.f32 %v2977_v21, %v10462_v48  ;;  %v2978_v36 = vadd.f32 0.5, %v2975_v44  ;;  %v9528_v48 = vmov 17   ;;  %v2987_v21 = vpop.permute.xlu1 %2986 }
 0xfcd   :  { %9072 = vset.pattern.permute.xlu0 %v9528_v48  ;;  %v2989_v17 = vmul.f32 %v2987_v21, %v9767_v61  ;;  %v2990_v0 = vmul.f32 %v2987_v21, %v9772_v5  ;;  %v2992_v62 = vmul.f32 %v2987_v21, %v9777_v12  ;;  %v2991_v25 = vmul.f32 %v2987_v21, %v9786_v26 }
 0xfce   :  { %v10509_v63 = vadd.f32 %v2981_v52, %v2980_v60  ;;  %3162 = vperm.xlu0 %9072, %v10403_v14  }
 0xfcf   :  { %v2993_v32 = vadd.f32 %v2989_v17, %v9775_v8  ;;  %v2994_v31 = vadd.f32 %v2990_v0, %v9780_v16  ;;  %v2996_v57 = vadd.f32 %v2992_v62, %v11464_v34 }
 0xfd0   :  { %9249 = vtanh.f32 %v10509_v63 }
 0xfda   :  { %v9250_v35 = vpop.eup %9249 }
 0xfdb   :  { %v2984_v27 = vmul.f32 %v9250_v35, %v2978_v36  ;;  %v2995_v36 = vadd.f32 %v2991_v25, %v9791_v47 }
 0xfdd   :  { %3062 = vmatmul.mubr.f32.vlgmr.msra.gmra.mrb[32].mxu0 %v2984_v27  ;;  %3133 = vmatmul.mubr.f32.vlgmr.msra.gmra.mrb[32].mxu1 %v2984_v27 }
 0xfde   :  { %7773 = vmatpush1.bf16.msra.mxu0 %v9627_v11  ;;  %7805 = vmatpush1.bf16.msra.mxu1 %v9630_v15 }
 0xfdf   :  { %7775 = vmatprep.subr.bf16.mxu0 %v9634_v19  ;;  %7807 = vmatprep.subr.bf16.mxu1 %v9636_v20 }
 0xfe0   :  { %3237 = vmatprep.mubr.f32.mxu0 %v11452_v1  ;;  %3308 = vmatprep.mubr.f32.mxu1 %v11452_v1 }
 0xfe2   :  { %7777 = vmatpush1.bf16.msra.mxu0 %v9639_v24  ;;  %7809 = vmatpush1.bf16.msra.mxu1 %v9643_v28 }
 0xfe3   :  { %7779 = vmatprep.subr.bf16.mxu0 %v9645_v29  ;;  %7811 = vmatprep.subr.bf16.mxu1 %v9647_v33 }
 0xfe6   :  { %7781 = vmatpush1.bf16.msra.mxu0 %v9650_v37  ;;  %7813 = vmatpush1.bf16.msra.mxu1 %v9654_v41 }
 0xfe7   :  { %7783 = vmatprep.subr.bf16.mxu0 %v9656_v42  ;;  %7815 = vmatprep.subr.bf16.mxu1 %v9659_v46 }
 0xfea   :  { %7785 = vmatpush1.bf16.msra.mxu0 %v9662_v53  ;;  %7817 = vmatpush1.bf16.msra.mxu1 %v9666_v54 }
 0xfeb   :  { %7787 = vmatprep.subr.bf16.mxu0 %v9668_v55  ;;  %7819 = vmatprep.subr.bf16.mxu1 %v9671_v59 }
 0xfee   :  { %7789 = vmatpush1.bf16.msra.mxu0 %v9674_v2  ;;  %7821 = vmatpush1.bf16.msra.mxu1 %v9678_v3 }
 0xfef   :  { %7791 = vmatprep.subr.bf16.mxu0 %v9680_v4  ;;  %7823 = vmatprep.subr.bf16.mxu1 %v9683_v9 }
 0xff2   :  { %7793 = vmatpush1.bf16.msra.mxu0 %v9686_v18  ;;  %7825 = vmatpush1.bf16.msra.mxu1 %v9690_v22 }
 0xff3   :  { %7795 = vmatprep.subr.bf16.mxu0 %v9692_v23  ;;  %7827 = vmatprep.subr.bf16.mxu1 %v9700_v30 }
 0xff6   :  { %7797 = vmatpush1.bf16.msra.mxu0 %v9704_v38  ;;  %7829 = vmatpush1.bf16.msra.mxu1 %v9708_v39 }
 0xff7   :  { %7799 = vmatprep.subr.bf16.mxu0 %v9710_v40  ;;  %7831 = vmatprep.subr.bf16.mxu1 %v9713_v45 }
 0xffa   :  { %7801 = vmatpush1.bf16.msra.mxu0 %v9716_v49  ;;  %7833 = vmatpush1.bf16.msra.mxu1 %v9720_v50 }
 0xffb   :  { %7835 = vmatprep.subr.bf16.mxu0 %v9623_v6  ;;  %7867 = vmatprep.subr.bf16.mxu1 %v9625_v10 }
0x10b0   :  { %v3063_v51 = vpop.f32.mrb[32].mxu0  ;;  %v3134_v13 = vpop.f32.mrb[32].mxu1 }
0x10b1   :  { %v3139_v7 = vadd.f32 %v3063_v51, %v2993_v32  ;;  %v3065_v58 = vpop.f32.mrb[33].mxu0  ;;  %v3136_v56 = vpop.f32.mrb[33].mxu1  ;;  %v3141_v35 = vadd.f32 %v3134_v13, %v2995_v36 }
0x10b2   :  { %v3140_v52 = vadd.f32 %v3065_v58, %v2994_v31  ;;  %v3142_v44 = vadd.f32 %v3136_v56, %v2996_v57 }
0x10b3   :  { %v3143_v60 = vmul.f32 0.5, %v3139_v7  ;;  %v3145_v27 = vmul.f32 0.5, %v3141_v35 }
0x10b4   :  { %v3144_v43 = vmul.f32 0.5, %v3140_v52 }
0x10b5   :  { %9251 = vtanh.f32 %v3143_v60 }
0x10b6   :  { %9253 = vtanh.f32 %v3144_v43 }
0x10b7   :  { %9255 = vtanh.f32 %v3142_v44 }
0x10b8   :  { %9257 = vtanh.f32 %v3145_v27 }
0x10bf   :  { %v9252_v48 = vpop.eup %9251 }
0x10c0   :  { %v3149_v17 = vmul.f32 0.5, %v9252_v48  ;;  %v9254_v0 = vpop.eup %9253 }
0x10c1   :  { %v3150_v62 = vmul.f32 0.5, %v9254_v0  ;;  %v9256_v51 = vpop.eup %9255  ;;  %v11465_v0 = vld [vmem:[#allocation9_spill] sm:$0xff] }
0x10c2   :  { %v3152_v32 = vadd.f32 0.5, %v3149_v17  ;;  %v9258_v58 = vpop.eup %9257 }
0x10c3   :  { %v3153_v34 = vadd.f32 0.5, %v3150_v62  ;;  %v3151_v57 = vmul.f32 0.5, %v9258_v58 }
0x10c4   :  { %v3157_v21 = vmul.f32 %v9256_v51, %v3152_v32 }
0x10c5   :  { %v3156_v31 = vmul.f32 %v3153_v34, %v10509_v63  ;;  %v3154_v56 = vadd.f32 0.5, %v3151_v57  ;;  %v9529_v63 = vmov 18   ;;  %v3163_v34 = vpop.permute.xlu0 %3162 }
0x10c6   :  { %9073 = vset.pattern.permute.xlu1 %v9529_v63  ;;  %v3165_v52 = vmul.f32 %v3163_v34, %v9767_v61  ;;  %v3166_v60 = vmul.f32 %v3163_v34, %v9772_v5  ;;  %v3168_v44 = vmul.f32 %v3163_v34, %v9777_v12  ;;  %v3167_v51 = vmul.f32 %v3163_v34, %v9786_v26 }
0x10c7   :  { %v10556_v7 = vadd.f32 %v3157_v21, %v3156_v31  ;;  %3338 = vperm.xlu1 %9073, %v10403_v14  }
0x10c8   :  { %v3169_v43 = vadd.f32 %v3165_v52, %v9775_v8  ;;  %v3170_v36 = vadd.f32 %v3166_v60, %v9780_v16  ;;  %v3172_v32 = vadd.f32 %v3168_v44, %v11465_v0 }
0x10c9   :  { %9259 = vtanh.f32 %v10556_v7 }
0x10d3   :  { %v9260_v13 = vpop.eup %9259 }
0x10d4   :  { %v3160_v25 = vmul.f32 %v9260_v13, %v3154_v56  ;;  %v3171_v56 = vadd.f32 %v3167_v51, %v9791_v47 }
0x10d6   :  { %3238 = vmatmul.mubr.f32.vlgmr.msra.gmra.mrb[34].mxu0 %v3160_v25  ;;  %3309 = vmatmul.mubr.f32.vlgmr.msra.gmra.mrb[34].mxu1 %v3160_v25 }
0x10d7   :  { %7837 = vmatpush1.bf16.msra.mxu0 %v9627_v11  ;;  %7869 = vmatpush1.bf16.msra.mxu1 %v9630_v15 }
0x10d8   :  { %7839 = vmatprep.subr.bf16.mxu0 %v9634_v19  ;;  %7871 = vmatprep.subr.bf16.mxu1 %v9636_v20 }
0x10d9   :  { %3413 = vmatprep.mubr.f32.mxu0 %v11452_v1  ;;  %3484 = vmatprep.mubr.f32.mxu1 %v11452_v1 }
0x10db   :  { %7841 = vmatpush1.bf16.msra.mxu0 %v9639_v24  ;;  %7873 = vmatpush1.bf16.msra.mxu1 %v9643_v28 }
0x10dc   :  { %7843 = vmatprep.subr.bf16.mxu0 %v9645_v29  ;;  %7875 = vmatprep.subr.bf16.mxu1 %v9647_v33 }
0x10df   :  { %7845 = vmatpush1.bf16.msra.mxu0 %v9650_v37  ;;  %7877 = vmatpush1.bf16.msra.mxu1 %v9654_v41 }
0x10e0   :  { %7847 = vmatprep.subr.bf16.mxu0 %v9656_v42  ;;  %7879 = vmatprep.subr.bf16.mxu1 %v9659_v46 }
0x10e3   :  { %7849 = vmatpush1.bf16.msra.mxu0 %v9662_v53  ;;  %7881 = vmatpush1.bf16.msra.mxu1 %v9666_v54 }
0x10e4   :  { %7851 = vmatprep.subr.bf16.mxu0 %v9668_v55  ;;  %7883 = vmatprep.subr.bf16.mxu1 %v9671_v59 }
0x10e7   :  { %7853 = vmatpush1.bf16.msra.mxu0 %v9674_v2  ;;  %7885 = vmatpush1.bf16.msra.mxu1 %v9678_v3 }
0x10e8   :  { %7855 = vmatprep.subr.bf16.mxu0 %v9680_v4  ;;  %7887 = vmatprep.subr.bf16.mxu1 %v9683_v9 }
0x10eb   :  { %7857 = vmatpush1.bf16.msra.mxu0 %v9686_v18  ;;  %7889 = vmatpush1.bf16.msra.mxu1 %v9690_v22 }
0x10ec   :  { %7859 = vmatprep.subr.bf16.mxu0 %v9692_v23  ;;  %7891 = vmatprep.subr.bf16.mxu1 %v9700_v30 }
0x10ef   :  { %7861 = vmatpush1.bf16.msra.mxu0 %v9704_v38  ;;  %7893 = vmatpush1.bf16.msra.mxu1 %v9708_v39 }
0x10f0   :  { %7863 = vmatprep.subr.bf16.mxu0 %v9710_v40  ;;  %7895 = vmatprep.subr.bf16.mxu1 %v9713_v45 }
0x10f3   :  { %7865 = vmatpush1.bf16.msra.mxu0 %v9716_v49  ;;  %7897 = vmatpush1.bf16.msra.mxu1 %v9720_v50 }
0x10f4   :  { %7899 = vmatprep.subr.bf16.mxu0 %v9623_v6  ;;  %7931 = vmatprep.subr.bf16.mxu1 %v9625_v10 }
0x11a9   :  { %v3239_v35 = vpop.f32.mrb[34].mxu0  ;;  %v3310_v27 = vpop.f32.mrb[34].mxu1 }
0x11aa   :  { %v3315_v48 = vadd.f32 %v3239_v35, %v3169_v43  ;;  %v3241_v17 = vpop.f32.mrb[35].mxu0  ;;  %v3312_v62 = vpop.f32.mrb[35].mxu1  ;;  %v3317_v13 = vadd.f32 %v3310_v27, %v3171_v56 }
0x11ab   :  { %v3316_v21 = vadd.f32 %v3241_v17, %v3170_v36  ;;  %v3318_v57 = vadd.f32 %v3312_v62, %v3172_v32 }
0x11ac   :  { %v3319_v31 = vmul.f32 0.5, %v3315_v48  ;;  %v3321_v25 = vmul.f32 0.5, %v3317_v13 }
0x11ad   :  { %v3320_v58 = vmul.f32 0.5, %v3316_v21 }
0x11ae   :  { %9261 = vtanh.f32 %v3319_v31 }
0x11af   :  { %9263 = vtanh.f32 %v3320_v58 }
0x11b0   :  { %9265 = vtanh.f32 %v3318_v57 }
0x11b1   :  { %9267 = vtanh.f32 %v3321_v25 }
0x11b8   :  { %v9262_v63 = vpop.eup %9261 }
0x11b9   :  { %v3325_v52 = vmul.f32 0.5, %v9262_v63  ;;  %v9264_v60 = vpop.eup %9263 }
0x11ba   :  { %v3326_v44 = vmul.f32 0.5, %v9264_v60  ;;  %v9266_v35 = vpop.eup %9265  ;;  %v11466_v60 = vld [vmem:[#allocation9_spill] sm:$0xff] }
0x11bb   :  { %v3328_v43 = vadd.f32 0.5, %v3325_v52  ;;  %v9268_v17 = vpop.eup %9267 }
0x11bc   :  { %v3329_v0 = vadd.f32 0.5, %v3326_v44  ;;  %v3327_v32 = vmul.f32 0.5, %v9268_v17 }
0x11bd   :  { %v3333_v34 = vmul.f32 %v9266_v35, %v3328_v43 }
0x11be   :  { %v3332_v36 = vmul.f32 %v3329_v0, %v10556_v7  ;;  %v3330_v62 = vadd.f32 0.5, %v3327_v32  ;;  %v9530_v7 = vmov 19   ;;  %v3339_v0 = vpop.permute.xlu1 %3338 }
0x11bf   :  { %9074 = vset.pattern.permute.xlu1 %v9530_v7  ;;  %v3341_v21 = vmul.f32 %v3339_v0, %v9767_v61  ;;  %v3342_v31 = vmul.f32 %v3339_v0, %v9772_v5  ;;  %v3344_v57 = vmul.f32 %v3339_v0, %v9777_v12  ;;  %v3343_v35 = vmul.f32 %v3339_v0, %v9786_v26 }
0x11c0   :  { %v10603_v48 = vadd.f32 %v3333_v34, %v3332_v36  ;;  %3514 = vperm.xlu1 %9074, %v10403_v14  }
0x11c1   :  { %v3345_v58 = vadd.f32 %v3341_v21, %v9775_v8  ;;  %v3346_v56 = vadd.f32 %v3342_v31, %v9780_v16  ;;  %v3348_v43 = vadd.f32 %v3344_v57, %v11466_v60 }
0x11c2   :  { %9269 = vtanh.f32 %v10603_v48 }
0x11cc   :  { %v9270_v27 = vpop.eup %9269 }
0x11cd   :  { %v3336_v51 = vmul.f32 %v9270_v27, %v3330_v62  ;;  %v3347_v62 = vadd.f32 %v3343_v35, %v9791_v47 }
0x11cf   :  { %3414 = vmatmul.mubr.f32.vlgmr.msra.gmra.mrb[36].mxu0 %v3336_v51  ;;  %3485 = vmatmul.mubr.f32.vlgmr.msra.gmra.mrb[36].mxu1 %v3336_v51 }
0x11d0   :  { %7901 = vmatpush1.bf16.msra.mxu0 %v9627_v11  ;;  %7933 = vmatpush1.bf16.msra.mxu1 %v9630_v15 }
0x11d1   :  { %7903 = vmatprep.subr.bf16.mxu0 %v9634_v19  ;;  %7935 = vmatprep.subr.bf16.mxu1 %v9636_v20 }
0x11d2   :  { %3589 = vmatprep.mubr.f32.mxu0 %v11452_v1  ;;  %3660 = vmatprep.mubr.f32.mxu1 %v11452_v1 }
0x11d4   :  { %7905 = vmatpush1.bf16.msra.mxu0 %v9639_v24  ;;  %7937 = vmatpush1.bf16.msra.mxu1 %v9643_v28 }
0x11d5   :  { %7907 = vmatprep.subr.bf16.mxu0 %v9645_v29  ;;  %7939 = vmatprep.subr.bf16.mxu1 %v9647_v33 }
0x11d8   :  { %7909 = vmatpush1.bf16.msra.mxu0 %v9650_v37  ;;  %7941 = vmatpush1.bf16.msra.mxu1 %v9654_v41 }
0x11d9   :  { %7911 = vmatprep.subr.bf16.mxu0 %v9656_v42  ;;  %7943 = vmatprep.subr.bf16.mxu1 %v9659_v46 }
0x11dc   :  { %7913 = vmatpush1.bf16.msra.mxu0 %v9662_v53  ;;  %7945 = vmatpush1.bf16.msra.mxu1 %v9666_v54 }
0x11dd   :  { %7915 = vmatprep.subr.bf16.mxu0 %v9668_v55  ;;  %7947 = vmatprep.subr.bf16.mxu1 %v9671_v59 }
0x11e0   :  { %7917 = vmatpush1.bf16.msra.mxu0 %v9674_v2  ;;  %7949 = vmatpush1.bf16.msra.mxu1 %v9678_v3 }
0x11e1   :  { %7919 = vmatprep.subr.bf16.mxu0 %v9680_v4  ;;  %7951 = vmatprep.subr.bf16.mxu1 %v9683_v9 }
0x11e4   :  { %7921 = vmatpush1.bf16.msra.mxu0 %v9686_v18  ;;  %7953 = vmatpush1.bf16.msra.mxu1 %v9690_v22 }
0x11e5   :  { %7923 = vmatprep.subr.bf16.mxu0 %v9692_v23  ;;  %7955 = vmatprep.subr.bf16.mxu1 %v9700_v30 }
0x11e8   :  { %7925 = vmatpush1.bf16.msra.mxu0 %v9704_v38  ;;  %7957 = vmatpush1.bf16.msra.mxu1 %v9708_v39 }
0x11e9   :  { %7927 = vmatprep.subr.bf16.mxu0 %v9710_v40  ;;  %7959 = vmatprep.subr.bf16.mxu1 %v9713_v45 }
0x11ec   :  { %7929 = vmatpush1.bf16.msra.mxu0 %v9716_v49  ;;  %7961 = vmatpush1.bf16.msra.mxu1 %v9720_v50 }
0x11ed   :  { %7963 = vmatprep.subr.bf16.mxu0 %v9623_v6  ;;  %7995 = vmatprep.subr.bf16.mxu1 %v9625_v10 }
0x12a2   :  { %v3415_v13 = vpop.f32.mrb[36].mxu0  ;;  %v3486_v25 = vpop.f32.mrb[36].mxu1 }
0x12a3   :  { %v3491_v63 = vadd.f32 %v3415_v13, %v3345_v58  ;;  %v3417_v52 = vpop.f32.mrb[37].mxu0  ;;  %v3488_v44 = vpop.f32.mrb[37].mxu1  ;;  %v3493_v27 = vadd.f32 %v3486_v25, %v3347_v62 }
0x12a4   :  { %v3492_v34 = vadd.f32 %v3417_v52, %v3346_v56  ;;  %v3494_v32 = vadd.f32 %v3488_v44, %v3348_v43 }
0x12a5   :  { %v3495_v36 = vmul.f32 0.5, %v3491_v63  ;;  %v3497_v51 = vmul.f32 0.5, %v3493_v27 }
0x12a6   :  { %v3496_v17 = vmul.f32 0.5, %v3492_v34 }
0x12a7   :  { %9271 = vtanh.f32 %v3495_v36 }
0x12a8   :  { %9273 = vtanh.f32 %v3496_v17 }
0x12a9   :  { %9275 = vtanh.f32 %v3494_v32 }
0x12aa   :  { %9277 = vtanh.f32 %v3497_v51 }
0x12b1   :  { %v9272_v7 = vpop.eup %9271 }
0x12b2   :  { %v3501_v21 = vmul.f32 0.5, %v9272_v7  ;;  %v9274_v31 = vpop.eup %9273 }
0x12b3   :  { %v3502_v57 = vmul.f32 0.5, %v9274_v31  ;;  %v9276_v13 = vpop.eup %9275  ;;  %v11467_v31 = vld [vmem:[#allocation9_spill] sm:$0xff] }
0x12b4   :  { %v3504_v58 = vadd.f32 0.5, %v3501_v21  ;;  %v9278_v52 = vpop.eup %9277 }
0x12b5   :  { %v3505_v60 = vadd.f32 0.5, %v3502_v57  ;;  %v3503_v43 = vmul.f32 0.5, %v9278_v52 }
0x12b6   :  { %v3509_v0 = vmul.f32 %v9276_v13, %v3504_v58 }
0x12b7   :  { %v3508_v56 = vmul.f32 %v3505_v60, %v10603_v48  ;;  %v3506_v44 = vadd.f32 0.5, %v3503_v43  ;;  %v9531_v48 = vmov 20   ;;  %v3515_v60 = vpop.permute.xlu1 %3514 }
0x12b8   :  { %9075 = vset.pattern.permute.xlu0 %v9531_v48  ;;  %v3517_v34 = vmul.f32 %v3515_v60, %v9767_v61  ;;  %v3518_v36 = vmul.f32 %v3515_v60, %v9772_v5  ;;  %v3520_v32 = vmul.f32 %v3515_v60, %v9777_v12 }
0x12b9   :  { %v10650_v63 = vadd.f32 %v3509_v0, %v3508_v56  ;;  %3690 = vperm.xlu0 %9075, %v10403_v14   ;;  %v3519_v14 = vmul.f32 %v3515_v60, %v9786_v26 }
0x12ba   :  { %v3521_v17 = vadd.f32 %v3517_v34, %v9775_v8  ;;  %v3522_v62 = vadd.f32 %v3518_v36, %v9780_v16  ;;  %v3524_v58 = vadd.f32 %v3520_v32, %v11467_v31 }
0x12bb   :  { %9279 = vtanh.f32 %v10650_v63  ;;  %v3523_v43 = vadd.f32 %v3519_v14, %v9791_v47 }
0x12c5   :  { %v9280_v25 = vpop.eup %9279 }
0x12c6   :  { %v3512_v35 = vmul.f32 %v9280_v25, %v3506_v44 }
0x12c8   :  { %3590 = vmatmul.mubr.f32.vlgmr.msra.gmra.mrb[38].mxu0 %v3512_v35  ;;  %3661 = vmatmul.mubr.f32.vlgmr.msra.gmra.mrb[38].mxu1 %v3512_v35 }
0x12c9   :  { %7965 = vmatpush1.bf16.msra.mxu0 %v9627_v11  ;;  %7997 = vmatpush1.bf16.msra.mxu1 %v9630_v15 }
0x12ca   :  { %7967 = vmatprep.subr.bf16.mxu0 %v9634_v19  ;;  %7999 = vmatprep.subr.bf16.mxu1 %v9636_v20 }
0x12cb   :  { %3765 = vmatprep.mubr.f32.mxu0 %v11452_v1  ;;  %3836 = vmatprep.mubr.f32.mxu1 %v11452_v1 }
0x12cd   :  { %7969 = vmatpush1.bf16.msra.mxu0 %v9639_v24  ;;  %8001 = vmatpush1.bf16.msra.mxu1 %v9643_v28 }
0x12ce   :  { %7971 = vmatprep.subr.bf16.mxu0 %v9645_v29  ;;  %8003 = vmatprep.subr.bf16.mxu1 %v9647_v33 }
0x12d1   :  { %7973 = vmatpush1.bf16.msra.mxu0 %v9650_v37  ;;  %8005 = vmatpush1.bf16.msra.mxu1 %v9654_v41 }
0x12d2   :  { %7975 = vmatprep.subr.bf16.mxu0 %v9656_v42  ;;  %8007 = vmatprep.subr.bf16.mxu1 %v9659_v46 }
0x12d5   :  { %7977 = vmatpush1.bf16.msra.mxu0 %v9662_v53  ;;  %8009 = vmatpush1.bf16.msra.mxu1 %v9666_v54 }
0x12d6   :  { %7979 = vmatprep.subr.bf16.mxu0 %v9668_v55  ;;  %8011 = vmatprep.subr.bf16.mxu1 %v9671_v59 }
0x12d9   :  { %7981 = vmatpush1.bf16.msra.mxu0 %v9674_v2  ;;  %8013 = vmatpush1.bf16.msra.mxu1 %v9678_v3 }
0x12da   :  { %7983 = vmatprep.subr.bf16.mxu0 %v9680_v4  ;;  %8015 = vmatprep.subr.bf16.mxu1 %v9683_v9 }
0x12dd   :  { %7985 = vmatpush1.bf16.msra.mxu0 %v9686_v18  ;;  %8017 = vmatpush1.bf16.msra.mxu1 %v9690_v22 }
0x12de   :  { %7987 = vmatprep.subr.bf16.mxu0 %v9692_v23  ;;  %8019 = vmatprep.subr.bf16.mxu1 %v9700_v30 }
0x12e1   :  { %7989 = vmatpush1.bf16.msra.mxu0 %v9704_v38  ;;  %8021 = vmatpush1.bf16.msra.mxu1 %v9708_v39 }
0x12e2   :  { %7991 = vmatprep.subr.bf16.mxu0 %v9710_v40  ;;  %8023 = vmatprep.subr.bf16.mxu1 %v9713_v45 }
0x12e5   :  { %7993 = vmatpush1.bf16.msra.mxu0 %v9716_v49  ;;  %8025 = vmatpush1.bf16.msra.mxu1 %v9720_v50 }
0x12e6   :  { %8027 = vmatprep.subr.bf16.mxu0 %v9623_v6  ;;  %8059 = vmatprep.subr.bf16.mxu1 %v9625_v10 }
0x139b   :  { %v3591_v27 = vpop.f32.mrb[38].mxu0  ;;  %v3662_v51 = vpop.f32.mrb[38].mxu1 }
0x139c   :  { %v3667_v7 = vadd.f32 %v3591_v27, %v3521_v17  ;;  %v3593_v21 = vpop.f32.mrb[39].mxu0  ;;  %v3664_v57 = vpop.f32.mrb[39].mxu1  ;;  %v3669_v44 = vadd.f32 %v3662_v51, %v3523_v43 }
0x139d   :  { %v3668_v13 = vadd.f32 %v3593_v21, %v3522_v62  ;;  %v3670_v52 = vadd.f32 %v3664_v57, %v3524_v58 }
0x139e   :  { %v3671_v0 = vmul.f32 0.5, %v3667_v7  ;;  %v3673_v25 = vmul.f32 0.5, %v3669_v44 }
0x139f   :  { %v3672_v56 = vmul.f32 0.5, %v3668_v13  ;;  %v10737_v13 = vld [vmem:[%s11434_s0] sm:$0x3] }
0x13a0   :  { %9281 = vtanh.f32 %v3671_v0  ;;  %v3691_v0 = vpop.permute.xlu0 %3690 }
0x13a1   :  { %9283 = vtanh.f32 %v3672_v56  ;;  %v3693_v56 = vmul.f32 %v3691_v0, %v9767_v61  ;;  %v3696_v44 = vmul.f32 %v3691_v0, %v9777_v12 }
0x13a2   :  { %9285 = vtanh.f32 %v3670_v52  ;;  %v3694_v52 = vmul.f32 %v3691_v0, %v9772_v5 }
0x13a3   :  { %9287 = vtanh.f32 %v3673_v25  ;;  %v3697_v43 = vadd.f32 %v3693_v56, %v9775_v8 }
0x13a4   :  { %v3698_v25 = vadd.f32 %v3694_v52, %v9780_v16 }
0x13aa   :  { %v9282_v35 = vpop.eup %9281 }
0x13ab   :  { %v3677_v48 = vmul.f32 0.5, %v9282_v35  ;;  %v9284_v34 = vpop.eup %9283 }
0x13ac   :  { %v3678_v17 = vmul.f32 0.5, %v9284_v34  ;;  %v9286_v32 = vpop.eup %9285 }
0x13ad   :  { %v3680_v36 = vadd.f32 0.5, %v3677_v48  ;;  %v9288_v21 = vpop.eup %9287 }
0x13ae   :  { %v3681_v27 = vadd.f32 0.5, %v3678_v17  ;;  %v3679_v58 = vmul.f32 0.5, %v9288_v21  ;;  %v3700_v17 = vadd.f32 %v3696_v44, %v11467_v31 }
0x13af   :  { %v3685_v60 = vmul.f32 %v9286_v32, %v3680_v36 }
0x13b0   :  { %v3684_v62 = vmul.f32 %v3681_v27, %v10650_v63  ;;  %v3682_v57 = vadd.f32 0.5, %v3679_v58  ;;  %v9532_v63 = vmov 21   ;;  %v3695_v27 = vmul.f32 %v3691_v0, %v9786_v26 }
0x13b1   :  { %9076 = vset.pattern.permute.xlu1 %v9532_v63 }
0x13b2   :  { %v10697_v7 = vadd.f32 %v3685_v60, %v3684_v62  ;;  %3866 = vperm.xlu1 %9076, %v10737_v13  }
0x13b4   :  { %9289 = vtanh.f32 %v10697_v7 }
0x13be   :  { %v9290_v51 = vpop.eup %9289 }
0x13bf   :  { %v3688_v14 = vmul.f32 %v9290_v51, %v3682_v57  ;;  %v3699_v57 = vadd.f32 %v3695_v27, %v9791_v47 }
0x13c1   :  { %3766 = vmatmul.mubr.f32.vlgmr.msra.gmra.mrb[40].mxu0 %v3688_v14  ;;  %3837 = vmatmul.mubr.f32.vlgmr.msra.gmra.mrb[40].mxu1 %v3688_v14 }
0x13c2   :  { %8029 = vmatpush1.bf16.msra.mxu0 %v9627_v11  ;;  %8061 = vmatpush1.bf16.msra.mxu1 %v9630_v15 }
0x13c3   :  { %8031 = vmatprep.subr.bf16.mxu0 %v9634_v19  ;;  %8063 = vmatprep.subr.bf16.mxu1 %v9636_v20 }
0x13c4   :  { %3941 = vmatprep.mubr.f32.mxu0 %v11452_v1  ;;  %4012 = vmatprep.mubr.f32.mxu1 %v11452_v1 }
0x13c6   :  { %8033 = vmatpush1.bf16.msra.mxu0 %v9639_v24  ;;  %8065 = vmatpush1.bf16.msra.mxu1 %v9643_v28 }
0x13c7   :  { %8035 = vmatprep.subr.bf16.mxu0 %v9645_v29  ;;  %8067 = vmatprep.subr.bf16.mxu1 %v9647_v33 }
0x13ca   :  { %8037 = vmatpush1.bf16.msra.mxu0 %v9650_v37  ;;  %8069 = vmatpush1.bf16.msra.mxu1 %v9654_v41 }
0x13cb   :  { %8039 = vmatprep.subr.bf16.mxu0 %v9656_v42  ;;  %8071 = vmatprep.subr.bf16.mxu1 %v9659_v46 }
0x13ce   :  { %8041 = vmatpush1.bf16.msra.mxu0 %v9662_v53  ;;  %8073 = vmatpush1.bf16.msra.mxu1 %v9666_v54 }
0x13cf   :  { %8043 = vmatprep.subr.bf16.mxu0 %v9668_v55  ;;  %8075 = vmatprep.subr.bf16.mxu1 %v9671_v59 }
0x13d2   :  { %8045 = vmatpush1.bf16.msra.mxu0 %v9674_v2  ;;  %8077 = vmatpush1.bf16.msra.mxu1 %v9678_v3 }
0x13d3   :  { %8047 = vmatprep.subr.bf16.mxu0 %v9680_v4  ;;  %8079 = vmatprep.subr.bf16.mxu1 %v9683_v9 }
0x13d6   :  { %8049 = vmatpush1.bf16.msra.mxu0 %v9686_v18  ;;  %8081 = vmatpush1.bf16.msra.mxu1 %v9690_v22 }
0x13d7   :  { %8051 = vmatprep.subr.bf16.mxu0 %v9692_v23  ;;  %8083 = vmatprep.subr.bf16.mxu1 %v9700_v30 }
0x13da   :  { %8053 = vmatpush1.bf16.msra.mxu0 %v9704_v38  ;;  %8085 = vmatpush1.bf16.msra.mxu1 %v9708_v39 }
0x13db   :  { %8055 = vmatprep.subr.bf16.mxu0 %v9710_v40  ;;  %8087 = vmatprep.subr.bf16.mxu1 %v9713_v45 }
0x13de   :  { %8057 = vmatpush1.bf16.msra.mxu0 %v9716_v49  ;;  %8089 = vmatpush1.bf16.msra.mxu1 %v9720_v50 }
0x13df   :  { %8091 = vmatprep.subr.bf16.mxu0 %v9623_v6  ;;  %8123 = vmatprep.subr.bf16.mxu1 %v9625_v10 }
0x1494   :  { %v3767_v35 = vpop.f32.mrb[40].mxu0  ;;  %v3838_v48 = vpop.f32.mrb[40].mxu1 }
0x1495   :  { %v3843_v34 = vadd.f32 %v3767_v35, %v3697_v43  ;;  %v3769_v36 = vpop.f32.mrb[41].mxu0  ;;  %v3840_v32 = vpop.f32.mrb[41].mxu1  ;;  %v3845_v51 = vadd.f32 %v3838_v48, %v3699_v57 }
0x1496   :  { %v3844_v60 = vadd.f32 %v3769_v36, %v3698_v25  ;;  %v3846_v58 = vadd.f32 %v3840_v32, %v3700_v17 }
0x1497   :  { %v3847_v62 = vmul.f32 0.5, %v3843_v34  ;;  %v3849_v14 = vmul.f32 0.5, %v3845_v51 }
0x1498   :  { %v3848_v21 = vmul.f32 0.5, %v3844_v60 }
0x1499   :  { %9291 = vtanh.f32 %v3847_v62 }
0x149a   :  { %9293 = vtanh.f32 %v3848_v21 }
0x149b   :  { %9295 = vtanh.f32 %v3846_v58 }
0x149c   :  { %9297 = vtanh.f32 %v3849_v14 }
0x14a3   :  { %v9292_v63 = vpop.eup %9291 }
0x14a4   :  { %v3853_v56 = vmul.f32 0.5, %v9292_v63  ;;  %v9294_v52 = vpop.eup %9293 }
0x14a5   :  { %v3854_v44 = vmul.f32 0.5, %v9294_v52  ;;  %v9296_v35 = vpop.eup %9295  ;;  %v11468_v52 = vld [vmem:[#allocation9_spill] sm:$0xff] }
0x14a6   :  { %v3856_v43 = vadd.f32 0.5, %v3853_v56  ;;  %v9298_v36 = vpop.eup %9297 }
0x14a7   :  { %v3857_v31 = vadd.f32 0.5, %v3854_v44  ;;  %v3855_v17 = vmul.f32 0.5, %v9298_v36 }
0x14a8   :  { %v3861_v0 = vmul.f32 %v9296_v35, %v3856_v43 }
0x14a9   :  { %v3860_v25 = vmul.f32 %v3857_v31, %v10697_v7  ;;  %v3858_v32 = vadd.f32 0.5, %v3855_v17  ;;  %v9533_v31 = vmov 22   ;;  %v3867_v7 = vpop.permute.xlu1 %3866 }
0x14aa   :  { %9077 = vset.pattern.permute.xlu1 %v9533_v31  ;;  %v3869_v60 = vmul.f32 %v3867_v7, %v9767_v61  ;;  %v3870_v62 = vmul.f32 %v3867_v7, %v9772_v5  ;;  %v3872_v58 = vmul.f32 %v3867_v7, %v9777_v12  ;;  %v3871_v35 = vmul.f32 %v3867_v7, %v9786_v26 }
0x14ab   :  { %v10749_v34 = vadd.f32 %v3861_v0, %v3860_v25  ;;  %4042 = vperm.xlu1 %9077, %v10737_v13  }
0x14ac   :  { %v3873_v21 = vadd.f32 %v3869_v60, %v9775_v8  ;;  %v3874_v57 = vadd.f32 %v3870_v62, %v9780_v16  ;;  %v3876_v43 = vadd.f32 %v3872_v58, %v11468_v52 }
0x14ad   :  { %9299 = vtanh.f32 %v10749_v34 }
0x14b7   :  { %v9300_v48 = vpop.eup %9299 }
0x14b8   :  { %v3864_v27 = vmul.f32 %v9300_v48, %v3858_v32  ;;  %v3875_v32 = vadd.f32 %v3871_v35, %v9791_v47 }
0x14ba   :  { %3942 = vmatmul.mubr.f32.vlgmr.msra.gmra.mrb[42].mxu0 %v3864_v27  ;;  %4013 = vmatmul.mubr.f32.vlgmr.msra.gmra.mrb[42].mxu1 %v3864_v27 }
0x14bb   :  { %8093 = vmatpush1.bf16.msra.mxu0 %v9627_v11  ;;  %8125 = vmatpush1.bf16.msra.mxu1 %v9630_v15 }
0x14bc   :  { %8095 = vmatprep.subr.bf16.mxu0 %v9634_v19  ;;  %8127 = vmatprep.subr.bf16.mxu1 %v9636_v20 }
0x14bd   :  { %4117 = vmatprep.mubr.f32.mxu0 %v11452_v1  ;;  %4188 = vmatprep.mubr.f32.mxu1 %v11452_v1 }
0x14bf   :  { %8097 = vmatpush1.bf16.msra.mxu0 %v9639_v24  ;;  %8129 = vmatpush1.bf16.msra.mxu1 %v9643_v28 }
0x14c0   :  { %8099 = vmatprep.subr.bf16.mxu0 %v9645_v29  ;;  %8131 = vmatprep.subr.bf16.mxu1 %v9647_v33 }
0x14c3   :  { %8101 = vmatpush1.bf16.msra.mxu0 %v9650_v37  ;;  %8133 = vmatpush1.bf16.msra.mxu1 %v9654_v41 }
0x14c4   :  { %8103 = vmatprep.subr.bf16.mxu0 %v9656_v42  ;;  %8135 = vmatprep.subr.bf16.mxu1 %v9659_v46 }
0x14c7   :  { %8105 = vmatpush1.bf16.msra.mxu0 %v9662_v53  ;;  %8137 = vmatpush1.bf16.msra.mxu1 %v9666_v54 }
0x14c8   :  { %8107 = vmatprep.subr.bf16.mxu0 %v9668_v55  ;;  %8139 = vmatprep.subr.bf16.mxu1 %v9671_v59 }
0x14cb   :  { %8109 = vmatpush1.bf16.msra.mxu0 %v9674_v2  ;;  %8141 = vmatpush1.bf16.msra.mxu1 %v9678_v3 }
0x14cc   :  { %8111 = vmatprep.subr.bf16.mxu0 %v9680_v4  ;;  %8143 = vmatprep.subr.bf16.mxu1 %v9683_v9 }
0x14cf   :  { %8113 = vmatpush1.bf16.msra.mxu0 %v9686_v18  ;;  %8145 = vmatpush1.bf16.msra.mxu1 %v9690_v22 }
0x14d0   :  { %8115 = vmatprep.subr.bf16.mxu0 %v9692_v23  ;;  %8147 = vmatprep.subr.bf16.mxu1 %v9700_v30 }
0x14d3   :  { %8117 = vmatpush1.bf16.msra.mxu0 %v9704_v38  ;;  %8149 = vmatpush1.bf16.msra.mxu1 %v9708_v39 }
0x14d4   :  { %8119 = vmatprep.subr.bf16.mxu0 %v9710_v40  ;;  %8151 = vmatprep.subr.bf16.mxu1 %v9713_v45 }
0x14d7   :  { %8121 = vmatpush1.bf16.msra.mxu0 %v9716_v49  ;;  %8153 = vmatpush1.bf16.msra.mxu1 %v9720_v50 }
0x14d8   :  { %8155 = vmatprep.subr.bf16.mxu0 %v9623_v6  ;;  %8187 = vmatprep.subr.bf16.mxu1 %v9625_v10 }
0x158d   :  { %v3943_v51 = vpop.f32.mrb[42].mxu0  ;;  %v4014_v14 = vpop.f32.mrb[42].mxu1 }
0x158e   :  { %v4019_v63 = vadd.f32 %v3943_v51, %v3873_v21  ;;  %v3945_v56 = vpop.f32.mrb[43].mxu0  ;;  %v4016_v44 = vpop.f32.mrb[43].mxu1  ;;  %v4021_v48 = vadd.f32 %v4014_v14, %v3875_v32 }
0x158f   :  { %v4020_v0 = vadd.f32 %v3945_v56, %v3874_v57  ;;  %v4022_v17 = vadd.f32 %v4016_v44, %v3876_v43 }
0x1590   :  { %v4023_v25 = vmul.f32 0.5, %v4019_v63  ;;  %v4025_v27 = vmul.f32 0.5, %v4021_v48 }
0x1591   :  { %v4024_v36 = vmul.f32 0.5, %v4020_v0 }
0x1592   :  { %9301 = vtanh.f32 %v4023_v25 }
0x1593   :  { %9303 = vtanh.f32 %v4024_v36 }
0x1594   :  { %9305 = vtanh.f32 %v4022_v17 }
0x1595   :  { %9307 = vtanh.f32 %v4025_v27 }
0x159c   :  { %v9302_v31 = vpop.eup %9301 }
0x159d   :  { %v4029_v60 = vmul.f32 0.5, %v9302_v31  ;;  %v9304_v62 = vpop.eup %9303 }
0x159e   :  { %v4030_v58 = vmul.f32 0.5, %v9304_v62  ;;  %v9306_v51 = vpop.eup %9305  ;;  %v11469_v62 = vld [vmem:[#allocation9_spill] sm:$0xff] }
0x159f   :  { %v4032_v21 = vadd.f32 0.5, %v4029_v60  ;;  %v9308_v56 = vpop.eup %9307 }
0x15a0   :  { %v4033_v52 = vadd.f32 0.5, %v4030_v58  ;;  %v4031_v43 = vmul.f32 0.5, %v9308_v56 }
0x15a1   :  { %v4037_v7 = vmul.f32 %v9306_v51, %v4032_v21 }
0x15a2   :  { %v4036_v57 = vmul.f32 %v4033_v52, %v10749_v34  ;;  %v4034_v44 = vadd.f32 0.5, %v4031_v43  ;;  %v9534_v34 = vmov 23   ;;  %v4043_v52 = vpop.permute.xlu1 %4042 }
0x15a3   :  { %9078 = vset.pattern.permute.xlu0 %v9534_v34  ;;  %v4045_v0 = vmul.f32 %v4043_v52, %v9767_v61  ;;  %v4046_v25 = vmul.f32 %v4043_v52, %v9772_v5  ;;  %v4048_v17 = vmul.f32 %v4043_v52, %v9777_v12  ;;  %v4047_v51 = vmul.f32 %v4043_v52, %v9786_v26 }
0x15a4   :  { %v10796_v63 = vadd.f32 %v4037_v7, %v4036_v57  ;;  %4218 = vperm.xlu0 %9078, %v10737_v13  }
0x15a5   :  { %v4049_v36 = vadd.f32 %v4045_v0, %v9775_v8  ;;  %v4050_v32 = vadd.f32 %v4046_v25, %v9780_v16  ;;  %v4052_v21 = vadd.f32 %v4048_v17, %v11469_v62 }
0x15a6   :  { %9309 = vtanh.f32 %v10796_v63 }
0x15b0   :  { %v9310_v14 = vpop.eup %9309 }
0x15b1   :  { %v4040_v35 = vmul.f32 %v9310_v14, %v4034_v44  ;;  %v4051_v44 = vadd.f32 %v4047_v51, %v9791_v47 }
0x15b3   :  { %4118 = vmatmul.mubr.f32.vlgmr.msra.gmra.mrb[44].mxu0 %v4040_v35  ;;  %4189 = vmatmul.mubr.f32.vlgmr.msra.gmra.mrb[44].mxu1 %v4040_v35 }
0x15b4   :  { %8157 = vmatpush1.bf16.msra.mxu0 %v9627_v11  ;;  %8189 = vmatpush1.bf16.msra.mxu1 %v9630_v15 }
0x15b5   :  { %8159 = vmatprep.subr.bf16.mxu0 %v9634_v19  ;;  %8191 = vmatprep.subr.bf16.mxu1 %v9636_v20 }
0x15b6   :  { %4293 = vmatprep.mubr.f32.mxu0 %v11452_v1  ;;  %4364 = vmatprep.mubr.f32.mxu1 %v11452_v1 }
0x15b8   :  { %8161 = vmatpush1.bf16.msra.mxu0 %v9639_v24  ;;  %8193 = vmatpush1.bf16.msra.mxu1 %v9643_v28 }
0x15b9   :  { %8163 = vmatprep.subr.bf16.mxu0 %v9645_v29  ;;  %8195 = vmatprep.subr.bf16.mxu1 %v9647_v33 }
0x15bc   :  { %8165 = vmatpush1.bf16.msra.mxu0 %v9650_v37  ;;  %8197 = vmatpush1.bf16.msra.mxu1 %v9654_v41 }
0x15bd   :  { %8167 = vmatprep.subr.bf16.mxu0 %v9656_v42  ;;  %8199 = vmatprep.subr.bf16.mxu1 %v9659_v46 }
0x15c0   :  { %8169 = vmatpush1.bf16.msra.mxu0 %v9662_v53  ;;  %8201 = vmatpush1.bf16.msra.mxu1 %v9666_v54 }
0x15c1   :  { %8171 = vmatprep.subr.bf16.mxu0 %v9668_v55  ;;  %8203 = vmatprep.subr.bf16.mxu1 %v9671_v59 }
0x15c4   :  { %8173 = vmatpush1.bf16.msra.mxu0 %v9674_v2  ;;  %8205 = vmatpush1.bf16.msra.mxu1 %v9678_v3 }
0x15c5   :  { %8175 = vmatprep.subr.bf16.mxu0 %v9680_v4  ;;  %8207 = vmatprep.subr.bf16.mxu1 %v9683_v9 }
0x15c8   :  { %8177 = vmatpush1.bf16.msra.mxu0 %v9686_v18  ;;  %8209 = vmatpush1.bf16.msra.mxu1 %v9690_v22 }
0x15c9   :  { %8179 = vmatprep.subr.bf16.mxu0 %v9692_v23  ;;  %8211 = vmatprep.subr.bf16.mxu1 %v9700_v30 }
0x15cc   :  { %8181 = vmatpush1.bf16.msra.mxu0 %v9704_v38  ;;  %8213 = vmatpush1.bf16.msra.mxu1 %v9708_v39 }
0x15cd   :  { %8183 = vmatprep.subr.bf16.mxu0 %v9710_v40  ;;  %8215 = vmatprep.subr.bf16.mxu1 %v9713_v45 }
0x15d0   :  { %8185 = vmatpush1.bf16.msra.mxu0 %v9716_v49  ;;  %8217 = vmatpush1.bf16.msra.mxu1 %v9720_v50 }
0x15d1   :  { %8219 = vmatprep.subr.bf16.mxu0 %v9623_v6  ;;  %8251 = vmatprep.subr.bf16.mxu1 %v9625_v10 }
0x1686   :  { %v4119_v48 = vpop.f32.mrb[44].mxu0  ;;  %v4190_v27 = vpop.f32.mrb[44].mxu1 }
0x1687   :  { %v4195_v31 = vadd.f32 %v4119_v48, %v4049_v36  ;;  %v4121_v60 = vpop.f32.mrb[45].mxu0  ;;  %v4192_v58 = vpop.f32.mrb[45].mxu1  ;;  %v4197_v14 = vadd.f32 %v4190_v27, %v4051_v44 }
0x1688   :  { %v4196_v7 = vadd.f32 %v4121_v60, %v4050_v32  ;;  %v4198_v43 = vadd.f32 %v4192_v58, %v4052_v21 }
0x1689   :  { %v4199_v57 = vmul.f32 0.5, %v4195_v31  ;;  %v4201_v35 = vmul.f32 0.5, %v4197_v14 }
0x168a   :  { %v4200_v56 = vmul.f32 0.5, %v4196_v7 }
0x168b   :  { %9311 = vtanh.f32 %v4199_v57 }
0x168c   :  { %9313 = vtanh.f32 %v4200_v56 }
0x168d   :  { %9315 = vtanh.f32 %v4198_v43 }
0x168e   :  { %9317 = vtanh.f32 %v4201_v35 }
0x1695   :  { %v9312_v34 = vpop.eup %9311 }
0x1696   :  { %v4205_v0 = vmul.f32 0.5, %v9312_v34  ;;  %v9314_v25 = vpop.eup %9313 }
0x1697   :  { %v4206_v17 = vmul.f32 0.5, %v9314_v25  ;;  %v9316_v48 = vpop.eup %9315  ;;  %v11470_v25 = vld [vmem:[#allocation9_spill] sm:$0xff] }
0x1698   :  { %v4208_v36 = vadd.f32 0.5, %v4205_v0  ;;  %v9318_v60 = vpop.eup %9317 }
0x1699   :  { %v4209_v62 = vadd.f32 0.5, %v4206_v17  ;;  %v4207_v21 = vmul.f32 0.5, %v9318_v60 }
0x169a   :  { %v4213_v52 = vmul.f32 %v9316_v48, %v4208_v36 }
0x169b   :  { %v4212_v32 = vmul.f32 %v4209_v62, %v10796_v63  ;;  %v4210_v58 = vadd.f32 0.5, %v4207_v21  ;;  %v9535_v63 = vmov 24   ;;  %v4219_v62 = vpop.permute.xlu0 %4218 }
0x169c   :  { %9079 = vset.pattern.permute.xlu1 %v9535_v63  ;;  %v4221_v7 = vmul.f32 %v4219_v62, %v9767_v61  ;;  %v4222_v57 = vmul.f32 %v4219_v62, %v9772_v5  ;;  %v4224_v43 = vmul.f32 %v4219_v62, %v9777_v12  ;;  %v4223_v48 = vmul.f32 %v4219_v62, %v9786_v26 }
0x169d   :  { %v10843_v31 = vadd.f32 %v4213_v52, %v4212_v32  ;;  %4394 = vperm.xlu1 %9079, %v10737_v13  }
0x169e   :  { %v4225_v56 = vadd.f32 %v4221_v7, %v9775_v8  ;;  %v4226_v44 = vadd.f32 %v4222_v57, %v9780_v16  ;;  %v4228_v36 = vadd.f32 %v4224_v43, %v11470_v25 }
0x169f   :  { %9319 = vtanh.f32 %v10843_v31 }
0x16a9   :  { %v9320_v27 = vpop.eup %9319 }
0x16aa   :  { %v4216_v51 = vmul.f32 %v9320_v27, %v4210_v58  ;;  %v4227_v58 = vadd.f32 %v4223_v48, %v9791_v47 }
0x16ac   :  { %4294 = vmatmul.mubr.f32.vlgmr.msra.gmra.mrb[46].mxu0 %v4216_v51  ;;  %4365 = vmatmul.mubr.f32.vlgmr.msra.gmra.mrb[46].mxu1 %v4216_v51 }
0x16ad   :  { %8221 = vmatpush1.bf16.msra.mxu0 %v9627_v11  ;;  %8253 = vmatpush1.bf16.msra.mxu1 %v9630_v15 }
0x16ae   :  { %8223 = vmatprep.subr.bf16.mxu0 %v9634_v19  ;;  %8255 = vmatprep.subr.bf16.mxu1 %v9636_v20 }
0x16af   :  { %4469 = vmatprep.mubr.f32.mxu0 %v11452_v1  ;;  %4540 = vmatprep.mubr.f32.mxu1 %v11452_v1 }
0x16b1   :  { %8225 = vmatpush1.bf16.msra.mxu0 %v9639_v24  ;;  %8257 = vmatpush1.bf16.msra.mxu1 %v9643_v28 }
0x16b2   :  { %8227 = vmatprep.subr.bf16.mxu0 %v9645_v29  ;;  %8259 = vmatprep.subr.bf16.mxu1 %v9647_v33 }
0x16b5   :  { %8229 = vmatpush1.bf16.msra.mxu0 %v9650_v37  ;;  %8261 = vmatpush1.bf16.msra.mxu1 %v9654_v41 }
0x16b6   :  { %8231 = vmatprep.subr.bf16.mxu0 %v9656_v42  ;;  %8263 = vmatprep.subr.bf16.mxu1 %v9659_v46 }
0x16b9   :  { %8233 = vmatpush1.bf16.msra.mxu0 %v9662_v53  ;;  %8265 = vmatpush1.bf16.msra.mxu1 %v9666_v54 }
0x16ba   :  { %8235 = vmatprep.subr.bf16.mxu0 %v9668_v55  ;;  %8267 = vmatprep.subr.bf16.mxu1 %v9671_v59 }
0x16bd   :  { %8237 = vmatpush1.bf16.msra.mxu0 %v9674_v2  ;;  %8269 = vmatpush1.bf16.msra.mxu1 %v9678_v3 }
0x16be   :  { %8239 = vmatprep.subr.bf16.mxu0 %v9680_v4  ;;  %8271 = vmatprep.subr.bf16.mxu1 %v9683_v9 }
0x16c1   :  { %8241 = vmatpush1.bf16.msra.mxu0 %v9686_v18  ;;  %8273 = vmatpush1.bf16.msra.mxu1 %v9690_v22 }
0x16c2   :  { %8243 = vmatprep.subr.bf16.mxu0 %v9692_v23  ;;  %8275 = vmatprep.subr.bf16.mxu1 %v9700_v30 }
0x16c5   :  { %8245 = vmatpush1.bf16.msra.mxu0 %v9704_v38  ;;  %8277 = vmatpush1.bf16.msra.mxu1 %v9708_v39 }
0x16c6   :  { %8247 = vmatprep.subr.bf16.mxu0 %v9710_v40  ;;  %8279 = vmatprep.subr.bf16.mxu1 %v9713_v45 }
0x16c9   :  { %8249 = vmatpush1.bf16.msra.mxu0 %v9716_v49  ;;  %8281 = vmatpush1.bf16.msra.mxu1 %v9720_v50 }
0x16ca   :  { %8283 = vmatprep.subr.bf16.mxu0 %v9623_v6  ;;  %8315 = vmatprep.subr.bf16.mxu1 %v9625_v10 }
0x177f   :  { %v4295_v14 = vpop.f32.mrb[46].mxu0  ;;  %v4366_v35 = vpop.f32.mrb[46].mxu1 }
0x1780   :  { %v4371_v34 = vadd.f32 %v4295_v14, %v4225_v56  ;;  %v4297_v0 = vpop.f32.mrb[47].mxu0  ;;  %v4368_v17 = vpop.f32.mrb[47].mxu1  ;;  %v4373_v27 = vadd.f32 %v4366_v35, %v4227_v58 }
0x1781   :  { %v4372_v52 = vadd.f32 %v4297_v0, %v4226_v44  ;;  %v4374_v21 = vadd.f32 %v4368_v17, %v4228_v36 }
0x1782   :  { %v4375_v32 = vmul.f32 0.5, %v4371_v34  ;;  %v4377_v51 = vmul.f32 0.5, %v4373_v27 }
0x1783   :  { %v4376_v60 = vmul.f32 0.5, %v4372_v52 }
0x1784   :  { %9321 = vtanh.f32 %v4375_v32 }
0x1785   :  { %9323 = vtanh.f32 %v4376_v60 }
0x1786   :  { %9325 = vtanh.f32 %v4374_v21 }
0x1787   :  { %9327 = vtanh.f32 %v4377_v51 }
0x178e   :  { %v9322_v63 = vpop.eup %9321 }
0x178f   :  { %v4381_v7 = vmul.f32 0.5, %v9322_v63  ;;  %v9324_v57 = vpop.eup %9323 }
0x1790   :  { %v4382_v43 = vmul.f32 0.5, %v9324_v57  ;;  %v9326_v14 = vpop.eup %9325  ;;  %v11471_v57 = vld [vmem:[#allocation9_spill] sm:$0xff] }
0x1791   :  { %v4384_v56 = vadd.f32 0.5, %v4381_v7  ;;  %v9328_v0 = vpop.eup %9327 }
0x1792   :  { %v4385_v25 = vadd.f32 0.5, %v4382_v43  ;;  %v4383_v36 = vmul.f32 0.5, %v9328_v0 }
0x1793   :  { %v4389_v62 = vmul.f32 %v9326_v14, %v4384_v56 }
0x1794   :  { %v4388_v44 = vmul.f32 %v4385_v25, %v10843_v31  ;;  %v4386_v17 = vadd.f32 0.5, %v4383_v36  ;;  %v9536_v31 = vmov 25   ;;  %v4395_v25 = vpop.permute.xlu1 %4394 }
0x1795   :  { %9080 = vset.pattern.permute.xlu1 %v9536_v31  ;;  %v4397_v52 = vmul.f32 %v4395_v25, %v9767_v61  ;;  %v4398_v32 = vmul.f32 %v4395_v25, %v9772_v5  ;;  %v4400_v21 = vmul.f32 %v4395_v25, %v9777_v12  ;;  %v4399_v14 = vmul.f32 %v4395_v25, %v9786_v26 }
0x1796   :  { %v10890_v34 = vadd.f32 %v4389_v62, %v4388_v44  ;;  %4570 = vperm.xlu1 %9080, %v10737_v13  }
0x1797   :  { %v4401_v60 = vadd.f32 %v4397_v52, %v9775_v8  ;;  %v4402_v58 = vadd.f32 %v4398_v32, %v9780_v16  ;;  %v4404_v56 = vadd.f32 %v4400_v21, %v11471_v57 }
0x1798   :  { %9329 = vtanh.f32 %v10890_v34 }
0x17a2   :  { %v9330_v35 = vpop.eup %9329 }
0x17a3   :  { %v4392_v48 = vmul.f32 %v9330_v35, %v4386_v17  ;;  %v4403_v17 = vadd.f32 %v4399_v14, %v9791_v47 }
0x17a5   :  { %4470 = vmatmul.mubr.f32.vlgmr.msra.gmra.mrb[48].mxu0 %v4392_v48  ;;  %4541 = vmatmul.mubr.f32.vlgmr.msra.gmra.mrb[48].mxu1 %v4392_v48 }
0x17a6   :  { %8285 = vmatpush1.bf16.msra.mxu0 %v9627_v11  ;;  %8317 = vmatpush1.bf16.msra.mxu1 %v9630_v15 }
0x17a7   :  { %8287 = vmatprep.subr.bf16.mxu0 %v9634_v19  ;;  %8319 = vmatprep.subr.bf16.mxu1 %v9636_v20 }
0x17a8   :  { %4645 = vmatprep.mubr.f32.mxu0 %v11452_v1  ;;  %4716 = vmatprep.mubr.f32.mxu1 %v11452_v1 }
0x17aa   :  { %8289 = vmatpush1.bf16.msra.mxu0 %v9639_v24  ;;  %8321 = vmatpush1.bf16.msra.mxu1 %v9643_v28 }
0x17ab   :  { %8291 = vmatprep.subr.bf16.mxu0 %v9645_v29  ;;  %8323 = vmatprep.subr.bf16.mxu1 %v9647_v33 }
0x17ae   :  { %8293 = vmatpush1.bf16.msra.mxu0 %v9650_v37  ;;  %8325 = vmatpush1.bf16.msra.mxu1 %v9654_v41 }
0x17af   :  { %8295 = vmatprep.subr.bf16.mxu0 %v9656_v42  ;;  %8327 = vmatprep.subr.bf16.mxu1 %v9659_v46 }
0x17b2   :  { %8297 = vmatpush1.bf16.msra.mxu0 %v9662_v53  ;;  %8329 = vmatpush1.bf16.msra.mxu1 %v9666_v54 }
0x17b3   :  { %8299 = vmatprep.subr.bf16.mxu0 %v9668_v55  ;;  %8331 = vmatprep.subr.bf16.mxu1 %v9671_v59 }
0x17b6   :  { %8301 = vmatpush1.bf16.msra.mxu0 %v9674_v2  ;;  %8333 = vmatpush1.bf16.msra.mxu1 %v9678_v3 }
0x17b7   :  { %8303 = vmatprep.subr.bf16.mxu0 %v9680_v4  ;;  %8335 = vmatprep.subr.bf16.mxu1 %v9683_v9 }
0x17ba   :  { %8305 = vmatpush1.bf16.msra.mxu0 %v9686_v18  ;;  %8337 = vmatpush1.bf16.msra.mxu1 %v9690_v22 }
0x17bb   :  { %8307 = vmatprep.subr.bf16.mxu0 %v9692_v23  ;;  %8339 = vmatprep.subr.bf16.mxu1 %v9700_v30 }
0x17be   :  { %8309 = vmatpush1.bf16.msra.mxu0 %v9704_v38  ;;  %8341 = vmatpush1.bf16.msra.mxu1 %v9708_v39 }
0x17bf   :  { %8311 = vmatprep.subr.bf16.mxu0 %v9710_v40  ;;  %8343 = vmatprep.subr.bf16.mxu1 %v9713_v45 }
0x17c2   :  { %8313 = vmatpush1.bf16.msra.mxu0 %v9716_v49  ;;  %8345 = vmatpush1.bf16.msra.mxu1 %v9720_v50 }
0x17c3   :  { %8347 = vmatprep.subr.bf16.mxu0 %v9623_v6  ;;  %8379 = vmatprep.subr.bf16.mxu1 %v9625_v10 }
0x1878   :  { %v4471_v27 = vpop.f32.mrb[48].mxu0  ;;  %v4542_v51 = vpop.f32.mrb[48].mxu1 }
0x1879   :  { %v4547_v63 = vadd.f32 %v4471_v27, %v4401_v60  ;;  %v4473_v7 = vpop.f32.mrb[49].mxu0  ;;  %v4544_v43 = vpop.f32.mrb[49].mxu1  ;;  %v4549_v35 = vadd.f32 %v4542_v51, %v4403_v17 }
0x187a   :  { %v4548_v62 = vadd.f32 %v4473_v7, %v4402_v58  ;;  %v4550_v36 = vadd.f32 %v4544_v43, %v4404_v56 }
0x187b   :  { %v4551_v44 = vmul.f32 0.5, %v4547_v63  ;;  %v4553_v48 = vmul.f32 0.5, %v4549_v35 }
0x187c   :  { %v4552_v0 = vmul.f32 0.5, %v4548_v62 }
0x187d   :  { %9331 = vtanh.f32 %v4551_v44 }
0x187e   :  { %9333 = vtanh.f32 %v4552_v0 }
0x187f   :  { %9335 = vtanh.f32 %v4550_v36 }
0x1880   :  { %9337 = vtanh.f32 %v4553_v48 }
0x1887   :  { %v9332_v31 = vpop.eup %9331 }
0x1888   :  { %v4557_v52 = vmul.f32 0.5, %v9332_v31  ;;  %v9334_v32 = vpop.eup %9333 }
0x1889   :  { %v4558_v21 = vmul.f32 0.5, %v9334_v32  ;;  %v9336_v27 = vpop.eup %9335  ;;  %v11472_v32 = vld [vmem:[#allocation9_spill] sm:$0xff] }
0x188a   :  { %v4560_v60 = vadd.f32 0.5, %v4557_v52  ;;  %v9338_v7 = vpop.eup %9337 }
0x188b   :  { %v4561_v57 = vadd.f32 0.5, %v4558_v21  ;;  %v4559_v56 = vmul.f32 0.5, %v9338_v7 }
0x188c   :  { %v4565_v25 = vmul.f32 %v9336_v27, %v4560_v60 }
0x188d   :  { %v4564_v58 = vmul.f32 %v4561_v57, %v10890_v34  ;;  %v4562_v43 = vadd.f32 0.5, %v4559_v56  ;;  %v9537_v34 = vmov 26   ;;  %v4571_v57 = vpop.permute.xlu1 %4570 }
0x188e   :  { %9081 = vset.pattern.permute.xlu0 %v9537_v34  ;;  %v4573_v62 = vmul.f32 %v4571_v57, %v9767_v61  ;;  %v4574_v44 = vmul.f32 %v4571_v57, %v9772_v5  ;;  %v4576_v36 = vmul.f32 %v4571_v57, %v9777_v12  ;;  %v4575_v27 = vmul.f32 %v4571_v57, %v9786_v26 }
0x188f   :  { %v10937_v63 = vadd.f32 %v4565_v25, %v4564_v58  ;;  %4746 = vperm.xlu0 %9081, %v10737_v13  }
0x1890   :  { %v4577_v0 = vadd.f32 %v4573_v62, %v9775_v8  ;;  %v4578_v17 = vadd.f32 %v4574_v44, %v9780_v16  ;;  %v4580_v60 = vadd.f32 %v4576_v36, %v11472_v32 }
0x1891   :  { %9339 = vtanh.f32 %v10937_v63 }
0x189b   :  { %v9340_v51 = vpop.eup %9339 }
0x189c   :  { %v4568_v14 = vmul.f32 %v9340_v51, %v4562_v43  ;;  %v4579_v43 = vadd.f32 %v4575_v27, %v9791_v47 }
0x189e   :  { %4646 = vmatmul.mubr.f32.vlgmr.msra.gmra.mrb[50].mxu0 %v4568_v14  ;;  %4717 = vmatmul.mubr.f32.vlgmr.msra.gmra.mrb[50].mxu1 %v4568_v14 }
0x189f   :  { %8349 = vmatpush1.bf16.msra.mxu0 %v9627_v11  ;;  %8381 = vmatpush1.bf16.msra.mxu1 %v9630_v15 }
0x18a0   :  { %8351 = vmatprep.subr.bf16.mxu0 %v9634_v19  ;;  %8383 = vmatprep.subr.bf16.mxu1 %v9636_v20 }
0x18a1   :  { %4821 = vmatprep.mubr.f32.mxu0 %v11452_v1  ;;  %4892 = vmatprep.mubr.f32.mxu1 %v11452_v1 }
0x18a3   :  { %8353 = vmatpush1.bf16.msra.mxu0 %v9639_v24  ;;  %8385 = vmatpush1.bf16.msra.mxu1 %v9643_v28 }
0x18a4   :  { %8355 = vmatprep.subr.bf16.mxu0 %v9645_v29  ;;  %8387 = vmatprep.subr.bf16.mxu1 %v9647_v33 }
0x18a7   :  { %8357 = vmatpush1.bf16.msra.mxu0 %v9650_v37  ;;  %8389 = vmatpush1.bf16.msra.mxu1 %v9654_v41 }
0x18a8   :  { %8359 = vmatprep.subr.bf16.mxu0 %v9656_v42  ;;  %8391 = vmatprep.subr.bf16.mxu1 %v9659_v46 }
0x18ab   :  { %8361 = vmatpush1.bf16.msra.mxu0 %v9662_v53  ;;  %8393 = vmatpush1.bf16.msra.mxu1 %v9666_v54 }
0x18ac   :  { %8363 = vmatprep.subr.bf16.mxu0 %v9668_v55  ;;  %8395 = vmatprep.subr.bf16.mxu1 %v9671_v59 }
0x18af   :  { %8365 = vmatpush1.bf16.msra.mxu0 %v9674_v2  ;;  %8397 = vmatpush1.bf16.msra.mxu1 %v9678_v3 }
0x18b0   :  { %8367 = vmatprep.subr.bf16.mxu0 %v9680_v4  ;;  %8399 = vmatprep.subr.bf16.mxu1 %v9683_v9 }
0x18b3   :  { %8369 = vmatpush1.bf16.msra.mxu0 %v9686_v18  ;;  %8401 = vmatpush1.bf16.msra.mxu1 %v9690_v22 }
0x18b4   :  { %8371 = vmatprep.subr.bf16.mxu0 %v9692_v23  ;;  %8403 = vmatprep.subr.bf16.mxu1 %v9700_v30 }
0x18b7   :  { %8373 = vmatpush1.bf16.msra.mxu0 %v9704_v38  ;;  %8405 = vmatpush1.bf16.msra.mxu1 %v9708_v39 }
0x18b8   :  { %8375 = vmatprep.subr.bf16.mxu0 %v9710_v40  ;;  %8407 = vmatprep.subr.bf16.mxu1 %v9713_v45 }
0x18bb   :  { %8377 = vmatpush1.bf16.msra.mxu0 %v9716_v49  ;;  %8409 = vmatpush1.bf16.msra.mxu1 %v9720_v50 }
0x18bc   :  { %8411 = vmatprep.subr.bf16.mxu0 %v9623_v6  ;;  %8443 = vmatprep.subr.bf16.mxu1 %v9625_v10 }
0x1971   :  { %v4647_v35 = vpop.f32.mrb[50].mxu0  ;;  %v4718_v48 = vpop.f32.mrb[50].mxu1 }
0x1972   :  { %v4723_v31 = vadd.f32 %v4647_v35, %v4577_v0  ;;  %v4649_v52 = vpop.f32.mrb[51].mxu0  ;;  %v4720_v21 = vpop.f32.mrb[51].mxu1  ;;  %v4725_v51 = vadd.f32 %v4718_v48, %v4579_v43 }
0x1973   :  { %v4724_v25 = vadd.f32 %v4649_v52, %v4578_v17  ;;  %v4726_v56 = vadd.f32 %v4720_v21, %v4580_v60 }
0x1974   :  { %v4727_v58 = vmul.f32 0.5, %v4723_v31  ;;  %v4729_v14 = vmul.f32 0.5, %v4725_v51 }
0x1975   :  { %v4728_v7 = vmul.f32 0.5, %v4724_v25 }
0x1976   :  { %9341 = vtanh.f32 %v4727_v58 }
0x1977   :  { %9343 = vtanh.f32 %v4728_v7 }
0x1978   :  { %9345 = vtanh.f32 %v4726_v56 }
0x1979   :  { %9347 = vtanh.f32 %v4729_v14 }
0x1980   :  { %v9342_v34 = vpop.eup %9341 }
0x1981   :  { %v4733_v62 = vmul.f32 0.5, %v9342_v34  ;;  %v9344_v44 = vpop.eup %9343 }
0x1982   :  { %v4734_v36 = vmul.f32 0.5, %v9344_v44  ;;  %v9346_v35 = vpop.eup %9345  ;;  %v11473_v44 = vld [vmem:[#allocation9_spill] sm:$0xff] }
0x1983   :  { %v4736_v0 = vadd.f32 0.5, %v4733_v62  ;;  %v9348_v52 = vpop.eup %9347 }
0x1984   :  { %v4737_v32 = vadd.f32 0.5, %v4734_v36  ;;  %v4735_v60 = vmul.f32 0.5, %v9348_v52 }
0x1985   :  { %v4741_v57 = vmul.f32 %v9346_v35, %v4736_v0 }
0x1986   :  { %v4740_v17 = vmul.f32 %v4737_v32, %v10937_v63  ;;  %v4738_v21 = vadd.f32 0.5, %v4735_v60  ;;  %v9538_v63 = vmov 27   ;;  %v4747_v32 = vpop.permute.xlu0 %4746 }
0x1987   :  { %9082 = vset.pattern.permute.xlu1 %v9538_v63  ;;  %v4749_v25 = vmul.f32 %v4747_v32, %v9767_v61  ;;  %v4750_v58 = vmul.f32 %v4747_v32, %v9772_v5  ;;  %v4752_v56 = vmul.f32 %v4747_v32, %v9777_v12 }
0x1988   :  { %v10984_v31 = vadd.f32 %v4741_v57, %v4740_v17  ;;  %4922 = vperm.xlu1 %9082, %v10737_v13   ;;  %v4751_v13 = vmul.f32 %v4747_v32, %v9786_v26 }
0x1989   :  { %v4753_v7 = vadd.f32 %v4749_v25, %v9775_v8  ;;  %v4754_v43 = vadd.f32 %v4750_v58, %v9780_v16  ;;  %v4756_v0 = vadd.f32 %v4752_v56, %v11473_v44 }
0x198a   :  { %9349 = vtanh.f32 %v10984_v31  ;;  %v4755_v60 = vadd.f32 %v4751_v13, %v9791_v47 }
0x1994   :  { %v9350_v48 = vpop.eup %9349 }
0x1995   :  { %v4744_v27 = vmul.f32 %v9350_v48, %v4738_v21 }
0x1997   :  { %4822 = vmatmul.mubr.f32.vlgmr.msra.gmra.mrb[52].mxu0 %v4744_v27  ;;  %4893 = vmatmul.mubr.f32.vlgmr.msra.gmra.mrb[52].mxu1 %v4744_v27 }
0x1998   :  { %8413 = vmatpush1.bf16.msra.mxu0 %v9627_v11  ;;  %8445 = vmatpush1.bf16.msra.mxu1 %v9630_v15 }
0x1999   :  { %8415 = vmatprep.subr.bf16.mxu0 %v9634_v19  ;;  %8447 = vmatprep.subr.bf16.mxu1 %v9636_v20 }
0x199a   :  { %4997 = vmatprep.mubr.f32.mxu0 %v11452_v1  ;;  %5068 = vmatprep.mubr.f32.mxu1 %v11452_v1 }
0x199c   :  { %8417 = vmatpush1.bf16.msra.mxu0 %v9639_v24  ;;  %8449 = vmatpush1.bf16.msra.mxu1 %v9643_v28 }
0x199d   :  { %8419 = vmatprep.subr.bf16.mxu0 %v9645_v29  ;;  %8451 = vmatprep.subr.bf16.mxu1 %v9647_v33 }
0x19a0   :  { %8421 = vmatpush1.bf16.msra.mxu0 %v9650_v37  ;;  %8453 = vmatpush1.bf16.msra.mxu1 %v9654_v41 }
0x19a1   :  { %8423 = vmatprep.subr.bf16.mxu0 %v9656_v42  ;;  %8455 = vmatprep.subr.bf16.mxu1 %v9659_v46 }
0x19a4   :  { %8425 = vmatpush1.bf16.msra.mxu0 %v9662_v53  ;;  %8457 = vmatpush1.bf16.msra.mxu1 %v9666_v54 }
0x19a5   :  { %8427 = vmatprep.subr.bf16.mxu0 %v9668_v55  ;;  %8459 = vmatprep.subr.bf16.mxu1 %v9671_v59 }
0x19a8   :  { %8429 = vmatpush1.bf16.msra.mxu0 %v9674_v2  ;;  %8461 = vmatpush1.bf16.msra.mxu1 %v9678_v3 }
0x19a9   :  { %8431 = vmatprep.subr.bf16.mxu0 %v9680_v4  ;;  %8463 = vmatprep.subr.bf16.mxu1 %v9683_v9 }
0x19ac   :  { %8433 = vmatpush1.bf16.msra.mxu0 %v9686_v18  ;;  %8465 = vmatpush1.bf16.msra.mxu1 %v9690_v22 }
0x19ad   :  { %8435 = vmatprep.subr.bf16.mxu0 %v9692_v23  ;;  %8467 = vmatprep.subr.bf16.mxu1 %v9700_v30 }
0x19b0   :  { %8437 = vmatpush1.bf16.msra.mxu0 %v9704_v38  ;;  %8469 = vmatpush1.bf16.msra.mxu1 %v9708_v39 }
0x19b1   :  { %8439 = vmatprep.subr.bf16.mxu0 %v9710_v40  ;;  %8471 = vmatprep.subr.bf16.mxu1 %v9713_v45 }
0x19b4   :  { %8441 = vmatpush1.bf16.msra.mxu0 %v9716_v49  ;;  %8473 = vmatpush1.bf16.msra.mxu1 %v9720_v50 }
0x19b5   :  { %8475 = vmatprep.subr.bf16.mxu0 %v9623_v6  ;;  %8507 = vmatprep.subr.bf16.mxu1 %v9625_v10 }
0x1a6a   :  { %v4823_v51 = vpop.f32.mrb[52].mxu0  ;;  %v4894_v14 = vpop.f32.mrb[52].mxu1 }
0x1a6b   :  { %v4899_v34 = vadd.f32 %v4823_v51, %v4753_v7  ;;  %v4825_v62 = vpop.f32.mrb[53].mxu0  ;;  %v4896_v36 = vpop.f32.mrb[53].mxu1  ;;  %v4901_v21 = vadd.f32 %v4894_v14, %v4755_v60 }
0x1a6c   :  { %v4900_v35 = vadd.f32 %v4825_v62, %v4754_v43  ;;  %v4902_v52 = vadd.f32 %v4896_v36, %v4756_v0 }
0x1a6d   :  { %v4903_v57 = vmul.f32 0.5, %v4899_v34  ;;  %v4905_v48 = vmul.f32 0.5, %v4901_v21 }
0x1a6e   :  { %v4904_v17 = vmul.f32 0.5, %v4900_v35  ;;  %v11071_v35 = vld [vmem:[%s11434_s0] sm:$0x3] }
0x1a6f   :  { %9351 = vtanh.f32 %v4903_v57  ;;  %v4923_v57 = vpop.permute.xlu1 %4922 }
0x1a70   :  { %9353 = vtanh.f32 %v4904_v17  ;;  %v4925_v17 = vmul.f32 %v4923_v57, %v9767_v61  ;;  %v4928_v21 = vmul.f32 %v4923_v57, %v9777_v12 }
0x1a71   :  { %9355 = vtanh.f32 %v4902_v52  ;;  %v4926_v52 = vmul.f32 %v4923_v57, %v9772_v5 }
0x1a72   :  { %9357 = vtanh.f32 %v4905_v48  ;;  %v4929_v60 = vadd.f32 %v4925_v17, %v9775_v8 }
0x1a73   :  { %v4930_v48 = vadd.f32 %v4926_v52, %v9780_v16 }
0x1a79   :  { %v9352_v27 = vpop.eup %9351 }
0x1a7a   :  { %v4909_v63 = vmul.f32 0.5, %v9352_v27  ;;  %v9354_v25 = vpop.eup %9353 }
0x1a7b   :  { %v4910_v7 = vmul.f32 0.5, %v9354_v25  ;;  %v9356_v56 = vpop.eup %9355 }
0x1a7c   :  { %v4912_v58 = vadd.f32 0.5, %v4909_v63  ;;  %v9358_v62 = vpop.eup %9357 }
0x1a7d   :  { %v4913_v51 = vadd.f32 0.5, %v4910_v7  ;;  %v4911_v0 = vmul.f32 0.5, %v9358_v62  ;;  %v4932_v7 = vadd.f32 %v4928_v21, %v11473_v44 }
0x1a7e   :  { %v4917_v32 = vmul.f32 %v9356_v56, %v4912_v58 }
0x1a7f   :  { %v4916_v43 = vmul.f32 %v4913_v51, %v10984_v31  ;;  %v4914_v36 = vadd.f32 0.5, %v4911_v0  ;;  %v9539_v31 = vmov 28   ;;  %v4927_v51 = vmul.f32 %v4923_v57, %v9786_v26 }
0x1a80   :  { %9083 = vset.pattern.permute.xlu1 %v9539_v31 }
0x1a81   :  { %v11031_v34 = vadd.f32 %v4917_v32, %v4916_v43  ;;  %5098 = vperm.xlu1 %9083, %v11071_v35  }
0x1a83   :  { %9359 = vtanh.f32 %v11031_v34 }
0x1a8d   :  { %v9360_v14 = vpop.eup %9359 }
0x1a8e   :  { %v4920_v13 = vmul.f32 %v9360_v14, %v4914_v36  ;;  %v4931_v36 = vadd.f32 %v4927_v51, %v9791_v47 }
0x1a90   :  { %4998 = vmatmul.mubr.f32.vlgmr.msra.gmra.mrb[54].mxu0 %v4920_v13  ;;  %5069 = vmatmul.mubr.f32.vlgmr.msra.gmra.mrb[54].mxu1 %v4920_v13 }
0x1a91   :  { %8477 = vmatpush1.bf16.msra.mxu0 %v9627_v11  ;;  %8509 = vmatpush1.bf16.msra.mxu1 %v9630_v15 }
0x1a92   :  { %8479 = vmatprep.subr.bf16.mxu0 %v9634_v19  ;;  %8511 = vmatprep.subr.bf16.mxu1 %v9636_v20 }
0x1a93   :  { %5173 = vmatprep.mubr.f32.mxu0 %v11452_v1  ;;  %5244 = vmatprep.mubr.f32.mxu1 %v11452_v1 }
0x1a95   :  { %8481 = vmatpush1.bf16.msra.mxu0 %v9639_v24  ;;  %8513 = vmatpush1.bf16.msra.mxu1 %v9643_v28 }
0x1a96   :  { %8483 = vmatprep.subr.bf16.mxu0 %v9645_v29  ;;  %8515 = vmatprep.subr.bf16.mxu1 %v9647_v33 }
0x1a99   :  { %8485 = vmatpush1.bf16.msra.mxu0 %v9650_v37  ;;  %8517 = vmatpush1.bf16.msra.mxu1 %v9654_v41 }
0x1a9a   :  { %8487 = vmatprep.subr.bf16.mxu0 %v9656_v42  ;;  %8519 = vmatprep.subr.bf16.mxu1 %v9659_v46 }
0x1a9d   :  { %8489 = vmatpush1.bf16.msra.mxu0 %v9662_v53  ;;  %8521 = vmatpush1.bf16.msra.mxu1 %v9666_v54 }
0x1a9e   :  { %8491 = vmatprep.subr.bf16.mxu0 %v9668_v55  ;;  %8523 = vmatprep.subr.bf16.mxu1 %v9671_v59 }
0x1aa1   :  { %8493 = vmatpush1.bf16.msra.mxu0 %v9674_v2  ;;  %8525 = vmatpush1.bf16.msra.mxu1 %v9678_v3 }
0x1aa2   :  { %8495 = vmatprep.subr.bf16.mxu0 %v9680_v4  ;;  %8527 = vmatprep.subr.bf16.mxu1 %v9683_v9 }
0x1aa5   :  { %8497 = vmatpush1.bf16.msra.mxu0 %v9686_v18  ;;  %8529 = vmatpush1.bf16.msra.mxu1 %v9690_v22 }
0x1aa6   :  { %8499 = vmatprep.subr.bf16.mxu0 %v9692_v23  ;;  %8531 = vmatprep.subr.bf16.mxu1 %v9700_v30 }
0x1aa9   :  { %8501 = vmatpush1.bf16.msra.mxu0 %v9704_v38  ;;  %8533 = vmatpush1.bf16.msra.mxu1 %v9708_v39 }
0x1aaa   :  { %8503 = vmatprep.subr.bf16.mxu0 %v9710_v40  ;;  %8535 = vmatprep.subr.bf16.mxu1 %v9713_v45 }
0x1aad   :  { %8505 = vmatpush1.bf16.msra.mxu0 %v9716_v49  ;;  %8537 = vmatpush1.bf16.msra.mxu1 %v9720_v50 }
0x1aae   :  { %8539 = vmatprep.subr.bf16.mxu0 %v9623_v6  ;;  %8571 = vmatprep.subr.bf16.mxu1 %v9625_v10 }
0x1b63   :  { %v4999_v27 = vpop.f32.mrb[54].mxu0  ;;  %v5070_v63 = vpop.f32.mrb[54].mxu1 }
0x1b64   :  { %v5075_v25 = vadd.f32 %v4999_v27, %v4929_v60  ;;  %v5001_v58 = vpop.f32.mrb[55].mxu0  ;;  %v5072_v56 = vpop.f32.mrb[55].mxu1  ;;  %v5077_v14 = vadd.f32 %v5070_v63, %v4931_v36 }
0x1b65   :  { %v5076_v32 = vadd.f32 %v5001_v58, %v4930_v48  ;;  %v5078_v0 = vadd.f32 %v5072_v56, %v4932_v7 }
0x1b66   :  { %v5079_v43 = vmul.f32 0.5, %v5075_v25  ;;  %v5081_v13 = vmul.f32 0.5, %v5077_v14 }
0x1b67   :  { %v5080_v62 = vmul.f32 0.5, %v5076_v32 }
0x1b68   :  { %9361 = vtanh.f32 %v5079_v43 }
0x1b69   :  { %9363 = vtanh.f32 %v5080_v62 }
0x1b6a   :  { %9365 = vtanh.f32 %v5078_v0 }
0x1b6b   :  { %9367 = vtanh.f32 %v5081_v13 }
0x1b72   :  { %v9362_v31 = vpop.eup %9361 }
0x1b73   :  { %v5085_v17 = vmul.f32 0.5, %v9362_v31  ;;  %v9364_v52 = vpop.eup %9363 }
0x1b74   :  { %v5086_v21 = vmul.f32 0.5, %v9364_v52  ;;  %v9366_v27 = vpop.eup %9365  ;;  %v11474_v52 = vld [vmem:[#allocation9_spill] sm:$0xff] }
0x1b75   :  { %v5088_v60 = vadd.f32 0.5, %v5085_v17  ;;  %v9368_v58 = vpop.eup %9367 }
0x1b76   :  { %v5089_v44 = vadd.f32 0.5, %v5086_v21  ;;  %v5087_v7 = vmul.f32 0.5, %v9368_v58 }
0x1b77   :  { %v5093_v57 = vmul.f32 %v9366_v27, %v5088_v60 }
0x1b78   :  { %v5092_v48 = vmul.f32 %v5089_v44, %v11031_v34  ;;  %v5090_v56 = vadd.f32 0.5, %v5087_v7  ;;  %v9540_v44 = vmov 29   ;;  %v5099_v34 = vpop.permute.xlu1 %5098 }
0x1b79   :  { %9084 = vset.pattern.permute.xlu0 %v9540_v44  ;;  %v5101_v32 = vmul.f32 %v5099_v34, %v9767_v61  ;;  %v5102_v43 = vmul.f32 %v5099_v34, %v9772_v5  ;;  %v5104_v0 = vmul.f32 %v5099_v34, %v9777_v12  ;;  %v5103_v27 = vmul.f32 %v5099_v34, %v9786_v26 }
0x1b7a   :  { %v11083_v25 = vadd.f32 %v5093_v57, %v5092_v48  ;;  %5274 = vperm.xlu0 %9084, %v11071_v35  }
0x1b7b   :  { %v5105_v62 = vadd.f32 %v5101_v32, %v9775_v8  ;;  %v5106_v36 = vadd.f32 %v5102_v43, %v9780_v16  ;;  %v5108_v60 = vadd.f32 %v5104_v0, %v11474_v52 }
0x1b7c   :  { %9369 = vtanh.f32 %v11083_v25 }
0x1b86   :  { %v9370_v63 = vpop.eup %9369 }
0x1b87   :  { %v5096_v51 = vmul.f32 %v9370_v63, %v5090_v56  ;;  %v5107_v56 = vadd.f32 %v5103_v27, %v9791_v47 }
0x1b89   :  { %5174 = vmatmul.mubr.f32.vlgmr.msra.gmra.mrb[56].mxu0 %v5096_v51  ;;  %5245 = vmatmul.mubr.f32.vlgmr.msra.gmra.mrb[56].mxu1 %v5096_v51 }
0x1b8a   :  { %8541 = vmatpush1.bf16.msra.mxu0 %v9627_v11  ;;  %8573 = vmatpush1.bf16.msra.mxu1 %v9630_v15 }
0x1b8b   :  { %8543 = vmatprep.subr.bf16.mxu0 %v9634_v19  ;;  %8575 = vmatprep.subr.bf16.mxu1 %v9636_v20 }
0x1b8c   :  { %5349 = vmatprep.mubr.f32.mxu0 %v11452_v1  ;;  %5420 = vmatprep.mubr.f32.mxu1 %v11452_v1 }
0x1b8e   :  { %8545 = vmatpush1.bf16.msra.mxu0 %v9639_v24  ;;  %8577 = vmatpush1.bf16.msra.mxu1 %v9643_v28 }
0x1b8f   :  { %8547 = vmatprep.subr.bf16.mxu0 %v9645_v29  ;;  %8579 = vmatprep.subr.bf16.mxu1 %v9647_v33 }
0x1b92   :  { %8549 = vmatpush1.bf16.msra.mxu0 %v9650_v37  ;;  %8581 = vmatpush1.bf16.msra.mxu1 %v9654_v41 }
0x1b93   :  { %8551 = vmatprep.subr.bf16.mxu0 %v9656_v42  ;;  %8583 = vmatprep.subr.bf16.mxu1 %v9659_v46 }
0x1b96   :  { %8553 = vmatpush1.bf16.msra.mxu0 %v9662_v53  ;;  %8585 = vmatpush1.bf16.msra.mxu1 %v9666_v54 }
0x1b97   :  { %8555 = vmatprep.subr.bf16.mxu0 %v9668_v55  ;;  %8587 = vmatprep.subr.bf16.mxu1 %v9671_v59 }
0x1b9a   :  { %8557 = vmatpush1.bf16.msra.mxu0 %v9674_v2  ;;  %8589 = vmatpush1.bf16.msra.mxu1 %v9678_v3 }
0x1b9b   :  { %8559 = vmatprep.subr.bf16.mxu0 %v9680_v4  ;;  %8591 = vmatprep.subr.bf16.mxu1 %v9683_v9 }
0x1b9e   :  { %8561 = vmatpush1.bf16.msra.mxu0 %v9686_v18  ;;  %8593 = vmatpush1.bf16.msra.mxu1 %v9690_v22 }
0x1b9f   :  { %8563 = vmatprep.subr.bf16.mxu0 %v9692_v23  ;;  %8595 = vmatprep.subr.bf16.mxu1 %v9700_v30 }
0x1ba2   :  { %8565 = vmatpush1.bf16.msra.mxu0 %v9704_v38  ;;  %8597 = vmatpush1.bf16.msra.mxu1 %v9708_v39 }
0x1ba3   :  { %8567 = vmatprep.subr.bf16.mxu0 %v9710_v40  ;;  %8599 = vmatprep.subr.bf16.mxu1 %v9713_v45 }
0x1ba6   :  { %8569 = vmatpush1.bf16.msra.mxu0 %v9716_v49  ;;  %8601 = vmatpush1.bf16.msra.mxu1 %v9720_v50 }
0x1ba7   :  { %8603 = vmatprep.subr.bf16.mxu0 %v9623_v6  ;;  %8635 = vmatprep.subr.bf16.mxu1 %v9625_v10 }
0x1c5c   :  { %v5175_v14 = vpop.f32.mrb[56].mxu0  ;;  %v5246_v13 = vpop.f32.mrb[56].mxu1 }
0x1c5d   :  { %v5251_v31 = vadd.f32 %v5175_v14, %v5105_v62  ;;  %v5177_v17 = vpop.f32.mrb[57].mxu0  ;;  %v5248_v21 = vpop.f32.mrb[57].mxu1  ;;  %v5253_v63 = vadd.f32 %v5246_v13, %v5107_v56 }
0x1c5e   :  { %v5252_v57 = vadd.f32 %v5177_v17, %v5106_v36  ;;  %v5254_v7 = vadd.f32 %v5248_v21, %v5108_v60 }
0x1c5f   :  { %v5255_v48 = vmul.f32 0.5, %v5251_v31  ;;  %v5257_v51 = vmul.f32 0.5, %v5253_v63 }
0x1c60   :  { %v5256_v58 = vmul.f32 0.5, %v5252_v57 }
0x1c61   :  { %9371 = vtanh.f32 %v5255_v48 }
0x1c62   :  { %9373 = vtanh.f32 %v5256_v58 }
0x1c63   :  { %9375 = vtanh.f32 %v5254_v7 }
0x1c64   :  { %9377 = vtanh.f32 %v5257_v51 }
0x1c6b   :  { %v9372_v44 = vpop.eup %9371 }
0x1c6c   :  { %v5261_v32 = vmul.f32 0.5, %v9372_v44  ;;  %v9374_v43 = vpop.eup %9373 }
0x1c6d   :  { %v5262_v0 = vmul.f32 0.5, %v9374_v43  ;;  %v9376_v14 = vpop.eup %9375  ;;  %v11475_v43 = vld [vmem:[#allocation9_spill] sm:$0xff] }
0x1c6e   :  { %v5264_v62 = vadd.f32 0.5, %v5261_v32  ;;  %v9378_v17 = vpop.eup %9377 }
0x1c6f   :  { %v5265_v52 = vadd.f32 0.5, %v5262_v0  ;;  %v5263_v60 = vmul.f32 0.5, %v9378_v17 }
0x1c70   :  { %v5269_v34 = vmul.f32 %v9376_v14, %v5264_v62 }
0x1c71   :  { %v5268_v36 = vmul.f32 %v5265_v52, %v11083_v25  ;;  %v5266_v21 = vadd.f32 0.5, %v5263_v60  ;;  %v9541_v25 = vmov 30   ;;  %v5275_v52 = vpop.permute.xlu0 %5274 }
0x1c72   :  { %9085 = vset.pattern.permute.xlu1 %v9541_v25  ;;  %v5277_v57 = vmul.f32 %v5275_v52, %v9767_v61  ;;  %v5278_v48 = vmul.f32 %v5275_v52, %v9772_v5  ;;  %v5280_v7 = vmul.f32 %v5275_v52, %v9777_v12  ;;  %v5279_v14 = vmul.f32 %v5275_v52, %v9786_v26 }
0x1c73   :  { %v11130_v31 = vadd.f32 %v5269_v34, %v5268_v36  ;;  %5450 = vperm.xlu1 %9085, %v11071_v35  }
0x1c74   :  { %v5281_v58 = vadd.f32 %v5277_v57, %v9775_v8  ;;  %v5282_v56 = vadd.f32 %v5278_v48, %v9780_v16  ;;  %v5284_v62 = vadd.f32 %v5280_v7, %v11475_v43 }
0x1c75   :  { %9379 = vtanh.f32 %v11130_v31 }
0x1c7f   :  { %v9380_v13 = vpop.eup %9379 }
0x1c80   :  { %v5272_v27 = vmul.f32 %v9380_v13, %v5266_v21  ;;  %v5283_v21 = vadd.f32 %v5279_v14, %v9791_v47 }
0x1c82   :  { %5350 = vmatmul.mubr.f32.vlgmr.msra.gmra.mrb[58].mxu0 %v5272_v27  ;;  %5421 = vmatmul.mubr.f32.vlgmr.msra.gmra.mrb[58].mxu1 %v5272_v27 }
0x1c83   :  { %8605 = vmatpush1.bf16.msra.mxu0 %v9627_v11  ;;  %8637 = vmatpush1.bf16.msra.mxu1 %v9630_v15 }
0x1c84   :  { %8607 = vmatprep.subr.bf16.mxu0 %v9634_v19  ;;  %8639 = vmatprep.subr.bf16.mxu1 %v9636_v20 }
0x1c85   :  { %5525 = vmatprep.mubr.f32.mxu0 %v11452_v1  ;;  %5596 = vmatprep.mubr.f32.mxu1 %v11452_v1 }
0x1c87   :  { %8609 = vmatpush1.bf16.msra.mxu0 %v9639_v24  ;;  %8641 = vmatpush1.bf16.msra.mxu1 %v9643_v28 }
0x1c88   :  { %8611 = vmatprep.subr.bf16.mxu0 %v9645_v29  ;;  %8643 = vmatprep.subr.bf16.mxu1 %v9647_v33 }
0x1c8b   :  { %8613 = vmatpush1.bf16.msra.mxu0 %v9650_v37  ;;  %8645 = vmatpush1.bf16.msra.mxu1 %v9654_v41 }
0x1c8c   :  { %8615 = vmatprep.subr.bf16.mxu0 %v9656_v42  ;;  %8647 = vmatprep.subr.bf16.mxu1 %v9659_v46 }
0x1c8f   :  { %8617 = vmatpush1.bf16.msra.mxu0 %v9662_v53  ;;  %8649 = vmatpush1.bf16.msra.mxu1 %v9666_v54 }
0x1c90   :  { %8619 = vmatprep.subr.bf16.mxu0 %v9668_v55  ;;  %8651 = vmatprep.subr.bf16.mxu1 %v9671_v59 }
0x1c93   :  { %8621 = vmatpush1.bf16.msra.mxu0 %v9674_v2  ;;  %8653 = vmatpush1.bf16.msra.mxu1 %v9678_v3 }
0x1c94   :  { %8623 = vmatprep.subr.bf16.mxu0 %v9680_v4  ;;  %8655 = vmatprep.subr.bf16.mxu1 %v9683_v9 }
0x1c97   :  { %8625 = vmatpush1.bf16.msra.mxu0 %v9686_v18  ;;  %8657 = vmatpush1.bf16.msra.mxu1 %v9690_v22 }
0x1c98   :  { %8627 = vmatprep.subr.bf16.mxu0 %v9692_v23  ;;  %8659 = vmatprep.subr.bf16.mxu1 %v9700_v30 }
0x1c9b   :  { %8629 = vmatpush1.bf16.msra.mxu0 %v9704_v38  ;;  %8661 = vmatpush1.bf16.msra.mxu1 %v9708_v39 }
0x1c9c   :  { %8631 = vmatprep.subr.bf16.mxu0 %v9710_v40  ;;  %8663 = vmatprep.subr.bf16.mxu1 %v9713_v45 }
0x1c9f   :  { %8633 = vmatpush1.bf16.msra.mxu0 %v9716_v49  ;;  %8665 = vmatpush1.bf16.msra.mxu1 %v9720_v50 }
0x1ca0   :  { %8667 = vmatprep.subr.bf16.mxu0 %v9623_v6  ;;  %8699 = vmatprep.subr.bf16.mxu1 %v9625_v10 }
0x1d55   :  { %v5351_v63 = vpop.f32.mrb[58].mxu0  ;;  %v5422_v51 = vpop.f32.mrb[58].mxu1 }
0x1d56   :  { %v5427_v44 = vadd.f32 %v5351_v63, %v5281_v58  ;;  %v5353_v32 = vpop.f32.mrb[59].mxu0  ;;  %v5424_v0 = vpop.f32.mrb[59].mxu1  ;;  %v5429_v13 = vadd.f32 %v5422_v51, %v5283_v21 }
0x1d57   :  { %v5428_v34 = vadd.f32 %v5353_v32, %v5282_v56  ;;  %v5430_v60 = vadd.f32 %v5424_v0, %v5284_v62 }
0x1d58   :  { %v5431_v36 = vmul.f32 0.5, %v5427_v44  ;;  %v5433_v27 = vmul.f32 0.5, %v5429_v13 }
0x1d59   :  { %v5432_v17 = vmul.f32 0.5, %v5428_v34 }
0x1d5a   :  { %9381 = vtanh.f32 %v5431_v36 }
0x1d5b   :  { %9383 = vtanh.f32 %v5432_v17 }
0x1d5c   :  { %9385 = vtanh.f32 %v5430_v60 }
0x1d5d   :  { %9387 = vtanh.f32 %v5433_v27 }
0x1d64   :  { %v9382_v25 = vpop.eup %9381 }
0x1d65   :  { %v5437_v57 = vmul.f32 0.5, %v9382_v25  ;;  %v9384_v48 = vpop.eup %9383 }
0x1d66   :  { %v5438_v7 = vmul.f32 0.5, %v9384_v48  ;;  %v9386_v63 = vpop.eup %9385  ;;  %v11476_v48 = vld [vmem:[#allocation9_spill] sm:$0xff] }
0x1d67   :  { %v5440_v58 = vadd.f32 0.5, %v5437_v57  ;;  %v9388_v32 = vpop.eup %9387 }
0x1d68   :  { %v5441_v43 = vadd.f32 0.5, %v5438_v7  ;;  %v5439_v62 = vmul.f32 0.5, %v9388_v32 }
0x1d69   :  { %v5445_v52 = vmul.f32 %v9386_v63, %v5440_v58 }
0x1d6a   :  { %v5444_v56 = vmul.f32 %v5441_v43, %v11130_v31  ;;  %v5442_v0 = vadd.f32 0.5, %v5439_v62  ;;  %v9542_v31 = vmov 31   ;;  %v5451_v43 = vpop.permute.xlu1 %5450 }
0x1d6b   :  { %9086 = vset.pattern.permute.xlu1 %v9542_v31  ;;  %v5453_v34 = vmul.f32 %v5451_v43, %v9767_v61  ;;  %v5454_v36 = vmul.f32 %v5451_v43, %v9772_v5  ;;  %v5456_v60 = vmul.f32 %v5451_v43, %v9777_v12  ;;  %v5455_v63 = vmul.f32 %v5451_v43, %v9786_v26 }
0x1d6c   :  { %v11177_v44 = vadd.f32 %v5445_v52, %v5444_v56  ;;  %5626 = vperm.xlu1 %9086, %v11071_v35  }
0x1d6d   :  { %v5457_v17 = vadd.f32 %v5453_v34, %v9775_v8  ;;  %v5458_v21 = vadd.f32 %v5454_v36, %v9780_v16  ;;  %v5460_v58 = vadd.f32 %v5456_v60, %v11476_v48 }
0x1d6e   :  { %9389 = vtanh.f32 %v11177_v44 }
0x1d78   :  { %v9390_v51 = vpop.eup %9389 }
0x1d79   :  { %v5448_v14 = vmul.f32 %v9390_v51, %v5442_v0  ;;  %v5459_v0 = vadd.f32 %v5455_v63, %v9791_v47 }
0x1d7b   :  { %5526 = vmatmul.mubr.f32.vlgmr.msra.gmra.mrb[60].mxu0 %v5448_v14  ;;  %5597 = vmatmul.mubr.f32.vlgmr.msra.gmra.mrb[60].mxu1 %v5448_v14 }
0x1d7c   :  { %8669 = vmatpush1.bf16.msra.mxu0 %v9627_v11  ;;  %8701 = vmatpush1.bf16.msra.mxu1 %v9630_v15 }
0x1d7d   :  { %8671 = vmatprep.subr.bf16.mxu0 %v9634_v19  ;;  %8703 = vmatprep.subr.bf16.mxu1 %v9636_v20 }
0x1d7e   :  { %5701 = vmatprep.mubr.f32.mxu0 %v11452_v1  ;;  %5772 = vmatprep.mubr.f32.mxu1 %v11452_v1 }
0x1d80   :  { %8673 = vmatpush1.bf16.msra.mxu0 %v9639_v24  ;;  %8705 = vmatpush1.bf16.msra.mxu1 %v9643_v28 }
0x1d81   :  { %8675 = vmatprep.subr.bf16.mxu0 %v9645_v29  ;;  %8707 = vmatprep.subr.bf16.mxu1 %v9647_v33 }
0x1d84   :  { %8677 = vmatpush1.bf16.msra.mxu0 %v9650_v37  ;;  %8709 = vmatpush1.bf16.msra.mxu1 %v9654_v41 }
0x1d85   :  { %8679 = vmatprep.subr.bf16.mxu0 %v9656_v42  ;;  %8711 = vmatprep.subr.bf16.mxu1 %v9659_v46 }
0x1d88   :  { %8681 = vmatpush1.bf16.msra.mxu0 %v9662_v53  ;;  %8713 = vmatpush1.bf16.msra.mxu1 %v9666_v54 }
0x1d89   :  { %8683 = vmatprep.subr.bf16.mxu0 %v9668_v55  ;;  %8715 = vmatprep.subr.bf16.mxu1 %v9671_v59 }
0x1d8c   :  { %8685 = vmatpush1.bf16.msra.mxu0 %v9674_v2  ;;  %8717 = vmatpush1.bf16.msra.mxu1 %v9678_v3 }
0x1d8d   :  { %8687 = vmatprep.subr.bf16.mxu0 %v9680_v4  ;;  %8719 = vmatprep.subr.bf16.mxu1 %v9683_v9 }
0x1d90   :  { %8689 = vmatpush1.bf16.msra.mxu0 %v9686_v18  ;;  %8721 = vmatpush1.bf16.msra.mxu1 %v9690_v22 }
0x1d91   :  { %8691 = vmatprep.subr.bf16.mxu0 %v9692_v23  ;;  %8723 = vmatprep.subr.bf16.mxu1 %v9700_v30 }
0x1d94   :  { %8693 = vmatpush1.bf16.msra.mxu0 %v9704_v38  ;;  %8725 = vmatpush1.bf16.msra.mxu1 %v9708_v39 }
0x1d95   :  { %8695 = vmatprep.subr.bf16.mxu0 %v9710_v40  ;;  %8727 = vmatprep.subr.bf16.mxu1 %v9713_v45 }
0x1d98   :  { %8697 = vmatpush1.bf16.msra.mxu0 %v9716_v49  ;;  %8729 = vmatpush1.bf16.msra.mxu1 %v9720_v50 }
0x1d99   :  { %8731 = vmatprep.subr.bf16.mxu0 %v9623_v6  ;;  %8763 = vmatprep.subr.bf16.mxu1 %v9625_v10 }
0x1e4e   :  { %v5527_v13 = vpop.f32.mrb[60].mxu0  ;;  %v5598_v27 = vpop.f32.mrb[60].mxu1 }
0x1e4f   :  { %v5603_v25 = vadd.f32 %v5527_v13, %v5457_v17  ;;  %v5529_v57 = vpop.f32.mrb[61].mxu0  ;;  %v5600_v7 = vpop.f32.mrb[61].mxu1  ;;  %v5605_v51 = vadd.f32 %v5598_v27, %v5459_v0 }
0x1e50   :  { %v5604_v52 = vadd.f32 %v5529_v57, %v5458_v21  ;;  %v5606_v62 = vadd.f32 %v5600_v7, %v5460_v58 }
0x1e51   :  { %v5607_v56 = vmul.f32 0.5, %v5603_v25  ;;  %v5609_v14 = vmul.f32 0.5, %v5605_v51 }
0x1e52   :  { %v5608_v32 = vmul.f32 0.5, %v5604_v52 }
0x1e53   :  { %9391 = vtanh.f32 %v5607_v56 }
0x1e54   :  { %9393 = vtanh.f32 %v5608_v32 }
0x1e55   :  { %9395 = vtanh.f32 %v5606_v62 }
0x1e56   :  { %9397 = vtanh.f32 %v5609_v14 }
0x1e5d   :  { %v9392_v31 = vpop.eup %9391 }
0x1e5e   :  { %v5613_v34 = vmul.f32 0.5, %v9392_v31  ;;  %v9394_v36 = vpop.eup %9393 }
0x1e5f   :  { %v5614_v60 = vmul.f32 0.5, %v9394_v36  ;;  %v9396_v13 = vpop.eup %9395  ;;  %v11477_v36 = vld [vmem:[#allocation9_spill] sm:$0xff] }
0x1e60   :  { %v5616_v17 = vadd.f32 0.5, %v5613_v34  ;;  %v9398_v57 = vpop.eup %9397 }
0x1e61   :  { %v5617_v48 = vadd.f32 0.5, %v5614_v60  ;;  %v5615_v58 = vmul.f32 0.5, %v9398_v57 }
0x1e62   :  { %v5621_v43 = vmul.f32 %v9396_v13, %v5616_v17 }
0x1e63   :  { %v5620_v21 = vmul.f32 %v5617_v48, %v11177_v44  ;;  %v5618_v7 = vadd.f32 0.5, %v5615_v58  ;;  %v9543_v44 = vmov 32   ;;  %v5627_v48 = vpop.permute.xlu1 %5626 }
0x1e64   :  { %9087 = vset.pattern.permute.xlu0 %v9543_v44  ;;  %v5629_v52 = vmul.f32 %v5627_v48, %v9767_v61  ;;  %v5630_v56 = vmul.f32 %v5627_v48, %v9772_v5  ;;  %v5632_v62 = vmul.f32 %v5627_v48, %v9777_v12  ;;  %v5631_v13 = vmul.f32 %v5627_v48, %v9786_v26 }
0x1e65   :  { %v11224_v25 = vadd.f32 %v5621_v43, %v5620_v21  ;;  %5802 = vperm.xlu0 %9087, %v11071_v35  }
0x1e66   :  { %v5633_v32 = vadd.f32 %v5629_v52, %v9775_v8  ;;  %v5634_v0 = vadd.f32 %v5630_v56, %v9780_v16  ;;  %v5636_v17 = vadd.f32 %v5632_v62, %v11477_v36 }
0x1e67   :  { %9399 = vtanh.f32 %v11224_v25 }
0x1e71   :  { %v9400_v27 = vpop.eup %9399 }
0x1e72   :  { %v5624_v63 = vmul.f32 %v9400_v27, %v5618_v7  ;;  %v5635_v7 = vadd.f32 %v5631_v13, %v9791_v47 }
0x1e74   :  { %5702 = vmatmul.mubr.f32.vlgmr.msra.gmra.mrb[62].mxu0 %v5624_v63  ;;  %5773 = vmatmul.mubr.f32.vlgmr.msra.gmra.mrb[62].mxu1 %v5624_v63 }
0x1e75   :  { %8733 = vmatpush1.bf16.msra.mxu0 %v9627_v11  ;;  %8765 = vmatpush1.bf16.msra.mxu1 %v9630_v15 }
0x1e76   :  { %8735 = vmatprep.subr.bf16.mxu0 %v9634_v19  ;;  %8767 = vmatprep.subr.bf16.mxu1 %v9636_v20 }
0x1e77   :  { %5877 = vmatprep.mubr.f32.mxu0 %v11452_v1  ;;  %5948 = vmatprep.mubr.f32.mxu1 %v11452_v1 }
0x1e79   :  { %8737 = vmatpush1.bf16.msra.mxu0 %v9639_v24  ;;  %8769 = vmatpush1.bf16.msra.mxu1 %v9643_v28 }
0x1e7a   :  { %8739 = vmatprep.subr.bf16.mxu0 %v9645_v29  ;;  %8771 = vmatprep.subr.bf16.mxu1 %v9647_v33 }
0x1e7d   :  { %8741 = vmatpush1.bf16.msra.mxu0 %v9650_v37  ;;  %8773 = vmatpush1.bf16.msra.mxu1 %v9654_v41 }
0x1e7e   :  { %8743 = vmatprep.subr.bf16.mxu0 %v9656_v42  ;;  %8775 = vmatprep.subr.bf16.mxu1 %v9659_v46 }
0x1e81   :  { %8745 = vmatpush1.bf16.msra.mxu0 %v9662_v53  ;;  %8777 = vmatpush1.bf16.msra.mxu1 %v9666_v54 }
0x1e82   :  { %8747 = vmatprep.subr.bf16.mxu0 %v9668_v55  ;;  %8779 = vmatprep.subr.bf16.mxu1 %v9671_v59 }
0x1e85   :  { %8749 = vmatpush1.bf16.msra.mxu0 %v9674_v2  ;;  %8781 = vmatpush1.bf16.msra.mxu1 %v9678_v3 }
0x1e86   :  { %8751 = vmatprep.subr.bf16.mxu0 %v9680_v4  ;;  %8783 = vmatprep.subr.bf16.mxu1 %v9683_v9 }
0x1e89   :  { %8753 = vmatpush1.bf16.msra.mxu0 %v9686_v18  ;;  %8785 = vmatpush1.bf16.msra.mxu1 %v9690_v22 }
0x1e8a   :  { %8755 = vmatprep.subr.bf16.mxu0 %v9692_v23  ;;  %8787 = vmatprep.subr.bf16.mxu1 %v9700_v30 }
0x1e8d   :  { %8757 = vmatpush1.bf16.msra.mxu0 %v9704_v38  ;;  %8789 = vmatpush1.bf16.msra.mxu1 %v9708_v39 }
0x1e8e   :  { %8759 = vmatprep.subr.bf16.mxu0 %v9710_v40  ;;  %8791 = vmatprep.subr.bf16.mxu1 %v9713_v45 }
0x1e91   :  { %8761 = vmatpush1.bf16.msra.mxu0 %v9716_v49  ;;  %8793 = vmatpush1.bf16.msra.mxu1 %v9720_v50 }
0x1e92   :  { %8795 = vmatprep.subr.bf16.mxu0 %v9623_v6  ;;  %8827 = vmatprep.subr.bf16.mxu1 %v9625_v10 }
0x1f47   :  { %v5703_v51 = vpop.f32.mrb[62].mxu0  ;;  %v5774_v14 = vpop.f32.mrb[62].mxu1 }
0x1f48   :  { %v5779_v31 = vadd.f32 %v5703_v51, %v5633_v32  ;;  %v5705_v34 = vpop.f32.mrb[63].mxu0  ;;  %v5776_v60 = vpop.f32.mrb[63].mxu1  ;;  %v5781_v27 = vadd.f32 %v5774_v14, %v5635_v7 }
0x1f49   :  { %v5780_v43 = vadd.f32 %v5705_v34, %v5634_v0  ;;  %v5782_v58 = vadd.f32 %v5776_v60, %v5636_v17 }
0x1f4a   :  { %v5783_v21 = vmul.f32 0.5, %v5779_v31  ;;  %v5785_v63 = vmul.f32 0.5, %v5781_v27 }
0x1f4b   :  { %v5784_v57 = vmul.f32 0.5, %v5780_v43 }
0x1f4c   :  { %9401 = vtanh.f32 %v5783_v21 }
0x1f4d   :  { %9403 = vtanh.f32 %v5784_v57 }
0x1f4e   :  { %9405 = vtanh.f32 %v5782_v58 }
0x1f4f   :  { %9407 = vtanh.f32 %v5785_v63 }
0x1f56   :  { %v9402_v44 = vpop.eup %9401 }
0x1f57   :  { %v5789_v52 = vmul.f32 0.5, %v9402_v44  ;;  %v9404_v56 = vpop.eup %9403 }
0x1f58   :  { %v5790_v62 = vmul.f32 0.5, %v9404_v56  ;;  %v9406_v51 = vpop.eup %9405  ;;  %v11478_v56 = vld [vmem:[#allocation9_spill] sm:$0xff] }
0x1f59   :  { %v5792_v32 = vadd.f32 0.5, %v5789_v52  ;;  %v9408_v34 = vpop.eup %9407 }
0x1f5a   :  { %v5793_v36 = vadd.f32 0.5, %v5790_v62  ;;  %v5791_v17 = vmul.f32 0.5, %v9408_v34 }
0x1f5b   :  { %v5797_v48 = vmul.f32 %v9406_v51, %v5792_v32 }
0x1f5c   :  { %v5796_v0 = vmul.f32 %v5793_v36, %v11224_v25  ;;  %v5794_v60 = vadd.f32 0.5, %v5791_v17  ;;  %v9544_v25 = vmov 33   ;;  %v5803_v36 = vpop.permute.xlu0 %5802 }
0x1f5d   :  { %9088 = vset.pattern.permute.xlu1 %v9544_v25  ;;  %v5805_v43 = vmul.f32 %v5803_v36, %v9767_v61  ;;  %v5806_v21 = vmul.f32 %v5803_v36, %v9772_v5  ;;  %v5808_v58 = vmul.f32 %v5803_v36, %v9777_v12  ;;  %v5807_v51 = vmul.f32 %v5803_v36, %v9786_v26 }
0x1f5e   :  { %v11271_v31 = vadd.f32 %v5797_v48, %v5796_v0  ;;  %5978 = vperm.xlu1 %9088, %v11071_v35  }
0x1f5f   :  { %v5809_v57 = vadd.f32 %v5805_v43, %v9775_v8  ;;  %v5810_v7 = vadd.f32 %v5806_v21, %v9780_v16  ;;  %v5812_v32 = vadd.f32 %v5808_v58, %v11478_v56 }
0x1f60   :  { %9409 = vtanh.f32 %v11271_v31 }
0x1f6a   :  { %v9410_v14 = vpop.eup %9409 }
0x1f6b   :  { %v5800_v13 = vmul.f32 %v9410_v14, %v5794_v60  ;;  %v5811_v60 = vadd.f32 %v5807_v51, %v9791_v47 }
0x1f6d   :  { %5878 = vmatmul.mubr.f32.vlgmr.msra.gmra.mrb[64].mxu0 %v5800_v13  ;;  %5949 = vmatmul.mubr.f32.vlgmr.msra.gmra.mrb[64].mxu1 %v5800_v13 }
0x1f6e   :  { %8797 = vmatpush1.bf16.msra.mxu0 %v9627_v11  ;;  %8829 = vmatpush1.bf16.msra.mxu1 %v9630_v15 }
0x1f6f   :  { %8799 = vmatprep.subr.bf16.mxu0 %v9634_v19  ;;  %8831 = vmatprep.subr.bf16.mxu1 %v9636_v20 }
0x1f70   :  { %6053 = vmatprep.mubr.f32.mxu0 %v11452_v1  ;;  %6124 = vmatprep.mubr.f32.mxu1 %v11452_v1 }
0x1f72   :  { %8801 = vmatpush1.bf16.msra.mxu0 %v9639_v24  ;;  %8833 = vmatpush1.bf16.msra.mxu1 %v9643_v28 }
0x1f73   :  { %8803 = vmatprep.subr.bf16.mxu0 %v9645_v29  ;;  %8835 = vmatprep.subr.bf16.mxu1 %v9647_v33 }
0x1f76   :  { %8805 = vmatpush1.bf16.msra.mxu0 %v9650_v37  ;;  %8837 = vmatpush1.bf16.msra.mxu1 %v9654_v41 }
0x1f77   :  { %8807 = vmatprep.subr.bf16.mxu0 %v9656_v42  ;;  %8839 = vmatprep.subr.bf16.mxu1 %v9659_v46 }
0x1f7a   :  { %8809 = vmatpush1.bf16.msra.mxu0 %v9662_v53  ;;  %8841 = vmatpush1.bf16.msra.mxu1 %v9666_v54 }
0x1f7b   :  { %8811 = vmatprep.subr.bf16.mxu0 %v9668_v55  ;;  %8843 = vmatprep.subr.bf16.mxu1 %v9671_v59 }
0x1f7e   :  { %8813 = vmatpush1.bf16.msra.mxu0 %v9674_v2  ;;  %8845 = vmatpush1.bf16.msra.mxu1 %v9678_v3 }
0x1f7f   :  { %8815 = vmatprep.subr.bf16.mxu0 %v9680_v4  ;;  %8847 = vmatprep.subr.bf16.mxu1 %v9683_v9 }
0x1f82   :  { %8817 = vmatpush1.bf16.msra.mxu0 %v9686_v18  ;;  %8849 = vmatpush1.bf16.msra.mxu1 %v9690_v22 }
0x1f83   :  { %8819 = vmatprep.subr.bf16.mxu0 %v9692_v23  ;;  %8851 = vmatprep.subr.bf16.mxu1 %v9700_v30 }
0x1f86   :  { %8821 = vmatpush1.bf16.msra.mxu0 %v9704_v38  ;;  %8853 = vmatpush1.bf16.msra.mxu1 %v9708_v39 }
0x1f87   :  { %8823 = vmatprep.subr.bf16.mxu0 %v9710_v40  ;;  %8855 = vmatprep.subr.bf16.mxu1 %v9713_v45 }
0x1f8a   :  { %8825 = vmatpush1.bf16.msra.mxu0 %v9716_v49  ;;  %8857 = vmatpush1.bf16.msra.mxu1 %v9720_v50 }
0x1f8b   :  { %8859 = vmatprep.subr.bf16.mxu0 %v9623_v6  ;;  %8891 = vmatprep.subr.bf16.mxu1 %v9625_v10 }
0x2040   :  { %v5879_v27 = vpop.f32.mrb[64].mxu0  ;;  %v5950_v63 = vpop.f32.mrb[64].mxu1 }
0x2041   :  { %v5955_v44 = vadd.f32 %v5879_v27, %v5809_v57  ;;  %v5881_v52 = vpop.f32.mrb[65].mxu0  ;;  %v5952_v62 = vpop.f32.mrb[65].mxu1  ;;  %v5957_v14 = vadd.f32 %v5950_v63, %v5811_v60 }
0x2042   :  { %v5956_v48 = vadd.f32 %v5881_v52, %v5810_v7  ;;  %v5958_v17 = vadd.f32 %v5952_v62, %v5812_v32 }
0x2043   :  { %v5959_v0 = vmul.f32 0.5, %v5955_v44  ;;  %v5961_v13 = vmul.f32 0.5, %v5957_v14 }
0x2044   :  { %v5960_v34 = vmul.f32 0.5, %v5956_v48 }
0x2045   :  { %9411 = vtanh.f32 %v5959_v0 }
0x2046   :  { %9413 = vtanh.f32 %v5960_v34 }
0x2047   :  { %9415 = vtanh.f32 %v5958_v17 }
0x2048   :  { %9417 = vtanh.f32 %v5961_v13 }
0x204f   :  { %v9412_v25 = vpop.eup %9411 }
0x2050   :  { %v5965_v43 = vmul.f32 0.5, %v9412_v25  ;;  %v9414_v21 = vpop.eup %9413 }
0x2051   :  { %v5966_v58 = vmul.f32 0.5, %v9414_v21  ;;  %v9416_v27 = vpop.eup %9415 }
0x2052   :  { %v5968_v57 = vadd.f32 0.5, %v5965_v43  ;;  %v9418_v52 = vpop.eup %9417 }
0x2053   :  { %v5969_v56 = vadd.f32 0.5, %v5966_v58  ;;  %v5967_v32 = vmul.f32 0.5, %v9418_v52 }
0x2054   :  { %v5973_v36 = vmul.f32 %v9416_v27, %v5968_v57 }
0x2055   :  { %v5972_v7 = vmul.f32 %v5969_v56, %v11271_v31  ;;  %v5970_v62 = vadd.f32 0.5, %v5967_v32  ;;  %v9545_v31 = vmov 34   ;;  %v5979_v56 = vpop.permute.xlu1 %5978 }
0x2056   :  { %9089 = vset.pattern.permute.xlu1 %v9545_v31  ;;  %v5981_v48 = vmul.f32 %v5979_v56, %v9767_v61  ;;  %v5982_v0 = vmul.f32 %v5979_v56, %v9772_v5  ;;  %v5984_v17 = vmul.f32 %v5979_v56, %v9777_v12 }
0x2057   :  { %v11318_v44 = vadd.f32 %v5973_v36, %v5972_v7  ;;  %6154 = vperm.xlu1 %9089, %v11071_v35   ;;  %v5983_v35 = vmul.f32 %v5979_v56, %v9786_v26 }
0x2058   :  { %v5985_v34 = vadd.f32 %v5981_v48, %v9775_v8  ;;  %v5986_v60 = vadd.f32 %v5982_v0, %v9780_v16 }
0x2059   :  { %9419 = vtanh.f32 %v11318_v44  ;;  %v5987_v7 = vadd.f32 %v5983_v35, %v9791_v47 }
0x2063   :  { %v9420_v63 = vpop.eup %9419 }
0x2064   :  { %v5976_v51 = vmul.f32 %v9420_v63, %v5970_v62 }
0x2066   :  { %6054 = vmatmul.mubr.f32.vlgmr.msra.gmra.mrb[66].mxu0 %v5976_v51  ;;  %6125 = vmatmul.mubr.f32.vlgmr.msra.gmra.mrb[66].mxu1 %v5976_v51 }
0x2067   :  { %8861 = vmatpush1.bf16.msra.mxu0 %v9627_v11  ;;  %8893 = vmatpush1.bf16.msra.mxu1 %v9630_v15 }
0x2068   :  { %8863 = vmatprep.subr.bf16.mxu0 %v9634_v19  ;;  %8895 = vmatprep.subr.bf16.mxu1 %v9636_v20 }
0x2069   :  { %6229 = vmatprep.mubr.f32.mxu0 %v11452_v1  ;;  %6300 = vmatprep.mubr.f32.mxu1 %v11452_v1 }
0x206b   :  { %8865 = vmatpush1.bf16.msra.mxu0 %v9639_v24  ;;  %8897 = vmatpush1.bf16.msra.mxu1 %v9643_v28 }
0x206c   :  { %8867 = vmatprep.subr.bf16.mxu0 %v9645_v29  ;;  %8899 = vmatprep.subr.bf16.mxu1 %v9647_v33 }
0x206f   :  { %8869 = vmatpush1.bf16.msra.mxu0 %v9650_v37  ;;  %8901 = vmatpush1.bf16.msra.mxu1 %v9654_v41 }
0x2070   :  { %8871 = vmatprep.subr.bf16.mxu0 %v9656_v42  ;;  %8903 = vmatprep.subr.bf16.mxu1 %v9659_v46 }
0x2073   :  { %8873 = vmatpush1.bf16.msra.mxu0 %v9662_v53  ;;  %8905 = vmatpush1.bf16.msra.mxu1 %v9666_v54 }
0x2074   :  { %8875 = vmatprep.subr.bf16.mxu0 %v9668_v55  ;;  %8907 = vmatprep.subr.bf16.mxu1 %v9671_v59 }
0x2077   :  { %8877 = vmatpush1.bf16.msra.mxu0 %v9674_v2  ;;  %8909 = vmatpush1.bf16.msra.mxu1 %v9678_v3 }
0x2078   :  { %8879 = vmatprep.subr.bf16.mxu0 %v9680_v4  ;;  %8911 = vmatprep.subr.bf16.mxu1 %v9683_v9 }
0x207b   :  { %8881 = vmatpush1.bf16.msra.mxu0 %v9686_v18  ;;  %8913 = vmatpush1.bf16.msra.mxu1 %v9690_v22 }
0x207c   :  { %8883 = vmatprep.subr.bf16.mxu0 %v9692_v23  ;;  %8915 = vmatprep.subr.bf16.mxu1 %v9700_v30 }
0x207f   :  { %8885 = vmatpush1.bf16.msra.mxu0 %v9704_v38  ;;  %8917 = vmatpush1.bf16.msra.mxu1 %v9708_v39 }
0x2080   :  { %8887 = vmatprep.subr.bf16.mxu0 %v9710_v40  ;;  %8919 = vmatprep.subr.bf16.mxu1 %v9713_v45 }
0x2083   :  { %8889 = vmatpush1.bf16.msra.mxu0 %v9716_v49  ;;  %8921 = vmatpush1.bf16.msra.mxu1 %v9720_v50 }
0x2084   :  { %8923 = vmatprep.subr.bf16.mxu0 %v9623_v6  ;;  %8955 = vmatprep.subr.bf16.mxu1 %v9625_v10  ;;  %v11479_v10 = vld [vmem:[#allocation9_spill] sm:$0xff] }
0x2085   :  { %v5988_v43 = vadd.f32 %v5984_v17, %v11479_v10 }
0x2139   :  { %v6055_v14 = vpop.f32.mrb[66].mxu0  ;;  %v6126_v13 = vpop.f32.mrb[66].mxu1 }
0x213a   :  { %v6131_v6 = vadd.f32 %v6055_v14, %v5985_v34  ;;  %v6057_v25 = vpop.f32.mrb[67].mxu0  ;;  %v6128_v21 = vpop.f32.mrb[67].mxu1  ;;  %v6133_v52 = vadd.f32 %v6126_v13, %v5987_v7  ;;  %v6505_v7 = vld [vmem:[#allocation5] sm:$0xff] }
0x213b   :  { %v6132_v57 = vadd.f32 %v6057_v25, %v5986_v60  ;;  %v6134_v36 = vadd.f32 %v6128_v21, %v5988_v43 }
0x213c   :  { %v6135_v58 = vmul.f32 0.5, %v6131_v6  ;;  %v6137_v32 = vmul.f32 0.5, %v6133_v52  ;;  %v6506_v52 = vld [vmem:[#allocation5 + $0x8] sm:$0xff] }
0x213d   :  { %v6136_v27 = vmul.f32 0.5, %v6132_v57 }
0x213e   :  { %9421 = vtanh.f32 %v6135_v58 }
0x213f   :  { %9423 = vtanh.f32 %v6136_v27 }
0x2140   :  { %9425 = vtanh.f32 %v6134_v36 }
0x2141   :  { %9427 = vtanh.f32 %v6137_v32  ;;  %v8987_v32 = vpack.c.bf16 %v6506_v52, %v6505_v7  ;;  %v6628_v52 = vld [vmem:[%s11440_s6] ss:$0 sm:$0xff] }
0x2148   :  { %v9422_v62 = vpop.eup %9421 }
0x2149   :  { %v6141_v63 = vmul.f32 0.5, %v9422_v62  ;;  %v9424_v51 = vpop.eup %9423  ;;  %v9547_v62 = vmov 0.0|0.0  }
0x214a   :  { %v6142_v48 = vmul.f32 0.5, %v9424_v51  ;;  %v9426_v0 = vpop.eup %9425  ;;  %v6508_v51 = vld [vmem:[#allocation5 + $0x18] sm:$0xff] }
0x214b   :  { %v6144_v31 = vadd.f32 0.5, %v6141_v63  ;;  %v9428_v14 = vpop.eup %9427  ;;  %v6507_v63 = vld [vmem:[#allocation5 + $0x10] sm:$0xff] }
0x214c   :  { %v6145_v34 = vadd.f32 0.5, %v6142_v48  ;;  %v6143_v6 = vmul.f32 0.5, %v9428_v14  ;;  %v6509_v48 = vld [vmem:[#allocation5 + $0x20] sm:$0xff] }
0x214d   :  { %v6149_v56 = vmul.f32 %v9426_v0, %v6144_v31  ;;  %v8990_v31 = vpack.c.bf16 %v6508_v51, %v6507_v63  ;;  %v6510_v0 = vld [vmem:[#allocation5 + $0x28] sm:$0xff]  ;;  %v6513_v14 = vld [vmem:[#allocation5 + $0x40] sm:$0xff]  ;;  %v6629_v63 = vld [vmem:[#allocation2] ss:$0 sm:$0xff] }
0x214e   :  { %v6148_v17 = vmul.f32 %v6145_v34, %v11318_v44  ;;  %v6146_v25 = vadd.f32 0.5, %v6143_v6  ;;  %v8993_v34 = vpack.c.bf16 %v6510_v0, %v6509_v48  ;;  %v6514_v6 = vld [vmem:[#allocation5 + $0x48] sm:$0xff] }
0x2150   :  { %v11365_v60 = vadd.f32 %v6149_v56, %v6148_v17  ;;  %v6511_v56 = vld [vmem:[#allocation5 + $0x30] sm:$0xff]  ;;  %v6512_v17 = vld [vmem:[#allocation5 + $0x38] sm:$0xff] }
0x2152   :  { %9429 = vtanh.f32 %v11365_v60 }
0x215c   :  { %v9430_v13 = vpop.eup %9429 }
0x215d   :  { %v6152_v43 = vmul.f32 %v9430_v13, %v6146_v25  ;;  %v8999_v25 = vpack.c.bf16 %v6514_v6, %v6513_v14  ;;  %v6515_v13 = vld [vmem:[#allocation5 + $0x50] sm:$0xff] }
0x215f   :  { %6230 = vmatmul.mubr.f32.vlgmr.msra.gmra.mrb[68].mxu0 %v6152_v43  ;;  %6301 = vmatmul.mubr.f32.vlgmr.msra.gmra.mrb[68].mxu1 %v6152_v43  ;;  %v6516_v43 = vld [vmem:[#allocation5 + $0x58] sm:$0xff] }
0x2160   :  { %8925 = vmatpush1.bf16.msra.mxu0 %v9627_v11  ;;  %8957 = vmatpush1.bf16.msra.mxu1 %v9630_v15  ;;  %v9546_v11 = vmov 35   ;;  %v9455_v15 = vld [vmem:[%s11434_s0] sm:$0x3] }
0x2161   :  { %8927 = vmatprep.subr.bf16.mxu0 %v9634_v19  ;;  %8959 = vmatprep.subr.bf16.mxu1 %v9636_v20  ;;  %v6155_v19 = vpop.permute.xlu1 %6154 }
0x2162   :  { %6405 = vmatprep.mubr.f32.mxu0 %v11452_v1  ;;  %6476 = vmatprep.mubr.f32.mxu1 %v11452_v1  ;;  %v6157_v20 = vmul.f32 %v6155_v19, %v9767_v61 }
0x2163   :  { %9090 = vset.pattern.permute.xlu0 %v9546_v11  ;;  %v9002_v11 = vpack.c.bf16 %v6516_v43, %v6515_v13 }
0x2164   :  { %8929 = vmatpush1.bf16.msra.mxu0 %v9639_v24  ;;  %8961 = vmatpush1.bf16.msra.mxu1 %v9643_v28  ;;  %v6158_v24 = vmul.f32 %v6155_v19, %v9772_v5  ;;  %v6161_v28 = vadd.f32 %v6157_v20, %v9775_v8 }
0x2165   :  { %8931 = vmatprep.subr.bf16.mxu0 %v9645_v29  ;;  %8963 = vmatprep.subr.bf16.mxu1 %v9647_v33  ;;  %v6160_v29 = vmul.f32 %v6155_v19, %v9777_v12 }
0x2166   :  { %6330 = vperm.xlu0 %9090, %v9455_v15   ;;  %v6162_v33 = vadd.f32 %v6158_v24, %v9780_v16  ;;  %v6517_v15 = vld [vmem:[#allocation5 + $0x60] sm:$0xff]  ;;  %v6519_v24 = vld [vmem:[#allocation5 + $0x70] sm:$0xff] }
0x2168   :  { %8933 = vmatpush1.bf16.msra.mxu0 %v9650_v37  ;;  %8965 = vmatpush1.bf16.msra.mxu1 %v9654_v41 }
0x2169   :  { %8935 = vmatprep.subr.bf16.mxu0 %v9656_v42  ;;  %8967 = vmatprep.subr.bf16.mxu1 %v9659_v46 }
0x216c   :  { %8937 = vmatpush1.bf16.msra.mxu0 %v9662_v53  ;;  %8969 = vmatpush1.bf16.msra.mxu1 %v9666_v54  ;;  %v6164_v53 = vadd.f32 %v6160_v29, %v11479_v10 }
0x216d   :  { %8939 = vmatprep.subr.bf16.mxu0 %v9668_v55  ;;  %8971 = vmatprep.subr.bf16.mxu1 %v9671_v59  ;;  %v6159_v55 = vmul.f32 %v6155_v19, %v9786_v26  ;;  %v6518_v19 = vld [vmem:[#allocation5 + $0x68] sm:$0xff] }
0x216e   :  { %v9005_v20 = vpack.c.bf16 %v6518_v19, %v6517_v15 }
0x2170   :  { %8941 = vmatpush1.bf16.msra.mxu0 %v9674_v2  ;;  %8973 = vmatpush1.bf16.msra.mxu1 %v9678_v3 }
0x2171   :  { %8943 = vmatprep.subr.bf16.mxu0 %v9680_v4  ;;  %8975 = vmatprep.subr.bf16.mxu1 %v9683_v9  ;;  %v6163_v9 = vadd.f32 %v6159_v55, %v9791_v47 }
0x2174   :  { %8945 = vmatpush1.bf16.msra.mxu0 %v9686_v18  ;;  %8977 = vmatpush1.bf16.msra.mxu1 %v9690_v22 }
0x2175   :  { %8947 = vmatprep.subr.bf16.mxu0 %v9692_v23  ;;  %8979 = vmatprep.subr.bf16.mxu1 %v9700_v30 }
0x2178   :  { %8949 = vmatpush1.bf16.msra.mxu0 %v9704_v38  ;;  %8981 = vmatpush1.bf16.msra.mxu1 %v9708_v39 }
0x2179   :  { %8951 = vmatprep.subr.bf16.mxu0 %v9710_v40  ;;  %8983 = vmatprep.subr.bf16.mxu1 %v9713_v45 }
0x217c   :  { %8953 = vmatpush1.bf16.msra.mxu0 %v9716_v49  ;;  %8985 = vmatpush1.bf16.msra.mxu1 %v9720_v50 }
0x217d   :  { %8986 = vmatprep.subr.bf16.mxu0 %v9547_v62 }
0x2232   :  { %v6231_v37 = vpop.f32.mrb[68].mxu0  ;;  %v6302_v41 = vpop.f32.mrb[68].mxu1 }
0x2233   :  { %v6307_v42 = vadd.f32 %v6231_v37, %v6161_v28  ;;  %v6233_v46 = vpop.f32.mrb[69].mxu0  ;;  %v6304_v54 = vpop.f32.mrb[69].mxu1  ;;  %v6309_v18 = vadd.f32 %v6302_v41, %v6163_v9  ;;  %v6520_v28 = vld [vmem:[#allocation5 + $0x78] sm:$0xff] }
0x2234   :  { %v6308_v59 = vadd.f32 %v6233_v46, %v6162_v33  ;;  %v6310_v4 = vadd.f32 %v6304_v54, %v6164_v53  ;;  %v9008_v29 = vpack.c.bf16 %v6520_v28, %v6519_v24  ;;  %v6331_v33 = vpop.permute.xlu0 %6330 }
0x2235   :  { %v6311_v2 = vmul.f32 0.5, %v6307_v42  ;;  %v6313_v22 = vmul.f32 0.5, %v6309_v18  ;;  %v6333_v37 = vmul.f32 %v6331_v33, %v9767_v61  ;;  %v6334_v41 = vmul.f32 %v6331_v33, %v9772_v5 }
0x2236   :  { %v6312_v3 = vmul.f32 0.5, %v6308_v59  ;;  %v6336_v42 = vmul.f32 %v6331_v33, %v9777_v12 }
0x2237   :  { %9431 = vtanh.f32 %v6311_v2  ;;  %v6337_v46 = vadd.f32 %v6333_v37, %v9775_v8 }
0x2238   :  { %9433 = vtanh.f32 %v6312_v3  ;;  %v6340_v2 = vadd.f32 %v6336_v42, %v11479_v10 }
0x2239   :  { %9435 = vtanh.f32 %v6310_v4  ;;  %v6335_v4 = vmul.f32 %v6331_v33, %v9786_v26 }
0x223a   :  { %9437 = vtanh.f32 %v6313_v22 }
0x223b   :  { %v6339_v12 = vadd.f32 %v6335_v4, %v9791_v47 }
0x2241   :  { %v9432_v23 = vpop.eup %9431 }
0x2242   :  { %v6317_v30 = vmul.f32 0.5, %v9432_v23  ;;  %v9434_v38 = vpop.eup %9433 }
0x2243   :  { %v6318_v40 = vmul.f32 0.5, %v9434_v38  ;;  %v9436_v45 = vpop.eup %9435 }
0x2244   :  { %v6320_v39 = vadd.f32 0.5, %v6317_v30  ;;  %v9438_v35 = vpop.eup %9437 }
0x2245   :  { %v6321_v49 = vadd.f32 0.5, %v6318_v40  ;;  %v6319_v57 = vmul.f32 0.5, %v9438_v35 }
0x2246   :  { %v6325_v50 = vmul.f32 %v9436_v45, %v6320_v39 }
0x2247   :  { %v6324_v44 = vmul.f32 %v6321_v49, %v11365_v60  ;;  %v6322_v58 = vadd.f32 0.5, %v6319_v57  ;;  %v8996_v60 = vpack.c.bf16 %v6512_v17, %v6511_v56 }
0x2249   :  { %v11412_v21 = vadd.f32 %v6325_v50, %v6324_v44 }
0x224b   :  { %9439 = vtanh.f32 %v11412_v21 }
0x2255   :  { %v9440_v27 = vpop.eup %9439 }
0x2256   :  { %v6328_v36 = vmul.f32 %v9440_v27, %v6322_v58  ;;  %v6627_v58 = vld [vmem:[%s11439_s5] ss:$0 sm:$0xff] }
0x2258   :  { %6406 = vmatmul.mubr.f32.vlgmr.msra.gmra.mrb[70].mxu0 %v6328_v36  ;;  %6477 = vmatmul.mubr.f32.vlgmr.msra.gmra.mrb[70].mxu1 %v6328_v36 }
0x2259   :  { %8988 = vmatpush3.bf16.msra.mxu0 %v8987_v32  ;;  %6679 = vmatprep.mubr.msk.f32.mxu0 %vm9548_vm0, %v11452_v1  ;;  %v6338_v1 = vadd.f32 %v6334_v41, %v9780_v16 }
0x225a   :  { %8989 = vmatprep.subr.bf16.mxu0 %v9547_v62 }
0x225d   :  { %8991 = vmatpush3.bf16.msra.mxu0 %v8990_v31 }
0x225e   :  { %8992 = vmatprep.subr.bf16.mxu0 %v9547_v62 }
0x2261   :  { %8994 = vmatpush3.bf16.msra.mxu0 %v8993_v34 }
0x2262   :  { %8995 = vmatprep.subr.bf16.mxu0 %v9547_v62 }
0x2265   :  { %8997 = vmatpush3.bf16.msra.mxu0 %v8996_v60 }
0x2266   :  { %8998 = vmatprep.subr.bf16.mxu0 %v9547_v62 }
0x2269   :  { %9000 = vmatpush3.bf16.msra.mxu0 %v8999_v25 }
0x226a   :  { %9001 = vmatprep.subr.bf16.mxu0 %v9547_v62 }
0x226d   :  { %9003 = vmatpush3.bf16.msra.mxu0 %v9002_v11 }
0x226e   :  { %9004 = vmatprep.subr.bf16.mxu0 %v9547_v62 }
0x2271   :  { %9006 = vmatpush3.bf16.msra.mxu0 %v9005_v20 }
0x2272   :  { %9007 = vmatprep.subr.bf16.mxu0 %v9547_v62 }
0x2275   :  { %9009 = vmatpush3.bf16.msra.mxu0 %v9008_v29 }
0x232b   :  { %v6407_v53 = vpop.f32.mrb[70].mxu0  ;;  %v6478_v54 = vpop.f32.mrb[70].mxu1 }
0x232c   :  { %v6483_v55 = vadd.f32 %v6407_v53, %v6337_v46  ;;  %v6409_v59 = vpop.f32.mrb[71].mxu0  ;;  %v6480_v3 = vpop.f32.mrb[71].mxu1  ;;  %v6485_v8 = vadd.f32 %v6478_v54, %v6339_v12 }
0x232d   :  { %v6484_v9 = vadd.f32 %v6409_v59, %v6338_v1  ;;  %v6486_v5 = vadd.f32 %v6480_v3, %v6340_v2 }
0x232e   :  { %v6487_v18 = vmul.f32 0.5, %v6483_v55  ;;  %v6489_v16 = vmul.f32 0.5, %v6485_v8 }
0x232f   :  { %v6488_v61 = vmul.f32 0.5, %v6484_v9 }
0x2330   :  { %9441 = vtanh.f32 %v6487_v18 }
0x2331   :  { %9443 = vtanh.f32 %v6488_v61 }
0x2332   :  { %9445 = vtanh.f32 %v6486_v5 }
0x2333   :  { %9447 = vtanh.f32 %v6489_v16 }
0x233a   :  { %v9442_v22 = vpop.eup %9441 }
0x233b   :  { %v6493_v23 = vmul.f32 0.5, %v9442_v22  ;;  %v9444_v30 = vpop.eup %9443 }
0x233c   :  { %v6494_v10 = vmul.f32 0.5, %v9444_v30  ;;  %v9446_v39 = vpop.eup %9445 }
0x233d   :  { %v6496_v38 = vadd.f32 0.5, %v6493_v23  ;;  %v9448_v50 = vpop.eup %9447 }
0x233e   :  { %v6497_v40 = vadd.f32 0.5, %v6494_v10  ;;  %v6495_v44 = vmul.f32 0.5, %v9448_v50 }
0x233f   :  { %v6501_v26 = vmul.f32 %v9446_v39, %v6496_v38 }
0x2340   :  { %v6500_v45 = vmul.f32 %v6497_v40, %v11412_v21  ;;  %v6498_v47 = vadd.f32 0.5, %v6495_v44 }
0x2342   :  { %v6502_v49 = vadd.f32 %v6501_v26, %v6500_v45 }
0x2344   :  { %9449 = vtanh.f32 %v6502_v49 }
0x234e   :  { %v9450_v35 = vpop.eup %9449 }
0x234f   :  { %v6504_v57 = vmul.f32 %v9450_v35, %v6498_v47 }
0x2351   :  { %6680 = vmatmul.mubr.f32.vlgmr.msra.gmra.mrb[72].mxu0 %v6504_v57 }
0x2424   :  { %v6594_v27 = vpop.f32.mrb[72].mxu0 }
0x2425   :  { %v6595_v36 = vadd.f32 %v6627_v58, %v6594_v27  ;;  %v6681_v7 = vpop.f32.mrb[73].mxu0 }
0x2427   :  { %v6598_v21 = vmax.f32 %v6595_v36, 0.0 }
0x2429   :  { %v6606_v32 = vmul.f32 %v6628_v52, %v6598_v21 }
0x242b   :  { %v6608_v62 = vsel %vm6607_vm1, %v6606_v32, 0.0 }
0x242c   :  { %6609 = vadd.xlane.f32.xlu1 %v6608_v62 }
0x24b9   :  { %v6610_v51 = vpop.xlane.xlu1 %6609 }
0x24ba   :  { %v6618_v31 = vadd.f32 %v6629_v63, %v6610_v51 }
0x24bc   :  { %6620 = vst.msk [vmem:[%s11442_s8] sm:$0x3] %vm6619_vm2, %v6618_v31 }
0x24bd   :  { %6625 = vsyncpa [#allocation4], 1 }
0x24be   :  { %6626 = vsyncpa [#allocation6], 1 }

</bundles_post_ra>
